<compile_context>
chip_gen: v7x
topology: tpu7x:2x2x1
jax: 0.10.0
libtpu: 0.0.40
codegen_flags: <defaults>
</compile_context>

<pallas_src>
import functools

import jax
import jax.numpy as jnp
from jax.experimental import pallas as pl
from jax.experimental.pallas import tpu as pltpu

BN_EPS = 1e-5
VMEM_LIMIT = 48 * 1024 * 1024   # fits v7x (64 MiB phys), plenty on v5e/v6e


def _pick_th(h, target=8):
    """Largest row-tile <= target that divides h (keeps grid >= 2 blocks/image)."""
    th = min(target, h)
    while h % th != 0:
        th -= 1
    return max(th, 1)


# ----------------------------------------------------------------------------
# Conv3x3(pad=1) + BN-partial-stats kernel.
# Works on one halo'd row-block of one image per grid step.
# ----------------------------------------------------------------------------
def _conv3x3_stats_kernel(x_ref, w_ref, b_ref, scale_ref, shift_ref,
                          y_ref, stats_ref, *, th, wo, cin, cout,
                          fuse_input_affine):
    # x_ref:     (th+2, wo+2, cin) bf16   halo'd input row-block (zero pad ring)
    # w_ref:     (9, cin, cout)    bf16   conv weight, tap-major (ky*3+kx)
    # b_ref:     (1, cout)         f32    conv bias
    # scale_ref: (1, cin)          f32    previous-layer BN scale (if fused)
    # shift_ref: (1, cin)          f32    previous-layer BN shift (if fused)
    # y_ref:     (th, wo, cout)    bf16   pre-BN conv output rows
    # stats_ref: (2, cout)         f32    [sum; sum-of-squares] over this block
    a = x_ref[...]
    if fuse_input_affine:
        # Previous layer's BN affine + ReLU applied to its pre-BN bf16 output.
        # True zero-padding positions (W ring always; H ring only on the
        # image-boundary row blocks) must remain exactly zero afterwards.
        af = a.astype(jnp.float32) * scale_ref[...] + shift_ref[...]
        af = jnp.maximum(af, 0.0)
        i = pl.program_id(1)
        rows = jax.lax.broadcasted_iota(jnp.int32, (th + 2, wo + 2, cin), 0)
        cols = jax.lax.broadcasted_iota(jnp.int32, (th + 2, wo + 2, cin), 1)
        valid = (cols >= 1) & (cols <= wo)
        valid = jnp.logical_and(valid, jnp.logical_or(rows != 0, i != 0))
        valid = jnp.logical_and(
            valid,
            jnp.logical_or(rows != th + 1, i != pl.num_programs(1) - 1))
        a = jnp.where(valid, af, 0.0).astype(jnp.bfloat16)

    w_taps = [w_ref[t] for t in range(9)]      # nine (cin, cout) bf16 tiles
    bias = b_ref[...]                          # (1, cout) f32

    s1 = jnp.zeros((1, cout), jnp.float32)
    s2 = jnp.zeros((1, cout), jnp.float32)
    for r in range(th):                        # static unroll over output rows
        acc = jnp.zeros((wo, cout), jnp.float32)
        for ky in range(3):
            row = a[r + ky]                    # (wo+2, cin)
            for kx in range(3):
                tap = row[kx:kx + wo, :]       # (wo, cin) shifted slice
                acc = acc + jnp.dot(tap, w_taps[ky * 3 + kx],
                                    preferred_element_type=jnp.float32)
        acc = acc + bias
        y_ref[r] = acc.astype(y_ref.dtype)
        s1 = s1 + jnp.sum(acc, axis=0, keepdims=True)
        s2 = s2 + jnp.sum(acc * acc, axis=0, keepdims=True)
    # Direct sublane-slice stores (no concatenate).
    stats_ref[0:1, :] = s1
    stats_ref[1:2, :] = s2


# ----------------------------------------------------------------------------
# Final BN affine + ReLU pass (only for the last layer; earlier layers are fused
# into the next conv's input read).
# ----------------------------------------------------------------------------
def _bn_relu_kernel(y_ref, scale_ref, shift_ref, o_ref):
    o_ref[...] = jnp.maximum(
        y_ref[...].astype(jnp.float32) * scale_ref[...] + shift_ref[...], 0.0)


# ----------------------------------------------------------------------------
# Host-side glue
# ----------------------------------------------------------------------------
def _halo_blocks(x_nhwc, th):
    """(N, H, W, C) -> (N, H//th, th+2, W+2, C) zero-padded halo'd row-blocks."""
    N, H, W, C = x_nhwc.shape
    n_hb = H // th
    xp = jnp.pad(x_nhwc, ((0, 0), (1, 1), (1, 1), (0, 0)))
    row_idx = (jnp.arange(n_hb)[:, None] * th
               + jnp.arange(th + 2)[None, :])            # (n_hb, th+2)
    return jnp.take(xp, row_idx, axis=1)                 # (N, n_hb, th+2, W+2, C)


def _conv3x3_bn_stats(h_bf16, w9, b2, scale_in, shift_in, *, fuse, th):
    """One Conv3x3(pad=1) layer: returns (pre-BN bf16 output, mean, var)."""
    N, H, W, cin = h_bf16.shape
    cout = int(w9.shape[-1])
    n_hb = H // th
    x_blk = _halo_blocks(h_bf16, th)

    kern = functools.partial(_conv3x3_stats_kernel, th=th, wo=W, cin=cin,
                             cout=cout, fuse_input_affine=fuse)
    flops = 2 * N * H * W * 9 * cin * cout
    bytes_accessed = (x_blk.size * 2 + w9.size * 2 + b2.size * 4
                      + N * H * W * cout * 2 + N * n_hb * 2 * cout * 4)

    y, stats = pl.pallas_call(
        kern,
        out_shape=(
            jax.ShapeDtypeStruct((N, H, W, cout), jnp.bfloat16),
            jax.ShapeDtypeStruct((N, n_hb, 2, cout), jnp.float32),
        ),
        grid=(N, n_hb),
        in_specs=[
            pl.BlockSpec((None, None, th + 2, W + 2, cin),
                         lambda n, i: (n, i, 0, 0, 0)),
            pl.BlockSpec((9, cin, cout), lambda n, i: (0, 0, 0)),
            pl.BlockSpec((1, cout), lambda n, i: (0, 0)),
            pl.BlockSpec((1, cin), lambda n, i: (0, 0)),
            pl.BlockSpec((1, cin), lambda n, i: (0, 0)),
        ],
        out_specs=(
            pl.BlockSpec((None, th, W, cout), lambda n, i: (n, i, 0, 0)),
            pl.BlockSpec((None, None, 2, cout), lambda n, i: (n, i, 0, 0)),
        ),
        compiler_params=pltpu.CompilerParams(
            dimension_semantics=("parallel", "parallel"),
            vmem_limit_bytes=VMEM_LIMIT),
        cost_estimate=pl.CostEstimate(flops=flops, transcendentals=0,
                                      bytes_accessed=bytes_accessed),
    )(x_blk, w9, b2, scale_in, shift_in)

    # Chan-style combine of per-block partials (equal block counts), avoiding
    # the full-M E[x^2]-E[x]^2 cancellation.
    nb = th * W
    s1 = stats[..., 0, :]                                 # (N, n_hb, cout)
    s2 = stats[..., 1, :]
    mean_b = s1 / nb
    m2_b = jnp.maximum(s2 - s1 * mean_b, 0.0)             # per-block Σ(y-mean_b)²
    mean = jnp.mean(mean_b, axis=(0, 1))
    m2 = (jnp.sum(m2_b, axis=(0, 1))
          + nb * jnp.sum((mean_b - mean) ** 2, axis=(0, 1)))
    var = m2 / (N * H * W)                                # biased, like PyTorch BN
    return y, mean, var


def _bn_relu_pallas(y_bf16, scale, shift, *, th):
    N, H, W, C = y_bf16.shape
    n_hb = H // th
    return pl.pallas_call(
        _bn_relu_kernel,
        out_shape=jax.ShapeDtypeStruct((N, H, W, C), jnp.float32),
        grid=(N, n_hb),
        in_specs=[
            pl.BlockSpec((None, th, W, C), lambda n, i: (n, i, 0, 0)),
            pl.BlockSpec((1, C), lambda n, i: (0, 0)),
            pl.BlockSpec((1, C), lambda n, i: (0, 0)),
        ],
        out_specs=pl.BlockSpec((None, th, W, C), lambda n, i: (n, i, 0, 0)),
        compiler_params=pltpu.CompilerParams(
            dimension_semantics=("parallel", "parallel"),
            vmem_limit_bytes=VMEM_LIMIT),
        cost_estimate=pl.CostEstimate(
            flops=2 * N * H * W * C, transcendentals=0,
            bytes_accessed=N * H * W * C * (2 + 4) + 2 * C * 4),
    )(y_bf16, scale, shift)


def max_unpool2x2_nhwc(x, ind):
    """PyTorch MaxUnpool2d(2, 2) producing NHWC directly as an elementwise
    compare against the flat output index (no one-hot tensor, no extra layout
    transposes of the large output).  Assumes each index lies inside its own
    2x2 window, as produced by max_pool2d(k=2, s=2, return_indices=True)."""
    N, C, H, W = x.shape
    Ho, Wo = 2 * H, 2 * W
    xv = jnp.transpose(x, (0, 2, 3, 1))                   # small, pre-unpool
    iv = jnp.transpose(ind, (0, 2, 3, 1))
    x_up = jnp.repeat(jnp.repeat(xv, 2, axis=1), 2, axis=2)    # (N,Ho,Wo,C)
    i_up = jnp.repeat(jnp.repeat(iv, 2, axis=1), 2, axis=2)
    flat = (jnp.arange(Ho, dtype=ind.dtype)[:, None] * Wo
            + jnp.arange(Wo, dtype=ind.dtype)[None, :])
    return jnp.where(i_up == flat[None, :, :, None], x_up, 0.0)


def prep_params(params):
    """Hoisted parameter layout prep: OIHW weights -> tap-major (9, Cin, Cout)
    bf16; bias -> (1, Cout) f32; gamma/beta kept as f32 vectors."""
    prepped = []
    for (w, b, g, beta) in params:
        cout, cin = int(w.shape[0]), int(w.shape[1])
        w9 = jnp.transpose(w, (2, 3, 1, 0)).reshape(9, cin, cout)
        w9 = w9.astype(jnp.bfloat16)
        b2 = jnp.asarray(b, jnp.float32).reshape(1, cout)
        prepped.append((w9, b2, jnp.asarray(g, jnp.float32),
                        jnp.asarray(beta, jnp.float32), cin, cout))
    return prepped


def decoder_block_segnet_forward(x, ind, prepped_params, *, row_tile=8):
    """x, ind: NCHW (N, Cin, H, W). Returns NCHW (N, Cout, 2H, 2W)."""
    u = max_unpool2x2_nhwc(x, ind)                        # (N, Ho, Wo, Cin) f32
    _, Ho, _, _ = u.shape
    th = _pick_th(Ho, row_tile)
    h = u.astype(jnp.bfloat16)                            # carried bf16 tensor
    scale = shift = None
    for (w9, b2, g, beta, cin, cout) in prepped_params:
        fuse = scale is not None
        if fuse:
            scale_in, shift_in = scale, shift
        else:
            scale_in = jnp.ones((1, cin), jnp.float32)
            shift_in = jnp.zeros((1, cin), jnp.float32)
        h, mean, var = _conv3x3_bn_stats(h, w9, b2, scale_in, shift_in,
                                         fuse=fuse, th=th)
        inv = jax.lax.rsqrt(var + BN_EPS)
        scale = (g * inv).reshape(1, cout).astype(jnp.float32)
        shift = (beta - mean * g * inv).reshape(1, cout).astype(jnp.float32)
    out = _bn_relu_pallas(h, scale, shift, th=th)         # (N, Ho, Wo, Cout) f32
    return jnp.transpose(out, (0, 3, 1, 2))               # NCHW


# ----------------------------------------------------------------------------
# Pure-JAX reference (mirrors the kernel's dtype path: bf16 MXU operands,
# bf16-stored pre-BN intermediates, f32 everywhere else)
# ----------------------------------------------------------------------------
def _ref_forward(x, ind, params):
    u = max_unpool2x2_nhwc(x, ind)
    a = u.astype(jnp.bfloat16)
    act = None
    for (w, b, g, beta) in params:
        a32 = a.astype(jnp.float32)
        w32 = w.astype(jnp.bfloat16).astype(jnp.float32)
        y = jax.lax.conv_general_dilated(
            a32, w32, window_strides=(1, 1), padding=((1, 1), (1, 1)),
            dimension_numbers=("NHWC", "OIHW", "NHWC"),
            preferred_element_type=jnp.float32)
        y = y + b[None, None, None, :]
        mean = jnp.mean(y, axis=(0, 1, 2))
        var = jnp.mean((y - mean) ** 2, axis=(0, 1, 2))
        sc = g * jax.lax.rsqrt(var + BN_EPS)
        sh = beta - mean * sc
        y_bf = y.astype(jnp.bfloat16)                     # kernel stores bf16
        act = jnp.maximum(y_bf.astype(jnp.float32) * sc + sh, 0.0)
        a = act.astype(jnp.bfloat16)
    return jnp.transpose(act, (0, 3, 1, 2))


# ----------------------------------------------------------------------------
# Deterministic input / parameter builders
# ----------------------------------------------------------------------------
def maxpool2x2_with_indices(y):
    """jnp equivalent of F.max_pool2d(..., 2, 2, return_indices=True)."""
    N, C, H2, W2 = y.shape
    H, W = H2 // 2, W2 // 2
    yr = y.reshape(N, C, H, 2, W, 2).transpose(0, 1, 2, 4, 3, 5)
    yr = yr.reshape(N, C, H, W, 4)
    arg = jnp.argmax(yr, axis=-1)
    val = jnp.max(yr, axis=-1)
    di, dj = arg // 2, arg % 2
    oh = 2 * jnp.arange(H, dtype=jnp.int32)[None, None, :, None] + di
    ow = 2 * jnp.arange(W, dtype=jnp.int32)[None, None, None, :] + dj
    ind = (oh * W2 + ow).astype(jnp.int32)
    return val, ind


def init_params(key, in_channels, out_channels, depth=2):
    params = []
    for i in range(depth):
        cin = in_channels
        cout = out_channels if i == depth - 1 else in_channels
        key, kw, kb, kg, kbe = jax.random.split(key, 5)
        fan_in = cin * 9
        w = jax.random.normal(kw, (cout, cin, 3, 3), jnp.float32) / jnp.sqrt(fan_in)
        b = 0.1 * jax.random.normal(kb, (cout,), jnp.float32)
        g = 1.0 + 0.1 * jax.random.normal(kg, (cout,), jnp.float32)
        beta = 0.1 * jax.random.normal(kbe, (cout,), jnp.float32)
        params.append((w, b, g, beta))
    return params


if __name__ == "__main__":
    key = jax.random.PRNGKey(0)
    k_in, k_par = jax.random.split(key)

    N, CIN, COUT = 2, 4, 8
    # Build realistic (x, ind) by max-pooling a 32x32 map -> x/ind are 16x16.
    y_full = jax.random.normal(k_in, (N, CIN, 32, 32), jnp.float32)
    x, ind = maxpool2x2_with_indices(y_full)        # (2, 4, 16, 16) each

    params = init_params(k_par, CIN, COUT, depth=2)
    prepped = prep_params(params)

    fwd = jax.jit(lambda xx, ii: decoder_block_segnet_forward(xx, ii, prepped))
    out = jax.block_until_ready(fwd(x, ind))        # (2, 8, 32, 32)

    ref = jax.block_until_ready(_ref_forward(x, ind, params))
    assert out.shape == (N, COUT, 32, 32), out.shape
    max_err = float(jnp.max(jnp.abs(out - ref)))
    # bf16-rounded intermediates can differ by one bf16 ulp where the f32
    # accumulations straddle a rounding boundary -> tolerance ~1e-2.
    assert jnp.allclose(out, ref, rtol=1e-2, atol=1e-2), max_err

    print("KERNEL_OK")
</pallas_src>

<mosaic_0001>
module attributes {stable_mosaic.version = 11 : i64} {
  func.func @_conv3x3_stats_kernel(%arg0: i32, %arg1: i32, %arg2: memref<1x1x10x34x4xbf16, #tpu.memory_space<vmem>>, %arg3: memref<9x4x4xbf16, #tpu.memory_space<vmem>>, %arg4: memref<1x4xf32, #tpu.memory_space<vmem>>, %arg5: memref<1x4xf32, #tpu.memory_space<vmem>>, %arg6: memref<1x4xf32, #tpu.memory_space<vmem>>, %arg7: memref<1x8x32x4xbf16, #tpu.memory_space<vmem>>, %arg8: memref<1x1x2x4xf32, #tpu.memory_space<vmem>>) attributes {dimension_semantics = [#tpu.dimension_semantics<parallel>, #tpu.dimension_semantics<parallel>], iteration_bounds = array<i64: 2, 4>, scalar_prefetch = 0 : i64, scratch_operands = 0 : i64, tpu.core_type = #tpu.core_type<tc>, window_params = [{transform_indices = @transform_0, window_bounds = array<i64: 1, 1, 10, 34, 4>}, {pipeline_mode = #tpu.pipeline_mode<synchronous>, transform_indices = @transform_1, window_bounds = array<i64: 9, 4, 4>}, {pipeline_mode = #tpu.pipeline_mode<synchronous>, transform_indices = @transform_2, window_bounds = array<i64: 1, 4>}, {pipeline_mode = #tpu.pipeline_mode<synchronous>, transform_indices = @transform_3, window_bounds = array<i64: 1, 4>}, {pipeline_mode = #tpu.pipeline_mode<synchronous>, transform_indices = @transform_4, window_bounds = array<i64: 1, 4>}, {transform_indices = @transform_5, window_bounds = array<i64: 1, 8, 32, 4>}, {transform_indices = @transform_6, window_bounds = array<i64: 1, 1, 2, 4>}]} {
    %c0 = arith.constant 0 : index
    %c0_0 = arith.constant 0 : index
    %c0_1 = arith.constant 0 : index
    %c0_2 = arith.constant 0 : index
    %c0_3 = arith.constant 0 : index
    %0 = vector.load %arg2[%c0, %c0_0, %c0_1, %c0_2, %c0_3] : memref<1x1x10x34x4xbf16, #tpu.memory_space<vmem>>, vector<1x1x10x34x4xbf16>
    %1 = vector.shape_cast %0 : vector<1x1x10x34x4xbf16> to vector<10x34x4xbf16>
    %c0_4 = arith.constant 0 : index
    %c0_5 = arith.constant 0 : index
    %c0_6 = arith.constant 0 : index
    %2 = vector.load %arg3[%c0_4, %c0_5, %c0_6] : memref<9x4x4xbf16, #tpu.memory_space<vmem>>, vector<1x4x4xbf16>
    %3 = vector.shape_cast %2 : vector<1x4x4xbf16> to vector<4x4xbf16>
    %c1 = arith.constant 1 : index
    %c0_7 = arith.constant 0 : index
    %c0_8 = arith.constant 0 : index
    %4 = vector.load %arg3[%c1, %c0_7, %c0_8] : memref<9x4x4xbf16, #tpu.memory_space<vmem>>, vector<1x4x4xbf16>
    %5 = vector.shape_cast %4 : vector<1x4x4xbf16> to vector<4x4xbf16>
    %c2 = arith.constant 2 : index
    %c0_9 = arith.constant 0 : index
    %c0_10 = arith.constant 0 : index
    %6 = vector.load %arg3[%c2, %c0_9, %c0_10] : memref<9x4x4xbf16, #tpu.memory_space<vmem>>, vector<1x4x4xbf16>
    %7 = vector.shape_cast %6 : vector<1x4x4xbf16> to vector<4x4xbf16>
    %c3 = arith.constant 3 : index
    %c0_11 = arith.constant 0 : index
    %c0_12 = arith.constant 0 : index
    %8 = vector.load %arg3[%c3, %c0_11, %c0_12] : memref<9x4x4xbf16, #tpu.memory_space<vmem>>, vector<1x4x4xbf16>
    %9 = vector.shape_cast %8 : vector<1x4x4xbf16> to vector<4x4xbf16>
    %c4 = arith.constant 4 : index
    %c0_13 = arith.constant 0 : index
    %c0_14 = arith.constant 0 : index
    %10 = vector.load %arg3[%c4, %c0_13, %c0_14] : memref<9x4x4xbf16, #tpu.memory_space<vmem>>, vector<1x4x4xbf16>
    %11 = vector.shape_cast %10 : vector<1x4x4xbf16> to vector<4x4xbf16>
    %c5 = arith.constant 5 : index
    %c0_15 = arith.constant 0 : index
    %c0_16 = arith.constant 0 : index
    %12 = vector.load %arg3[%c5, %c0_15, %c0_16] : memref<9x4x4xbf16, #tpu.memory_space<vmem>>, vector<1x4x4xbf16>
    %13 = vector.shape_cast %12 : vector<1x4x4xbf16> to vector<4x4xbf16>
    %c6 = arith.constant 6 : index
    %c0_17 = arith.constant 0 : index
    %c0_18 = arith.constant 0 : index
    %14 = vector.load %arg3[%c6, %c0_17, %c0_18] : memref<9x4x4xbf16, #tpu.memory_space<vmem>>, vector<1x4x4xbf16>
    %15 = vector.shape_cast %14 : vector<1x4x4xbf16> to vector<4x4xbf16>
    %c7 = arith.constant 7 : index
    %c0_19 = arith.constant 0 : index
    %c0_20 = arith.constant 0 : index
    %16 = vector.load %arg3[%c7, %c0_19, %c0_20] : memref<9x4x4xbf16, #tpu.memory_space<vmem>>, vector<1x4x4xbf16>
    %17 = vector.shape_cast %16 : vector<1x4x4xbf16> to vector<4x4xbf16>
    %c8 = arith.constant 8 : index
    %c0_21 = arith.constant 0 : index
    %c0_22 = arith.constant 0 : index
    %18 = vector.load %arg3[%c8, %c0_21, %c0_22] : memref<9x4x4xbf16, #tpu.memory_space<vmem>>, vector<1x4x4xbf16>
    %19 = vector.shape_cast %18 : vector<1x4x4xbf16> to vector<4x4xbf16>
    %c0_23 = arith.constant 0 : index
    %c0_24 = arith.constant 0 : index
    %20 = vector.load %arg4[%c0_23, %c0_24] : memref<1x4xf32, #tpu.memory_space<vmem>>, vector<1x4xf32>
    %cst = arith.constant 0.000000e+00 : f32
    %21 = vector.broadcast %cst : f32 to vector<1x4xf32>
    %cst_25 = arith.constant 0.000000e+00 : f32
    %22 = vector.broadcast %cst_25 : f32 to vector<1x4xf32>
    %cst_26 = arith.constant 0.000000e+00 : f32
    %23 = vector.broadcast %cst_26 : f32 to vector<32x4xf32>
    %24 = vector.extract_strided_slice %1 {offsets = [0, 0, 0], sizes = [1, 34, 4], strides = [1, 1, 1]} : vector<10x34x4xbf16> to vector<1x34x4xbf16>
    %25 = vector.shape_cast %24 : vector<1x34x4xbf16> to vector<34x4xbf16>
    %26 = vector.extract_strided_slice %25 {offsets = [0, 0], sizes = [32, 4], strides = [1, 1]} : vector<34x4xbf16> to vector<32x4xbf16>
    %cst_27 = arith.constant dense<0.000000e+00> : vector<32x4xf32>
    %27 = tpu.matmul %26, %3, %cst_27 {dimension_numbers = #tpu.dot_dimension_numbers<[1], [0], [0], [1], [0, 0, 1, 1], [], []>} : vector<32x4xbf16>, vector<4x4xbf16>, vector<32x4xf32> -> vector<32x4xf32>
    %28 = arith.addf %23, %27 : vector<32x4xf32>
    %29 = vector.extract_strided_slice %25 {offsets = [1, 0], sizes = [32, 4], strides = [1, 1]} : vector<34x4xbf16> to vector<32x4xbf16>
    %cst_28 = arith.constant dense<0.000000e+00> : vector<32x4xf32>
    %30 = tpu.matmul %29, %5, %cst_28 {dimension_numbers = #tpu.dot_dimension_numbers<[1], [0], [0], [1], [0, 0, 1, 1], [], []>} : vector<32x4xbf16>, vector<4x4xbf16>, vector<32x4xf32> -> vector<32x4xf32>
    %31 = arith.addf %28, %30 : vector<32x4xf32>
    %32 = vector.extract_strided_slice %25 {offsets = [2, 0], sizes = [32, 4], strides = [1, 1]} : vector<34x4xbf16> to vector<32x4xbf16>
    %cst_29 = arith.constant dense<0.000000e+00> : vector<32x4xf32>
    %33 = tpu.matmul %32, %7, %cst_29 {dimension_numbers = #tpu.dot_dimension_numbers<[1], [0], [0], [1], [0, 0, 1, 1], [], []>} : vector<32x4xbf16>, vector<4x4xbf16>, vector<32x4xf32> -> vector<32x4xf32>
    %34 = arith.addf %31, %33 : vector<32x4xf32>
    %35 = vector.extract_strided_slice %1 {offsets = [1, 0, 0], sizes = [1, 34, 4], strides = [1, 1, 1]} : vector<10x34x4xbf16> to vector<1x34x4xbf16>
    %36 = vector.shape_cast %35 : vector<1x34x4xbf16> to vector<34x4xbf16>
    %37 = vector.extract_strided_slice %36 {offsets = [0, 0], sizes = [32, 4], strides = [1, 1]} : vector<34x4xbf16> to vector<32x4xbf16>
    %cst_30 = arith.constant dense<0.000000e+00> : vector<32x4xf32>
    %38 = tpu.matmul %37, %9, %cst_30 {dimension_numbers = #tpu.dot_dimension_numbers<[1], [0], [0], [1], [0, 0, 1, 1], [], []>} : vector<32x4xbf16>, vector<4x4xbf16>, vector<32x4xf32> -> vector<32x4xf32>
    %39 = arith.addf %34, %38 : vector<32x4xf32>
    %40 = vector.extract_strided_slice %36 {offsets = [1, 0], sizes = [32, 4], strides = [1, 1]} : vector<34x4xbf16> to vector<32x4xbf16>
    %cst_31 = arith.constant dense<0.000000e+00> : vector<32x4xf32>
    %41 = tpu.matmul %40, %11, %cst_31 {dimension_numbers = #tpu.dot_dimension_numbers<[1], [0], [0], [1], [0, 0, 1, 1], [], []>} : vector<32x4xbf16>, vector<4x4xbf16>, vector<32x4xf32> -> vector<32x4xf32>
    %42 = arith.addf %39, %41 : vector<32x4xf32>
    %43 = vector.extract_strided_slice %36 {offsets = [2, 0], sizes = [32, 4], strides = [1, 1]} : vector<34x4xbf16> to vector<32x4xbf16>
    %cst_32 = arith.constant dense<0.000000e+00> : vector<32x4xf32>
    %44 = tpu.matmul %43, %13, %cst_32 {dimension_numbers = #tpu.dot_dimension_numbers<[1], [0], [0], [1], [0, 0, 1, 1], [], []>} : vector<32x4xbf16>, vector<4x4xbf16>, vector<32x4xf32> -> vector<32x4xf32>
    %45 = arith.addf %42, %44 : vector<32x4xf32>
    %46 = vector.extract_strided_slice %1 {offsets = [2, 0, 0], sizes = [1, 34, 4], strides = [1, 1, 1]} : vector<10x34x4xbf16> to vector<1x34x4xbf16>
    %47 = vector.shape_cast %46 : vector<1x34x4xbf16> to vector<34x4xbf16>
    %48 = vector.extract_strided_slice %47 {offsets = [0, 0], sizes = [32, 4], strides = [1, 1]} : vector<34x4xbf16> to vector<32x4xbf16>
    %cst_33 = arith.constant dense<0.000000e+00> : vector<32x4xf32>
    %49 = tpu.matmul %48, %15, %cst_33 {dimension_numbers = #tpu.dot_dimension_numbers<[1], [0], [0], [1], [0, 0, 1, 1], [], []>} : vector<32x4xbf16>, vector<4x4xbf16>, vector<32x4xf32> -> vector<32x4xf32>
    %50 = arith.addf %45, %49 : vector<32x4xf32>
    %51 = vector.extract_strided_slice %47 {offsets = [1, 0], sizes = [32, 4], strides = [1, 1]} : vector<34x4xbf16> to vector<32x4xbf16>
    %cst_34 = arith.constant dense<0.000000e+00> : vector<32x4xf32>
    %52 = tpu.matmul %51, %17, %cst_34 {dimension_numbers = #tpu.dot_dimension_numbers<[1], [0], [0], [1], [0, 0, 1, 1], [], []>} : vector<32x4xbf16>, vector<4x4xbf16>, vector<32x4xf32> -> vector<32x4xf32>
    %53 = arith.addf %50, %52 : vector<32x4xf32>
    %54 = vector.extract_strided_slice %47 {offsets = [2, 0], sizes = [32, 4], strides = [1, 1]} : vector<34x4xbf16> to vector<32x4xbf16>
    %cst_35 = arith.constant dense<0.000000e+00> : vector<32x4xf32>
    %55 = tpu.matmul %54, %19, %cst_35 {dimension_numbers = #tpu.dot_dimension_numbers<[1], [0], [0], [1], [0, 0, 1, 1], [], []>} : vector<32x4xbf16>, vector<4x4xbf16>, vector<32x4xf32> -> vector<32x4xf32>
    %56 = arith.addf %53, %55 : vector<32x4xf32>
    %57 = vector.broadcast %20 : vector<1x4xf32> to vector<32x4xf32>
    %58 = arith.addf %56, %57 : vector<32x4xf32>
    %59 = arith.truncf %58 : vector<32x4xf32> to vector<32x4xbf16>
    %c0_36 = arith.constant 0 : index
    %c0_37 = arith.constant 0 : index
    %c0_38 = arith.constant 0 : index
    %c0_39 = arith.constant 0 : index
    %60 = vector.load %arg7[%c0_36, %c0_37, %c0_38, %c0_39] : memref<1x8x32x4xbf16, #tpu.memory_space<vmem>>, vector<1x1x32x4xbf16>
    %61 = vector.shape_cast %60 : vector<1x1x32x4xbf16> to vector<32x4xbf16>
    %62 = vector.shape_cast %59 : vector<32x4xbf16> to vector<1x1x32x4xbf16>
    tpu.vector_store %arg7[%c0_36, %c0_37, %c0_38, %c0_39], %62 {strides = array<i32>} : memref<1x8x32x4xbf16, #tpu.memory_space<vmem>>, vector<1x1x32x4xbf16>,
    %cst_40 = arith.constant dense<0.000000e+00> : vector<4xf32>
    %63 = vector.multi_reduction <add>, %58, %cst_40 [0] : vector<32x4xf32> to vector<4xf32>
    %64 = vector.shape_cast %63 : vector<4xf32> to vector<1x4xf32>
    %65 = arith.addf %21, %64 : vector<1x4xf32>
    %66 = arith.mulf %58, %58 : vector<32x4xf32>
    %cst_41 = arith.constant dense<0.000000e+00> : vector<4xf32>
    %67 = vector.multi_reduction <add>, %66, %cst_41 [0] : vector<32x4xf32> to vector<4xf32>
    %68 = vector.shape_cast %67 : vector<4xf32> to vector<1x4xf32>
    %69 = arith.addf %22, %68 : vector<1x4xf32>
    %cst_42 = arith.constant 0.000000e+00 : f32
    %70 = vector.broadcast %cst_42 : f32 to vector<32x4xf32>
    %71 = vector.extract_strided_slice %1 {offsets = [1, 0, 0], sizes = [1, 34, 4], strides = [1, 1, 1]} : vector<10x34x4xbf16> to vector<1x34x4xbf16>
    %72 = vector.shape_cast %71 : vector<1x34x4xbf16> to vector<34x4xbf16>
    %73 = vector.extract_strided_slice %72 {offsets = [0, 0], sizes = [32, 4], strides = [1, 1]} : vector<34x4xbf16> to vector<32x4xbf16>
    %cst_43 = arith.constant dense<0.000000e+00> : vector<32x4xf32>
    %74 = tpu.matmul %73, %3, %cst_43 {dimension_numbers = #tpu.dot_dimension_numbers<[1], [0], [0], [1], [0, 0, 1, 1], [], []>} : vector<32x4xbf16>, vector<4x4xbf16>, vector<32x4xf32> -> vector<32x4xf32>
    %75 = arith.addf %70, %74 : vector<32x4xf32>
    %76 = vector.extract_strided_slice %72 {offsets = [1, 0], sizes = [32, 4], strides = [1, 1]} : vector<34x4xbf16> to vector<32x4xbf16>
    %cst_44 = arith.constant dense<0.000000e+00> : vector<32x4xf32>
    %77 = tpu.matmul %76, %5, %cst_44 {dimension_numbers = #tpu.dot_dimension_numbers<[1], [0], [0], [1], [0, 0, 1, 1], [], []>} : vector<32x4xbf16>, vector<4x4xbf16>, vector<32x4xf32> -> vector<32x4xf32>
    %78 = arith.addf %75, %77 : vector<32x4xf32>
    %79 = vector.extract_strided_slice %72 {offsets = [2, 0], sizes = [32, 4], strides = [1, 1]} : vector<34x4xbf16> to vector<32x4xbf16>
    %cst_45 = arith.constant dense<0.000000e+00> : vector<32x4xf32>
    %80 = tpu.matmul %79, %7, %cst_45 {dimension_numbers = #tpu.dot_dimension_numbers<[1], [0], [0], [1], [0, 0, 1, 1], [], []>} : vector<32x4xbf16>, vector<4x4xbf16>, vector<32x4xf32> -> vector<32x4xf32>
    %81 = arith.addf %78, %80 : vector<32x4xf32>
    %82 = vector.extract_strided_slice %1 {offsets = [2, 0, 0], sizes = [1, 34, 4], strides = [1, 1, 1]} : vector<10x34x4xbf16> to vector<1x34x4xbf16>
    %83 = vector.shape_cast %82 : vector<1x34x4xbf16> to vector<34x4xbf16>
    %84 = vector.extract_strided_slice %83 {offsets = [0, 0], sizes = [32, 4], strides = [1, 1]} : vector<34x4xbf16> to vector<32x4xbf16>
    %cst_46 = arith.constant dense<0.000000e+00> : vector<32x4xf32>
    %85 = tpu.matmul %84, %9, %cst_46 {dimension_numbers = #tpu.dot_dimension_numbers<[1], [0], [0], [1], [0, 0, 1, 1], [], []>} : vector<32x4xbf16>, vector<4x4xbf16>, vector<32x4xf32> -> vector<32x4xf32>
    %86 = arith.addf %81, %85 : vector<32x4xf32>
    %87 = vector.extract_strided_slice %83 {offsets = [1, 0], sizes = [32, 4], strides = [1, 1]} : vector<34x4xbf16> to vector<32x4xbf16>
    %cst_47 = arith.constant dense<0.000000e+00> : vector<32x4xf32>
    %88 = tpu.matmul %87, %11, %cst_47 {dimension_numbers = #tpu.dot_dimension_numbers<[1], [0], [0], [1], [0, 0, 1, 1], [], []>} : vector<32x4xbf16>, vector<4x4xbf16>, vector<32x4xf32> -> vector<32x4xf32>
    %89 = arith.addf %86, %88 : vector<32x4xf32>
    %90 = vector.extract_strided_slice %83 {offsets = [2, 0], sizes = [32, 4], strides = [1, 1]} : vector<34x4xbf16> to vector<32x4xbf16>
    %cst_48 = arith.constant dense<0.000000e+00> : vector<32x4xf32>
    %91 = tpu.matmul %90, %13, %cst_48 {dimension_numbers = #tpu.dot_dimension_numbers<[1], [0], [0], [1], [0, 0, 1, 1], [], []>} : vector<32x4xbf16>, vector<4x4xbf16>, vector<32x4xf32> -> vector<32x4xf32>
    %92 = arith.addf %89, %91 : vector<32x4xf32>
    %93 = vector.extract_strided_slice %1 {offsets = [3, 0, 0], sizes = [1, 34, 4], strides = [1, 1, 1]} : vector<10x34x4xbf16> to vector<1x34x4xbf16>
    %94 = vector.shape_cast %93 : vector<1x34x4xbf16> to vector<34x4xbf16>
    %95 = vector.extract_strided_slice %94 {offsets = [0, 0], sizes = [32, 4], strides = [1, 1]} : vector<34x4xbf16> to vector<32x4xbf16>
    %cst_49 = arith.constant dense<0.000000e+00> : vector<32x4xf32>
    %96 = tpu.matmul %95, %15, %cst_49 {dimension_numbers = #tpu.dot_dimension_numbers<[1], [0], [0], [1], [0, 0, 1, 1], [], []>} : vector<32x4xbf16>, vector<4x4xbf16>, vector<32x4xf32> -> vector<32x4xf32>
    %97 = arith.addf %92, %96 : vector<32x4xf32>
    %98 = vector.extract_strided_slice %94 {offsets = [1, 0], sizes = [32, 4], strides = [1, 1]} : vector<34x4xbf16> to vector<32x4xbf16>
    %cst_50 = arith.constant dense<0.000000e+00> : vector<32x4xf32>
    %99 = tpu.matmul %98, %17, %cst_50 {dimension_numbers = #tpu.dot_dimension_numbers<[1], [0], [0], [1], [0, 0, 1, 1], [], []>} : vector<32x4xbf16>, vector<4x4xbf16>, vector<32x4xf32> -> vector<32x4xf32>
    %100 = arith.addf %97, %99 : vector<32x4xf32>
    %101 = vector.extract_strided_slice %94 {offsets = [2, 0], sizes = [32, 4], strides = [1, 1]} : vector<34x4xbf16> to vector<32x4xbf16>
    %cst_51 = arith.constant dense<0.000000e+00> : vector<32x4xf32>
    %102 = tpu.matmul %101, %19, %cst_51 {dimension_numbers = #tpu.dot_dimension_numbers<[1], [0], [0], [1], [0, 0, 1, 1], [], []>} : vector<32x4xbf16>, vector<4x4xbf16>, vector<32x4xf32> -> vector<32x4xf32>
    %103 = arith.addf %100, %102 : vector<32x4xf32>
    %104 = vector.broadcast %20 : vector<1x4xf32> to vector<32x4xf32>
    %105 = arith.addf %103, %104 : vector<32x4xf32>
    %106 = arith.truncf %105 : vector<32x4xf32> to vector<32x4xbf16>
    %c0_52 = arith.constant 0 : index
    %c1_53 = arith.constant 1 : index
    %c0_54 = arith.constant 0 : index
    %c0_55 = arith.constant 0 : index
    %107 = vector.load %arg7[%c0_52, %c1_53, %c0_54, %c0_55] : memref<1x8x32x4xbf16, #tpu.memory_space<vmem>>, vector<1x1x32x4xbf16>
    %108 = vector.shape_cast %107 : vector<1x1x32x4xbf16> to vector<32x4xbf16>
    %109 = vector.shape_cast %106 : vector<32x4xbf16> to vector<1x1x32x4xbf16>
    tpu.vector_store %arg7[%c0_52, %c1_53, %c0_54, %c0_55], %109 {strides = array<i32>} : memref<1x8x32x4xbf16, #tpu.memory_space<vmem>>, vector<1x1x32x4xbf16>,
    %cst_56 = arith.constant dense<0.000000e+00> : vector<4xf32>
    %110 = vector.multi_reduction <add>, %105, %cst_56 [0] : vector<32x4xf32> to vector<4xf32>
    %111 = vector.shape_cast %110 : vector<4xf32> to vector<1x4xf32>
    %112 = arith.addf %65, %111 : vector<1x4xf32>
    %113 = arith.mulf %105, %105 : vector<32x4xf32>
    %cst_57 = arith.constant dense<0.000000e+00> : vector<4xf32>
    %114 = vector.multi_reduction <add>, %113, %cst_57 [0] : vector<32x4xf32> to vector<4xf32>
    %115 = vector.shape_cast %114 : vector<4xf32> to vector<1x4xf32>
    %116 = arith.addf %69, %115 : vector<1x4xf32>
    %cst_58 = arith.constant 0.000000e+00 : f32
    %117 = vector.broadcast %cst_58 : f32 to vector<32x4xf32>
    %118 = vector.extract_strided_slice %1 {offsets = [2, 0, 0], sizes = [1, 34, 4], strides = [1, 1, 1]} : vector<10x34x4xbf16> to vector<1x34x4xbf16>
    %119 = vector.shape_cast %118 : vector<1x34x4xbf16> to vector<34x4xbf16>
    %120 = vector.extract_strided_slice %119 {offsets = [0, 0], sizes = [32, 4], strides = [1, 1]} : vector<34x4xbf16> to vector<32x4xbf16>
    %cst_59 = arith.constant dense<0.000000e+00> : vector<32x4xf32>
    %121 = tpu.matmul %120, %3, %cst_59 {dimension_numbers = #tpu.dot_dimension_numbers<[1], [0], [0], [1], [0, 0, 1, 1], [], []>} : vector<32x4xbf16>, vector<4x4xbf16>, vector<32x4xf32> -> vector<32x4xf32>
    %122 = arith.addf %117, %121 : vector<32x4xf32>
    %123 = vector.extract_strided_slice %119 {offsets = [1, 0], sizes = [32, 4], strides = [1, 1]} : vector<34x4xbf16> to vector<32x4xbf16>
    %cst_60 = arith.constant dense<0.000000e+00> : vector<32x4xf32>
    %124 = tpu.matmul %123, %5, %cst_60 {dimension_numbers = #tpu.dot_dimension_numbers<[1], [0], [0], [1], [0, 0, 1, 1], [], []>} : vector<32x4xbf16>, vector<4x4xbf16>, vector<32x4xf32> -> vector<32x4xf32>
    %125 = arith.addf %122, %124 : vector<32x4xf32>
    %126 = vector.extract_strided_slice %119 {offsets = [2, 0], sizes = [32, 4], strides = [1, 1]} : vector<34x4xbf16> to vector<32x4xbf16>
    %cst_61 = arith.constant dense<0.000000e+00> : vector<32x4xf32>
    %127 = tpu.matmul %126, %7, %cst_61 {dimension_numbers = #tpu.dot_dimension_numbers<[1], [0], [0], [1], [0, 0, 1, 1], [], []>} : vector<32x4xbf16>, vector<4x4xbf16>, vector<32x4xf32> -> vector<32x4xf32>
    %128 = arith.addf %125, %127 : vector<32x4xf32>
    %129 = vector.extract_strided_slice %1 {offsets = [3, 0, 0], sizes = [1, 34, 4], strides = [1, 1, 1]} : vector<10x34x4xbf16> to vector<1x34x4xbf16>
    %130 = vector.shape_cast %129 : vector<1x34x4xbf16> to vector<34x4xbf16>
    %131 = vector.extract_strided_slice %130 {offsets = [0, 0], sizes = [32, 4], strides = [1, 1]} : vector<34x4xbf16> to vector<32x4xbf16>
    %cst_62 = arith.constant dense<0.000000e+00> : vector<32x4xf32>
    %132 = tpu.matmul %131, %9, %cst_62 {dimension_numbers = #tpu.dot_dimension_numbers<[1], [0], [0], [1], [0, 0, 1, 1], [], []>} : vector<32x4xbf16>, vector<4x4xbf16>, vector<32x4xf32> -> vector<32x4xf32>
    %133 = arith.addf %128, %132 : vector<32x4xf32>
    %134 = vector.extract_strided_slice %130 {offsets = [1, 0], sizes = [32, 4], strides = [1, 1]} : vector<34x4xbf16> to vector<32x4xbf16>
    %cst_63 = arith.constant dense<0.000000e+00> : vector<32x4xf32>
    %135 = tpu.matmul %134, %11, %cst_63 {dimension_numbers = #tpu.dot_dimension_numbers<[1], [0], [0], [1], [0, 0, 1, 1], [], []>} : vector<32x4xbf16>, vector<4x4xbf16>, vector<32x4xf32> -> vector<32x4xf32>
    %136 = arith.addf %133, %135 : vector<32x4xf32>
    %137 = vector.extract_strided_slice %130 {offsets = [2, 0], sizes = [32, 4], strides = [1, 1]} : vector<34x4xbf16> to vector<32x4xbf16>
    %cst_64 = arith.constant dense<0.000000e+00> : vector<32x4xf32>
    %138 = tpu.matmul %137, %13, %cst_64 {dimension_numbers = #tpu.dot_dimension_numbers<[1], [0], [0], [1], [0, 0, 1, 1], [], []>} : vector<32x4xbf16>, vector<4x4xbf16>, vector<32x4xf32> -> vector<32x4xf32>
    %139 = arith.addf %136, %138 : vector<32x4xf32>
    %140 = vector.extract_strided_slice %1 {offsets = [4, 0, 0], sizes = [1, 34, 4], strides = [1, 1, 1]} : vector<10x34x4xbf16> to vector<1x34x4xbf16>
    %141 = vector.shape_cast %140 : vector<1x34x4xbf16> to vector<34x4xbf16>
    %142 = vector.extract_strided_slice %141 {offsets = [0, 0], sizes = [32, 4], strides = [1, 1]} : vector<34x4xbf16> to vector<32x4xbf16>
    %cst_65 = arith.constant dense<0.000000e+00> : vector<32x4xf32>
    %143 = tpu.matmul %142, %15, %cst_65 {dimension_numbers = #tpu.dot_dimension_numbers<[1], [0], [0], [1], [0, 0, 1, 1], [], []>} : vector<32x4xbf16>, vector<4x4xbf16>, vector<32x4xf32> -> vector<32x4xf32>
    %144 = arith.addf %139, %143 : vector<32x4xf32>
    %145 = vector.extract_strided_slice %141 {offsets = [1, 0], sizes = [32, 4], strides = [1, 1]} : vector<34x4xbf16> to vector<32x4xbf16>
    %cst_66 = arith.constant dense<0.000000e+00> : vector<32x4xf32>
    %146 = tpu.matmul %145, %17, %cst_66 {dimension_numbers = #tpu.dot_dimension_numbers<[1], [0], [0], [1], [0, 0, 1, 1], [], []>} : vector<32x4xbf16>, vector<4x4xbf16>, vector<32x4xf32> -> vector<32x4xf32>
    %147 = arith.addf %144, %146 : vector<32x4xf32>
    %148 = vector.extract_strided_slice %141 {offsets = [2, 0], sizes = [32, 4], strides = [1, 1]} : vector<34x4xbf16> to vector<32x4xbf16>
    %cst_67 = arith.constant dense<0.000000e+00> : vector<32x4xf32>
    %149 = tpu.matmul %148, %19, %cst_67 {dimension_numbers = #tpu.dot_dimension_numbers<[1], [0], [0], [1], [0, 0, 1, 1], [], []>} : vector<32x4xbf16>, vector<4x4xbf16>, vector<32x4xf32> -> vector<32x4xf32>
    %150 = arith.addf %147, %149 : vector<32x4xf32>
    %151 = vector.broadcast %20 : vector<1x4xf32> to vector<32x4xf32>
    %152 = arith.addf %150, %151 : vector<32x4xf32>
    %153 = arith.truncf %152 : vector<32x4xf32> to vector<32x4xbf16>
    %c0_68 = arith.constant 0 : index
    %c2_69 = arith.constant 2 : index
    %c0_70 = arith.constant 0 : index
    %c0_71 = arith.constant 0 : index
    %154 = vector.load %arg7[%c0_68, %c2_69, %c0_70, %c0_71] : memref<1x8x32x4xbf16, #tpu.memory_space<vmem>>, vector<1x1x32x4xbf16>
    %155 = vector.shape_cast %154 : vector<1x1x32x4xbf16> to vector<32x4xbf16>
    %156 = vector.shape_cast %153 : vector<32x4xbf16> to vector<1x1x32x4xbf16>
    tpu.vector_store %arg7[%c0_68, %c2_69, %c0_70, %c0_71], %156 {strides = array<i32>} : memref<1x8x32x4xbf16, #tpu.memory_space<vmem>>, vector<1x1x32x4xbf16>,
    %cst_72 = arith.constant dense<0.000000e+00> : vector<4xf32>
    %157 = vector.multi_reduction <add>, %152, %cst_72 [0] : vector<32x4xf32> to vector<4xf32>
    %158 = vector.shape_cast %157 : vector<4xf32> to vector<1x4xf32>
    %159 = arith.addf %112, %158 : vector<1x4xf32>
    %160 = arith.mulf %152, %152 : vector<32x4xf32>
    %cst_73 = arith.constant dense<0.000000e+00> : vector<4xf32>
    %161 = vector.multi_reduction <add>, %160, %cst_73 [0] : vector<32x4xf32> to vector<4xf32>
    %162 = vector.shape_cast %161 : vector<4xf32> to vector<1x4xf32>
    %163 = arith.addf %116, %162 : vector<1x4xf32>
    %cst_74 = arith.constant 0.000000e+00 : f32
    %164 = vector.broadcast %cst_74 : f32 to vector<32x4xf32>
    %165 = vector.extract_strided_slice %1 {offsets = [3, 0, 0], sizes = [1, 34, 4], strides = [1, 1, 1]} : vector<10x34x4xbf16> to vector<1x34x4xbf16>
    %166 = vector.shape_cast %165 : vector<1x34x4xbf16> to vector<34x4xbf16>
    %167 = vector.extract_strided_slice %166 {offsets = [0, 0], sizes = [32, 4], strides = [1, 1]} : vector<34x4xbf16> to vector<32x4xbf16>
    %cst_75 = arith.constant dense<0.000000e+00> : vector<32x4xf32>
    %168 = tpu.matmul %167, %3, %cst_75 {dimension_numbers = #tpu.dot_dimension_numbers<[1], [0], [0], [1], [0, 0, 1, 1], [], []>} : vector<32x4xbf16>, vector<4x4xbf16>, vector<32x4xf32> -> vector<32x4xf32>
    %169 = arith.addf %164, %168 : vector<32x4xf32>
    %170 = vector.extract_strided_slice %166 {offsets = [1, 0], sizes = [32, 4], strides = [1, 1]} : vector<34x4xbf16> to vector<32x4xbf16>
    %cst_76 = arith.constant dense<0.000000e+00> : vector<32x4xf32>
    %171 = tpu.matmul %170, %5, %cst_76 {dimension_numbers = #tpu.dot_dimension_numbers<[1], [0], [0], [1], [0, 0, 1, 1], [], []>} : vector<32x4xbf16>, vector<4x4xbf16>, vector<32x4xf32> -> vector<32x4xf32>
    %172 = arith.addf %169, %171 : vector<32x4xf32>
    %173 = vector.extract_strided_slice %166 {offsets = [2, 0], sizes = [32, 4], strides = [1, 1]} : vector<34x4xbf16> to vector<32x4xbf16>
    %cst_77 = arith.constant dense<0.000000e+00> : vector<32x4xf32>
    %174 = tpu.matmul %173, %7, %cst_77 {dimension_numbers = #tpu.dot_dimension_numbers<[1], [0], [0], [1], [0, 0, 1, 1], [], []>} : vector<32x4xbf16>, vector<4x4xbf16>, vector<32x4xf32> -> vector<32x4xf32>
    %175 = arith.addf %172, %174 : vector<32x4xf32>
    %176 = vector.extract_strided_slice %1 {offsets = [4, 0, 0], sizes = [1, 34, 4], strides = [1, 1, 1]} : vector<10x34x4xbf16> to vector<1x34x4xbf16>
    %177 = vector.shape_cast %176 : vector<1x34x4xbf16> to vector<34x4xbf16>
    %178 = vector.extract_strided_slice %177 {offsets = [0, 0], sizes = [32, 4], strides = [1, 1]} : vector<34x4xbf16> to vector<32x4xbf16>
    %cst_78 = arith.constant dense<0.000000e+00> : vector<32x4xf32>
    %179 = tpu.matmul %178, %9, %cst_78 {dimension_numbers = #tpu.dot_dimension_numbers<[1], [0], [0], [1], [0, 0, 1, 1], [], []>} : vector<32x4xbf16>, vector<4x4xbf16>, vector<32x4xf32> -> vector<32x4xf32>
    %180 = arith.addf %175, %179 : vector<32x4xf32>
    %181 = vector.extract_strided_slice %177 {offsets = [1, 0], sizes = [32, 4], strides = [1, 1]} : vector<34x4xbf16> to vector<32x4xbf16>
    %cst_79 = arith.constant dense<0.000000e+00> : vector<32x4xf32>
    %182 = tpu.matmul %181, %11, %cst_79 {dimension_numbers = #tpu.dot_dimension_numbers<[1], [0], [0], [1], [0, 0, 1, 1], [], []>} : vector<32x4xbf16>, vector<4x4xbf16>, vector<32x4xf32> -> vector<32x4xf32>
    %183 = arith.addf %180, %182 : vector<32x4xf32>
    %184 = vector.extract_strided_slice %177 {offsets = [2, 0], sizes = [32, 4], strides = [1, 1]} : vector<34x4xbf16> to vector<32x4xbf16>
    %cst_80 = arith.constant dense<0.000000e+00> : vector<32x4xf32>
    %185 = tpu.matmul %184, %13, %cst_80 {dimension_numbers = #tpu.dot_dimension_numbers<[1], [0], [0], [1], [0, 0, 1, 1], [], []>} : vector<32x4xbf16>, vector<4x4xbf16>, vector<32x4xf32> -> vector<32x4xf32>
    %186 = arith.addf %183, %185 : vector<32x4xf32>
    %187 = vector.extract_strided_slice %1 {offsets = [5, 0, 0], sizes = [1, 34, 4], strides = [1, 1, 1]} : vector<10x34x4xbf16> to vector<1x34x4xbf16>
    %188 = vector.shape_cast %187 : vector<1x34x4xbf16> to vector<34x4xbf16>
    %189 = vector.extract_strided_slice %188 {offsets = [0, 0], sizes = [32, 4], strides = [1, 1]} : vector<34x4xbf16> to vector<32x4xbf16>
    %cst_81 = arith.constant dense<0.000000e+00> : vector<32x4xf32>
    %190 = tpu.matmul %189, %15, %cst_81 {dimension_numbers = #tpu.dot_dimension_numbers<[1], [0], [0], [1], [0, 0, 1, 1], [], []>} : vector<32x4xbf16>, vector<4x4xbf16>, vector<32x4xf32> -> vector<32x4xf32>
    %191 = arith.addf %186, %190 : vector<32x4xf32>
    %192 = vector.extract_strided_slice %188 {offsets = [1, 0], sizes = [32, 4], strides = [1, 1]} : vector<34x4xbf16> to vector<32x4xbf16>
    %cst_82 = arith.constant dense<0.000000e+00> : vector<32x4xf32>
    %193 = tpu.matmul %192, %17, %cst_82 {dimension_numbers = #tpu.dot_dimension_numbers<[1], [0], [0], [1], [0, 0, 1, 1], [], []>} : vector<32x4xbf16>, vector<4x4xbf16>, vector<32x4xf32> -> vector<32x4xf32>
    %194 = arith.addf %191, %193 : vector<32x4xf32>
    %195 = vector.extract_strided_slice %188 {offsets = [2, 0], sizes = [32, 4], strides = [1, 1]} : vector<34x4xbf16> to vector<32x4xbf16>
    %cst_83 = arith.constant dense<0.000000e+00> : vector<32x4xf32>
    %196 = tpu.matmul %195, %19, %cst_83 {dimension_numbers = #tpu.dot_dimension_numbers<[1], [0], [0], [1], [0, 0, 1, 1], [], []>} : vector<32x4xbf16>, vector<4x4xbf16>, vector<32x4xf32> -> vector<32x4xf32>
    %197 = arith.addf %194, %196 : vector<32x4xf32>
    %198 = vector.broadcast %20 : vector<1x4xf32> to vector<32x4xf32>
    %199 = arith.addf %197, %198 : vector<32x4xf32>
    %200 = arith.truncf %199 : vector<32x4xf32> to vector<32x4xbf16>
    %c0_84 = arith.constant 0 : index
    %c3_85 = arith.constant 3 : index
    %c0_86 = arith.constant 0 : index
    %c0_87 = arith.constant 0 : index
    %201 = vector.load %arg7[%c0_84, %c3_85, %c0_86, %c0_87] : memref<1x8x32x4xbf16, #tpu.memory_space<vmem>>, vector<1x1x32x4xbf16>
    %202 = vector.shape_cast %201 : vector<1x1x32x4xbf16> to vector<32x4xbf16>
    %203 = vector.shape_cast %200 : vector<32x4xbf16> to vector<1x1x32x4xbf16>
    tpu.vector_store %arg7[%c0_84, %c3_85, %c0_86, %c0_87], %203 {strides = array<i32>} : memref<1x8x32x4xbf16, #tpu.memory_space<vmem>>, vector<1x1x32x4xbf16>,
    %cst_88 = arith.constant dense<0.000000e+00> : vector<4xf32>
    %204 = vector.multi_reduction <add>, %199, %cst_88 [0] : vector<32x4xf32> to vector<4xf32>
    %205 = vector.shape_cast %204 : vector<4xf32> to vector<1x4xf32>
    %206 = arith.addf %159, %205 : vector<1x4xf32>
    %207 = arith.mulf %199, %199 : vector<32x4xf32>
    %cst_89 = arith.constant dense<0.000000e+00> : vector<4xf32>
    %208 = vector.multi_reduction <add>, %207, %cst_89 [0] : vector<32x4xf32> to vector<4xf32>
    %209 = vector.shape_cast %208 : vector<4xf32> to vector<1x4xf32>
    %210 = arith.addf %163, %209 : vector<1x4xf32>
    %cst_90 = arith.constant 0.000000e+00 : f32
    %211 = vector.broadcast %cst_90 : f32 to vector<32x4xf32>
    %212 = vector.extract_strided_slice %1 {offsets = [4, 0, 0], sizes = [1, 34, 4], strides = [1, 1, 1]} : vector<10x34x4xbf16> to vector<1x34x4xbf16>
    %213 = vector.shape_cast %212 : vector<1x34x4xbf16> to vector<34x4xbf16>
    %214 = vector.extract_strided_slice %213 {offsets = [0, 0], sizes = [32, 4], strides = [1, 1]} : vector<34x4xbf16> to vector<32x4xbf16>
    %cst_91 = arith.constant dense<0.000000e+00> : vector<32x4xf32>
    %215 = tpu.matmul %214, %3, %cst_91 {dimension_numbers = #tpu.dot_dimension_numbers<[1], [0], [0], [1], [0, 0, 1, 1], [], []>} : vector<32x4xbf16>, vector<4x4xbf16>, vector<32x4xf32> -> vector<32x4xf32>
    %216 = arith.addf %211, %215 : vector<32x4xf32>
    %217 = vector.extract_strided_slice %213 {offsets = [1, 0], sizes = [32, 4], strides = [1, 1]} : vector<34x4xbf16> to vector<32x4xbf16>
    %cst_92 = arith.constant dense<0.000000e+00> : vector<32x4xf32>
    %218 = tpu.matmul %217, %5, %cst_92 {dimension_numbers = #tpu.dot_dimension_numbers<[1], [0], [0], [1], [0, 0, 1, 1], [], []>} : vector<32x4xbf16>, vector<4x4xbf16>, vector<32x4xf32> -> vector<32x4xf32>
    %219 = arith.addf %216, %218 : vector<32x4xf32>
    %220 = vector.extract_strided_slice %213 {offsets = [2, 0], sizes = [32, 4], strides = [1, 1]} : vector<34x4xbf16> to vector<32x4xbf16>
    %cst_93 = arith.constant dense<0.000000e+00> : vector<32x4xf32>
    %221 = tpu.matmul %220, %7, %cst_93 {dimension_numbers = #tpu.dot_dimension_numbers<[1], [0], [0], [1], [0, 0, 1, 1], [], []>} : vector<32x4xbf16>, vector<4x4xbf16>, vector<32x4xf32> -> vector<32x4xf32>
    %222 = arith.addf %219, %221 : vector<32x4xf32>
    %223 = vector.extract_strided_slice %1 {offsets = [5, 0, 0], sizes = [1, 34, 4], strides = [1, 1, 1]} : vector<10x34x4xbf16> to vector<1x34x4xbf16>
    %224 = vector.shape_cast %223 : vector<1x34x4xbf16> to vector<34x4xbf16>
    %225 = vector.extract_strided_slice %224 {offsets = [0, 0], sizes = [32, 4], strides = [1, 1]} : vector<34x4xbf16> to vector<32x4xbf16>
    %cst_94 = arith.constant dense<0.000000e+00> : vector<32x4xf32>
    %226 = tpu.matmul %225, %9, %cst_94 {dimension_numbers = #tpu.dot_dimension_numbers<[1], [0], [0], [1], [0, 0, 1, 1], [], []>} : vector<32x4xbf16>, vector<4x4xbf16>, vector<32x4xf32> -> vector<32x4xf32>
    %227 = arith.addf %222, %226 : vector<32x4xf32>
    %228 = vector.extract_strided_slice %224 {offsets = [1, 0], sizes = [32, 4], strides = [1, 1]} : vector<34x4xbf16> to vector<32x4xbf16>
    %cst_95 = arith.constant dense<0.000000e+00> : vector<32x4xf32>
    %229 = tpu.matmul %228, %11, %cst_95 {dimension_numbers = #tpu.dot_dimension_numbers<[1], [0], [0], [1], [0, 0, 1, 1], [], []>} : vector<32x4xbf16>, vector<4x4xbf16>, vector<32x4xf32> -> vector<32x4xf32>
    %230 = arith.addf %227, %229 : vector<32x4xf32>
    %231 = vector.extract_strided_slice %224 {offsets = [2, 0], sizes = [32, 4], strides = [1, 1]} : vector<34x4xbf16> to vector<32x4xbf16>
    %cst_96 = arith.constant dense<0.000000e+00> : vector<32x4xf32>
    %232 = tpu.matmul %231, %13, %cst_96 {dimension_numbers = #tpu.dot_dimension_numbers<[1], [0], [0], [1], [0, 0, 1, 1], [], []>} : vector<32x4xbf16>, vector<4x4xbf16>, vector<32x4xf32> -> vector<32x4xf32>
    %233 = arith.addf %230, %232 : vector<32x4xf32>
    %234 = vector.extract_strided_slice %1 {offsets = [6, 0, 0], sizes = [1, 34, 4], strides = [1, 1, 1]} : vector<10x34x4xbf16> to vector<1x34x4xbf16>
    %235 = vector.shape_cast %234 : vector<1x34x4xbf16> to vector<34x4xbf16>
    %236 = vector.extract_strided_slice %235 {offsets = [0, 0], sizes = [32, 4], strides = [1, 1]} : vector<34x4xbf16> to vector<32x4xbf16>
    %cst_97 = arith.constant dense<0.000000e+00> : vector<32x4xf32>
    %237 = tpu.matmul %236, %15, %cst_97 {dimension_numbers = #tpu.dot_dimension_numbers<[1], [0], [0], [1], [0, 0, 1, 1], [], []>} : vector<32x4xbf16>, vector<4x4xbf16>, vector<32x4xf32> -> vector<32x4xf32>
    %238 = arith.addf %233, %237 : vector<32x4xf32>
    %239 = vector.extract_strided_slice %235 {offsets = [1, 0], sizes = [32, 4], strides = [1, 1]} : vector<34x4xbf16> to vector<32x4xbf16>
    %cst_98 = arith.constant dense<0.000000e+00> : vector<32x4xf32>
    %240 = tpu.matmul %239, %17, %cst_98 {dimension_numbers = #tpu.dot_dimension_numbers<[1], [0], [0], [1], [0, 0, 1, 1], [], []>} : vector<32x4xbf16>, vector<4x4xbf16>, vector<32x4xf32> -> vector<32x4xf32>
    %241 = arith.addf %238, %240 : vector<32x4xf32>
    %242 = vector.extract_strided_slice %235 {offsets = [2, 0], sizes = [32, 4], strides = [1, 1]} : vector<34x4xbf16> to vector<32x4xbf16>
    %cst_99 = arith.constant dense<0.000000e+00> : vector<32x4xf32>
    %243 = tpu.matmul %242, %19, %cst_99 {dimension_numbers = #tpu.dot_dimension_numbers<[1], [0], [0], [1], [0, 0, 1, 1], [], []>} : vector<32x4xbf16>, vector<4x4xbf16>, vector<32x4xf32> -> vector<32x4xf32>
    %244 = arith.addf %241, %243 : vector<32x4xf32>
    %245 = vector.broadcast %20 : vector<1x4xf32> to vector<32x4xf32>
    %246 = arith.addf %244, %245 : vector<32x4xf32>
    %247 = arith.truncf %246 : vector<32x4xf32> to vector<32x4xbf16>
    %c0_100 = arith.constant 0 : index
    %c4_101 = arith.constant 4 : index
    %c0_102 = arith.constant 0 : index
    %c0_103 = arith.constant 0 : index
    %248 = vector.load %arg7[%c0_100, %c4_101, %c0_102, %c0_103] : memref<1x8x32x4xbf16, #tpu.memory_space<vmem>>, vector<1x1x32x4xbf16>
    %249 = vector.shape_cast %248 : vector<1x1x32x4xbf16> to vector<32x4xbf16>
    %250 = vector.shape_cast %247 : vector<32x4xbf16> to vector<1x1x32x4xbf16>
    tpu.vector_store %arg7[%c0_100, %c4_101, %c0_102, %c0_103], %250 {strides = array<i32>} : memref<1x8x32x4xbf16, #tpu.memory_space<vmem>>, vector<1x1x32x4xbf16>,
    %cst_104 = arith.constant dense<0.000000e+00> : vector<4xf32>
    %251 = vector.multi_reduction <add>, %246, %cst_104 [0] : vector<32x4xf32> to vector<4xf32>
    %252 = vector.shape_cast %251 : vector<4xf32> to vector<1x4xf32>
    %253 = arith.addf %206, %252 : vector<1x4xf32>
    %254 = arith.mulf %246, %246 : vector<32x4xf32>
    %cst_105 = arith.constant dense<0.000000e+00> : vector<4xf32>
    %255 = vector.multi_reduction <add>, %254, %cst_105 [0] : vector<32x4xf32> to vector<4xf32>
    %256 = vector.shape_cast %255 : vector<4xf32> to vector<1x4xf32>
    %257 = arith.addf %210, %256 : vector<1x4xf32>
    %cst_106 = arith.constant 0.000000e+00 : f32
    %258 = vector.broadcast %cst_106 : f32 to vector<32x4xf32>
    %259 = vector.extract_strided_slice %1 {offsets = [5, 0, 0], sizes = [1, 34, 4], strides = [1, 1, 1]} : vector<10x34x4xbf16> to vector<1x34x4xbf16>
    %260 = vector.shape_cast %259 : vector<1x34x4xbf16> to vector<34x4xbf16>
    %261 = vector.extract_strided_slice %260 {offsets = [0, 0], sizes = [32, 4], strides = [1, 1]} : vector<34x4xbf16> to vector<32x4xbf16>
    %cst_107 = arith.constant dense<0.000000e+00> : vector<32x4xf32>
    %262 = tpu.matmul %261, %3, %cst_107 {dimension_numbers = #tpu.dot_dimension_numbers<[1], [0], [0], [1], [0, 0, 1, 1], [], []>} : vector<32x4xbf16>, vector<4x4xbf16>, vector<32x4xf32> -> vector<32x4xf32>
    %263 = arith.addf %258, %262 : vector<32x4xf32>
    %264 = vector.extract_strided_slice %260 {offsets = [1, 0], sizes = [32, 4], strides = [1, 1]} : vector<34x4xbf16> to vector<32x4xbf16>
    %cst_108 = arith.constant dense<0.000000e+00> : vector<32x4xf32>
    %265 = tpu.matmul %264, %5, %cst_108 {dimension_numbers = #tpu.dot_dimension_numbers<[1], [0], [0], [1], [0, 0, 1, 1], [], []>} : vector<32x4xbf16>, vector<4x4xbf16>, vector<32x4xf32> -> vector<32x4xf32>
    %266 = arith.addf %263, %265 : vector<32x4xf32>
    %267 = vector.extract_strided_slice %260 {offsets = [2, 0], sizes = [32, 4], strides = [1, 1]} : vector<34x4xbf16> to vector<32x4xbf16>
    %cst_109 = arith.constant dense<0.000000e+00> : vector<32x4xf32>
    %268 = tpu.matmul %267, %7, %cst_109 {dimension_numbers = #tpu.dot_dimension_numbers<[1], [0], [0], [1], [0, 0, 1, 1], [], []>} : vector<32x4xbf16>, vector<4x4xbf16>, vector<32x4xf32> -> vector<32x4xf32>
    %269 = arith.addf %266, %268 : vector<32x4xf32>
    %270 = vector.extract_strided_slice %1 {offsets = [6, 0, 0], sizes = [1, 34, 4], strides = [1, 1, 1]} : vector<10x34x4xbf16> to vector<1x34x4xbf16>
    %271 = vector.shape_cast %270 : vector<1x34x4xbf16> to vector<34x4xbf16>
    %272 = vector.extract_strided_slice %271 {offsets = [0, 0], sizes = [32, 4], strides = [1, 1]} : vector<34x4xbf16> to vector<32x4xbf16>
    %cst_110 = arith.constant dense<0.000000e+00> : vector<32x4xf32>
    %273 = tpu.matmul %272, %9, %cst_110 {dimension_numbers = #tpu.dot_dimension_numbers<[1], [0], [0], [1], [0, 0, 1, 1], [], []>} : vector<32x4xbf16>, vector<4x4xbf16>, vector<32x4xf32> -> vector<32x4xf32>
    %274 = arith.addf %269, %273 : vector<32x4xf32>
    %275 = vector.extract_strided_slice %271 {offsets = [1, 0], sizes = [32, 4], strides = [1, 1]} : vector<34x4xbf16> to vector<32x4xbf16>
    %cst_111 = arith.constant dense<0.000000e+00> : vector<32x4xf32>
    %276 = tpu.matmul %275, %11, %cst_111 {dimension_numbers = #tpu.dot_dimension_numbers<[1], [0], [0], [1], [0, 0, 1, 1], [], []>} : vector<32x4xbf16>, vector<4x4xbf16>, vector<32x4xf32> -> vector<32x4xf32>
    %277 = arith.addf %274, %276 : vector<32x4xf32>
    %278 = vector.extract_strided_slice %271 {offsets = [2, 0], sizes = [32, 4], strides = [1, 1]} : vector<34x4xbf16> to vector<32x4xbf16>
    %cst_112 = arith.constant dense<0.000000e+00> : vector<32x4xf32>
    %279 = tpu.matmul %278, %13, %cst_112 {dimension_numbers = #tpu.dot_dimension_numbers<[1], [0], [0], [1], [0, 0, 1, 1], [], []>} : vector<32x4xbf16>, vector<4x4xbf16>, vector<32x4xf32> -> vector<32x4xf32>
    %280 = arith.addf %277, %279 : vector<32x4xf32>
    %281 = vector.extract_strided_slice %1 {offsets = [7, 0, 0], sizes = [1, 34, 4], strides = [1, 1, 1]} : vector<10x34x4xbf16> to vector<1x34x4xbf16>
    %282 = vector.shape_cast %281 : vector<1x34x4xbf16> to vector<34x4xbf16>
    %283 = vector.extract_strided_slice %282 {offsets = [0, 0], sizes = [32, 4], strides = [1, 1]} : vector<34x4xbf16> to vector<32x4xbf16>
    %cst_113 = arith.constant dense<0.000000e+00> : vector<32x4xf32>
    %284 = tpu.matmul %283, %15, %cst_113 {dimension_numbers = #tpu.dot_dimension_numbers<[1], [0], [0], [1], [0, 0, 1, 1], [], []>} : vector<32x4xbf16>, vector<4x4xbf16>, vector<32x4xf32> -> vector<32x4xf32>
    %285 = arith.addf %280, %284 : vector<32x4xf32>
    %286 = vector.extract_strided_slice %282 {offsets = [1, 0], sizes = [32, 4], strides = [1, 1]} : vector<34x4xbf16> to vector<32x4xbf16>
    %cst_114 = arith.constant dense<0.000000e+00> : vector<32x4xf32>
    %287 = tpu.matmul %286, %17, %cst_114 {dimension_numbers = #tpu.dot_dimension_numbers<[1], [0], [0], [1], [0, 0, 1, 1], [], []>} : vector<32x4xbf16>, vector<4x4xbf16>, vector<32x4xf32> -> vector<32x4xf32>
    %288 = arith.addf %285, %287 : vector<32x4xf32>
    %289 = vector.extract_strided_slice %282 {offsets = [2, 0], sizes = [32, 4], strides = [1, 1]} : vector<34x4xbf16> to vector<32x4xbf16>
    %cst_115 = arith.constant dense<0.000000e+00> : vector<32x4xf32>
    %290 = tpu.matmul %289, %19, %cst_115 {dimension_numbers = #tpu.dot_dimension_numbers<[1], [0], [0], [1], [0, 0, 1, 1], [], []>} : vector<32x4xbf16>, vector<4x4xbf16>, vector<32x4xf32> -> vector<32x4xf32>
    %291 = arith.addf %288, %290 : vector<32x4xf32>
    %292 = vector.broadcast %20 : vector<1x4xf32> to vector<32x4xf32>
    %293 = arith.addf %291, %292 : vector<32x4xf32>
    %294 = arith.truncf %293 : vector<32x4xf32> to vector<32x4xbf16>
    %c0_116 = arith.constant 0 : index
    %c5_117 = arith.constant 5 : index
    %c0_118 = arith.constant 0 : index
    %c0_119 = arith.constant 0 : index
    %295 = vector.load %arg7[%c0_116, %c5_117, %c0_118, %c0_119] : memref<1x8x32x4xbf16, #tpu.memory_space<vmem>>, vector<1x1x32x4xbf16>
    %296 = vector.shape_cast %295 : vector<1x1x32x4xbf16> to vector<32x4xbf16>
    %297 = vector.shape_cast %294 : vector<32x4xbf16> to vector<1x1x32x4xbf16>
    tpu.vector_store %arg7[%c0_116, %c5_117, %c0_118, %c0_119], %297 {strides = array<i32>} : memref<1x8x32x4xbf16, #tpu.memory_space<vmem>>, vector<1x1x32x4xbf16>,
    %cst_120 = arith.constant dense<0.000000e+00> : vector<4xf32>
    %298 = vector.multi_reduction <add>, %293, %cst_120 [0] : vector<32x4xf32> to vector<4xf32>
    %299 = vector.shape_cast %298 : vector<4xf32> to vector<1x4xf32>
    %300 = arith.addf %253, %299 : vector<1x4xf32>
    %301 = arith.mulf %293, %293 : vector<32x4xf32>
    %cst_121 = arith.constant dense<0.000000e+00> : vector<4xf32>
    %302 = vector.multi_reduction <add>, %301, %cst_121 [0] : vector<32x4xf32> to vector<4xf32>
    %303 = vector.shape_cast %302 : vector<4xf32> to vector<1x4xf32>
    %304 = arith.addf %257, %303 : vector<1x4xf32>
    %cst_122 = arith.constant 0.000000e+00 : f32
    %305 = vector.broadcast %cst_122 : f32 to vector<32x4xf32>
    %306 = vector.extract_strided_slice %1 {offsets = [6, 0, 0], sizes = [1, 34, 4], strides = [1, 1, 1]} : vector<10x34x4xbf16> to vector<1x34x4xbf16>
    %307 = vector.shape_cast %306 : vector<1x34x4xbf16> to vector<34x4xbf16>
    %308 = vector.extract_strided_slice %307 {offsets = [0, 0], sizes = [32, 4], strides = [1, 1]} : vector<34x4xbf16> to vector<32x4xbf16>
    %cst_123 = arith.constant dense<0.000000e+00> : vector<32x4xf32>
    %309 = tpu.matmul %308, %3, %cst_123 {dimension_numbers = #tpu.dot_dimension_numbers<[1], [0], [0], [1], [0, 0, 1, 1], [], []>} : vector<32x4xbf16>, vector<4x4xbf16>, vector<32x4xf32> -> vector<32x4xf32>
    %310 = arith.addf %305, %309 : vector<32x4xf32>
    %311 = vector.extract_strided_slice %307 {offsets = [1, 0], sizes = [32, 4], strides = [1, 1]} : vector<34x4xbf16> to vector<32x4xbf16>
    %cst_124 = arith.constant dense<0.000000e+00> : vector<32x4xf32>
    %312 = tpu.matmul %311, %5, %cst_124 {dimension_numbers = #tpu.dot_dimension_numbers<[1], [0], [0], [1], [0, 0, 1, 1], [], []>} : vector<32x4xbf16>, vector<4x4xbf16>, vector<32x4xf32> -> vector<32x4xf32>
    %313 = arith.addf %310, %312 : vector<32x4xf32>
    %314 = vector.extract_strided_slice %307 {offsets = [2, 0], sizes = [32, 4], strides = [1, 1]} : vector<34x4xbf16> to vector<32x4xbf16>
    %cst_125 = arith.constant dense<0.000000e+00> : vector<32x4xf32>
    %315 = tpu.matmul %314, %7, %cst_125 {dimension_numbers = #tpu.dot_dimension_numbers<[1], [0], [0], [1], [0, 0, 1, 1], [], []>} : vector<32x4xbf16>, vector<4x4xbf16>, vector<32x4xf32> -> vector<32x4xf32>
    %316 = arith.addf %313, %315 : vector<32x4xf32>
    %317 = vector.extract_strided_slice %1 {offsets = [7, 0, 0], sizes = [1, 34, 4], strides = [1, 1, 1]} : vector<10x34x4xbf16> to vector<1x34x4xbf16>
    %318 = vector.shape_cast %317 : vector<1x34x4xbf16> to vector<34x4xbf16>
    %319 = vector.extract_strided_slice %318 {offsets = [0, 0], sizes = [32, 4], strides = [1, 1]} : vector<34x4xbf16> to vector<32x4xbf16>
    %cst_126 = arith.constant dense<0.000000e+00> : vector<32x4xf32>
    %320 = tpu.matmul %319, %9, %cst_126 {dimension_numbers = #tpu.dot_dimension_numbers<[1], [0], [0], [1], [0, 0, 1, 1], [], []>} : vector<32x4xbf16>, vector<4x4xbf16>, vector<32x4xf32> -> vector<32x4xf32>
    %321 = arith.addf %316, %320 : vector<32x4xf32>
    %322 = vector.extract_strided_slice %318 {offsets = [1, 0], sizes = [32, 4], strides = [1, 1]} : vector<34x4xbf16> to vector<32x4xbf16>
    %cst_127 = arith.constant dense<0.000000e+00> : vector<32x4xf32>
    %323 = tpu.matmul %322, %11, %cst_127 {dimension_numbers = #tpu.dot_dimension_numbers<[1], [0], [0], [1], [0, 0, 1, 1], [], []>} : vector<32x4xbf16>, vector<4x4xbf16>, vector<32x4xf32> -> vector<32x4xf32>
    %324 = arith.addf %321, %323 : vector<32x4xf32>
    %325 = vector.extract_strided_slice %318 {offsets = [2, 0], sizes = [32, 4], strides = [1, 1]} : vector<34x4xbf16> to vector<32x4xbf16>
    %cst_128 = arith.constant dense<0.000000e+00> : vector<32x4xf32>
    %326 = tpu.matmul %325, %13, %cst_128 {dimension_numbers = #tpu.dot_dimension_numbers<[1], [0], [0], [1], [0, 0, 1, 1], [], []>} : vector<32x4xbf16>, vector<4x4xbf16>, vector<32x4xf32> -> vector<32x4xf32>
    %327 = arith.addf %324, %326 : vector<32x4xf32>
    %328 = vector.extract_strided_slice %1 {offsets = [8, 0, 0], sizes = [1, 34, 4], strides = [1, 1, 1]} : vector<10x34x4xbf16> to vector<1x34x4xbf16>
    %329 = vector.shape_cast %328 : vector<1x34x4xbf16> to vector<34x4xbf16>
    %330 = vector.extract_strided_slice %329 {offsets = [0, 0], sizes = [32, 4], strides = [1, 1]} : vector<34x4xbf16> to vector<32x4xbf16>
    %cst_129 = arith.constant dense<0.000000e+00> : vector<32x4xf32>
    %331 = tpu.matmul %330, %15, %cst_129 {dimension_numbers = #tpu.dot_dimension_numbers<[1], [0], [0], [1], [0, 0, 1, 1], [], []>} : vector<32x4xbf16>, vector<4x4xbf16>, vector<32x4xf32> -> vector<32x4xf32>
    %332 = arith.addf %327, %331 : vector<32x4xf32>
    %333 = vector.extract_strided_slice %329 {offsets = [1, 0], sizes = [32, 4], strides = [1, 1]} : vector<34x4xbf16> to vector<32x4xbf16>
    %cst_130 = arith.constant dense<0.000000e+00> : vector<32x4xf32>
    %334 = tpu.matmul %333, %17, %cst_130 {dimension_numbers = #tpu.dot_dimension_numbers<[1], [0], [0], [1], [0, 0, 1, 1], [], []>} : vector<32x4xbf16>, vector<4x4xbf16>, vector<32x4xf32> -> vector<32x4xf32>
    %335 = arith.addf %332, %334 : vector<32x4xf32>
    %336 = vector.extract_strided_slice %329 {offsets = [2, 0], sizes = [32, 4], strides = [1, 1]} : vector<34x4xbf16> to vector<32x4xbf16>
    %cst_131 = arith.constant dense<0.000000e+00> : vector<32x4xf32>
    %337 = tpu.matmul %336, %19, %cst_131 {dimension_numbers = #tpu.dot_dimension_numbers<[1], [0], [0], [1], [0, 0, 1, 1], [], []>} : vector<32x4xbf16>, vector<4x4xbf16>, vector<32x4xf32> -> vector<32x4xf32>
    %338 = arith.addf %335, %337 : vector<32x4xf32>
    %339 = vector.broadcast %20 : vector<1x4xf32> to vector<32x4xf32>
    %340 = arith.addf %338, %339 : vector<32x4xf32>
    %341 = arith.truncf %340 : vector<32x4xf32> to vector<32x4xbf16>
    %c0_132 = arith.constant 0 : index
    %c6_133 = arith.constant 6 : index
    %c0_134 = arith.constant 0 : index
    %c0_135 = arith.constant 0 : index
    %342 = vector.load %arg7[%c0_132, %c6_133, %c0_134, %c0_135] : memref<1x8x32x4xbf16, #tpu.memory_space<vmem>>, vector<1x1x32x4xbf16>
    %343 = vector.shape_cast %342 : vector<1x1x32x4xbf16> to vector<32x4xbf16>
    %344 = vector.shape_cast %341 : vector<32x4xbf16> to vector<1x1x32x4xbf16>
    tpu.vector_store %arg7[%c0_132, %c6_133, %c0_134, %c0_135], %344 {strides = array<i32>} : memref<1x8x32x4xbf16, #tpu.memory_space<vmem>>, vector<1x1x32x4xbf16>,
    %cst_136 = arith.constant dense<0.000000e+00> : vector<4xf32>
    %345 = vector.multi_reduction <add>, %340, %cst_136 [0] : vector<32x4xf32> to vector<4xf32>
    %346 = vector.shape_cast %345 : vector<4xf32> to vector<1x4xf32>
    %347 = arith.addf %300, %346 : vector<1x4xf32>
    %348 = arith.mulf %340, %340 : vector<32x4xf32>
    %cst_137 = arith.constant dense<0.000000e+00> : vector<4xf32>
    %349 = vector.multi_reduction <add>, %348, %cst_137 [0] : vector<32x4xf32> to vector<4xf32>
    %350 = vector.shape_cast %349 : vector<4xf32> to vector<1x4xf32>
    %351 = arith.addf %304, %350 : vector<1x4xf32>
    %cst_138 = arith.constant 0.000000e+00 : f32
    %352 = vector.broadcast %cst_138 : f32 to vector<32x4xf32>
    %353 = vector.extract_strided_slice %1 {offsets = [7, 0, 0], sizes = [1, 34, 4], strides = [1, 1, 1]} : vector<10x34x4xbf16> to vector<1x34x4xbf16>
    %354 = vector.shape_cast %353 : vector<1x34x4xbf16> to vector<34x4xbf16>
    %355 = vector.extract_strided_slice %354 {offsets = [0, 0], sizes = [32, 4], strides = [1, 1]} : vector<34x4xbf16> to vector<32x4xbf16>
    %cst_139 = arith.constant dense<0.000000e+00> : vector<32x4xf32>
    %356 = tpu.matmul %355, %3, %cst_139 {dimension_numbers = #tpu.dot_dimension_numbers<[1], [0], [0], [1], [0, 0, 1, 1], [], []>} : vector<32x4xbf16>, vector<4x4xbf16>, vector<32x4xf32> -> vector<32x4xf32>
    %357 = arith.addf %352, %356 : vector<32x4xf32>
    %358 = vector.extract_strided_slice %354 {offsets = [1, 0], sizes = [32, 4], strides = [1, 1]} : vector<34x4xbf16> to vector<32x4xbf16>
    %cst_140 = arith.constant dense<0.000000e+00> : vector<32x4xf32>
    %359 = tpu.matmul %358, %5, %cst_140 {dimension_numbers = #tpu.dot_dimension_numbers<[1], [0], [0], [1], [0, 0, 1, 1], [], []>} : vector<32x4xbf16>, vector<4x4xbf16>, vector<32x4xf32> -> vector<32x4xf32>
    %360 = arith.addf %357, %359 : vector<32x4xf32>
    %361 = vector.extract_strided_slice %354 {offsets = [2, 0], sizes = [32, 4], strides = [1, 1]} : vector<34x4xbf16> to vector<32x4xbf16>
    %cst_141 = arith.constant dense<0.000000e+00> : vector<32x4xf32>
    %362 = tpu.matmul %361, %7, %cst_141 {dimension_numbers = #tpu.dot_dimension_numbers<[1], [0], [0], [1], [0, 0, 1, 1], [], []>} : vector<32x4xbf16>, vector<4x4xbf16>, vector<32x4xf32> -> vector<32x4xf32>
    %363 = arith.addf %360, %362 : vector<32x4xf32>
    %364 = vector.extract_strided_slice %1 {offsets = [8, 0, 0], sizes = [1, 34, 4], strides = [1, 1, 1]} : vector<10x34x4xbf16> to vector<1x34x4xbf16>
    %365 = vector.shape_cast %364 : vector<1x34x4xbf16> to vector<34x4xbf16>
    %366 = vector.extract_strided_slice %365 {offsets = [0, 0], sizes = [32, 4], strides = [1, 1]} : vector<34x4xbf16> to vector<32x4xbf16>
    %cst_142 = arith.constant dense<0.000000e+00> : vector<32x4xf32>
    %367 = tpu.matmul %366, %9, %cst_142 {dimension_numbers = #tpu.dot_dimension_numbers<[1], [0], [0], [1], [0, 0, 1, 1], [], []>} : vector<32x4xbf16>, vector<4x4xbf16>, vector<32x4xf32> -> vector<32x4xf32>
    %368 = arith.addf %363, %367 : vector<32x4xf32>
    %369 = vector.extract_strided_slice %365 {offsets = [1, 0], sizes = [32, 4], strides = [1, 1]} : vector<34x4xbf16> to vector<32x4xbf16>
    %cst_143 = arith.constant dense<0.000000e+00> : vector<32x4xf32>
    %370 = tpu.matmul %369, %11, %cst_143 {dimension_numbers = #tpu.dot_dimension_numbers<[1], [0], [0], [1], [0, 0, 1, 1], [], []>} : vector<32x4xbf16>, vector<4x4xbf16>, vector<32x4xf32> -> vector<32x4xf32>
    %371 = arith.addf %368, %370 : vector<32x4xf32>
    %372 = vector.extract_strided_slice %365 {offsets = [2, 0], sizes = [32, 4], strides = [1, 1]} : vector<34x4xbf16> to vector<32x4xbf16>
    %cst_144 = arith.constant dense<0.000000e+00> : vector<32x4xf32>
    %373 = tpu.matmul %372, %13, %cst_144 {dimension_numbers = #tpu.dot_dimension_numbers<[1], [0], [0], [1], [0, 0, 1, 1], [], []>} : vector<32x4xbf16>, vector<4x4xbf16>, vector<32x4xf32> -> vector<32x4xf32>
    %374 = arith.addf %371, %373 : vector<32x4xf32>
    %375 = vector.extract_strided_slice %1 {offsets = [9, 0, 0], sizes = [1, 34, 4], strides = [1, 1, 1]} : vector<10x34x4xbf16> to vector<1x34x4xbf16>
    %376 = vector.shape_cast %375 : vector<1x34x4xbf16> to vector<34x4xbf16>
    %377 = vector.extract_strided_slice %376 {offsets = [0, 0], sizes = [32, 4], strides = [1, 1]} : vector<34x4xbf16> to vector<32x4xbf16>
    %cst_145 = arith.constant dense<0.000000e+00> : vector<32x4xf32>
    %378 = tpu.matmul %377, %15, %cst_145 {dimension_numbers = #tpu.dot_dimension_numbers<[1], [0], [0], [1], [0, 0, 1, 1], [], []>} : vector<32x4xbf16>, vector<4x4xbf16>, vector<32x4xf32> -> vector<32x4xf32>
    %379 = arith.addf %374, %378 : vector<32x4xf32>
    %380 = vector.extract_strided_slice %376 {offsets = [1, 0], sizes = [32, 4], strides = [1, 1]} : vector<34x4xbf16> to vector<32x4xbf16>
    %cst_146 = arith.constant dense<0.000000e+00> : vector<32x4xf32>
    %381 = tpu.matmul %380, %17, %cst_146 {dimension_numbers = #tpu.dot_dimension_numbers<[1], [0], [0], [1], [0, 0, 1, 1], [], []>} : vector<32x4xbf16>, vector<4x4xbf16>, vector<32x4xf32> -> vector<32x4xf32>
    %382 = arith.addf %379, %381 : vector<32x4xf32>
    %383 = vector.extract_strided_slice %376 {offsets = [2, 0], sizes = [32, 4], strides = [1, 1]} : vector<34x4xbf16> to vector<32x4xbf16>
    %cst_147 = arith.constant dense<0.000000e+00> : vector<32x4xf32>
    %384 = tpu.matmul %383, %19, %cst_147 {dimension_numbers = #tpu.dot_dimension_numbers<[1], [0], [0], [1], [0, 0, 1, 1], [], []>} : vector<32x4xbf16>, vector<4x4xbf16>, vector<32x4xf32> -> vector<32x4xf32>
    %385 = arith.addf %382, %384 : vector<32x4xf32>
    %386 = vector.broadcast %20 : vector<1x4xf32> to vector<32x4xf32>
    %387 = arith.addf %385, %386 : vector<32x4xf32>
    %388 = arith.truncf %387 : vector<32x4xf32> to vector<32x4xbf16>
    %c0_148 = arith.constant 0 : index
    %c7_149 = arith.constant 7 : index
    %c0_150 = arith.constant 0 : index
    %c0_151 = arith.constant 0 : index
    %389 = vector.load %arg7[%c0_148, %c7_149, %c0_150, %c0_151] : memref<1x8x32x4xbf16, #tpu.memory_space<vmem>>, vector<1x1x32x4xbf16>
    %390 = vector.shape_cast %389 : vector<1x1x32x4xbf16> to vector<32x4xbf16>
    %391 = vector.shape_cast %388 : vector<32x4xbf16> to vector<1x1x32x4xbf16>
    tpu.vector_store %arg7[%c0_148, %c7_149, %c0_150, %c0_151], %391 {strides = array<i32>} : memref<1x8x32x4xbf16, #tpu.memory_space<vmem>>, vector<1x1x32x4xbf16>,
    %cst_152 = arith.constant dense<0.000000e+00> : vector<4xf32>
    %392 = vector.multi_reduction <add>, %387, %cst_152 [0] : vector<32x4xf32> to vector<4xf32>
    %393 = vector.shape_cast %392 : vector<4xf32> to vector<1x4xf32>
    %394 = arith.addf %347, %393 : vector<1x4xf32>
    %395 = arith.mulf %387, %387 : vector<32x4xf32>
    %cst_153 = arith.constant dense<0.000000e+00> : vector<4xf32>
    %396 = vector.multi_reduction <add>, %395, %cst_153 [0] : vector<32x4xf32> to vector<4xf32>
    %397 = vector.shape_cast %396 : vector<4xf32> to vector<1x4xf32>
    %398 = arith.addf %351, %397 : vector<1x4xf32>
    %c0_154 = arith.constant 0 : index
    %c0_155 = arith.constant 0 : index
    %c0_156 = arith.constant 0 : index
    %c0_157 = arith.constant 0 : index
    %399 = vector.load %arg8[%c0_154, %c0_155, %c0_156, %c0_157] : memref<1x1x2x4xf32, #tpu.memory_space<vmem>>, vector<1x1x1x4xf32>
    %400 = vector.shape_cast %399 : vector<1x1x1x4xf32> to vector<1x4xf32>
    %401 = vector.shape_cast %394 : vector<1x4xf32> to vector<1x1x1x4xf32>
    tpu.vector_store %arg8[%c0_154, %c0_155, %c0_156, %c0_157], %401 {strides = array<i32>} : memref<1x1x2x4xf32, #tpu.memory_space<vmem>>, vector<1x1x1x4xf32>,
    %c0_158 = arith.constant 0 : index
    %c0_159 = arith.constant 0 : index
    %c1_160 = arith.constant 1 : index
    %c0_161 = arith.constant 0 : index
    %402 = vector.load %arg8[%c0_158, %c0_159, %c1_160, %c0_161] : memref<1x1x2x4xf32, #tpu.memory_space<vmem>>, vector<1x1x1x4xf32>
    %403 = vector.shape_cast %402 : vector<1x1x1x4xf32> to vector<1x4xf32>
    %404 = vector.shape_cast %398 : vector<1x4xf32> to vector<1x1x1x4xf32>
    tpu.vector_store %arg8[%c0_158, %c0_159, %c1_160, %c0_161], %404 {strides = array<i32>} : memref<1x1x2x4xf32, #tpu.memory_space<vmem>>, vector<1x1x1x4xf32>,
    return
  }
  func.func @transform_0(%arg0: i32, %arg1: i32) -> (i32, i32, i32, i32, i32) {
    %c0_i32 = arith.constant 0 : i32
    %c0_i32_0 = arith.constant 0 : i32
    %c0_i32_1 = arith.constant 0 : i32
    %c0_i32_2 = arith.constant 0 : i32
    return %arg0, %arg1, %c0_i32, %c0_i32_0, %c0_i32_1 : i32, i32, i32, i32, i32
  }
  func.func @transform_1(%arg0: i32, %arg1: i32) -> (i32, i32, i32) {
    %c0_i32 = arith.constant 0 : i32
    %c0_i32_0 = arith.constant 0 : i32
    %c0_i32_1 = arith.constant 0 : i32
    %c0_i32_2 = arith.constant 0 : i32
    return %c0_i32, %c0_i32_0, %c0_i32_1 : i32, i32, i32
  }
  func.func @transform_2(%arg0: i32, %arg1: i32) -> (i32, i32) {
    %c0_i32 = arith.constant 0 : i32
    %c0_i32_0 = arith.constant 0 : i32
    %c0_i32_1 = arith.constant 0 : i32
    return %c0_i32, %c0_i32_0 : i32, i32
  }
  func.func @transform_3(%arg0: i32, %arg1: i32) -> (i32, i32) {
    %c0_i32 = arith.constant 0 : i32
    %c0_i32_0 = arith.constant 0 : i32
    %c0_i32_1 = arith.constant 0 : i32
    return %c0_i32, %c0_i32_0 : i32, i32
  }
  func.func @transform_4(%arg0: i32, %arg1: i32) -> (i32, i32) {
    %c0_i32 = arith.constant 0 : i32
    %c0_i32_0 = arith.constant 0 : i32
    %c0_i32_1 = arith.constant 0 : i32
    return %c0_i32, %c0_i32_0 : i32, i32
  }
  func.func @transform_5(%arg0: i32, %arg1: i32) -> (i32, i32, i32, i32) {
    %c0_i32 = arith.constant 0 : i32
    %c0_i32_0 = arith.constant 0 : i32
    %c0_i32_1 = arith.constant 0 : i32
    return %arg0, %arg1, %c0_i32, %c0_i32_0 : i32, i32, i32, i32
  }
  func.func @transform_6(%arg0: i32, %arg1: i32) -> (i32, i32, i32, i32) {
    %c0_i32 = arith.constant 0 : i32
    %c0_i32_0 = arith.constant 0 : i32
    %c0_i32_1 = arith.constant 0 : i32
    return %arg0, %arg1, %c0_i32, %c0_i32_0 : i32, i32, i32, i32
  }
}

module attributes {stable_mosaic.version = 11 : i64} {
  func.func @_conv3x3_stats_kernel(%arg0: i32, %arg1: i32, %arg2: memref<1x1x10x34x4xbf16, #tpu.memory_space<vmem>>, %arg3: memref<9x4x8xbf16, #tpu.memory_space<vmem>>, %arg4: memref<1x8xf32, #tpu.memory_space<vmem>>, %arg5: memref<1x4xf32, #tpu.memory_space<vmem>>, %arg6: memref<1x4xf32, #tpu.memory_space<vmem>>, %arg7: memref<1x8x32x8xbf16, #tpu.memory_space<vmem>>, %arg8: memref<1x1x2x8xf32, #tpu.memory_space<vmem>>) attributes {dimension_semantics = [#tpu.dimension_semantics<parallel>, #tpu.dimension_semantics<parallel>], iteration_bounds = array<i64: 2, 4>, scalar_prefetch = 0 : i64, scratch_operands = 0 : i64, tpu.core_type = #tpu.core_type<tc>, window_params = [{transform_indices = @transform_0, window_bounds = array<i64: 1, 1, 10, 34, 4>}, {pipeline_mode = #tpu.pipeline_mode<synchronous>, transform_indices = @transform_1, window_bounds = array<i64: 9, 4, 8>}, {pipeline_mode = #tpu.pipeline_mode<synchronous>, transform_indices = @transform_2, window_bounds = array<i64: 1, 8>}, {pipeline_mode = #tpu.pipeline_mode<synchronous>, transform_indices = @transform_3, window_bounds = array<i64: 1, 4>}, {pipeline_mode = #tpu.pipeline_mode<synchronous>, transform_indices = @transform_4, window_bounds = array<i64: 1, 4>}, {transform_indices = @transform_5, window_bounds = array<i64: 1, 8, 32, 8>}, {transform_indices = @transform_6, window_bounds = array<i64: 1, 1, 2, 8>}]} {
    %c0 = arith.constant 0 : index
    %c0_0 = arith.constant 0 : index
    %c0_1 = arith.constant 0 : index
    %c0_2 = arith.constant 0 : index
    %c0_3 = arith.constant 0 : index
    %0 = vector.load %arg2[%c0, %c0_0, %c0_1, %c0_2, %c0_3] : memref<1x1x10x34x4xbf16, #tpu.memory_space<vmem>>, vector<1x1x10x34x4xbf16>
    %1 = vector.shape_cast %0 : vector<1x1x10x34x4xbf16> to vector<10x34x4xbf16>
    %2 = arith.extf %1 : vector<10x34x4xbf16> to vector<10x34x4xf32>
    %c0_4 = arith.constant 0 : index
    %c0_5 = arith.constant 0 : index
    %3 = vector.load %arg5[%c0_4, %c0_5] : memref<1x4xf32, #tpu.memory_space<vmem>>, vector<1x4xf32>
    %4 = vector.shape_cast %3 : vector<1x4xf32> to vector<1x1x4xf32>
    %5 = vector.broadcast %4 : vector<1x1x4xf32> to vector<10x34x4xf32>
    %6 = arith.mulf %2, %5 : vector<10x34x4xf32>
    %c0_6 = arith.constant 0 : index
    %c0_7 = arith.constant 0 : index
    %7 = vector.load %arg6[%c0_6, %c0_7] : memref<1x4xf32, #tpu.memory_space<vmem>>, vector<1x4xf32>
    %8 = vector.shape_cast %7 : vector<1x4xf32> to vector<1x1x4xf32>
    %9 = vector.broadcast %8 : vector<1x1x4xf32> to vector<10x34x4xf32>
    %10 = arith.addf %6, %9 : vector<10x34x4xf32>
    %cst = arith.constant 0.000000e+00 : f32
    %11 = vector.broadcast %cst : f32 to vector<10x34x4xf32>
    %12 = arith.maximumf %10, %11 : vector<10x34x4xf32>
    %13 = tpu.iota {dimensions = array<i32: 0>} : vector<10x34x4xi32>
    %14 = tpu.iota {dimensions = array<i32: 1>} : vector<10x34x4xi32>
    %c1_i32 = arith.constant 1 : i32
    %15 = vector.broadcast %c1_i32 : i32 to vector<10x34x4xi32>
    %16 = arith.cmpi sge, %14, %15 : vector<10x34x4xi32>
    %c32_i32 = arith.constant 32 : i32
    %17 = vector.broadcast %c32_i32 : i32 to vector<10x34x4xi32>
    %18 = arith.cmpi sle, %14, %17 : vector<10x34x4xi32>
    %19 = arith.andi %16, %18 : vector<10x34x4xi1>
    %c0_i32 = arith.constant 0 : i32
    %20 = vector.broadcast %c0_i32 : i32 to vector<10x34x4xi32>
    %21 = arith.cmpi ne, %13, %20 : vector<10x34x4xi32>
    %c0_i32_8 = arith.constant 0 : i32
    %22 = arith.cmpi ne, %arg1, %c0_i32_8 : i32
    %23 = vector.broadcast %22 : i1 to vector<10x34x4xi1>
    %24 = arith.ori %21, %23 : vector<10x34x4xi1>
    %25 = arith.andi %19, %24 : vector<10x34x4xi1>
    %c9_i32 = arith.constant 9 : i32
    %26 = vector.broadcast %c9_i32 : i32 to vector<10x34x4xi32>
    %27 = arith.cmpi ne, %13, %26 : vector<10x34x4xi32>
    %c3_i32 = arith.constant 3 : i32
    %28 = arith.cmpi ne, %arg1, %c3_i32 : i32
    %29 = vector.broadcast %28 : i1 to vector<10x34x4xi1>
    %30 = arith.ori %27, %29 : vector<10x34x4xi1>
    %31 = arith.andi %25, %30 : vector<10x34x4xi1>
    %cst_9 = arith.constant 0.000000e+00 : f32
    %32 = vector.broadcast %cst_9 : f32 to vector<10x34x4xf32>
    %33 = arith.select %31, %12, %32 : vector<10x34x4xi1>, vector<10x34x4xf32>
    %34 = arith.truncf %33 : vector<10x34x4xf32> to vector<10x34x4xbf16>
    %c0_10 = arith.constant 0 : index
    %c0_11 = arith.constant 0 : index
    %c0_12 = arith.constant 0 : index
    %35 = vector.load %arg3[%c0_10, %c0_11, %c0_12] : memref<9x4x8xbf16, #tpu.memory_space<vmem>>, vector<1x4x8xbf16>
    %36 = vector.shape_cast %35 : vector<1x4x8xbf16> to vector<4x8xbf16>
    %c1 = arith.constant 1 : index
    %c0_13 = arith.constant 0 : index
    %c0_14 = arith.constant 0 : index
    %37 = vector.load %arg3[%c1, %c0_13, %c0_14] : memref<9x4x8xbf16, #tpu.memory_space<vmem>>, vector<1x4x8xbf16>
    %38 = vector.shape_cast %37 : vector<1x4x8xbf16> to vector<4x8xbf16>
    %c2 = arith.constant 2 : index
    %c0_15 = arith.constant 0 : index
    %c0_16 = arith.constant 0 : index
    %39 = vector.load %arg3[%c2, %c0_15, %c0_16] : memref<9x4x8xbf16, #tpu.memory_space<vmem>>, vector<1x4x8xbf16>
    %40 = vector.shape_cast %39 : vector<1x4x8xbf16> to vector<4x8xbf16>
    %c3 = arith.constant 3 : index
    %c0_17 = arith.constant 0 : index
    %c0_18 = arith.constant 0 : index
    %41 = vector.load %arg3[%c3, %c0_17, %c0_18] : memref<9x4x8xbf16, #tpu.memory_space<vmem>>, vector<1x4x8xbf16>
    %42 = vector.shape_cast %41 : vector<1x4x8xbf16> to vector<4x8xbf16>
    %c4 = arith.constant 4 : index
    %c0_19 = arith.constant 0 : index
    %c0_20 = arith.constant 0 : index
    %43 = vector.load %arg3[%c4, %c0_19, %c0_20] : memref<9x4x8xbf16, #tpu.memory_space<vmem>>, vector<1x4x8xbf16>
    %44 = vector.shape_cast %43 : vector<1x4x8xbf16> to vector<4x8xbf16>
    %c5 = arith.constant 5 : index
    %c0_21 = arith.constant 0 : index
    %c0_22 = arith.constant 0 : index
    %45 = vector.load %arg3[%c5, %c0_21, %c0_22] : memref<9x4x8xbf16, #tpu.memory_space<vmem>>, vector<1x4x8xbf16>
    %46 = vector.shape_cast %45 : vector<1x4x8xbf16> to vector<4x8xbf16>
    %c6 = arith.constant 6 : index
    %c0_23 = arith.constant 0 : index
    %c0_24 = arith.constant 0 : index
    %47 = vector.load %arg3[%c6, %c0_23, %c0_24] : memref<9x4x8xbf16, #tpu.memory_space<vmem>>, vector<1x4x8xbf16>
    %48 = vector.shape_cast %47 : vector<1x4x8xbf16> to vector<4x8xbf16>
    %c7 = arith.constant 7 : index
    %c0_25 = arith.constant 0 : index
    %c0_26 = arith.constant 0 : index
    %49 = vector.load %arg3[%c7, %c0_25, %c0_26] : memref<9x4x8xbf16, #tpu.memory_space<vmem>>, vector<1x4x8xbf16>
    %50 = vector.shape_cast %49 : vector<1x4x8xbf16> to vector<4x8xbf16>
    %c8 = arith.constant 8 : index
    %c0_27 = arith.constant 0 : index
    %c0_28 = arith.constant 0 : index
    %51 = vector.load %arg3[%c8, %c0_27, %c0_28] : memref<9x4x8xbf16, #tpu.memory_space<vmem>>, vector<1x4x8xbf16>
    %52 = vector.shape_cast %51 : vector<1x4x8xbf16> to vector<4x8xbf16>
    %c0_29 = arith.constant 0 : index
    %c0_30 = arith.constant 0 : index
    %53 = vector.load %arg4[%c0_29, %c0_30] : memref<1x8xf32, #tpu.memory_space<vmem>>, vector<1x8xf32>
    %cst_31 = arith.constant 0.000000e+00 : f32
    %54 = vector.broadcast %cst_31 : f32 to vector<1x8xf32>
    %cst_32 = arith.constant 0.000000e+00 : f32
    %55 = vector.broadcast %cst_32 : f32 to vector<1x8xf32>
    %cst_33 = arith.constant 0.000000e+00 : f32
    %56 = vector.broadcast %cst_33 : f32 to vector<32x8xf32>
    %57 = vector.extract_strided_slice %34 {offsets = [0, 0, 0], sizes = [1, 34, 4], strides = [1, 1, 1]} : vector<10x34x4xbf16> to vector<1x34x4xbf16>
    %58 = vector.shape_cast %57 : vector<1x34x4xbf16> to vector<34x4xbf16>
    %59 = vector.extract_strided_slice %58 {offsets = [0, 0], sizes = [32, 4], strides = [1, 1]} : vector<34x4xbf16> to vector<32x4xbf16>
    %cst_34 = arith.constant dense<0.000000e+00> : vector<32x8xf32>
    %60 = tpu.matmul %59, %36, %cst_34 {dimension_numbers = #tpu.dot_dimension_numbers<[1], [0], [0], [1], [0, 0, 1, 1], [], []>} : vector<32x4xbf16>, vector<4x8xbf16>, vector<32x8xf32> -> vector<32x8xf32>
    %61 = arith.addf %56, %60 : vector<32x8xf32>
    %62 = vector.extract_strided_slice %58 {offsets = [1, 0], sizes = [32, 4], strides = [1, 1]} : vector<34x4xbf16> to vector<32x4xbf16>
    %cst_35 = arith.constant dense<0.000000e+00> : vector<32x8xf32>
    %63 = tpu.matmul %62, %38, %cst_35 {dimension_numbers = #tpu.dot_dimension_numbers<[1], [0], [0], [1], [0, 0, 1, 1], [], []>} : vector<32x4xbf16>, vector<4x8xbf16>, vector<32x8xf32> -> vector<32x8xf32>
    %64 = arith.addf %61, %63 : vector<32x8xf32>
    %65 = vector.extract_strided_slice %58 {offsets = [2, 0], sizes = [32, 4], strides = [1, 1]} : vector<34x4xbf16> to vector<32x4xbf16>
    %cst_36 = arith.constant dense<0.000000e+00> : vector<32x8xf32>
    %66 = tpu.matmul %65, %40, %cst_36 {dimension_numbers = #tpu.dot_dimension_numbers<[1], [0], [0], [1], [0, 0, 1, 1], [], []>} : vector<32x4xbf16>, vector<4x8xbf16>, vector<32x8xf32> -> vector<32x8xf32>
    %67 = arith.addf %64, %66 : vector<32x8xf32>
    %68 = vector.extract_strided_slice %34 {offsets = [1, 0, 0], sizes = [1, 34, 4], strides = [1, 1, 1]} : vector<10x34x4xbf16> to vector<1x34x4xbf16>
    %69 = vector.shape_cast %68 : vector<1x34x4xbf16> to vector<34x4xbf16>
    %70 = vector.extract_strided_slice %69 {offsets = [0, 0], sizes = [32, 4], strides = [1, 1]} : vector<34x4xbf16> to vector<32x4xbf16>
    %cst_37 = arith.constant dense<0.000000e+00> : vector<32x8xf32>
    %71 = tpu.matmul %70, %42, %cst_37 {dimension_numbers = #tpu.dot_dimension_numbers<[1], [0], [0], [1], [0, 0, 1, 1], [], []>} : vector<32x4xbf16>, vector<4x8xbf16>, vector<32x8xf32> -> vector<32x8xf32>
    %72 = arith.addf %67, %71 : vector<32x8xf32>
    %73 = vector.extract_strided_slice %69 {offsets = [1, 0], sizes = [32, 4], strides = [1, 1]} : vector<34x4xbf16> to vector<32x4xbf16>
    %cst_38 = arith.constant dense<0.000000e+00> : vector<32x8xf32>
    %74 = tpu.matmul %73, %44, %cst_38 {dimension_numbers = #tpu.dot_dimension_numbers<[1], [0], [0], [1], [0, 0, 1, 1], [], []>} : vector<32x4xbf16>, vector<4x8xbf16>, vector<32x8xf32> -> vector<32x8xf32>
    %75 = arith.addf %72, %74 : vector<32x8xf32>
    %76 = vector.extract_strided_slice %69 {offsets = [2, 0], sizes = [32, 4], strides = [1, 1]} : vector<34x4xbf16> to vector<32x4xbf16>
    %cst_39 = arith.constant dense<0.000000e+00> : vector<32x8xf32>
    %77 = tpu.matmul %76, %46, %cst_39 {dimension_numbers = #tpu.dot_dimension_numbers<[1], [0], [0], [1], [0, 0, 1, 1], [], []>} : vector<32x4xbf16>, vector<4x8xbf16>, vector<32x8xf32> -> vector<32x8xf32>
    %78 = arith.addf %75, %77 : vector<32x8xf32>
    %79 = vector.extract_strided_slice %34 {offsets = [2, 0, 0], sizes = [1, 34, 4], strides = [1, 1, 1]} : vector<10x34x4xbf16> to vector<1x34x4xbf16>
    %80 = vector.shape_cast %79 : vector<1x34x4xbf16> to vector<34x4xbf16>
    %81 = vector.extract_strided_slice %80 {offsets = [0, 0], sizes = [32, 4], strides = [1, 1]} : vector<34x4xbf16> to vector<32x4xbf16>
    %cst_40 = arith.constant dense<0.000000e+00> : vector<32x8xf32>
    %82 = tpu.matmul %81, %48, %cst_40 {dimension_numbers = #tpu.dot_dimension_numbers<[1], [0], [0], [1], [0, 0, 1, 1], [], []>} : vector<32x4xbf16>, vector<4x8xbf16>, vector<32x8xf32> -> vector<32x8xf32>
    %83 = arith.addf %78, %82 : vector<32x8xf32>
    %84 = vector.extract_strided_slice %80 {offsets = [1, 0], sizes = [32, 4], strides = [1, 1]} : vector<34x4xbf16> to vector<32x4xbf16>
    %cst_41 = arith.constant dense<0.000000e+00> : vector<32x8xf32>
    %85 = tpu.matmul %84, %50, %cst_41 {dimension_numbers = #tpu.dot_dimension_numbers<[1], [0], [0], [1], [0, 0, 1, 1], [], []>} : vector<32x4xbf16>, vector<4x8xbf16>, vector<32x8xf32> -> vector<32x8xf32>
    %86 = arith.addf %83, %85 : vector<32x8xf32>
    %87 = vector.extract_strided_slice %80 {offsets = [2, 0], sizes = [32, 4], strides = [1, 1]} : vector<34x4xbf16> to vector<32x4xbf16>
    %cst_42 = arith.constant dense<0.000000e+00> : vector<32x8xf32>
    %88 = tpu.matmul %87, %52, %cst_42 {dimension_numbers = #tpu.dot_dimension_numbers<[1], [0], [0], [1], [0, 0, 1, 1], [], []>} : vector<32x4xbf16>, vector<4x8xbf16>, vector<32x8xf32> -> vector<32x8xf32>
    %89 = arith.addf %86, %88 : vector<32x8xf32>
    %90 = vector.broadcast %53 : vector<1x8xf32> to vector<32x8xf32>
    %91 = arith.addf %89, %90 : vector<32x8xf32>
    %92 = arith.truncf %91 : vector<32x8xf32> to vector<32x8xbf16>
    %c0_43 = arith.constant 0 : index
    %c0_44 = arith.constant 0 : index
    %c0_45 = arith.constant 0 : index
    %c0_46 = arith.constant 0 : index
    %93 = vector.load %arg7[%c0_43, %c0_44, %c0_45, %c0_46] : memref<1x8x32x8xbf16, #tpu.memory_space<vmem>>, vector<1x1x32x8xbf16>
    %94 = vector.shape_cast %93 : vector<1x1x32x8xbf16> to vector<32x8xbf16>
    %95 = vector.shape_cast %92 : vector<32x8xbf16> to vector<1x1x32x8xbf16>
    tpu.vector_store %arg7[%c0_43, %c0_44, %c0_45, %c0_46], %95 {strides = array<i32>} : memref<1x8x32x8xbf16, #tpu.memory_space<vmem>>, vector<1x1x32x8xbf16>,
    %cst_47 = arith.constant dense<0.000000e+00> : vector<8xf32>
    %96 = vector.multi_reduction <add>, %91, %cst_47 [0] : vector<32x8xf32> to vector<8xf32>
    %97 = vector.shape_cast %96 : vector<8xf32> to vector<1x8xf32>
    %98 = arith.addf %54, %97 : vector<1x8xf32>
    %99 = arith.mulf %91, %91 : vector<32x8xf32>
    %cst_48 = arith.constant dense<0.000000e+00> : vector<8xf32>
    %100 = vector.multi_reduction <add>, %99, %cst_48 [0] : vector<32x8xf32> to vector<8xf32>
    %101 = vector.shape_cast %100 : vector<8xf32> to vector<1x8xf32>
    %102 = arith.addf %55, %101 : vector<1x8xf32>
    %cst_49 = arith.constant 0.000000e+00 : f32
    %103 = vector.broadcast %cst_49 : f32 to vector<32x8xf32>
    %104 = vector.extract_strided_slice %34 {offsets = [1, 0, 0], sizes = [1, 34, 4], strides = [1, 1, 1]} : vector<10x34x4xbf16> to vector<1x34x4xbf16>
    %105 = vector.shape_cast %104 : vector<1x34x4xbf16> to vector<34x4xbf16>
    %106 = vector.extract_strided_slice %105 {offsets = [0, 0], sizes = [32, 4], strides = [1, 1]} : vector<34x4xbf16> to vector<32x4xbf16>
    %cst_50 = arith.constant dense<0.000000e+00> : vector<32x8xf32>
    %107 = tpu.matmul %106, %36, %cst_50 {dimension_numbers = #tpu.dot_dimension_numbers<[1], [0], [0], [1], [0, 0, 1, 1], [], []>} : vector<32x4xbf16>, vector<4x8xbf16>, vector<32x8xf32> -> vector<32x8xf32>
    %108 = arith.addf %103, %107 : vector<32x8xf32>
    %109 = vector.extract_strided_slice %105 {offsets = [1, 0], sizes = [32, 4], strides = [1, 1]} : vector<34x4xbf16> to vector<32x4xbf16>
    %cst_51 = arith.constant dense<0.000000e+00> : vector<32x8xf32>
    %110 = tpu.matmul %109, %38, %cst_51 {dimension_numbers = #tpu.dot_dimension_numbers<[1], [0], [0], [1], [0, 0, 1, 1], [], []>} : vector<32x4xbf16>, vector<4x8xbf16>, vector<32x8xf32> -> vector<32x8xf32>
    %111 = arith.addf %108, %110 : vector<32x8xf32>
    %112 = vector.extract_strided_slice %105 {offsets = [2, 0], sizes = [32, 4], strides = [1, 1]} : vector<34x4xbf16> to vector<32x4xbf16>
    %cst_52 = arith.constant dense<0.000000e+00> : vector<32x8xf32>
    %113 = tpu.matmul %112, %40, %cst_52 {dimension_numbers = #tpu.dot_dimension_numbers<[1], [0], [0], [1], [0, 0, 1, 1], [], []>} : vector<32x4xbf16>, vector<4x8xbf16>, vector<32x8xf32> -> vector<32x8xf32>
    %114 = arith.addf %111, %113 : vector<32x8xf32>
    %115 = vector.extract_strided_slice %34 {offsets = [2, 0, 0], sizes = [1, 34, 4], strides = [1, 1, 1]} : vector<10x34x4xbf16> to vector<1x34x4xbf16>
    %116 = vector.shape_cast %115 : vector<1x34x4xbf16> to vector<34x4xbf16>
    %117 = vector.extract_strided_slice %116 {offsets = [0, 0], sizes = [32, 4], strides = [1, 1]} : vector<34x4xbf16> to vector<32x4xbf16>
    %cst_53 = arith.constant dense<0.000000e+00> : vector<32x8xf32>
    %118 = tpu.matmul %117, %42, %cst_53 {dimension_numbers = #tpu.dot_dimension_numbers<[1], [0], [0], [1], [0, 0, 1, 1], [], []>} : vector<32x4xbf16>, vector<4x8xbf16>, vector<32x8xf32> -> vector<32x8xf32>
    %119 = arith.addf %114, %118 : vector<32x8xf32>
    %120 = vector.extract_strided_slice %116 {offsets = [1, 0], sizes = [32, 4], strides = [1, 1]} : vector<34x4xbf16> to vector<32x4xbf16>
    %cst_54 = arith.constant dense<0.000000e+00> : vector<32x8xf32>
    %121 = tpu.matmul %120, %44, %cst_54 {dimension_numbers = #tpu.dot_dimension_numbers<[1], [0], [0], [1], [0, 0, 1, 1], [], []>} : vector<32x4xbf16>, vector<4x8xbf16>, vector<32x8xf32> -> vector<32x8xf32>
    %122 = arith.addf %119, %121 : vector<32x8xf32>
    %123 = vector.extract_strided_slice %116 {offsets = [2, 0], sizes = [32, 4], strides = [1, 1]} : vector<34x4xbf16> to vector<32x4xbf16>
    %cst_55 = arith.constant dense<0.000000e+00> : vector<32x8xf32>
    %124 = tpu.matmul %123, %46, %cst_55 {dimension_numbers = #tpu.dot_dimension_numbers<[1], [0], [0], [1], [0, 0, 1, 1], [], []>} : vector<32x4xbf16>, vector<4x8xbf16>, vector<32x8xf32> -> vector<32x8xf32>
    %125 = arith.addf %122, %124 : vector<32x8xf32>
    %126 = vector.extract_strided_slice %34 {offsets = [3, 0, 0], sizes = [1, 34, 4], strides = [1, 1, 1]} : vector<10x34x4xbf16> to vector<1x34x4xbf16>
    %127 = vector.shape_cast %126 : vector<1x34x4xbf16> to vector<34x4xbf16>
    %128 = vector.extract_strided_slice %127 {offsets = [0, 0], sizes = [32, 4], strides = [1, 1]} : vector<34x4xbf16> to vector<32x4xbf16>
    %cst_56 = arith.constant dense<0.000000e+00> : vector<32x8xf32>
    %129 = tpu.matmul %128, %48, %cst_56 {dimension_numbers = #tpu.dot_dimension_numbers<[1], [0], [0], [1], [0, 0, 1, 1], [], []>} : vector<32x4xbf16>, vector<4x8xbf16>, vector<32x8xf32> -> vector<32x8xf32>
    %130 = arith.addf %125, %129 : vector<32x8xf32>
    %131 = vector.extract_strided_slice %127 {offsets = [1, 0], sizes = [32, 4], strides = [1, 1]} : vector<34x4xbf16> to vector<32x4xbf16>
    %cst_57 = arith.constant dense<0.000000e+00> : vector<32x8xf32>
    %132 = tpu.matmul %131, %50, %cst_57 {dimension_numbers = #tpu.dot_dimension_numbers<[1], [0], [0], [1], [0, 0, 1, 1], [], []>} : vector<32x4xbf16>, vector<4x8xbf16>, vector<32x8xf32> -> vector<32x8xf32>
    %133 = arith.addf %130, %132 : vector<32x8xf32>
    %134 = vector.extract_strided_slice %127 {offsets = [2, 0], sizes = [32, 4], strides = [1, 1]} : vector<34x4xbf16> to vector<32x4xbf16>
    %cst_58 = arith.constant dense<0.000000e+00> : vector<32x8xf32>
    %135 = tpu.matmul %134, %52, %cst_58 {dimension_numbers = #tpu.dot_dimension_numbers<[1], [0], [0], [1], [0, 0, 1, 1], [], []>} : vector<32x4xbf16>, vector<4x8xbf16>, vector<32x8xf32> -> vector<32x8xf32>
    %136 = arith.addf %133, %135 : vector<32x8xf32>
    %137 = vector.broadcast %53 : vector<1x8xf32> to vector<32x8xf32>
    %138 = arith.addf %136, %137 : vector<32x8xf32>
    %139 = arith.truncf %138 : vector<32x8xf32> to vector<32x8xbf16>
    %c0_59 = arith.constant 0 : index
    %c1_60 = arith.constant 1 : index
    %c0_61 = arith.constant 0 : index
    %c0_62 = arith.constant 0 : index
    %140 = vector.load %arg7[%c0_59, %c1_60, %c0_61, %c0_62] : memref<1x8x32x8xbf16, #tpu.memory_space<vmem>>, vector<1x1x32x8xbf16>
    %141 = vector.shape_cast %140 : vector<1x1x32x8xbf16> to vector<32x8xbf16>
    %142 = vector.shape_cast %139 : vector<32x8xbf16> to vector<1x1x32x8xbf16>
    tpu.vector_store %arg7[%c0_59, %c1_60, %c0_61, %c0_62], %142 {strides = array<i32>} : memref<1x8x32x8xbf16, #tpu.memory_space<vmem>>, vector<1x1x32x8xbf16>,
    %cst_63 = arith.constant dense<0.000000e+00> : vector<8xf32>
    %143 = vector.multi_reduction <add>, %138, %cst_63 [0] : vector<32x8xf32> to vector<8xf32>
    %144 = vector.shape_cast %143 : vector<8xf32> to vector<1x8xf32>
    %145 = arith.addf %98, %144 : vector<1x8xf32>
    %146 = arith.mulf %138, %138 : vector<32x8xf32>
    %cst_64 = arith.constant dense<0.000000e+00> : vector<8xf32>
    %147 = vector.multi_reduction <add>, %146, %cst_64 [0] : vector<32x8xf32> to vector<8xf32>
    %148 = vector.shape_cast %147 : vector<8xf32> to vector<1x8xf32>
    %149 = arith.addf %102, %148 : vector<1x8xf32>
    %cst_65 = arith.constant 0.000000e+00 : f32
    %150 = vector.broadcast %cst_65 : f32 to vector<32x8xf32>
    %151 = vector.extract_strided_slice %34 {offsets = [2, 0, 0], sizes = [1, 34, 4], strides = [1, 1, 1]} : vector<10x34x4xbf16> to vector<1x34x4xbf16>
    %152 = vector.shape_cast %151 : vector<1x34x4xbf16> to vector<34x4xbf16>
    %153 = vector.extract_strided_slice %152 {offsets = [0, 0], sizes = [32, 4], strides = [1, 1]} : vector<34x4xbf16> to vector<32x4xbf16>
    %cst_66 = arith.constant dense<0.000000e+00> : vector<32x8xf32>
    %154 = tpu.matmul %153, %36, %cst_66 {dimension_numbers = #tpu.dot_dimension_numbers<[1], [0], [0], [1], [0, 0, 1, 1], [], []>} : vector<32x4xbf16>, vector<4x8xbf16>, vector<32x8xf32> -> vector<32x8xf32>
    %155 = arith.addf %150, %154 : vector<32x8xf32>
    %156 = vector.extract_strided_slice %152 {offsets = [1, 0], sizes = [32, 4], strides = [1, 1]} : vector<34x4xbf16> to vector<32x4xbf16>
    %cst_67 = arith.constant dense<0.000000e+00> : vector<32x8xf32>
    %157 = tpu.matmul %156, %38, %cst_67 {dimension_numbers = #tpu.dot_dimension_numbers<[1], [0], [0], [1], [0, 0, 1, 1], [], []>} : vector<32x4xbf16>, vector<4x8xbf16>, vector<32x8xf32> -> vector<32x8xf32>
    %158 = arith.addf %155, %157 : vector<32x8xf32>
    %159 = vector.extract_strided_slice %152 {offsets = [2, 0], sizes = [32, 4], strides = [1, 1]} : vector<34x4xbf16> to vector<32x4xbf16>
    %cst_68 = arith.constant dense<0.000000e+00> : vector<32x8xf32>
    %160 = tpu.matmul %159, %40, %cst_68 {dimension_numbers = #tpu.dot_dimension_numbers<[1], [0], [0], [1], [0, 0, 1, 1], [], []>} : vector<32x4xbf16>, vector<4x8xbf16>, vector<32x8xf32> -> vector<32x8xf32>
    %161 = arith.addf %158, %160 : vector<32x8xf32>
    %162 = vector.extract_strided_slice %34 {offsets = [3, 0, 0], sizes = [1, 34, 4], strides = [1, 1, 1]} : vector<10x34x4xbf16> to vector<1x34x4xbf16>
    %163 = vector.shape_cast %162 : vector<1x34x4xbf16> to vector<34x4xbf16>
    %164 = vector.extract_strided_slice %163 {offsets = [0, 0], sizes = [32, 4], strides = [1, 1]} : vector<34x4xbf16> to vector<32x4xbf16>
    %cst_69 = arith.constant dense<0.000000e+00> : vector<32x8xf32>
    %165 = tpu.matmul %164, %42, %cst_69 {dimension_numbers = #tpu.dot_dimension_numbers<[1], [0], [0], [1], [0, 0, 1, 1], [], []>} : vector<32x4xbf16>, vector<4x8xbf16>, vector<32x8xf32> -> vector<32x8xf32>
    %166 = arith.addf %161, %165 : vector<32x8xf32>
    %167 = vector.extract_strided_slice %163 {offsets = [1, 0], sizes = [32, 4], strides = [1, 1]} : vector<34x4xbf16> to vector<32x4xbf16>
    %cst_70 = arith.constant dense<0.000000e+00> : vector<32x8xf32>
    %168 = tpu.matmul %167, %44, %cst_70 {dimension_numbers = #tpu.dot_dimension_numbers<[1], [0], [0], [1], [0, 0, 1, 1], [], []>} : vector<32x4xbf16>, vector<4x8xbf16>, vector<32x8xf32> -> vector<32x8xf32>
    %169 = arith.addf %166, %168 : vector<32x8xf32>
    %170 = vector.extract_strided_slice %163 {offsets = [2, 0], sizes = [32, 4], strides = [1, 1]} : vector<34x4xbf16> to vector<32x4xbf16>
    %cst_71 = arith.constant dense<0.000000e+00> : vector<32x8xf32>
    %171 = tpu.matmul %170, %46, %cst_71 {dimension_numbers = #tpu.dot_dimension_numbers<[1], [0], [0], [1], [0, 0, 1, 1], [], []>} : vector<32x4xbf16>, vector<4x8xbf16>, vector<32x8xf32> -> vector<32x8xf32>
    %172 = arith.addf %169, %171 : vector<32x8xf32>
    %173 = vector.extract_strided_slice %34 {offsets = [4, 0, 0], sizes = [1, 34, 4], strides = [1, 1, 1]} : vector<10x34x4xbf16> to vector<1x34x4xbf16>
    %174 = vector.shape_cast %173 : vector<1x34x4xbf16> to vector<34x4xbf16>
    %175 = vector.extract_strided_slice %174 {offsets = [0, 0], sizes = [32, 4], strides = [1, 1]} : vector<34x4xbf16> to vector<32x4xbf16>
    %cst_72 = arith.constant dense<0.000000e+00> : vector<32x8xf32>
    %176 = tpu.matmul %175, %48, %cst_72 {dimension_numbers = #tpu.dot_dimension_numbers<[1], [0], [0], [1], [0, 0, 1, 1], [], []>} : vector<32x4xbf16>, vector<4x8xbf16>, vector<32x8xf32> -> vector<32x8xf32>
    %177 = arith.addf %172, %176 : vector<32x8xf32>
    %178 = vector.extract_strided_slice %174 {offsets = [1, 0], sizes = [32, 4], strides = [1, 1]} : vector<34x4xbf16> to vector<32x4xbf16>
    %cst_73 = arith.constant dense<0.000000e+00> : vector<32x8xf32>
    %179 = tpu.matmul %178, %50, %cst_73 {dimension_numbers = #tpu.dot_dimension_numbers<[1], [0], [0], [1], [0, 0, 1, 1], [], []>} : vector<32x4xbf16>, vector<4x8xbf16>, vector<32x8xf32> -> vector<32x8xf32>
    %180 = arith.addf %177, %179 : vector<32x8xf32>
    %181 = vector.extract_strided_slice %174 {offsets = [2, 0], sizes = [32, 4], strides = [1, 1]} : vector<34x4xbf16> to vector<32x4xbf16>
    %cst_74 = arith.constant dense<0.000000e+00> : vector<32x8xf32>
    %182 = tpu.matmul %181, %52, %cst_74 {dimension_numbers = #tpu.dot_dimension_numbers<[1], [0], [0], [1], [0, 0, 1, 1], [], []>} : vector<32x4xbf16>, vector<4x8xbf16>, vector<32x8xf32> -> vector<32x8xf32>
    %183 = arith.addf %180, %182 : vector<32x8xf32>
    %184 = vector.broadcast %53 : vector<1x8xf32> to vector<32x8xf32>
    %185 = arith.addf %183, %184 : vector<32x8xf32>
    %186 = arith.truncf %185 : vector<32x8xf32> to vector<32x8xbf16>
    %c0_75 = arith.constant 0 : index
    %c2_76 = arith.constant 2 : index
    %c0_77 = arith.constant 0 : index
    %c0_78 = arith.constant 0 : index
    %187 = vector.load %arg7[%c0_75, %c2_76, %c0_77, %c0_78] : memref<1x8x32x8xbf16, #tpu.memory_space<vmem>>, vector<1x1x32x8xbf16>
    %188 = vector.shape_cast %187 : vector<1x1x32x8xbf16> to vector<32x8xbf16>
    %189 = vector.shape_cast %186 : vector<32x8xbf16> to vector<1x1x32x8xbf16>
    tpu.vector_store %arg7[%c0_75, %c2_76, %c0_77, %c0_78], %189 {strides = array<i32>} : memref<1x8x32x8xbf16, #tpu.memory_space<vmem>>, vector<1x1x32x8xbf16>,
    %cst_79 = arith.constant dense<0.000000e+00> : vector<8xf32>
    %190 = vector.multi_reduction <add>, %185, %cst_79 [0] : vector<32x8xf32> to vector<8xf32>
    %191 = vector.shape_cast %190 : vector<8xf32> to vector<1x8xf32>
    %192 = arith.addf %145, %191 : vector<1x8xf32>
    %193 = arith.mulf %185, %185 : vector<32x8xf32>
    %cst_80 = arith.constant dense<0.000000e+00> : vector<8xf32>
    %194 = vector.multi_reduction <add>, %193, %cst_80 [0] : vector<32x8xf32> to vector<8xf32>
    %195 = vector.shape_cast %194 : vector<8xf32> to vector<1x8xf32>
    %196 = arith.addf %149, %195 : vector<1x8xf32>
    %cst_81 = arith.constant 0.000000e+00 : f32
    %197 = vector.broadcast %cst_81 : f32 to vector<32x8xf32>
    %198 = vector.extract_strided_slice %34 {offsets = [3, 0, 0], sizes = [1, 34, 4], strides = [1, 1, 1]} : vector<10x34x4xbf16> to vector<1x34x4xbf16>
    %199 = vector.shape_cast %198 : vector<1x34x4xbf16> to vector<34x4xbf16>
    %200 = vector.extract_strided_slice %199 {offsets = [0, 0], sizes = [32, 4], strides = [1, 1]} : vector<34x4xbf16> to vector<32x4xbf16>
    %cst_82 = arith.constant dense<0.000000e+00> : vector<32x8xf32>
    %201 = tpu.matmul %200, %36, %cst_82 {dimension_numbers = #tpu.dot_dimension_numbers<[1], [0], [0], [1], [0, 0, 1, 1], [], []>} : vector<32x4xbf16>, vector<4x8xbf16>, vector<32x8xf32> -> vector<32x8xf32>
    %202 = arith.addf %197, %201 : vector<32x8xf32>
    %203 = vector.extract_strided_slice %199 {offsets = [1, 0], sizes = [32, 4], strides = [1, 1]} : vector<34x4xbf16> to vector<32x4xbf16>
    %cst_83 = arith.constant dense<0.000000e+00> : vector<32x8xf32>
    %204 = tpu.matmul %203, %38, %cst_83 {dimension_numbers = #tpu.dot_dimension_numbers<[1], [0], [0], [1], [0, 0, 1, 1], [], []>} : vector<32x4xbf16>, vector<4x8xbf16>, vector<32x8xf32> -> vector<32x8xf32>
    %205 = arith.addf %202, %204 : vector<32x8xf32>
    %206 = vector.extract_strided_slice %199 {offsets = [2, 0], sizes = [32, 4], strides = [1, 1]} : vector<34x4xbf16> to vector<32x4xbf16>
    %cst_84 = arith.constant dense<0.000000e+00> : vector<32x8xf32>
    %207 = tpu.matmul %206, %40, %cst_84 {dimension_numbers = #tpu.dot_dimension_numbers<[1], [0], [0], [1], [0, 0, 1, 1], [], []>} : vector<32x4xbf16>, vector<4x8xbf16>, vector<32x8xf32> -> vector<32x8xf32>
    %208 = arith.addf %205, %207 : vector<32x8xf32>
    %209 = vector.extract_strided_slice %34 {offsets = [4, 0, 0], sizes = [1, 34, 4], strides = [1, 1, 1]} : vector<10x34x4xbf16> to vector<1x34x4xbf16>
    %210 = vector.shape_cast %209 : vector<1x34x4xbf16> to vector<34x4xbf16>
    %211 = vector.extract_strided_slice %210 {offsets = [0, 0], sizes = [32, 4], strides = [1, 1]} : vector<34x4xbf16> to vector<32x4xbf16>
    %cst_85 = arith.constant dense<0.000000e+00> : vector<32x8xf32>
    %212 = tpu.matmul %211, %42, %cst_85 {dimension_numbers = #tpu.dot_dimension_numbers<[1], [0], [0], [1], [0, 0, 1, 1], [], []>} : vector<32x4xbf16>, vector<4x8xbf16>, vector<32x8xf32> -> vector<32x8xf32>
    %213 = arith.addf %208, %212 : vector<32x8xf32>
    %214 = vector.extract_strided_slice %210 {offsets = [1, 0], sizes = [32, 4], strides = [1, 1]} : vector<34x4xbf16> to vector<32x4xbf16>
    %cst_86 = arith.constant dense<0.000000e+00> : vector<32x8xf32>
    %215 = tpu.matmul %214, %44, %cst_86 {dimension_numbers = #tpu.dot_dimension_numbers<[1], [0], [0], [1], [0, 0, 1, 1], [], []>} : vector<32x4xbf16>, vector<4x8xbf16>, vector<32x8xf32> -> vector<32x8xf32>
    %216 = arith.addf %213, %215 : vector<32x8xf32>
    %217 = vector.extract_strided_slice %210 {offsets = [2, 0], sizes = [32, 4], strides = [1, 1]} : vector<34x4xbf16> to vector<32x4xbf16>
    %cst_87 = arith.constant dense<0.000000e+00> : vector<32x8xf32>
    %218 = tpu.matmul %217, %46, %cst_87 {dimension_numbers = #tpu.dot_dimension_numbers<[1], [0], [0], [1], [0, 0, 1, 1], [], []>} : vector<32x4xbf16>, vector<4x8xbf16>, vector<32x8xf32> -> vector<32x8xf32>
    %219 = arith.addf %216, %218 : vector<32x8xf32>
    %220 = vector.extract_strided_slice %34 {offsets = [5, 0, 0], sizes = [1, 34, 4], strides = [1, 1, 1]} : vector<10x34x4xbf16> to vector<1x34x4xbf16>
    %221 = vector.shape_cast %220 : vector<1x34x4xbf16> to vector<34x4xbf16>
    %222 = vector.extract_strided_slice %221 {offsets = [0, 0], sizes = [32, 4], strides = [1, 1]} : vector<34x4xbf16> to vector<32x4xbf16>
    %cst_88 = arith.constant dense<0.000000e+00> : vector<32x8xf32>
    %223 = tpu.matmul %222, %48, %cst_88 {dimension_numbers = #tpu.dot_dimension_numbers<[1], [0], [0], [1], [0, 0, 1, 1], [], []>} : vector<32x4xbf16>, vector<4x8xbf16>, vector<32x8xf32> -> vector<32x8xf32>
    %224 = arith.addf %219, %223 : vector<32x8xf32>
    %225 = vector.extract_strided_slice %221 {offsets = [1, 0], sizes = [32, 4], strides = [1, 1]} : vector<34x4xbf16> to vector<32x4xbf16>
    %cst_89 = arith.constant dense<0.000000e+00> : vector<32x8xf32>
    %226 = tpu.matmul %225, %50, %cst_89 {dimension_numbers = #tpu.dot_dimension_numbers<[1], [0], [0], [1], [0, 0, 1, 1], [], []>} : vector<32x4xbf16>, vector<4x8xbf16>, vector<32x8xf32> -> vector<32x8xf32>
    %227 = arith.addf %224, %226 : vector<32x8xf32>
    %228 = vector.extract_strided_slice %221 {offsets = [2, 0], sizes = [32, 4], strides = [1, 1]} : vector<34x4xbf16> to vector<32x4xbf16>
    %cst_90 = arith.constant dense<0.000000e+00> : vector<32x8xf32>
    %229 = tpu.matmul %228, %52, %cst_90 {dimension_numbers = #tpu.dot_dimension_numbers<[1], [0], [0], [1], [0, 0, 1, 1], [], []>} : vector<32x4xbf16>, vector<4x8xbf16>, vector<32x8xf32> -> vector<32x8xf32>
    %230 = arith.addf %227, %229 : vector<32x8xf32>
    %231 = vector.broadcast %53 : vector<1x8xf32> to vector<32x8xf32>
    %232 = arith.addf %230, %231 : vector<32x8xf32>
    %233 = arith.truncf %232 : vector<32x8xf32> to vector<32x8xbf16>
    %c0_91 = arith.constant 0 : index
    %c3_92 = arith.constant 3 : index
    %c0_93 = arith.constant 0 : index
    %c0_94 = arith.constant 0 : index
    %234 = vector.load %arg7[%c0_91, %c3_92, %c0_93, %c0_94] : memref<1x8x32x8xbf16, #tpu.memory_space<vmem>>, vector<1x1x32x8xbf16>
    %235 = vector.shape_cast %234 : vector<1x1x32x8xbf16> to vector<32x8xbf16>
    %236 = vector.shape_cast %233 : vector<32x8xbf16> to vector<1x1x32x8xbf16>
    tpu.vector_store %arg7[%c0_91, %c3_92, %c0_93, %c0_94], %236 {strides = array<i32>} : memref<1x8x32x8xbf16, #tpu.memory_space<vmem>>, vector<1x1x32x8xbf16>,
    %cst_95 = arith.constant dense<0.000000e+00> : vector<8xf32>
    %237 = vector.multi_reduction <add>, %232, %cst_95 [0] : vector<32x8xf32> to vector<8xf32>
    %238 = vector.shape_cast %237 : vector<8xf32> to vector<1x8xf32>
    %239 = arith.addf %192, %238 : vector<1x8xf32>
    %240 = arith.mulf %232, %232 : vector<32x8xf32>
    %cst_96 = arith.constant dense<0.000000e+00> : vector<8xf32>
    %241 = vector.multi_reduction <add>, %240, %cst_96 [0] : vector<32x8xf32> to vector<8xf32>
    %242 = vector.shape_cast %241 : vector<8xf32> to vector<1x8xf32>
    %243 = arith.addf %196, %242 : vector<1x8xf32>
    %cst_97 = arith.constant 0.000000e+00 : f32
    %244 = vector.broadcast %cst_97 : f32 to vector<32x8xf32>
    %245 = vector.extract_strided_slice %34 {offsets = [4, 0, 0], sizes = [1, 34, 4], strides = [1, 1, 1]} : vector<10x34x4xbf16> to vector<1x34x4xbf16>
    %246 = vector.shape_cast %245 : vector<1x34x4xbf16> to vector<34x4xbf16>
    %247 = vector.extract_strided_slice %246 {offsets = [0, 0], sizes = [32, 4], strides = [1, 1]} : vector<34x4xbf16> to vector<32x4xbf16>
    %cst_98 = arith.constant dense<0.000000e+00> : vector<32x8xf32>
    %248 = tpu.matmul %247, %36, %cst_98 {dimension_numbers = #tpu.dot_dimension_numbers<[1], [0], [0], [1], [0, 0, 1, 1], [], []>} : vector<32x4xbf16>, vector<4x8xbf16>, vector<32x8xf32> -> vector<32x8xf32>
    %249 = arith.addf %244, %248 : vector<32x8xf32>
    %250 = vector.extract_strided_slice %246 {offsets = [1, 0], sizes = [32, 4], strides = [1, 1]} : vector<34x4xbf16> to vector<32x4xbf16>
    %cst_99 = arith.constant dense<0.000000e+00> : vector<32x8xf32>
    %251 = tpu.matmul %250, %38, %cst_99 {dimension_numbers = #tpu.dot_dimension_numbers<[1], [0], [0], [1], [0, 0, 1, 1], [], []>} : vector<32x4xbf16>, vector<4x8xbf16>, vector<32x8xf32> -> vector<32x8xf32>
    %252 = arith.addf %249, %251 : vector<32x8xf32>
    %253 = vector.extract_strided_slice %246 {offsets = [2, 0], sizes = [32, 4], strides = [1, 1]} : vector<34x4xbf16> to vector<32x4xbf16>
    %cst_100 = arith.constant dense<0.000000e+00> : vector<32x8xf32>
    %254 = tpu.matmul %253, %40, %cst_100 {dimension_numbers = #tpu.dot_dimension_numbers<[1], [0], [0], [1], [0, 0, 1, 1], [], []>} : vector<32x4xbf16>, vector<4x8xbf16>, vector<32x8xf32> -> vector<32x8xf32>
    %255 = arith.addf %252, %254 : vector<32x8xf32>
    %256 = vector.extract_strided_slice %34 {offsets = [5, 0, 0], sizes = [1, 34, 4], strides = [1, 1, 1]} : vector<10x34x4xbf16> to vector<1x34x4xbf16>
    %257 = vector.shape_cast %256 : vector<1x34x4xbf16> to vector<34x4xbf16>
    %258 = vector.extract_strided_slice %257 {offsets = [0, 0], sizes = [32, 4], strides = [1, 1]} : vector<34x4xbf16> to vector<32x4xbf16>
    %cst_101 = arith.constant dense<0.000000e+00> : vector<32x8xf32>
    %259 = tpu.matmul %258, %42, %cst_101 {dimension_numbers = #tpu.dot_dimension_numbers<[1], [0], [0], [1], [0, 0, 1, 1], [], []>} : vector<32x4xbf16>, vector<4x8xbf16>, vector<32x8xf32> -> vector<32x8xf32>
    %260 = arith.addf %255, %259 : vector<32x8xf32>
    %261 = vector.extract_strided_slice %257 {offsets = [1, 0], sizes = [32, 4], strides = [1, 1]} : vector<34x4xbf16> to vector<32x4xbf16>
    %cst_102 = arith.constant dense<0.000000e+00> : vector<32x8xf32>
    %262 = tpu.matmul %261, %44, %cst_102 {dimension_numbers = #tpu.dot_dimension_numbers<[1], [0], [0], [1], [0, 0, 1, 1], [], []>} : vector<32x4xbf16>, vector<4x8xbf16>, vector<32x8xf32> -> vector<32x8xf32>
    %263 = arith.addf %260, %262 : vector<32x8xf32>
    %264 = vector.extract_strided_slice %257 {offsets = [2, 0], sizes = [32, 4], strides = [1, 1]} : vector<34x4xbf16> to vector<32x4xbf16>
    %cst_103 = arith.constant dense<0.000000e+00> : vector<32x8xf32>
    %265 = tpu.matmul %264, %46, %cst_103 {dimension_numbers = #tpu.dot_dimension_numbers<[1], [0], [0], [1], [0, 0, 1, 1], [], []>} : vector<32x4xbf16>, vector<4x8xbf16>, vector<32x8xf32> -> vector<32x8xf32>
    %266 = arith.addf %263, %265 : vector<32x8xf32>
    %267 = vector.extract_strided_slice %34 {offsets = [6, 0, 0], sizes = [1, 34, 4], strides = [1, 1, 1]} : vector<10x34x4xbf16> to vector<1x34x4xbf16>
    %268 = vector.shape_cast %267 : vector<1x34x4xbf16> to vector<34x4xbf16>
    %269 = vector.extract_strided_slice %268 {offsets = [0, 0], sizes = [32, 4], strides = [1, 1]} : vector<34x4xbf16> to vector<32x4xbf16>
    %cst_104 = arith.constant dense<0.000000e+00> : vector<32x8xf32>
    %270 = tpu.matmul %269, %48, %cst_104 {dimension_numbers = #tpu.dot_dimension_numbers<[1], [0], [0], [1], [0, 0, 1, 1], [], []>} : vector<32x4xbf16>, vector<4x8xbf16>, vector<32x8xf32> -> vector<32x8xf32>
    %271 = arith.addf %266, %270 : vector<32x8xf32>
    %272 = vector.extract_strided_slice %268 {offsets = [1, 0], sizes = [32, 4], strides = [1, 1]} : vector<34x4xbf16> to vector<32x4xbf16>
    %cst_105 = arith.constant dense<0.000000e+00> : vector<32x8xf32>
    %273 = tpu.matmul %272, %50, %cst_105 {dimension_numbers = #tpu.dot_dimension_numbers<[1], [0], [0], [1], [0, 0, 1, 1], [], []>} : vector<32x4xbf16>, vector<4x8xbf16>, vector<32x8xf32> -> vector<32x8xf32>
    %274 = arith.addf %271, %273 : vector<32x8xf32>
    %275 = vector.extract_strided_slice %268 {offsets = [2, 0], sizes = [32, 4], strides = [1, 1]} : vector<34x4xbf16> to vector<32x4xbf16>
    %cst_106 = arith.constant dense<0.000000e+00> : vector<32x8xf32>
    %276 = tpu.matmul %275, %52, %cst_106 {dimension_numbers = #tpu.dot_dimension_numbers<[1], [0], [0], [1], [0, 0, 1, 1], [], []>} : vector<32x4xbf16>, vector<4x8xbf16>, vector<32x8xf32> -> vector<32x8xf32>
    %277 = arith.addf %274, %276 : vector<32x8xf32>
    %278 = vector.broadcast %53 : vector<1x8xf32> to vector<32x8xf32>
    %279 = arith.addf %277, %278 : vector<32x8xf32>
    %280 = arith.truncf %279 : vector<32x8xf32> to vector<32x8xbf16>
    %c0_107 = arith.constant 0 : index
    %c4_108 = arith.constant 4 : index
    %c0_109 = arith.constant 0 : index
    %c0_110 = arith.constant 0 : index
    %281 = vector.load %arg7[%c0_107, %c4_108, %c0_109, %c0_110] : memref<1x8x32x8xbf16, #tpu.memory_space<vmem>>, vector<1x1x32x8xbf16>
    %282 = vector.shape_cast %281 : vector<1x1x32x8xbf16> to vector<32x8xbf16>
    %283 = vector.shape_cast %280 : vector<32x8xbf16> to vector<1x1x32x8xbf16>
    tpu.vector_store %arg7[%c0_107, %c4_108, %c0_109, %c0_110], %283 {strides = array<i32>} : memref<1x8x32x8xbf16, #tpu.memory_space<vmem>>, vector<1x1x32x8xbf16>,
    %cst_111 = arith.constant dense<0.000000e+00> : vector<8xf32>
    %284 = vector.multi_reduction <add>, %279, %cst_111 [0] : vector<32x8xf32> to vector<8xf32>
    %285 = vector.shape_cast %284 : vector<8xf32> to vector<1x8xf32>
    %286 = arith.addf %239, %285 : vector<1x8xf32>
    %287 = arith.mulf %279, %279 : vector<32x8xf32>
    %cst_112 = arith.constant dense<0.000000e+00> : vector<8xf32>
    %288 = vector.multi_reduction <add>, %287, %cst_112 [0] : vector<32x8xf32> to vector<8xf32>
    %289 = vector.shape_cast %288 : vector<8xf32> to vector<1x8xf32>
    %290 = arith.addf %243, %289 : vector<1x8xf32>
    %cst_113 = arith.constant 0.000000e+00 : f32
    %291 = vector.broadcast %cst_113 : f32 to vector<32x8xf32>
    %292 = vector.extract_strided_slice %34 {offsets = [5, 0, 0], sizes = [1, 34, 4], strides = [1, 1, 1]} : vector<10x34x4xbf16> to vector<1x34x4xbf16>
    %293 = vector.shape_cast %292 : vector<1x34x4xbf16> to vector<34x4xbf16>
    %294 = vector.extract_strided_slice %293 {offsets = [0, 0], sizes = [32, 4], strides = [1, 1]} : vector<34x4xbf16> to vector<32x4xbf16>
    %cst_114 = arith.constant dense<0.000000e+00> : vector<32x8xf32>
    %295 = tpu.matmul %294, %36, %cst_114 {dimension_numbers = #tpu.dot_dimension_numbers<[1], [0], [0], [1], [0, 0, 1, 1], [], []>} : vector<32x4xbf16>, vector<4x8xbf16>, vector<32x8xf32> -> vector<32x8xf32>
    %296 = arith.addf %291, %295 : vector<32x8xf32>
    %297 = vector.extract_strided_slice %293 {offsets = [1, 0], sizes = [32, 4], strides = [1, 1]} : vector<34x4xbf16> to vector<32x4xbf16>
    %cst_115 = arith.constant dense<0.000000e+00> : vector<32x8xf32>
    %298 = tpu.matmul %297, %38, %cst_115 {dimension_numbers = #tpu.dot_dimension_numbers<[1], [0], [0], [1], [0, 0, 1, 1], [], []>} : vector<32x4xbf16>, vector<4x8xbf16>, vector<32x8xf32> -> vector<32x8xf32>
    %299 = arith.addf %296, %298 : vector<32x8xf32>
    %300 = vector.extract_strided_slice %293 {offsets = [2, 0], sizes = [32, 4], strides = [1, 1]} : vector<34x4xbf16> to vector<32x4xbf16>
    %cst_116 = arith.constant dense<0.000000e+00> : vector<32x8xf32>
    %301 = tpu.matmul %300, %40, %cst_116 {dimension_numbers = #tpu.dot_dimension_numbers<[1], [0], [0], [1], [0, 0, 1, 1], [], []>} : vector<32x4xbf16>, vector<4x8xbf16>, vector<32x8xf32> -> vector<32x8xf32>
    %302 = arith.addf %299, %301 : vector<32x8xf32>
    %303 = vector.extract_strided_slice %34 {offsets = [6, 0, 0], sizes = [1, 34, 4], strides = [1, 1, 1]} : vector<10x34x4xbf16> to vector<1x34x4xbf16>
    %304 = vector.shape_cast %303 : vector<1x34x4xbf16> to vector<34x4xbf16>
    %305 = vector.extract_strided_slice %304 {offsets = [0, 0], sizes = [32, 4], strides = [1, 1]} : vector<34x4xbf16> to vector<32x4xbf16>
    %cst_117 = arith.constant dense<0.000000e+00> : vector<32x8xf32>
    %306 = tpu.matmul %305, %42, %cst_117 {dimension_numbers = #tpu.dot_dimension_numbers<[1], [0], [0], [1], [0, 0, 1, 1], [], []>} : vector<32x4xbf16>, vector<4x8xbf16>, vector<32x8xf32> -> vector<32x8xf32>
    %307 = arith.addf %302, %306 : vector<32x8xf32>
    %308 = vector.extract_strided_slice %304 {offsets = [1, 0], sizes = [32, 4], strides = [1, 1]} : vector<34x4xbf16> to vector<32x4xbf16>
    %cst_118 = arith.constant dense<0.000000e+00> : vector<32x8xf32>
    %309 = tpu.matmul %308, %44, %cst_118 {dimension_numbers = #tpu.dot_dimension_numbers<[1], [0], [0], [1], [0, 0, 1, 1], [], []>} : vector<32x4xbf16>, vector<4x8xbf16>, vector<32x8xf32> -> vector<32x8xf32>
    %310 = arith.addf %307, %309 : vector<32x8xf32>
    %311 = vector.extract_strided_slice %304 {offsets = [2, 0], sizes = [32, 4], strides = [1, 1]} : vector<34x4xbf16> to vector<32x4xbf16>
    %cst_119 = arith.constant dense<0.000000e+00> : vector<32x8xf32>
    %312 = tpu.matmul %311, %46, %cst_119 {dimension_numbers = #tpu.dot_dimension_numbers<[1], [0], [0], [1], [0, 0, 1, 1], [], []>} : vector<32x4xbf16>, vector<4x8xbf16>, vector<32x8xf32> -> vector<32x8xf32>
    %313 = arith.addf %310, %312 : vector<32x8xf32>
    %314 = vector.extract_strided_slice %34 {offsets = [7, 0, 0], sizes = [1, 34, 4], strides = [1, 1, 1]} : vector<10x34x4xbf16> to vector<1x34x4xbf16>
    %315 = vector.shape_cast %314 : vector<1x34x4xbf16> to vector<34x4xbf16>
    %316 = vector.extract_strided_slice %315 {offsets = [0, 0], sizes = [32, 4], strides = [1, 1]} : vector<34x4xbf16> to vector<32x4xbf16>
    %cst_120 = arith.constant dense<0.000000e+00> : vector<32x8xf32>
    %317 = tpu.matmul %316, %48, %cst_120 {dimension_numbers = #tpu.dot_dimension_numbers<[1], [0], [0], [1], [0, 0, 1, 1], [], []>} : vector<32x4xbf16>, vector<4x8xbf16>, vector<32x8xf32> -> vector<32x8xf32>
    %318 = arith.addf %313, %317 : vector<32x8xf32>
    %319 = vector.extract_strided_slice %315 {offsets = [1, 0], sizes = [32, 4], strides = [1, 1]} : vector<34x4xbf16> to vector<32x4xbf16>
    %cst_121 = arith.constant dense<0.000000e+00> : vector<32x8xf32>
    %320 = tpu.matmul %319, %50, %cst_121 {dimension_numbers = #tpu.dot_dimension_numbers<[1], [0], [0], [1], [0, 0, 1, 1], [], []>} : vector<32x4xbf16>, vector<4x8xbf16>, vector<32x8xf32> -> vector<32x8xf32>
    %321 = arith.addf %318, %320 : vector<32x8xf32>
    %322 = vector.extract_strided_slice %315 {offsets = [2, 0], sizes = [32, 4], strides = [1, 1]} : vector<34x4xbf16> to vector<32x4xbf16>
    %cst_122 = arith.constant dense<0.000000e+00> : vector<32x8xf32>
    %323 = tpu.matmul %322, %52, %cst_122 {dimension_numbers = #tpu.dot_dimension_numbers<[1], [0], [0], [1], [0, 0, 1, 1], [], []>} : vector<32x4xbf16>, vector<4x8xbf16>, vector<32x8xf32> -> vector<32x8xf32>
    %324 = arith.addf %321, %323 : vector<32x8xf32>
    %325 = vector.broadcast %53 : vector<1x8xf32> to vector<32x8xf32>
    %326 = arith.addf %324, %325 : vector<32x8xf32>
    %327 = arith.truncf %326 : vector<32x8xf32> to vector<32x8xbf16>
    %c0_123 = arith.constant 0 : index
    %c5_124 = arith.constant 5 : index
    %c0_125 = arith.constant 0 : index
    %c0_126 = arith.constant 0 : index
    %328 = vector.load %arg7[%c0_123, %c5_124, %c0_125, %c0_126] : memref<1x8x32x8xbf16, #tpu.memory_space<vmem>>, vector<1x1x32x8xbf16>
    %329 = vector.shape_cast %328 : vector<1x1x32x8xbf16> to vector<32x8xbf16>
    %330 = vector.shape_cast %327 : vector<32x8xbf16> to vector<1x1x32x8xbf16>
    tpu.vector_store %arg7[%c0_123, %c5_124, %c0_125, %c0_126], %330 {strides = array<i32>} : memref<1x8x32x8xbf16, #tpu.memory_space<vmem>>, vector<1x1x32x8xbf16>,
    %cst_127 = arith.constant dense<0.000000e+00> : vector<8xf32>
    %331 = vector.multi_reduction <add>, %326, %cst_127 [0] : vector<32x8xf32> to vector<8xf32>
    %332 = vector.shape_cast %331 : vector<8xf32> to vector<1x8xf32>
    %333 = arith.addf %286, %332 : vector<1x8xf32>
    %334 = arith.mulf %326, %326 : vector<32x8xf32>
    %cst_128 = arith.constant dense<0.000000e+00> : vector<8xf32>
    %335 = vector.multi_reduction <add>, %334, %cst_128 [0] : vector<32x8xf32> to vector<8xf32>
    %336 = vector.shape_cast %335 : vector<8xf32> to vector<1x8xf32>
    %337 = arith.addf %290, %336 : vector<1x8xf32>
    %cst_129 = arith.constant 0.000000e+00 : f32
    %338 = vector.broadcast %cst_129 : f32 to vector<32x8xf32>
    %339 = vector.extract_strided_slice %34 {offsets = [6, 0, 0], sizes = [1, 34, 4], strides = [1, 1, 1]} : vector<10x34x4xbf16> to vector<1x34x4xbf16>
    %340 = vector.shape_cast %339 : vector<1x34x4xbf16> to vector<34x4xbf16>
    %341 = vector.extract_strided_slice %340 {offsets = [0, 0], sizes = [32, 4], strides = [1, 1]} : vector<34x4xbf16> to vector<32x4xbf16>
    %cst_130 = arith.constant dense<0.000000e+00> : vector<32x8xf32>
    %342 = tpu.matmul %341, %36, %cst_130 {dimension_numbers = #tpu.dot_dimension_numbers<[1], [0], [0], [1], [0, 0, 1, 1], [], []>} : vector<32x4xbf16>, vector<4x8xbf16>, vector<32x8xf32> -> vector<32x8xf32>
    %343 = arith.addf %338, %342 : vector<32x8xf32>
    %344 = vector.extract_strided_slice %340 {offsets = [1, 0], sizes = [32, 4], strides = [1, 1]} : vector<34x4xbf16> to vector<32x4xbf16>
    %cst_131 = arith.constant dense<0.000000e+00> : vector<32x8xf32>
    %345 = tpu.matmul %344, %38, %cst_131 {dimension_numbers = #tpu.dot_dimension_numbers<[1], [0], [0], [1], [0, 0, 1, 1], [], []>} : vector<32x4xbf16>, vector<4x8xbf16>, vector<32x8xf32> -> vector<32x8xf32>
    %346 = arith.addf %343, %345 : vector<32x8xf32>
    %347 = vector.extract_strided_slice %340 {offsets = [2, 0], sizes = [32, 4], strides = [1, 1]} : vector<34x4xbf16> to vector<32x4xbf16>
    %cst_132 = arith.constant dense<0.000000e+00> : vector<32x8xf32>
    %348 = tpu.matmul %347, %40, %cst_132 {dimension_numbers = #tpu.dot_dimension_numbers<[1], [0], [0], [1], [0, 0, 1, 1], [], []>} : vector<32x4xbf16>, vector<4x8xbf16>, vector<32x8xf32> -> vector<32x8xf32>
    %349 = arith.addf %346, %348 : vector<32x8xf32>
    %350 = vector.extract_strided_slice %34 {offsets = [7, 0, 0], sizes = [1, 34, 4], strides = [1, 1, 1]} : vector<10x34x4xbf16> to vector<1x34x4xbf16>
    %351 = vector.shape_cast %350 : vector<1x34x4xbf16> to vector<34x4xbf16>
    %352 = vector.extract_strided_slice %351 {offsets = [0, 0], sizes = [32, 4], strides = [1, 1]} : vector<34x4xbf16> to vector<32x4xbf16>
    %cst_133 = arith.constant dense<0.000000e+00> : vector<32x8xf32>
    %353 = tpu.matmul %352, %42, %cst_133 {dimension_numbers = #tpu.dot_dimension_numbers<[1], [0], [0], [1], [0, 0, 1, 1], [], []>} : vector<32x4xbf16>, vector<4x8xbf16>, vector<32x8xf32> -> vector<32x8xf32>
    %354 = arith.addf %349, %353 : vector<32x8xf32>
    %355 = vector.extract_strided_slice %351 {offsets = [1, 0], sizes = [32, 4], strides = [1, 1]} : vector<34x4xbf16> to vector<32x4xbf16>
    %cst_134 = arith.constant dense<0.000000e+00> : vector<32x8xf32>
    %356 = tpu.matmul %355, %44, %cst_134 {dimension_numbers = #tpu.dot_dimension_numbers<[1], [0], [0], [1], [0, 0, 1, 1], [], []>} : vector<32x4xbf16>, vector<4x8xbf16>, vector<32x8xf32> -> vector<32x8xf32>
    %357 = arith.addf %354, %356 : vector<32x8xf32>
    %358 = vector.extract_strided_slice %351 {offsets = [2, 0], sizes = [32, 4], strides = [1, 1]} : vector<34x4xbf16> to vector<32x4xbf16>
    %cst_135 = arith.constant dense<0.000000e+00> : vector<32x8xf32>
    %359 = tpu.matmul %358, %46, %cst_135 {dimension_numbers = #tpu.dot_dimension_numbers<[1], [0], [0], [1], [0, 0, 1, 1], [], []>} : vector<32x4xbf16>, vector<4x8xbf16>, vector<32x8xf32> -> vector<32x8xf32>
    %360 = arith.addf %357, %359 : vector<32x8xf32>
    %361 = vector.extract_strided_slice %34 {offsets = [8, 0, 0], sizes = [1, 34, 4], strides = [1, 1, 1]} : vector<10x34x4xbf16> to vector<1x34x4xbf16>
    %362 = vector.shape_cast %361 : vector<1x34x4xbf16> to vector<34x4xbf16>
    %363 = vector.extract_strided_slice %362 {offsets = [0, 0], sizes = [32, 4], strides = [1, 1]} : vector<34x4xbf16> to vector<32x4xbf16>
    %cst_136 = arith.constant dense<0.000000e+00> : vector<32x8xf32>
    %364 = tpu.matmul %363, %48, %cst_136 {dimension_numbers = #tpu.dot_dimension_numbers<[1], [0], [0], [1], [0, 0, 1, 1], [], []>} : vector<32x4xbf16>, vector<4x8xbf16>, vector<32x8xf32> -> vector<32x8xf32>
    %365 = arith.addf %360, %364 : vector<32x8xf32>
    %366 = vector.extract_strided_slice %362 {offsets = [1, 0], sizes = [32, 4], strides = [1, 1]} : vector<34x4xbf16> to vector<32x4xbf16>
    %cst_137 = arith.constant dense<0.000000e+00> : vector<32x8xf32>
    %367 = tpu.matmul %366, %50, %cst_137 {dimension_numbers = #tpu.dot_dimension_numbers<[1], [0], [0], [1], [0, 0, 1, 1], [], []>} : vector<32x4xbf16>, vector<4x8xbf16>, vector<32x8xf32> -> vector<32x8xf32>
    %368 = arith.addf %365, %367 : vector<32x8xf32>
    %369 = vector.extract_strided_slice %362 {offsets = [2, 0], sizes = [32, 4], strides = [1, 1]} : vector<34x4xbf16> to vector<32x4xbf16>
    %cst_138 = arith.constant dense<0.000000e+00> : vector<32x8xf32>
    %370 = tpu.matmul %369, %52, %cst_138 {dimension_numbers = #tpu.dot_dimension_numbers<[1], [0], [0], [1], [0, 0, 1, 1], [], []>} : vector<32x4xbf16>, vector<4x8xbf16>, vector<32x8xf32> -> vector<32x8xf32>
    %371 = arith.addf %368, %370 : vector<32x8xf32>
    %372 = vector.broadcast %53 : vector<1x8xf32> to vector<32x8xf32>
    %373 = arith.addf %371, %372 : vector<32x8xf32>
    %374 = arith.truncf %373 : vector<32x8xf32> to vector<32x8xbf16>
    %c0_139 = arith.constant 0 : index
    %c6_140 = arith.constant 6 : index
    %c0_141 = arith.constant 0 : index
    %c0_142 = arith.constant 0 : index
    %375 = vector.load %arg7[%c0_139, %c6_140, %c0_141, %c0_142] : memref<1x8x32x8xbf16, #tpu.memory_space<vmem>>, vector<1x1x32x8xbf16>
    %376 = vector.shape_cast %375 : vector<1x1x32x8xbf16> to vector<32x8xbf16>
    %377 = vector.shape_cast %374 : vector<32x8xbf16> to vector<1x1x32x8xbf16>
    tpu.vector_store %arg7[%c0_139, %c6_140, %c0_141, %c0_142], %377 {strides = array<i32>} : memref<1x8x32x8xbf16, #tpu.memory_space<vmem>>, vector<1x1x32x8xbf16>,
    %cst_143 = arith.constant dense<0.000000e+00> : vector<8xf32>
    %378 = vector.multi_reduction <add>, %373, %cst_143 [0] : vector<32x8xf32> to vector<8xf32>
    %379 = vector.shape_cast %378 : vector<8xf32> to vector<1x8xf32>
    %380 = arith.addf %333, %379 : vector<1x8xf32>
    %381 = arith.mulf %373, %373 : vector<32x8xf32>
    %cst_144 = arith.constant dense<0.000000e+00> : vector<8xf32>
    %382 = vector.multi_reduction <add>, %381, %cst_144 [0] : vector<32x8xf32> to vector<8xf32>
    %383 = vector.shape_cast %382 : vector<8xf32> to vector<1x8xf32>
    %384 = arith.addf %337, %383 : vector<1x8xf32>
    %cst_145 = arith.constant 0.000000e+00 : f32
    %385 = vector.broadcast %cst_145 : f32 to vector<32x8xf32>
    %386 = vector.extract_strided_slice %34 {offsets = [7, 0, 0], sizes = [1, 34, 4], strides = [1, 1, 1]} : vector<10x34x4xbf16> to vector<1x34x4xbf16>
    %387 = vector.shape_cast %386 : vector<1x34x4xbf16> to vector<34x4xbf16>
    %388 = vector.extract_strided_slice %387 {offsets = [0, 0], sizes = [32, 4], strides = [1, 1]} : vector<34x4xbf16> to vector<32x4xbf16>
    %cst_146 = arith.constant dense<0.000000e+00> : vector<32x8xf32>
    %389 = tpu.matmul %388, %36, %cst_146 {dimension_numbers = #tpu.dot_dimension_numbers<[1], [0], [0], [1], [0, 0, 1, 1], [], []>} : vector<32x4xbf16>, vector<4x8xbf16>, vector<32x8xf32> -> vector<32x8xf32>
    %390 = arith.addf %385, %389 : vector<32x8xf32>
    %391 = vector.extract_strided_slice %387 {offsets = [1, 0], sizes = [32, 4], strides = [1, 1]} : vector<34x4xbf16> to vector<32x4xbf16>
    %cst_147 = arith.constant dense<0.000000e+00> : vector<32x8xf32>
    %392 = tpu.matmul %391, %38, %cst_147 {dimension_numbers = #tpu.dot_dimension_numbers<[1], [0], [0], [1], [0, 0, 1, 1], [], []>} : vector<32x4xbf16>, vector<4x8xbf16>, vector<32x8xf32> -> vector<32x8xf32>
    %393 = arith.addf %390, %392 : vector<32x8xf32>
    %394 = vector.extract_strided_slice %387 {offsets = [2, 0], sizes = [32, 4], strides = [1, 1]} : vector<34x4xbf16> to vector<32x4xbf16>
    %cst_148 = arith.constant dense<0.000000e+00> : vector<32x8xf32>
    %395 = tpu.matmul %394, %40, %cst_148 {dimension_numbers = #tpu.dot_dimension_numbers<[1], [0], [0], [1], [0, 0, 1, 1], [], []>} : vector<32x4xbf16>, vector<4x8xbf16>, vector<32x8xf32> -> vector<32x8xf32>
    %396 = arith.addf %393, %395 : vector<32x8xf32>
    %397 = vector.extract_strided_slice %34 {offsets = [8, 0, 0], sizes = [1, 34, 4], strides = [1, 1, 1]} : vector<10x34x4xbf16> to vector<1x34x4xbf16>
    %398 = vector.shape_cast %397 : vector<1x34x4xbf16> to vector<34x4xbf16>
    %399 = vector.extract_strided_slice %398 {offsets = [0, 0], sizes = [32, 4], strides = [1, 1]} : vector<34x4xbf16> to vector<32x4xbf16>
    %cst_149 = arith.constant dense<0.000000e+00> : vector<32x8xf32>
    %400 = tpu.matmul %399, %42, %cst_149 {dimension_numbers = #tpu.dot_dimension_numbers<[1], [0], [0], [1], [0, 0, 1, 1], [], []>} : vector<32x4xbf16>, vector<4x8xbf16>, vector<32x8xf32> -> vector<32x8xf32>
    %401 = arith.addf %396, %400 : vector<32x8xf32>
    %402 = vector.extract_strided_slice %398 {offsets = [1, 0], sizes = [32, 4], strides = [1, 1]} : vector<34x4xbf16> to vector<32x4xbf16>
    %cst_150 = arith.constant dense<0.000000e+00> : vector<32x8xf32>
    %403 = tpu.matmul %402, %44, %cst_150 {dimension_numbers = #tpu.dot_dimension_numbers<[1], [0], [0], [1], [0, 0, 1, 1], [], []>} : vector<32x4xbf16>, vector<4x8xbf16>, vector<32x8xf32> -> vector<32x8xf32>
    %404 = arith.addf %401, %403 : vector<32x8xf32>
    %405 = vector.extract_strided_slice %398 {offsets = [2, 0], sizes = [32, 4], strides = [1, 1]} : vector<34x4xbf16> to vector<32x4xbf16>
    %cst_151 = arith.constant dense<0.000000e+00> : vector<32x8xf32>
    %406 = tpu.matmul %405, %46, %cst_151 {dimension_numbers = #tpu.dot_dimension_numbers<[1], [0], [0], [1], [0, 0, 1, 1], [], []>} : vector<32x4xbf16>, vector<4x8xbf16>, vector<32x8xf32> -> vector<32x8xf32>
    %407 = arith.addf %404, %406 : vector<32x8xf32>
    %408 = vector.extract_strided_slice %34 {offsets = [9, 0, 0], sizes = [1, 34, 4], strides = [1, 1, 1]} : vector<10x34x4xbf16> to vector<1x34x4xbf16>
    %409 = vector.shape_cast %408 : vector<1x34x4xbf16> to vector<34x4xbf16>
    %410 = vector.extract_strided_slice %409 {offsets = [0, 0], sizes = [32, 4], strides = [1, 1]} : vector<34x4xbf16> to vector<32x4xbf16>
    %cst_152 = arith.constant dense<0.000000e+00> : vector<32x8xf32>
    %411 = tpu.matmul %410, %48, %cst_152 {dimension_numbers = #tpu.dot_dimension_numbers<[1], [0], [0], [1], [0, 0, 1, 1], [], []>} : vector<32x4xbf16>, vector<4x8xbf16>, vector<32x8xf32> -> vector<32x8xf32>
    %412 = arith.addf %407, %411 : vector<32x8xf32>
    %413 = vector.extract_strided_slice %409 {offsets = [1, 0], sizes = [32, 4], strides = [1, 1]} : vector<34x4xbf16> to vector<32x4xbf16>
    %cst_153 = arith.constant dense<0.000000e+00> : vector<32x8xf32>
    %414 = tpu.matmul %413, %50, %cst_153 {dimension_numbers = #tpu.dot_dimension_numbers<[1], [0], [0], [1], [0, 0, 1, 1], [], []>} : vector<32x4xbf16>, vector<4x8xbf16>, vector<32x8xf32> -> vector<32x8xf32>
    %415 = arith.addf %412, %414 : vector<32x8xf32>
    %416 = vector.extract_strided_slice %409 {offsets = [2, 0], sizes = [32, 4], strides = [1, 1]} : vector<34x4xbf16> to vector<32x4xbf16>
    %cst_154 = arith.constant dense<0.000000e+00> : vector<32x8xf32>
    %417 = tpu.matmul %416, %52, %cst_154 {dimension_numbers = #tpu.dot_dimension_numbers<[1], [0], [0], [1], [0, 0, 1, 1], [], []>} : vector<32x4xbf16>, vector<4x8xbf16>, vector<32x8xf32> -> vector<32x8xf32>
    %418 = arith.addf %415, %417 : vector<32x8xf32>
    %419 = vector.broadcast %53 : vector<1x8xf32> to vector<32x8xf32>
    %420 = arith.addf %418, %419 : vector<32x8xf32>
    %421 = arith.truncf %420 : vector<32x8xf32> to vector<32x8xbf16>
    %c0_155 = arith.constant 0 : index
    %c7_156 = arith.constant 7 : index
    %c0_157 = arith.constant 0 : index
    %c0_158 = arith.constant 0 : index
    %422 = vector.load %arg7[%c0_155, %c7_156, %c0_157, %c0_158] : memref<1x8x32x8xbf16, #tpu.memory_space<vmem>>, vector<1x1x32x8xbf16>
    %423 = vector.shape_cast %422 : vector<1x1x32x8xbf16> to vector<32x8xbf16>
    %424 = vector.shape_cast %421 : vector<32x8xbf16> to vector<1x1x32x8xbf16>
    tpu.vector_store %arg7[%c0_155, %c7_156, %c0_157, %c0_158], %424 {strides = array<i32>} : memref<1x8x32x8xbf16, #tpu.memory_space<vmem>>, vector<1x1x32x8xbf16>,
    %cst_159 = arith.constant dense<0.000000e+00> : vector<8xf32>
    %425 = vector.multi_reduction <add>, %420, %cst_159 [0] : vector<32x8xf32> to vector<8xf32>
    %426 = vector.shape_cast %425 : vector<8xf32> to vector<1x8xf32>
    %427 = arith.addf %380, %426 : vector<1x8xf32>
    %428 = arith.mulf %420, %420 : vector<32x8xf32>
    %cst_160 = arith.constant dense<0.000000e+00> : vector<8xf32>
    %429 = vector.multi_reduction <add>, %428, %cst_160 [0] : vector<32x8xf32> to vector<8xf32>
    %430 = vector.shape_cast %429 : vector<8xf32> to vector<1x8xf32>
    %431 = arith.addf %384, %430 : vector<1x8xf32>
    %c0_161 = arith.constant 0 : index
    %c0_162 = arith.constant 0 : index
    %c0_163 = arith.constant 0 : index
    %c0_164 = arith.constant 0 : index
    %432 = vector.load %arg8[%c0_161, %c0_162, %c0_163, %c0_164] : memref<1x1x2x8xf32, #tpu.memory_space<vmem>>, vector<1x1x1x8xf32>
    %433 = vector.shape_cast %432 : vector<1x1x1x8xf32> to vector<1x8xf32>
    %434 = vector.shape_cast %427 : vector<1x8xf32> to vector<1x1x1x8xf32>
    tpu.vector_store %arg8[%c0_161, %c0_162, %c0_163, %c0_164], %434 {strides = array<i32>} : memref<1x1x2x8xf32, #tpu.memory_space<vmem>>, vector<1x1x1x8xf32>,
    %c0_165 = arith.constant 0 : index
    %c0_166 = arith.constant 0 : index
    %c1_167 = arith.constant 1 : index
    %c0_168 = arith.constant 0 : index
    %435 = vector.load %arg8[%c0_165, %c0_166, %c1_167, %c0_168] : memref<1x1x2x8xf32, #tpu.memory_space<vmem>>, vector<1x1x1x8xf32>
    %436 = vector.shape_cast %435 : vector<1x1x1x8xf32> to vector<1x8xf32>
    %437 = vector.shape_cast %431 : vector<1x8xf32> to vector<1x1x1x8xf32>
    tpu.vector_store %arg8[%c0_165, %c0_166, %c1_167, %c0_168], %437 {strides = array<i32>} : memref<1x1x2x8xf32, #tpu.memory_space<vmem>>, vector<1x1x1x8xf32>,
    return
  }
  func.func @transform_0(%arg0: i32, %arg1: i32) -> (i32, i32, i32, i32, i32) {
    %c0_i32 = arith.constant 0 : i32
    %c0_i32_0 = arith.constant 0 : i32
    %c0_i32_1 = arith.constant 0 : i32
    %c0_i32_2 = arith.constant 0 : i32
    return %arg0, %arg1, %c0_i32, %c0_i32_0, %c0_i32_1 : i32, i32, i32, i32, i32
  }
  func.func @transform_1(%arg0: i32, %arg1: i32) -> (i32, i32, i32) {
    %c0_i32 = arith.constant 0 : i32
    %c0_i32_0 = arith.constant 0 : i32
    %c0_i32_1 = arith.constant 0 : i32
    %c0_i32_2 = arith.constant 0 : i32
    return %c0_i32, %c0_i32_0, %c0_i32_1 : i32, i32, i32
  }
  func.func @transform_2(%arg0: i32, %arg1: i32) -> (i32, i32) {
    %c0_i32 = arith.constant 0 : i32
    %c0_i32_0 = arith.constant 0 : i32
    %c0_i32_1 = arith.constant 0 : i32
    return %c0_i32, %c0_i32_0 : i32, i32
  }
  func.func @transform_3(%arg0: i32, %arg1: i32) -> (i32, i32) {
    %c0_i32 = arith.constant 0 : i32
    %c0_i32_0 = arith.constant 0 : i32
    %c0_i32_1 = arith.constant 0 : i32
    return %c0_i32, %c0_i32_0 : i32, i32
  }
  func.func @transform_4(%arg0: i32, %arg1: i32) -> (i32, i32) {
    %c0_i32 = arith.constant 0 : i32
    %c0_i32_0 = arith.constant 0 : i32
    %c0_i32_1 = arith.constant 0 : i32
    return %c0_i32, %c0_i32_0 : i32, i32
  }
  func.func @transform_5(%arg0: i32, %arg1: i32) -> (i32, i32, i32, i32) {
    %c0_i32 = arith.constant 0 : i32
    %c0_i32_0 = arith.constant 0 : i32
    %c0_i32_1 = arith.constant 0 : i32
    return %arg0, %arg1, %c0_i32, %c0_i32_0 : i32, i32, i32, i32
  }
  func.func @transform_6(%arg0: i32, %arg1: i32) -> (i32, i32, i32, i32) {
    %c0_i32 = arith.constant 0 : i32
    %c0_i32_0 = arith.constant 0 : i32
    %c0_i32_1 = arith.constant 0 : i32
    return %arg0, %arg1, %c0_i32, %c0_i32_0 : i32, i32, i32, i32
  }
}

module attributes {stable_mosaic.version = 11 : i64} {
  func.func @_bn_relu_kernel(%arg0: i32, %arg1: i32, %arg2: memref<1x8x32x8xbf16, #tpu.memory_space<vmem>>, %arg3: memref<1x8xf32, #tpu.memory_space<vmem>>, %arg4: memref<1x8xf32, #tpu.memory_space<vmem>>, %arg5: memref<1x8x32x8xf32, #tpu.memory_space<vmem>>) attributes {dimension_semantics = [#tpu.dimension_semantics<parallel>, #tpu.dimension_semantics<parallel>], iteration_bounds = array<i64: 2, 4>, scalar_prefetch = 0 : i64, scratch_operands = 0 : i64, tpu.core_type = #tpu.core_type<tc>, window_params = [{transform_indices = @transform_0, window_bounds = array<i64: 1, 8, 32, 8>}, {pipeline_mode = #tpu.pipeline_mode<synchronous>, transform_indices = @transform_1, window_bounds = array<i64: 1, 8>}, {pipeline_mode = #tpu.pipeline_mode<synchronous>, transform_indices = @transform_2, window_bounds = array<i64: 1, 8>}, {transform_indices = @transform_3, window_bounds = array<i64: 1, 8, 32, 8>}]} {
    %c0 = arith.constant 0 : index
    %c0_0 = arith.constant 0 : index
    %c0_1 = arith.constant 0 : index
    %c0_2 = arith.constant 0 : index
    %0 = vector.load %arg2[%c0, %c0_0, %c0_1, %c0_2] : memref<1x8x32x8xbf16, #tpu.memory_space<vmem>>, vector<1x8x32x8xbf16>
    %1 = vector.shape_cast %0 : vector<1x8x32x8xbf16> to vector<8x32x8xbf16>
    %2 = arith.extf %1 : vector<8x32x8xbf16> to vector<8x32x8xf32>
    %c0_3 = arith.constant 0 : index
    %c0_4 = arith.constant 0 : index
    %3 = vector.load %arg3[%c0_3, %c0_4] : memref<1x8xf32, #tpu.memory_space<vmem>>, vector<1x8xf32>
    %4 = vector.shape_cast %3 : vector<1x8xf32> to vector<1x1x8xf32>
    %5 = vector.broadcast %4 : vector<1x1x8xf32> to vector<8x32x8xf32>
    %6 = arith.mulf %2, %5 : vector<8x32x8xf32>
    %c0_5 = arith.constant 0 : index
    %c0_6 = arith.constant 0 : index
    %7 = vector.load %arg4[%c0_5, %c0_6] : memref<1x8xf32, #tpu.memory_space<vmem>>, vector<1x8xf32>
    %8 = vector.shape_cast %7 : vector<1x8xf32> to vector<1x1x8xf32>
    %9 = vector.broadcast %8 : vector<1x1x8xf32> to vector<8x32x8xf32>
    %10 = arith.addf %6, %9 : vector<8x32x8xf32>
    %cst = arith.constant 0.000000e+00 : f32
    %11 = vector.broadcast %cst : f32 to vector<8x32x8xf32>
    %12 = arith.maximumf %10, %11 : vector<8x32x8xf32>
    %c0_7 = arith.constant 0 : index
    %c0_8 = arith.constant 0 : index
    %c0_9 = arith.constant 0 : index
    %c0_10 = arith.constant 0 : index
    %13 = vector.load %arg5[%c0_7, %c0_8, %c0_9, %c0_10] : memref<1x8x32x8xf32, #tpu.memory_space<vmem>>, vector<1x8x32x8xf32>
    %14 = vector.shape_cast %13 : vector<1x8x32x8xf32> to vector<8x32x8xf32>
    %15 = vector.shape_cast %12 : vector<8x32x8xf32> to vector<1x8x32x8xf32>
    tpu.vector_store %arg5[%c0_7, %c0_8, %c0_9, %c0_10], %15 {strides = array<i32>} : memref<1x8x32x8xf32, #tpu.memory_space<vmem>>, vector<1x8x32x8xf32>,
    return
  }
  func.func @transform_0(%arg0: i32, %arg1: i32) -> (i32, i32, i32, i32) {
    %c0_i32 = arith.constant 0 : i32
    %c0_i32_0 = arith.constant 0 : i32
    %c0_i32_1 = arith.constant 0 : i32
    return %arg0, %arg1, %c0_i32, %c0_i32_0 : i32, i32, i32, i32
  }
  func.func @transform_1(%arg0: i32, %arg1: i32) -> (i32, i32) {
    %c0_i32 = arith.constant 0 : i32
    %c0_i32_0 = arith.constant 0 : i32
    %c0_i32_1 = arith.constant 0 : i32
    return %c0_i32, %c0_i32_0 : i32, i32
  }
  func.func @transform_2(%arg0: i32, %arg1: i32) -> (i32, i32) {
    %c0_i32 = arith.constant 0 : i32
    %c0_i32_0 = arith.constant 0 : i32
    %c0_i32_1 = arith.constant 0 : i32
    return %c0_i32, %c0_i32_0 : i32, i32
  }
  func.func @transform_3(%arg0: i32, %arg1: i32) -> (i32, i32, i32, i32) {
    %c0_i32 = arith.constant 0 : i32
    %c0_i32_0 = arith.constant 0 : i32
    %c0_i32_1 = arith.constant 0 : i32
    return %arg0, %arg1, %c0_i32, %c0_i32_0 : i32, i32, i32, i32
  }
}

</mosaic_0001>

<bundles_post_ra>
// kernel: _lambda_.3
= control target key start
LH: loop header
LB: loop body
LE: loop exit
PB: predicated region body
PF: predicated region fallthrough
CT: control target
= control target key end

     0   :  { %s6727_s21 = smov 0   ;;  %s6729_s22 = smov 0   ;;  %s7733_s0 = inlined_call_operand.vmem [shape: bf16[2,4,10,34,4], index: 0, kind: input, shape index: {}]   ;;  %s7734_s1 = inlined_call_operand.vmem [shape: bf16[9,4,4], index: 1, kind: input, shape index: {}]   ;;  %s7735_s2 = inlined_call_operand.vmem [shape: f32[1,4], index: 2, kind: input, shape index: {}]   ;;  %s7736_s3 = inlined_call_operand.vmem [shape: f32[1,4], index: 3, kind: input, shape index: {}]   ;;  %s7737_s4 = inlined_call_operand.vmem [shape: f32[1,4], index: 4, kind: input, shape index: {}]   ;;  %s7738_s5 = inlined_call_operand.vmem [shape: bf16[2,32,32,4], index: 5, kind: output, shape index: {0}]   ;;  %s7739_s6 = inlined_call_operand.vmem [shape: f32[2,4,2,4], index: 6, kind: output, shape index: {1}]  }
   0x1   :  { %s6731_s23 = smov 0   ;;  %s6733_s24 = smov 0  }
   0x2   :  { %s6735_s25 = smov 0  }
   0x3 LB: > { %s26_s3 = sadd.s32 1, %s6682_s23  ;;  %s29_s4 = sadd.s32 1, %s6686_s24  ;;  %s6690_s25 = sphi %s6735_s25, %s17_s25   ;;  %s6686_s24 = sphi %s6733_s24, %s7743_s24   ;;  %s6682_s23 = sphi %s6731_s23, %s7742_s23   ;;  %s6678_s22 = sphi %s6729_s22, %s7741_s22   ;;  %s6674_s21 = sphi %s6727_s21, %s7740_s21  }
   0x4   : > { %p27_p0 = scmp.ge.s32.totalorder %s26_s3, 4  ;;  %p5319_p1 = scmp.ge.s32.totalorder %s6690_s25, 1 }
   0x5   : > { %p237_p2 = scmp.lt.s32.totalorder %s6690_s25, 9 }
   0x6   : > { %s7745_s3 = smov (%p27_p0, %s26_s3), 0  ;;  %s7747_s4 = smov (!%p27_p0, %s29_s4), %s6686_s24 }
   0x7   : > { %p238_p3 = pnand %p5319_p1, %p237_p2  ;;  %p31_p4 = scmp.ge.s32.totalorder %s7747_s4, 2 }
   0x8   : > { %v6762_v0 = vld [vmem:[%s7734_s1 + $0x2] sm:$0x3] (!%p238_p3)  ;;  %vm422_vm0 = vcmask (!%p238_p3), 1041408   ;;  %p284_p5 = scmp.lt.s32.totalorder (!%p238_p3), %s6678_s22, 1  ;;  %p286_p6 = scmp.lt.s32.totalorder (!%p238_p3), %s6674_s21, 3  ;;  %vm415_vm2 = vcmask (!%p238_p3), 31744  }
   0x9   : > { %s7749_s4 = smov (%p31_p4, %s7747_s4), 0  ;;  %241 = sbr.rel (%p238_p3) target bundleno = 686 (0x2ae), region = 40 }
   0xa   : > { %6508 = vmatprep.subr.msk.bf16.mxu0 (!%p238_p3), %vm422_vm0, %v6762_v0  ;;  %v6769_v1 = vsel (!%p238_p3), %vm422_vm0, %v6762_v0, 0  ;;  %6517 = vmatprep.subr.msk.bf16.mxu1 (!%p238_p3), %vm422_vm0, %v6762_v0  ;;  %v6776_v2 = vld [vmem:[%s7734_s1] sm:$0x3] (!%p238_p3)  ;;  %vm394_vm1 = vsmask.f32 (!%p238_p3), 7424  ;;  %vm531_vm3 = vcmask (!%p238_p3), 1046528  }
   0xb   : > { %5821 = vmatpush3.bf16.msra.mxu0 (!%p238_p3), %v6769_v1  ;;  %5875 = vmatpush3.bf16.msra.mxu1 (!%p238_p3), %v6769_v1  ;;  %v6818_v29 = vsel (!%p238_p3), %vm422_vm0, %v6776_v2, 0  ;;  %v6826_v33 = vld [vmem:[%s7734_s1 + $0x4] sm:$0x3] (!%p238_p3)  ;;  %v6853_v40 = vld [vmem:[%s7734_s1 + $0x6] sm:$0x3] (!%p238_p3)  ;;  %vm1069_vm4 = vcmask (!%p238_p3), 27648  }
   0xc   : > { %6509 = vmatprep.subr.msk.bf16.mxu0 (!%p238_p3), %vm422_vm0, %v6776_v2  ;;  %6518 = vmatprep.subr.msk.bf16.mxu1 (!%p238_p3), %vm422_vm0, %v6776_v2  ;;  %v6846_v37 = vsel (!%p238_p3), %vm422_vm0, %v6826_v33, 0  ;;  %v6872_v46 = vsel (!%p238_p3), %vm422_vm0, %v6853_v40, 0  ;;  %v6881_v49 = vld [vmem:[%s7734_s1 + $0x8] sm:$0x3] (!%p238_p3)  ;;  %v6908_v58 = vld [vmem:[%s7734_s1 + $0xa] sm:$0x3] (!%p238_p3) }
   0xd   : > { %v6903_v57 = vsel (!%p238_p3), %vm422_vm0, %v6881_v49, 0  ;;  %vm5166_vm5 = vcmask (!%p238_p3), 24576  }
  0x10   : > { %s7751_s22 = smov (!%p284_p5, %s6678_s22), 1 }
  0x11   : > { %s6783_s30 = scalar_select %p286_p6, %s6674_s21, 3 }
  0x12   : > { %s6581_s7 = smul.u32 200, %s7751_s22  ;;  %s5323_s11 = sshll.u32 %s7751_s22, 7 }
  0x13   : > { %s6580_s8 = smul.u32 50, %s6783_s30 }
  0x15   : > { %s290_s9 = sadd.s32 %s6581_s7, %s6580_s8 }
  0x16   : > { %s5320_s10 = sshll.u32 %s290_s9, 2 }
  0x17   : > { %s6794_s13 = scalar_lea.vmem %s7733_s0, %s5320_s10  ;;  %s5321_s10 = sshll.u32 %s6674_s21, 3 }
  0x18   : > { %v6622_v3 = vld [vmem:[%s6794_s13] sm:$0xff]   ;;  %v6798_v4 = vld [vmem:[%s6794_s13 + $0x8] sm:$0xff]   ;;  %v6803_v9 = vld [vmem:[%s6794_s13 + $0x14] sm:$0xff]   ;;  %p296_p7 = scmp.lt.s32.totalorder %s5321_s10, 31 }
  0x19   : > { %v396_v5 = vshrl.u32 %v6622_v3, 16  ;;  %v398_v6 = vshll.u32 %v6622_v3, 16  ;;  %v403_v7 = vshll.u32 %v6798_v4, 16  ;;  %v407_v8 = vshrl.u32 %v6798_v4, 16  ;;  %v6806_v10 = vld [vmem:[%s6794_s13 + $0x1c] sm:$0xff]   ;;  %v6875_v47 = vld [vmem:[%s6794_s13 + $0x28] sm:$0xff]  }
  0x1a   : > { %v6626_v13 = vld [vmem:[%s6794_s13 + $0x10] ss:$0 sps:$4 sm:$0x11]   ;;  %v674_v14 = vshrl.u32 %v6803_v9, 16  ;;  %v676_v15 = vshll.u32 %v6803_v9, 16  ;;  %v680_v16 = vshll.u32 %v6806_v10, 16 }
  0x1b   : > { %v400_v11 = vrot.slane %v398_v6, 1  ;;  %v405_v12 = vrot.slane %v403_v7, 1  ;;  %v684_v17 = vshrl.u32 %v6806_v10, 16  ;;  %v411_v20 = vshll.u32 %v6626_v13, 16  ;;  %v6892_v51 = vld [vmem:[%s6794_s13 + $0x30] sm:$0xff]   ;;  %s7753_s10 = smov (!%p296_p7, %s5321_s10), 31 }
  0x1c   : > { %v6627_v21 = vld [vmem:[%s6794_s13 + $0x24] ss:$0 sps:$4 sm:$0x11]   ;;  %v678_v22 = vrot.slane %v676_v15, 1  ;;  %v682_v23 = vrot.slane %v680_v16, 1  ;;  %v532_v35 = vrot.slane %v6622_v3, 1 }
  0x1d   : > { %v401_v18 = vor.u32 %v400_v11, %v396_v5  ;;  %v409_v19 = vor.u32 %v407_v8, %v405_v12  ;;  %v413_v25 = vrot.slane %v411_v20, 1  ;;  %v688_v26 = vshll.u32 %v6627_v21, 16  ;;  %v6630_v59 = vld [vmem:[%s6794_s13 + $0x38] ss:$0 sps:$4 sm:$0x11]   ;;  %v6983_v16 = vld [vmem:[%s6794_s13 + $0x44] sm:$0xff]  }
  0x1e   : > { %v679_v27 = vor.u32 %v678_v22, %v674_v14  ;;  %v686_v28 = vor.u32 %v684_v17, %v682_v23  ;;  %v533_v36 = vrot.slane %v6798_v4, 1  ;;  %v754_v38 = vrot.slane %v6803_v9, 1  ;;  %v6940_v8 = vld [vmem:[%s7734_s1 + $0xc] sm:$0x3]  ;;  %v6971_v14 = vld [vmem:[%s7734_s1 + $0xe] sm:$0x3] }
  0x1f   : > { %v406_v24 = vsel %vm394_vm1, %v401_v18, %v405_v12  ;;  %v414_v30 = vsel %vm394_vm1, %v409_v19, %v413_v25  ;;  %v690_v31 = vrot.slane %v688_v26, 1  ;;  %v755_v39 = vrot.slane %v6806_v10, 1  ;;  %v6963_v12 = vld [vmem:[%s6794_s13 + $0x3c] sm:$0xff]   ;;  %s5322_s21 = sshll.u32 %s7753_s10, 2 }
  0x20   : > { %5822 = vmatprep.mubr.msk.bf16.mxu0 %vm415_vm2, %v406_v24  ;;  %v683_v32 = vsel %vm394_vm1, %v679_v27, %v682_v23  ;;  %v534_v41 = vsel %vm531_vm3, %v532_v35, %v533_v36  ;;  %v535_v43 = vrot.slane %v6626_v13, 1  ;;  %v757_v44 = vrot.slane %v6627_v21, 1  ;;  %v6999_v23 = vld [vmem:[%s7734_s1 + $0x10] sm:$0x3]  ;;  %s300_s12 = sadd.s32 %s5323_s11, %s5322_s21 }
  0x21   : > { %5823 = vmatmul.mubr.msk.bf16.vlgmr.msra.gmra.mrb[0].mxu0 %vm415_vm2, %v414_v30  ;;  %5876 = vmatprep.mubr.msk.bf16.mxu1 %vm415_vm2, %v683_v32  ;;  %v6831_v34 = vsel %vm394_vm1, %v686_v28, %v690_v31  ;;  %v756_v42 = vsel %vm531_vm3, %v754_v38, %v755_v39  ;;  %v898_v50 = vshll.u32 %v6875_v47, 16  ;;  %v896_v52 = vshrl.u32 %v6875_v47, 16  ;;  %v6633_v24 = vld [vmem:[%s6794_s13 + $0x4c] ss:$0 sps:$4 sm:$0x11]   ;;  %s5324_s16 = sshll.u32 %s300_s12, 2 }
  0x22   : > { %5827 = vmatpush3.bf16.msra.mxu0 %v6818_v29  ;;  %5877 = vmatmul.mubr.msk.bf16.vlgmr.msra.gmra.mrb[0].mxu1 %vm415_vm2, %v6831_v34  ;;  %v536_v45 = vsel %vm531_vm3, %v533_v36, %v535_v43  ;;  %v758_v48 = vsel %vm531_vm3, %v755_v39, %v757_v44  ;;  %v902_v54 = vshll.u32 %v6892_v51, 16  ;;  %v906_v61 = vshrl.u32 %v6892_v51, 16  ;;  %v7105_v43 = vld [vmem:[%s6794_s13 + $0x58] sm:$0xff]   ;;  %s7426_s19 = scalar_lea.vmem %s7738_s5, %s5324_s16 }
  0x23   : > { %5828 = vmatprep.mubr.msk.bf16.mxu0 %vm415_vm2, %v6622_v3  ;;  %5881 = vmatpush3.bf16.msra.mxu1 %v6818_v29  ;;  %v900_v53 = vrot.slane %v898_v50, 1  ;;  %v910_v62 = vshll.u32 %v6630_v59, 16  ;;  %v977_v5 = vrot.slane %v6892_v51, 1  ;;  %v6932_v6 = vsel %vm422_vm0, %v6908_v58, 0 }
  0x24   : > { %6510 = vmatprep.subr.msk.bf16.mxu0 %vm422_vm0, %v6826_v33  ;;  %5882 = vmatprep.mubr.msk.bf16.mxu1 %vm415_vm2, %v6803_v9  ;;  %v904_v56 = vrot.slane %v902_v54, 1  ;;  %v6960_v11 = vsel %vm422_vm0, %v6940_v8, 0  ;;  %v1490_v15 = vshll.u32 %v6963_v12, 16  ;;  %v1488_v17 = vshrl.u32 %v6963_v12, 16 }
  0x25   : > { %6519 = vmatprep.subr.msk.bf16.mxu1 %vm422_vm0, %v6826_v33  ;;  %v901_v55 = vor.u32 %v900_v53, %v896_v52  ;;  %v912_v3 = vrot.slane %v910_v62, 1  ;;  %v1494_v19 = vshll.u32 %v6983_v16, 16  ;;  %v6994_v22 = vsel %vm422_vm0, %v6971_v14, 0 }
  0x26   : > { %v908_v63 = vor.u32 %v906_v61, %v904_v56  ;;  %v1492_v18 = vrot.slane %v1490_v15, 1  ;;  %v1498_v26 = vshrl.u32 %v6983_v16, 16  ;;  %v1502_v27 = vshll.u32 %v6633_v24, 16 }
  0x27   : > { %v6914_v60 = vsel %vm394_vm1, %v901_v55, %v904_v56  ;;  %v1496_v21 = vrot.slane %v1494_v19, 1  ;;  %v1565_v31 = vrot.slane %v6963_v12, 1  ;;  %v1568_v38 = vrot.slane %v6633_v24, 1 }
  0x28   : > { %v6935_v7 = vsel %vm394_vm1, %v908_v63, %v912_v3  ;;  %v1493_v20 = vor.u32 %v1492_v18, %v1488_v17  ;;  %v1504_v30 = vrot.slane %v1502_v27, 1  ;;  %v2078_v53 = vshrl.u32 %v7105_v43, 16  ;;  %v7156_v3 = vld [vmem:[%s6794_s13 + $0x64] sm:$0xff]  }
  0x29   : > { %v1500_v28 = vor.u32 %v1498_v26, %v1496_v21  ;;  %v2725_v24 = vrot.slane %v7156_v3, 1 }
  0x2a   : > { %v7005_v25 = vsel %vm394_vm1, %v1493_v20, %v1496_v21 }
  0x2b   : > { %v7027_v35 = vsel %vm394_vm1, %v1500_v28, %v1504_v30 }
  0x2d   : > { %5829 = vmatmul.mubr.msk.bf16.vlgmr.msra.gmra.mrb[0].mxu0 %vm415_vm2, %v6798_v4  ;;  %v976_v4 = vrot.slane %v6875_v47, 1 }
  0x2e   : > { %5833 = vmatpush3.bf16.msra.mxu0 %v6846_v37  ;;  %5834 = vmatprep.mubr.msk.bf16.mxu0 %vm415_vm2, %v534_v41  ;;  %v7092_v41 = vld [vmem:[%s6794_s13 + $0x50] sm:$0xff]  }
  0x2f   : > { %5883 = vmatmul.mubr.msk.bf16.vlgmr.msra.gmra.mrb[0].mxu1 %vm415_vm2, %v6806_v10  ;;  %6511 = vmatprep.subr.msk.bf16.mxu0 %vm422_vm0, %v6853_v40  ;;  %v2068_v44 = vshrl.u32 %v7092_v41, 16 }
  0x30   : > { %5887 = vmatpush3.bf16.msra.mxu1 %v6846_v37  ;;  %5888 = vmatprep.mubr.msk.bf16.mxu1 %vm415_vm2, %v756_v42 }
  0x31   : > { %6520 = vmatprep.subr.msk.bf16.mxu1 %vm422_vm0, %v6853_v40 }
  0x39   : > { %5835 = vmatmul.mubr.msk.bf16.vlgmr.msra.gmra.mrb[0].mxu0 %vm415_vm2, %v536_v45 }
  0x3a   : > { %5839 = vmatpush3.bf16.msra.mxu0 %v6872_v46  ;;  %5840 = vmatprep.mubr.msk.bf16.mxu0 %vm415_vm2, %v6803_v9  ;;  %v6945_v9 = vsel %vm531_vm3, %v976_v4, %v977_v5 }
  0x3b   : > { %5889 = vmatmul.mubr.msk.bf16.vlgmr.msra.gmra.mrb[0].mxu1 %vm415_vm2, %v758_v48  ;;  %6512 = vmatprep.subr.msk.bf16.mxu0 %vm422_vm0, %v6881_v49 }
  0x3c   : > { %5893 = vmatpush3.bf16.msra.mxu1 %v6872_v46  ;;  %5894 = vmatprep.mubr.msk.bf16.mxu1 %vm415_vm2, %v6875_v47 }
  0x3d   : > { %6521 = vmatprep.subr.msk.bf16.mxu1 %vm422_vm0, %v6881_v49 }
  0x45   : > { %5841 = vmatmul.mubr.msk.bf16.vlgmr.msra.gmra.mrb[0].mxu0 %vm415_vm2, %v6806_v10  ;;  %v979_v10 = vrot.slane %v6630_v59, 1  ;;  %v2145_v59 = vrot.slane %v7092_v41, 1 }
  0x46   : > { %5845 = vmatpush3.bf16.msra.mxu0 %v6903_v57  ;;  %5846 = vmatprep.mubr.msk.bf16.mxu0 %vm415_vm2, %v683_v32  ;;  %v1566_v32 = vrot.slane %v6983_v16, 1 }
  0x47   : > { %5895 = vmatmul.mubr.msk.bf16.vlgmr.msra.gmra.mrb[0].mxu1 %vm415_vm2, %v6892_v51  ;;  %6513 = vmatprep.subr.msk.bf16.mxu0 %vm422_vm0, %v6908_v58  ;;  %v6966_v13 = vsel %vm531_vm3, %v977_v5, %v979_v10  ;;  %v2650_v5 = vshll.u32 %v7156_v3, 16 }
  0x48   : > { %5899 = vmatpush3.bf16.msra.mxu1 %v6903_v57  ;;  %5900 = vmatprep.mubr.msk.bf16.mxu1 %vm415_vm2, %v6914_v60  ;;  %v7032_v36 = vsel %vm531_vm3, %v1565_v31, %v1566_v32  ;;  %v7047_v39 = vsel %vm531_vm3, %v1566_v32, %v1568_v38  ;;  %v7268_v31 = vld [vmem:[%s6794_s13 + $0x78] sm:$0xff]  }
  0x49   : > { %6522 = vmatprep.subr.msk.bf16.mxu1 %vm422_vm0, %v6908_v58  ;;  %v2652_v10 = vrot.slane %v2650_v5, 1  ;;  %v3230_v32 = vshll.u32 %v7268_v31, 16 }
  0x4b   : > { %v3232_v38 = vrot.slane %v3230_v32, 1 }
  0x51   : > { %5847 = vmatmul.mubr.msk.bf16.vlgmr.msra.gmra.mrb[0].mxu0 %vm415_vm2, %v6831_v34  ;;  %v7024_v34 = vsel %vm422_vm0, %v6999_v23, 0 }
  0x52   : > { %5851 = vmatpush3.bf16.msra.mxu0 %v6932_v6  ;;  %5852 = vmatprep.mubr.msk.bf16.mxu0 %vm415_vm2, %v756_v42  ;;  %v2070_v42 = vshll.u32 %v7092_v41, 16 }
  0x53   : > { %5901 = vmatmul.mubr.msk.bf16.vlgmr.msra.gmra.mrb[0].mxu1 %vm415_vm2, %v6935_v7  ;;  %6514 = vmatprep.subr.msk.bf16.mxu0 %vm422_vm0, %v6940_v8 }
  0x54   : > { %5905 = vmatpush3.bf16.msra.mxu1 %v6932_v6  ;;  %5906 = vmatprep.mubr.msk.bf16.mxu1 %vm415_vm2, %v6945_v9  ;;  %v2072_v45 = vrot.slane %v2070_v42, 1 }
  0x55   : > { %6523 = vmatprep.subr.msk.bf16.mxu1 %vm422_vm0, %v6940_v8 }
  0x5d   : > { %5853 = vmatmul.mubr.msk.bf16.vlgmr.msra.gmra.mrb[0].mxu0 %vm415_vm2, %v758_v48  ;;  %v2073_v48 = vor.u32 %v2072_v45, %v2068_v44 }
  0x5e   : > { %5857 = vmatpush3.bf16.msra.mxu0 %v6960_v11  ;;  %5858 = vmatprep.mubr.msk.bf16.mxu0 %vm415_vm2, %v6875_v47 }
  0x5f   : > { %5907 = vmatmul.mubr.msk.bf16.vlgmr.msra.gmra.mrb[0].mxu1 %vm415_vm2, %v6966_v13  ;;  %6515 = vmatprep.subr.msk.bf16.mxu0 %vm422_vm0, %v6971_v14 }
  0x60   : > { %5911 = vmatpush3.bf16.msra.mxu1 %v6960_v11  ;;  %5912 = vmatprep.mubr.msk.bf16.mxu1 %vm415_vm2, %v6963_v12 }
  0x61   : > { %6524 = vmatprep.subr.msk.bf16.mxu1 %vm422_vm0, %v6971_v14 }
  0x69   : > { %5859 = vmatmul.mubr.msk.bf16.vlgmr.msra.gmra.mrb[0].mxu0 %vm415_vm2, %v6892_v51 }
  0x6a   : > { %5863 = vmatpush3.bf16.msra.mxu0 %v6994_v22  ;;  %5864 = vmatprep.mubr.msk.bf16.mxu0 %vm415_vm2, %v6914_v60 }
  0x6b   : > { %5913 = vmatmul.mubr.msk.bf16.vlgmr.msra.gmra.mrb[0].mxu1 %vm415_vm2, %v6983_v16  ;;  %6516 = vmatprep.subr.msk.bf16.mxu0 %vm422_vm0, %v6999_v23 }
  0x6c   : > { %5917 = vmatpush3.bf16.msra.mxu1 %v6994_v22  ;;  %5918 = vmatprep.mubr.msk.bf16.mxu1 %vm415_vm2, %v7005_v25 }
  0x6d   : > { %6525 = vmatprep.subr.msk.bf16.mxu1 %vm422_vm0, %v6999_v23 }
  0x75   : > { %5865 = vmatmul.mubr.msk.bf16.vlgmr.msra.gmra.mrb[0].mxu0 %vm415_vm2, %v6935_v7 }
  0x76   : > { %5869 = vmatpush3.bf16.msra.mxu0 %v7024_v34  ;;  %5870 = vmatprep.mubr.msk.bf16.mxu0 %vm415_vm2, %v6945_v9 }
  0x77   : > { %5919 = vmatmul.mubr.msk.bf16.vlgmr.msra.gmra.mrb[0].mxu1 %vm415_vm2, %v7027_v35  ;;  %6526 = vmatprep.subr.msk.bf16.mxu0 %vm422_vm0, %v6762_v0 }
  0x78   : > { %5923 = vmatpush3.bf16.msra.mxu1 %v7024_v34  ;;  %5924 = vmatprep.mubr.msk.bf16.mxu1 %vm415_vm2, %v7032_v36 }
  0x79   : > { %6535 = vmatprep.subr.msk.bf16.mxu1 %vm422_vm0, %v6762_v0 }
  0x81   : > { %5871 = vmatmul.mubr.msk.bf16.vlgmr.msra.gmra.mrb[0].mxu0 %vm415_vm2, %v6966_v13 }
  0x82   : > { %5929 = vmatpush3.bf16.msra.mxu0 %v6769_v1  ;;  %5930 = vmatprep.mubr.msk.bf16.mxu0 %vm415_vm2, %v6914_v60  ;;  %v2146_v60 = vrot.slane %v7105_v43, 1 }
  0x83   : > { %5925 = vmatmul.mubr.msk.bf16.vlgmr.msra.gmra.mrb[0].mxu1 %vm415_vm2, %v7047_v39  ;;  %6527 = vmatprep.subr.msk.bf16.mxu0 %vm422_vm0, %v6776_v2 }
  0x84   : > { %5983 = vmatpush3.bf16.msra.mxu1 %v6769_v1  ;;  %5984 = vmatprep.mubr.msk.bf16.mxu1 %vm415_vm2, %v7005_v25  ;;  %v7141_v62 = vsel %vm531_vm3, %v2145_v59, %v2146_v60 }
  0x85   : > { %6536 = vmatprep.subr.msk.bf16.mxu1 %vm422_vm0, %v6776_v2 }
  0x89   : > { %5931 = vmatmul.mubr.msk.bf16.vlgmr.msra.gmra.mrb[4].mxu0 %vm415_vm2, %v6935_v7  ;;  %v7172_v7 = vld [vmem:[%s6794_s13 + $0x6c] sm:$0xff]  }
  0x8a   : > { %5935 = vmatpush3.bf16.msra.mxu0 %v6818_v29  ;;  %5936 = vmatprep.mubr.msk.bf16.mxu0 %vm415_vm2, %v6875_v47  ;;  %v2074_v47 = vshll.u32 %v7105_v43, 16  ;;  %v2658_v18 = vshrl.u32 %v7172_v7, 16 }
  0x8b   : > { %5985 = vmatmul.mubr.msk.bf16.vlgmr.msra.gmra.mrb[4].mxu1 %vm415_vm2, %v7027_v35  ;;  %6528 = vmatprep.subr.msk.bf16.mxu0 %vm422_vm0, %v6826_v33 }
  0x8c   : > { %5989 = vmatpush3.bf16.msra.mxu1 %v6818_v29  ;;  %5990 = vmatprep.mubr.msk.bf16.mxu1 %vm415_vm2, %v6963_v12  ;;  %v2076_v50 = vrot.slane %v2074_v47, 1 }
  0x8d   : > { %6537 = vmatprep.subr.msk.bf16.mxu1 %vm422_vm0, %v6826_v33 }
  0x8e   : > { %v7118_v52 = vsel %vm394_vm1, %v2073_v48, %v2076_v50  ;;  %v2080_v55 = vor.u32 %v2078_v53, %v2076_v50 }
  0x95   : > { %5937 = vmatmul.mubr.msk.bf16.vlgmr.msra.gmra.mrb[4].mxu0 %vm415_vm2, %v6892_v51  ;;  %v6636_v51 = vld [vmem:[%s6794_s13 + $0x60] ss:$0 sps:$4 sm:$0x11]  }
  0x96   : > { %5941 = vmatpush3.bf16.msra.mxu0 %v6846_v37  ;;  %5942 = vmatprep.mubr.msk.bf16.mxu0 %vm415_vm2, %v6945_v9  ;;  %v2082_v54 = vshll.u32 %v6636_v51, 16  ;;  %v2148_v63 = vrot.slane %v6636_v51, 1  ;;  %v2648_v9 = vshrl.u32 %v7156_v3, 16  ;;  %v3305_v51 = vrot.slane %v7268_v31, 1 }
  0x97   : > { %5991 = vmatmul.mubr.msk.bf16.vlgmr.msra.gmra.mrb[4].mxu1 %vm415_vm2, %v6983_v16  ;;  %6529 = vmatprep.subr.msk.bf16.mxu0 %vm422_vm0, %v6853_v40 }
  0x98   : > { %5995 = vmatpush3.bf16.msra.mxu1 %v6846_v37  ;;  %5996 = vmatprep.mubr.msk.bf16.mxu1 %vm415_vm2, %v7032_v36  ;;  %v2084_v56 = vrot.slane %v2082_v54, 1  ;;  %v7159_v4 = vsel %vm531_vm3, %v2146_v60, %v2148_v63 }
  0x99   : > { %6538 = vmatprep.subr.msk.bf16.mxu1 %vm422_vm0, %v6853_v40 }
  0x9a   : > { %v7136_v61 = vsel %vm394_vm1, %v2080_v55, %v2084_v56  ;;  %v7332_v56 = vld [vmem:[%s6794_s13 + $0x8c] sm:$0xff]  }
  0x9b   : > { %v3810_v60 = vshll.u32 %v7332_v56, 16 }
  0x9d   : > { %v3812_v63 = vrot.slane %v3810_v60, 1 }
  0xa1   : > { %5943 = vmatmul.mubr.msk.bf16.vlgmr.msra.gmra.mrb[4].mxu0 %vm415_vm2, %v6966_v13  ;;  %v2653_v13 = vor.u32 %v2652_v10, %v2648_v9 }
  0xa2   : > { %5947 = vmatpush3.bf16.msra.mxu0 %v6872_v46  ;;  %5948 = vmatprep.mubr.msk.bf16.mxu0 %vm415_vm2, %v6963_v12  ;;  %v2654_v12 = vshll.u32 %v7172_v7, 16 }
  0xa3   : > { %5997 = vmatmul.mubr.msk.bf16.vlgmr.msra.gmra.mrb[4].mxu1 %vm415_vm2, %v7047_v39  ;;  %6530 = vmatprep.subr.msk.bf16.mxu0 %vm422_vm0, %v6881_v49 }
  0xa4   : > { %6001 = vmatpush3.bf16.msra.mxu1 %v6872_v46  ;;  %6002 = vmatprep.mubr.msk.bf16.mxu1 %vm415_vm2, %v7092_v41  ;;  %v2656_v15 = vrot.slane %v2654_v12, 1 }
  0xa5   : > { %6539 = vmatprep.subr.msk.bf16.mxu1 %vm422_vm0, %v6881_v49 }
  0xa6   : > { %v7185_v17 = vsel %vm394_vm1, %v2653_v13, %v2656_v15  ;;  %v2660_v20 = vor.u32 %v2658_v18, %v2656_v15 }
  0xad   : > { %5949 = vmatmul.mubr.msk.bf16.vlgmr.msra.gmra.mrb[4].mxu0 %vm415_vm2, %v6983_v16  ;;  %v6639_v16 = vld [vmem:[%s6794_s13 + $0x74] ss:$0 sps:$4 sm:$0x11]  }
  0xae   : > { %5953 = vmatpush3.bf16.msra.mxu0 %v6903_v57  ;;  %5954 = vmatprep.mubr.msk.bf16.mxu0 %vm415_vm2, %v7005_v25  ;;  %v2662_v19 = vshll.u32 %v6639_v16, 16  ;;  %v2726_v25 = vrot.slane %v7172_v7, 1  ;;  %v2728_v28 = vrot.slane %v6639_v16, 1  ;;  %v3885_v16 = vrot.slane %v7332_v56, 1 }
  0xaf   : > { %6003 = vmatmul.mubr.msk.bf16.vlgmr.msra.gmra.mrb[4].mxu1 %vm415_vm2, %v7105_v43  ;;  %6531 = vmatprep.subr.msk.bf16.mxu0 %vm422_vm0, %v6908_v58 }
  0xb0   : > { %6007 = vmatpush3.bf16.msra.mxu1 %v6903_v57  ;;  %6008 = vmatprep.mubr.msk.bf16.mxu1 %vm415_vm2, %v7118_v52  ;;  %v2664_v21 = vrot.slane %v2662_v19, 1  ;;  %v7208_v27 = vsel %vm531_vm3, %v2725_v24, %v2726_v25  ;;  %v7223_v30 = vsel %vm531_vm3, %v2726_v25, %v2728_v28  ;;  %v7409_v24 = vld [vmem:[%s7735_s2] ss:$0 sm:$0xff] }
  0xb1   : > { %6540 = vmatprep.subr.msk.bf16.mxu1 %vm422_vm0, %v6908_v58 }
  0xb2   : > { %v7203_v26 = vsel %vm394_vm1, %v2660_v20, %v2664_v21 }
  0xb9   : > { %5955 = vmatmul.mubr.msk.bf16.vlgmr.msra.gmra.mrb[4].mxu0 %vm415_vm2, %v7027_v35  ;;  %v7281_v35 = vld [vmem:[%s6794_s13 + $0x80] sm:$0xff]  }
  0xba   : > { %5959 = vmatpush3.bf16.msra.mxu0 %v6932_v6  ;;  %5960 = vmatprep.mubr.msk.bf16.mxu0 %vm415_vm2, %v7032_v36  ;;  %v3228_v36 = vshrl.u32 %v7268_v31, 16  ;;  %v3238_v45 = vshrl.u32 %v7281_v35, 16 }
  0xbb   : > { %6009 = vmatmul.mubr.msk.bf16.vlgmr.msra.gmra.mrb[4].mxu1 %vm415_vm2, %v7136_v61  ;;  %6532 = vmatprep.subr.msk.bf16.mxu0 %vm422_vm0, %v6940_v8 }
  0xbc   : > { %6013 = vmatpush3.bf16.msra.mxu1 %v6932_v6  ;;  %6014 = vmatprep.mubr.msk.bf16.mxu1 %vm415_vm2, %v7141_v62 }
  0xbd   : > { %6541 = vmatprep.subr.msk.bf16.mxu1 %vm422_vm0, %v6940_v8 }
  0xc5   : > { %5961 = vmatmul.mubr.msk.bf16.vlgmr.msra.gmra.mrb[4].mxu0 %vm415_vm2, %v7047_v39  ;;  %v3234_v39 = vshll.u32 %v7281_v35, 16 }
  0xc6   : > { %5965 = vmatpush3.bf16.msra.mxu0 %v6960_v11  ;;  %5966 = vmatprep.mubr.msk.bf16.mxu0 %vm415_vm2, %v7092_v41 }
  0xc7   : > { %6015 = vmatmul.mubr.msk.bf16.vlgmr.msra.gmra.mrb[4].mxu1 %vm415_vm2, %v7159_v4  ;;  %6533 = vmatprep.subr.msk.bf16.mxu0 %vm422_vm0, %v6971_v14  ;;  %v3236_v42 = vrot.slane %v3234_v39, 1 }
  0xc8   : > { %6019 = vmatpush3.bf16.msra.mxu1 %v6960_v11  ;;  %6020 = vmatprep.mubr.msk.bf16.mxu1 %vm415_vm2, %v7156_v3 }
  0xc9   : > { %6542 = vmatprep.subr.msk.bf16.mxu1 %vm422_vm0, %v6971_v14  ;;  %v3240_v48 = vor.u32 %v3238_v45, %v3236_v42 }
  0xd1   : > { %5967 = vmatmul.mubr.msk.bf16.vlgmr.msra.gmra.mrb[4].mxu0 %vm415_vm2, %v7105_v43 }
  0xd2   : > { %5971 = vmatpush3.bf16.msra.mxu0 %v6994_v22  ;;  %5972 = vmatprep.mubr.msk.bf16.mxu0 %vm415_vm2, %v7118_v52 }
  0xd3   : > { %6021 = vmatmul.mubr.msk.bf16.vlgmr.msra.gmra.mrb[4].mxu1 %vm415_vm2, %v7172_v7  ;;  %6534 = vmatprep.subr.msk.bf16.mxu0 %vm422_vm0, %v6999_v23 }
  0xd4   : > { %6025 = vmatpush3.bf16.msra.mxu1 %v6994_v22  ;;  %6026 = vmatprep.mubr.msk.bf16.mxu1 %vm415_vm2, %v7185_v17 }
  0xd5   : > { %6543 = vmatprep.subr.msk.bf16.mxu1 %vm422_vm0, %v6999_v23 }
  0xdd   : > { %5973 = vmatmul.mubr.msk.bf16.vlgmr.msra.gmra.mrb[4].mxu0 %vm415_vm2, %v7136_v61 }
  0xde   : > { %5977 = vmatpush3.bf16.msra.mxu0 %v7024_v34  ;;  %5978 = vmatprep.mubr.msk.bf16.mxu0 %vm415_vm2, %v7141_v62 }
  0xdf   : > { %6027 = vmatmul.mubr.msk.bf16.vlgmr.msra.gmra.mrb[4].mxu1 %vm415_vm2, %v7203_v26  ;;  %6544 = vmatprep.subr.msk.bf16.mxu0 %vm422_vm0, %v6762_v0 }
  0xe0   : > { %6031 = vmatpush3.bf16.msra.mxu1 %v7024_v34  ;;  %6032 = vmatprep.mubr.msk.bf16.mxu1 %vm415_vm2, %v7208_v27 }
  0xe1   : > { %6553 = vmatprep.subr.msk.bf16.mxu1 %vm422_vm0, %v6762_v0 }
  0xe9   : > { %5979 = vmatmul.mubr.msk.bf16.vlgmr.msra.gmra.mrb[4].mxu0 %vm415_vm2, %v7159_v4 }
  0xea   : > { %6037 = vmatpush3.bf16.msra.mxu0 %v6769_v1  ;;  %6038 = vmatprep.mubr.msk.bf16.mxu0 %vm415_vm2, %v7118_v52  ;;  %v3306_v52 = vrot.slane %v7281_v35, 1 }
  0xeb   : > { %6033 = vmatmul.mubr.msk.bf16.vlgmr.msra.gmra.mrb[4].mxu1 %vm415_vm2, %v7223_v30  ;;  %6545 = vmatprep.subr.msk.bf16.mxu0 %vm422_vm0, %v6776_v2 }
  0xec   : > { %6091 = vmatpush3.bf16.msra.mxu1 %v6769_v1  ;;  %6092 = vmatprep.mubr.msk.bf16.mxu1 %vm415_vm2, %v7185_v17  ;;  %v7317_v54 = vsel %vm531_vm3, %v3305_v51, %v3306_v52 }
  0xed   : > { %6554 = vmatprep.subr.msk.bf16.mxu1 %vm422_vm0, %v6776_v2 }
  0xf1   : > { %6039 = vmatmul.mubr.msk.bf16.vlgmr.msra.gmra.mrb[8].mxu0 %vm415_vm2, %v7136_v61  ;;  %v7348_v61 = vld [vmem:[%s6794_s13 + $0x94] sm:$0xff]  }
  0xf2   : > { %6043 = vmatpush3.bf16.msra.mxu0 %v6818_v29  ;;  %6044 = vmatprep.mubr.msk.bf16.mxu0 %vm415_vm2, %v7092_v41  ;;  %v3233_v41 = vor.u32 %v3232_v38, %v3228_v36  ;;  %v3818_v10 = vshrl.u32 %v7348_v61, 16 }
  0xf3   : > { %6093 = vmatmul.mubr.msk.bf16.vlgmr.msra.gmra.mrb[8].mxu1 %vm415_vm2, %v7203_v26  ;;  %6546 = vmatprep.subr.msk.bf16.mxu0 %vm422_vm0, %v6826_v33 }
  0xf4   : > { %6097 = vmatpush3.bf16.msra.mxu1 %v6818_v29  ;;  %6098 = vmatprep.mubr.msk.bf16.mxu1 %vm415_vm2, %v7156_v3  ;;  %v7294_v44 = vsel %vm394_vm1, %v3233_v41, %v3236_v42 }
  0xf5   : > { %6555 = vmatprep.subr.msk.bf16.mxu1 %vm422_vm0, %v6826_v33 }
  0xfd   : > { %6045 = vmatmul.mubr.msk.bf16.vlgmr.msra.gmra.mrb[8].mxu0 %vm415_vm2, %v7105_v43  ;;  %v6642_v43 = vld [vmem:[%s6794_s13 + $0x88] ss:$0 sps:$4 sm:$0x11]  }
  0xfe   : > { %6049 = vmatpush3.bf16.msra.mxu0 %v6846_v37  ;;  %6050 = vmatprep.mubr.msk.bf16.mxu0 %vm415_vm2, %v7141_v62  ;;  %v3242_v47 = vshll.u32 %v6642_v43, 16  ;;  %v3308_v55 = vrot.slane %v6642_v43, 1  ;;  %v3808_v62 = vshrl.u32 %v7332_v56, 16 }
  0xff   : > { %6099 = vmatmul.mubr.msk.bf16.vlgmr.msra.gmra.mrb[8].mxu1 %vm415_vm2, %v7172_v7  ;;  %6547 = vmatprep.subr.msk.bf16.mxu0 %vm422_vm0, %v6853_v40 }
 0x100   : > { %6103 = vmatpush3.bf16.msra.mxu1 %v6846_v37  ;;  %6104 = vmatprep.mubr.msk.bf16.mxu1 %vm415_vm2, %v7208_v27  ;;  %v3244_v50 = vrot.slane %v3242_v47, 1  ;;  %v7335_v59 = vsel %vm531_vm3, %v3306_v52, %v3308_v55 }
 0x101   : > { %6556 = vmatprep.subr.msk.bf16.mxu1 %vm422_vm0, %v6853_v40 }
 0x102   : > { %v7312_v53 = vsel %vm394_vm1, %v3240_v48, %v3244_v50 }
 0x109   : > { %6051 = vmatmul.mubr.msk.bf16.vlgmr.msra.gmra.mrb[8].mxu0 %vm415_vm2, %v7159_v4  ;;  %v3813_v4 = vor.u32 %v3812_v63, %v3808_v62 }
 0x10a   : > { %6055 = vmatpush3.bf16.msra.mxu0 %v6872_v46  ;;  %6056 = vmatprep.mubr.msk.bf16.mxu0 %vm415_vm2, %v7156_v3  ;;  %v3814_v3 = vshll.u32 %v7348_v61, 16 }
 0x10b   : > { %6105 = vmatmul.mubr.msk.bf16.vlgmr.msra.gmra.mrb[8].mxu1 %vm415_vm2, %v7223_v30  ;;  %6548 = vmatprep.subr.msk.bf16.mxu0 %vm422_vm0, %v6881_v49 }
 0x10c   : > { %6109 = vmatpush3.bf16.msra.mxu1 %v6872_v46  ;;  %6110 = vmatprep.mubr.msk.bf16.mxu1 %vm415_vm2, %v7268_v31  ;;  %v3816_v5 = vrot.slane %v3814_v3, 1 }
 0x10d   : > { %6557 = vmatprep.subr.msk.bf16.mxu1 %vm422_vm0, %v6881_v49 }
 0x10e   : > { %v7361_v9 = vsel %vm394_vm1, %v3813_v4, %v3816_v5  ;;  %v3820_v13 = vor.u32 %v3818_v10, %v3816_v5 }
 0x115   : > { %6057 = vmatmul.mubr.msk.bf16.vlgmr.msra.gmra.mrb[8].mxu0 %vm415_vm2, %v7172_v7  ;;  %v6645_v7 = vld [vmem:[%s6794_s13 + $0x9c] ss:$0 sps:$4 sm:$0x11]  }
 0x116   : > { %6061 = vmatpush3.bf16.msra.mxu0 %v6903_v57  ;;  %6062 = vmatprep.mubr.msk.bf16.mxu0 %vm415_vm2, %v7185_v17  ;;  %v3822_v12 = vshll.u32 %v6645_v7, 16  ;;  %v3886_v17 = vrot.slane %v7348_v61, 1  ;;  %v3888_v20 = vrot.slane %v6645_v7, 1 }
 0x117   : > { %6111 = vmatmul.mubr.msk.bf16.vlgmr.msra.gmra.mrb[8].mxu1 %vm415_vm2, %v7281_v35  ;;  %6549 = vmatprep.subr.msk.bf16.mxu0 %vm422_vm0, %v6908_v58 }
 0x118   : > { %6115 = vmatpush3.bf16.msra.mxu1 %v6903_v57  ;;  %6116 = vmatprep.mubr.msk.bf16.mxu1 %vm415_vm2, %v7294_v44  ;;  %v3824_v15 = vrot.slane %v3822_v12, 1  ;;  %v7385_v19 = vsel %vm531_vm3, %v3885_v16, %v3886_v17  ;;  %v7401_v21 = vsel %vm531_vm3, %v3886_v17, %v3888_v20 }
 0x119   : > { %6558 = vmatprep.subr.msk.bf16.mxu1 %vm422_vm0, %v6908_v58 }
 0x11a   : > { %v7380_v18 = vsel %vm394_vm1, %v3820_v13, %v3824_v15 }
 0x121   : > { %6063 = vmatmul.mubr.msk.bf16.vlgmr.msra.gmra.mrb[8].mxu0 %vm415_vm2, %v7203_v26 }
 0x122   : > { %6067 = vmatpush3.bf16.msra.mxu0 %v6932_v6  ;;  %6068 = vmatprep.mubr.msk.bf16.mxu0 %vm415_vm2, %v7208_v27 }
 0x123   : > { %6117 = vmatmul.mubr.msk.bf16.vlgmr.msra.gmra.mrb[8].mxu1 %vm415_vm2, %v7312_v53  ;;  %6550 = vmatprep.subr.msk.bf16.mxu0 %vm422_vm0, %v6940_v8 }
 0x124   : > { %6121 = vmatpush3.bf16.msra.mxu1 %v6932_v6  ;;  %6122 = vmatprep.mubr.msk.bf16.mxu1 %vm415_vm2, %v7317_v54 }
 0x125   : > { %6559 = vmatprep.subr.msk.bf16.mxu1 %vm422_vm0, %v6940_v8 }
 0x12d   : > { %6069 = vmatmul.mubr.msk.bf16.vlgmr.msra.gmra.mrb[8].mxu0 %vm415_vm2, %v7223_v30 }
 0x12e   : > { %6073 = vmatpush3.bf16.msra.mxu0 %v6960_v11  ;;  %6074 = vmatprep.mubr.msk.bf16.mxu0 %vm415_vm2, %v7268_v31 }
 0x12f   : > { %6123 = vmatmul.mubr.msk.bf16.vlgmr.msra.gmra.mrb[8].mxu1 %vm415_vm2, %v7335_v59  ;;  %6551 = vmatprep.subr.msk.bf16.mxu0 %vm422_vm0, %v6971_v14 }
 0x130   : > { %6127 = vmatpush3.bf16.msra.mxu1 %v6960_v11  ;;  %6128 = vmatprep.mubr.msk.bf16.mxu1 %vm415_vm2, %v7332_v56 }
 0x131   : > { %6560 = vmatprep.subr.msk.bf16.mxu1 %vm422_vm0, %v6971_v14 }
 0x139   : > { %6075 = vmatmul.mubr.msk.bf16.vlgmr.msra.gmra.mrb[8].mxu0 %vm415_vm2, %v7281_v35 }
 0x13a   : > { %6079 = vmatpush3.bf16.msra.mxu0 %v6994_v22  ;;  %6080 = vmatprep.mubr.msk.bf16.mxu0 %vm415_vm2, %v7294_v44 }
 0x13b   : > { %6129 = vmatmul.mubr.msk.bf16.vlgmr.msra.gmra.mrb[8].mxu1 %vm415_vm2, %v7348_v61  ;;  %6552 = vmatprep.subr.msk.bf16.mxu0 %vm422_vm0, %v6999_v23 }
 0x13c   : > { %6133 = vmatpush3.bf16.msra.mxu1 %v6994_v22  ;;  %6134 = vmatprep.mubr.msk.bf16.mxu1 %vm415_vm2, %v7361_v9 }
 0x13d   : > { %6561 = vmatprep.subr.msk.bf16.mxu1 %vm422_vm0, %v6999_v23 }
 0x145   : > { %6081 = vmatmul.mubr.msk.bf16.vlgmr.msra.gmra.mrb[8].mxu0 %vm415_vm2, %v7312_v53 }
 0x146   : > { %6085 = vmatpush3.bf16.msra.mxu0 %v7024_v34  ;;  %6086 = vmatprep.mubr.msk.bf16.mxu0 %vm415_vm2, %v7317_v54 }
 0x147   : > { %6135 = vmatmul.mubr.msk.bf16.vlgmr.msra.gmra.mrb[8].mxu1 %vm415_vm2, %v7380_v18  ;;  %6562 = vmatprep.subr.msk.bf16.mxu0 %vm422_vm0, %v6762_v0 }
 0x148   : > { %6139 = vmatpush3.bf16.msra.mxu1 %v7024_v34  ;;  %6140 = vmatprep.mubr.msk.bf16.mxu1 %vm415_vm2, %v7385_v19 }
 0x149   : > { %6571 = vmatprep.subr.msk.bf16.mxu1 %vm422_vm0, %v6762_v0 }
 0x151   : > { %6087 = vmatmul.mubr.msk.bf16.vlgmr.msra.gmra.mrb[8].mxu0 %vm415_vm2, %v7335_v59 }
 0x152   : > { %6145 = vmatpush3.bf16.msra.mxu0 %v6769_v1  ;;  %6146 = vmatprep.mubr.msk.bf16.mxu0 %vm415_vm2, %v7294_v44 }
 0x153   : > { %6141 = vmatmul.mubr.msk.bf16.vlgmr.msra.gmra.mrb[8].mxu1 %vm415_vm2, %v7401_v21  ;;  %6563 = vmatprep.subr.msk.bf16.mxu0 %vm422_vm0, %v6776_v2 }
 0x154   : > { %6199 = vmatpush3.bf16.msra.mxu1 %v6769_v1  ;;  %v5872_v0 = vpop.f32.mrb[0].mxu0  ;;  %6200 = vmatprep.mubr.msk.bf16.mxu1 %vm415_vm2, %v7361_v9 }
 0x155   : > { %v1051_v25 = vadd.f32 %v5872_v0, %v7409_v24  ;;  %v1024_v26 = vpop.f32.mrb[1].mxu0  ;;  %6572 = vmatprep.subr.msk.bf16.mxu1 %vm422_vm0, %v6776_v2 }
 0x156   : > { %v5926_v27 = vpop.f32.mrb[0].mxu1  ;;  %v1049_v1 = vadd.f32 %v7409_v24, %v1024_v26  ;;  %v5873_v28 = vpop.f32.mrb[2].mxu0 }
 0x157   : > { %v5574_v30 = vpack.c.bf16 %v1051_v25, %v1051_v25  ;;  %v1631_v32 = vadd.f32 %v5926_v27, %v7409_v24  ;;  %v1610_v36 = vpop.f32.mrb[1].mxu1  ;;  %v1027_v38 = vpop.f32.mrb[3].mxu0  ;;  %v1052_v47 = vadd.f32 %v5873_v28, %v7409_v24  ;;  %v1077_v51 = vsel %vm415_vm2, %v1051_v25, 0.0 }
 0x158   : > { %v5572_v39 = vpack.c.bf16 %v1049_v1, %v1049_v1  ;;  %v1629_v2 = vadd.f32 %v7409_v24, %v1610_v36  ;;  %v5927_v41 = vpop.f32.mrb[2].mxu1  ;;  %v1088_v44 = vmul.f32 %v1049_v1, %v1049_v1  ;;  %v1050_v50 = vadd.f32 %v7409_v24, %v1027_v38 }
 0x159   : > { %1072 = vst.msk [vmem:[%s7426_s19 + $0x8] sm:$0xf] %vm1069_vm4, %v5574_v30  ;;  %v5578_v42 = vpack.c.bf16 %v1631_v32, %v1631_v32  ;;  %v1613_v43 = vpop.f32.mrb[3].mxu1  ;;  %6147 = vmatmul.mubr.msk.bf16.vlgmr.msra.gmra.mrb[12].mxu0 %vm415_vm2, %v7312_v53  ;;  %v1632_v48 = vadd.f32 %v5927_v41, %v7409_v24  ;;  %v1090_v53 = vmul.f32 %v1051_v25, %v1051_v25  ;;  %v1074_v55 = vsel %vm415_vm2, %v1049_v1, 0.0 }
 0x15a   : > { %1070 = vst.msk [vmem:[%s7426_s19] sm:$0xf] %vm1069_vm4, %v5572_v39  ;;  %v5576_v45 = vpack.c.bf16 %v1629_v2, %v1629_v2  ;;  %6151 = vmatpush3.bf16.msra.mxu0 %v6818_v29  ;;  %6152 = vmatprep.mubr.msk.bf16.mxu0 %vm415_vm2, %v7268_v31  ;;  %v1668_v31 = vmul.f32 %v1629_v2, %v1629_v2  ;;  %v1657_v63 = vsel %vm415_vm2, %v1631_v32, 0.0  ;;  %v1075_v5 = vsel %vm415_vm2, %v1050_v50, 0.0 }
 0x15b   : > { %5394 = vst.msk [vmem:[%s7426_s19 + $0x18] sm:$0xf] %vm1069_vm4, %v5578_v42  ;;  %6201 = vmatmul.mubr.msk.bf16.vlgmr.msra.gmra.mrb[12].mxu1 %vm415_vm2, %v7380_v18  ;;  %6564 = vmatprep.subr.msk.bf16.mxu0 %vm422_vm0, %v6826_v33  ;;  %v1630_v52 = vadd.f32 %v7409_v24, %v1613_v43  ;;  %v5575_v60 = vpack.c.bf16 %v1052_v47, %v1052_v47  ;;  %v1654_v13 = vsel %vm415_vm2, %v1629_v2, 0.0  ;;  %v1079_v26 = vsel %vm415_vm2, %v1052_v47, 0.0 }
 0x15c   : > { %5392 = vst.msk [vmem:[%s7426_s19 + $0x10] sm:$0xf] %vm1069_vm4, %v5576_v45  ;;  %6205 = vmatpush3.bf16.msra.mxu1 %v6818_v29  ;;  %6206 = vmatprep.mubr.msk.bf16.mxu1 %vm415_vm2, %v7332_v56  ;;  %v5579_v62 = vpack.c.bf16 %v1632_v48, %v1632_v48  ;;  %v1670_v3 = vmul.f32 %v1631_v32, %v1631_v32  ;;  %v1092_v29 = vsel %vm415_vm2, %v1088_v44, 0.0  ;;  %v1095_v30 = vsel %vm415_vm2, %v1090_v53, 0.0 }
 0x15d   : > { %6573 = vmatprep.subr.msk.bf16.mxu1 %vm422_vm0, %v6826_v33  ;;  %v5573_v4 = vpack.c.bf16 %v1050_v50, %v1050_v50  ;;  %1073 = vst.msk [vmem:[%s7426_s19 + $0xc] sm:$0xf] %vm1069_vm4, %v5575_v60  ;;  %v1076_v7 = vadd.f32 %v1075_v5, %v1074_v55  ;;  %v1089_v10 = vmul.f32 %v1050_v50, %v1050_v50  ;;  %v1672_v33 = vsel %vm415_vm2, %v1668_v31, 0.0 }
 0x15e   : > { %5395 = vst.msk [vmem:[%s7426_s19 + $0x1c] sm:$0xf] %vm1069_vm4, %v5579_v62  ;;  %v5577_v12 = vpack.c.bf16 %v1630_v52, %v1630_v52  ;;  %v1655_v15 = vsel %vm415_vm2, %v1630_v52, 0.0  ;;  %v1669_v16 = vmul.f32 %v1630_v52, %v1630_v52  ;;  %v1091_v17 = vmul.f32 %v1052_v47, %v1052_v47 }
 0x15f   : > { %1071 = vst.msk [vmem:[%s7426_s19 + $0x4] sm:$0xf] %vm1069_vm4, %v5573_v4  ;;  %v1078_v20 = vadd.f32 %v1077_v51, %v1076_v7  ;;  %v1093_v0 = vsel %vm415_vm2, %v1089_v10, 0.0  ;;  %v1656_v25 = vadd.f32 %v1655_v15, %v1654_v13  ;;  %v1671_v27 = vmul.f32 %v1632_v48, %v1632_v48  ;;  %v6646_v13 = vld [vmem:[%s6794_s13 + $0xa0] sm:$0xff]  }
 0x160   : > { %5393 = vst.msk [vmem:[%s7426_s19 + $0x14] sm:$0xf] %vm1069_vm4, %v5577_v12  ;;  %v1094_v1 = vadd.f32 %v1093_v0, %v1092_v29  ;;  %v1673_v28 = vsel %vm415_vm2, %v1669_v16, 0.0  ;;  %v1675_v39 = vsel %vm415_vm2, %v1670_v3, 0.0  ;;  %v1659_v2 = vsel %vm415_vm2, %v1632_v48, 0.0 }
 0x161   : > { %v1080_v32 = vadd.f32 %v1079_v26, %v1078_v20  ;;  %v1658_v36 = vadd.f32 %v1657_v63, %v1656_v25  ;;  %v1674_v38 = vadd.f32 %v1673_v28, %v1672_v33  ;;  %v1097_v42 = vsel %vm415_vm2, %v1091_v17, 0.0  ;;  %v6647_v25 = vld [vmem:[%s6794_s13 + $0xa8] sm:$0xff]  }
 0x162   : > { %v1096_v41 = vadd.f32 %v1095_v30, %v1094_v1  ;;  %v1677_v47 = vsel %vm415_vm2, %v1671_v27, 0.0  ;;  %v4394_v27 = vshll.u32 %v6647_v25, 16  ;;  %v6648_v30 = vld [vmem:[%s6794_s13 + $0xb0] ss:$0 sps:$4 sm:$0x11]  }
 0x163   : > { %v1081_v43 = vrot.slane %v1080_v32, 4  ;;  %v1660_v44 = vadd.f32 %v1659_v2, %v1658_v36  ;;  %v1676_v45 = vadd.f32 %v1675_v39, %v1674_v38  ;;  %v4465_v38 = vrot.slane %v6646_v13, 1 }
 0x164   : > { %v1098_v50 = vadd.f32 %v1097_v42, %v1096_v41  ;;  %v4396_v28 = vrot.slane %v4394_v27, 1  ;;  %v4466_v39 = vrot.slane %v6647_v25, 1 }
 0x165   : > { %6153 = vmatmul.mubr.msk.bf16.vlgmr.msra.gmra.mrb[12].mxu0 %vm415_vm2, %v7281_v35  ;;  %v1082_v51 = vadd.f32 %v1081_v43, %v1080_v32  ;;  %v1661_v31 = vrot.slane %v1660_v44, 4  ;;  %v1678_v48 = vadd.f32 %v1677_v47, %v1676_v45 }
 0x166   : > { %6157 = vmatpush3.bf16.msra.mxu0 %v6846_v37  ;;  %6158 = vmatprep.mubr.msk.bf16.mxu0 %vm415_vm2, %v7317_v54  ;;  %v1099_v52 = vrot.slane %v1098_v50, 4  ;;  %v4467_v2 = vsel %vm531_vm3, %v4465_v38, %v4466_v39 }
 0x167   : > { %6207 = vmatmul.mubr.msk.bf16.vlgmr.msra.gmra.mrb[12].mxu1 %vm415_vm2, %v7348_v61  ;;  %6565 = vmatprep.subr.msk.bf16.mxu0 %vm422_vm0, %v6853_v40  ;;  %v1083_v35 = vrot.slane %v1082_v51, 2  ;;  %v1662_v53 = vadd.f32 %v1661_v31, %v1660_v44  ;;  %v1679_v55 = vrot.slane %v1678_v48, 4  ;;  %v6651_v44 = vld [vmem:[%s6794_s13 + $0xc4] ss:$0 sps:$4 sm:$0x11]  }
 0x168   : > { %6211 = vmatpush3.bf16.msra.mxu1 %v6846_v37  ;;  %6212 = vmatprep.mubr.msk.bf16.mxu1 %vm415_vm2, %v7385_v19  ;;  %v1100_v54 = vadd.f32 %v1099_v52, %v1098_v50 }
 0x169   : > { %6574 = vmatprep.subr.msk.bf16.mxu1 %vm422_vm0, %v6853_v40  ;;  %v1084_v60 = vadd.f32 %v1083_v35, %v1082_v51  ;;  %v1663_v62 = vrot.slane %v1662_v53, 2  ;;  %v1680_v63 = vadd.f32 %v1679_v55, %v1678_v48  ;;  %v4390_v40 = vshll.u32 %v6646_v13, 16 }
 0x16a   : > { %v1101_v3 = vrot.slane %v1100_v54, 2 }
 0x16b   : > { %v1085_v4 = vrot.slane %v1084_v60, 1  ;;  %v1664_v5 = vadd.f32 %v1663_v62, %v1662_v53  ;;  %v1681_v29 = vrot.slane %v1680_v63, 2  ;;  %v4392_v26 = vrot.slane %v4390_v40, 1 }
 0x16c   : > { %v1102_v7 = vadd.f32 %v1101_v3, %v1100_v54 }
 0x16d   : > { %v1086_v37 = vadd.f32 %v1085_v4, %v1084_v60  ;;  %v1665_v10 = vrot.slane %v1664_v5, 1  ;;  %v1682_v12 = vadd.f32 %v1681_v29, %v1680_v63 }
 0x16e   : > { %v1103_v33 = vrot.slane %v1102_v7, 1 }
 0x16f   : > { %v1666_v15 = vadd.f32 %v1665_v10, %v1664_v5  ;;  %v1683_v16 = vrot.slane %v1682_v12, 1 }
 0x170   : > { %v1104_v17 = vadd.f32 %v1103_v33, %v1102_v7 }
 0x171   : > { %6159 = vmatmul.mubr.msk.bf16.vlgmr.msra.gmra.mrb[12].mxu0 %vm415_vm2, %v7335_v59  ;;  %v7501_v20 = vadd.f32 %v1666_v15, %v1086_v37  ;;  %v1684_v0 = vadd.f32 %v1683_v16, %v1682_v12 }
 0x172   : > { %6163 = vmatpush3.bf16.msra.mxu0 %v6872_v46  ;;  %6164 = vmatprep.mubr.msk.bf16.mxu0 %vm415_vm2, %v7332_v56  ;;  %v4388_v56 = vshrl.u32 %v6646_v13, 16 }
 0x173   : > { %6213 = vmatmul.mubr.msk.bf16.vlgmr.msra.gmra.mrb[12].mxu1 %vm415_vm2, %v7401_v21  ;;  %6566 = vmatprep.subr.msk.bf16.mxu0 %vm422_vm0, %v6881_v49  ;;  %v7510_v59 = vadd.f32 %v1684_v0, %v1104_v17 }
 0x174   : > { %6217 = vmatpush3.bf16.msra.mxu1 %v6872_v46  ;;  %6218 = vmatprep.mubr.msk.bf16.mxu1 %vm415_vm2, %v6646_v13  ;;  %v4393_v1 = vor.u32 %v4392_v26, %v4388_v56  ;;  %v4398_v46 = vshrl.u32 %v6647_v25, 16 }
 0x175   : > { %6575 = vmatprep.subr.msk.bf16.mxu1 %vm422_vm0, %v6881_v49  ;;  %v4402_v49 = vshll.u32 %v6648_v30, 16 }
 0x176   : > { %v4397_v32 = vsel %vm394_vm1, %v4393_v1, %v4396_v28 }
 0x177   : > { %v4404_v36 = vrot.slane %v4402_v49, 1 }
 0x17d   : > { %6165 = vmatmul.mubr.msk.bf16.vlgmr.msra.gmra.mrb[12].mxu0 %vm415_vm2, %v7348_v61  ;;  %v4400_v61 = vor.u32 %v4398_v46, %v4396_v28 }
 0x17e   : > { %6169 = vmatpush3.bf16.msra.mxu0 %v6903_v57  ;;  %6170 = vmatprep.mubr.msk.bf16.mxu0 %vm415_vm2, %v7361_v9 }
 0x17f   : > { %6219 = vmatmul.mubr.msk.bf16.vlgmr.msra.gmra.mrb[12].mxu1 %vm415_vm2, %v6647_v25  ;;  %6567 = vmatprep.subr.msk.bf16.mxu0 %vm422_vm0, %v6908_v58  ;;  %v4405_v9 = vsel %vm394_vm1, %v4400_v61, %v4404_v36 }
 0x180   : > { %6223 = vmatpush3.bf16.msra.mxu1 %v6903_v57  ;;  %6224 = vmatprep.mubr.msk.bf16.mxu1 %vm415_vm2, %v4397_v32  ;;  %v4468_v57 = vrot.slane %v6648_v30, 1 }
 0x181   : > { %6576 = vmatprep.subr.msk.bf16.mxu1 %vm422_vm0, %v6908_v58  ;;  %v6649_v58 = vld [vmem:[%s6794_s13 + $0xb4] sm:$0xff]  }
 0x182   : > { %v5045_v51 = vrot.slane %v6649_v58, 1 }
 0x189   : > { %6171 = vmatmul.mubr.msk.bf16.vlgmr.msra.gmra.mrb[12].mxu0 %vm415_vm2, %v7380_v18  ;;  %v4469_v18 = vsel %vm531_vm3, %v4466_v39, %v4468_v57 }
 0x18a   : > { %6175 = vmatpush3.bf16.msra.mxu0 %v6932_v6  ;;  %6176 = vmatprep.mubr.msk.bf16.mxu0 %vm415_vm2, %v7385_v19  ;;  %v4970_v19 = vshll.u32 %v6649_v58, 16 }
 0x18b   : > { %6225 = vmatmul.mubr.msk.bf16.vlgmr.msra.gmra.mrb[12].mxu1 %vm415_vm2, %v4405_v9  ;;  %6568 = vmatprep.subr.msk.bf16.mxu0 %vm422_vm0, %v6940_v8 }
 0x18c   : > { %6229 = vmatpush3.bf16.msra.mxu1 %v6932_v6  ;;  %6230 = vmatprep.mubr.msk.bf16.mxu1 %vm415_vm2, %v4467_v2  ;;  %v6650_v6 = vld [vmem:[%s6794_s13 + $0xbc] sm:$0xff]   ;;  %s5325_s13 = sshll.u32 %s7751_s22, 2 }
 0x18d   : > { %6577 = vmatprep.subr.msk.bf16.mxu1 %vm422_vm0, %v6940_v8  ;;  %v4968_v8 = vshrl.u32 %v6649_v58, 16  ;;  %v4974_v41 = vshll.u32 %v6650_v6, 16  ;;  %v5046_v31 = vrot.slane %v6650_v6, 1  ;;  %s309_s20 = sadd.s32 %s5325_s13, %s6783_s30 }
 0x18e   : > { %s5326_s26 = sshll.u32 %s309_s20, 1 }
 0x18f   : > { %v4976_v43 = vrot.slane %v4974_v41, 1  ;;  %v5047_v52 = vsel %vm531_vm3, %v5045_v51, %v5046_v31  ;;  %s311_s28 = scalar_lea.vmem %s7739_s6, %s5326_s26 }
 0x195   : > { %6177 = vmatmul.mubr.msk.bf16.vlgmr.msra.gmra.mrb[12].mxu0 %vm415_vm2, %v7401_v21  ;;  %v4972_v21 = vrot.slane %v4970_v19, 1 }
 0x196   : > { %6181 = vmatpush3.bf16.msra.mxu0 %v6960_v11  ;;  %6182 = vmatprep.mubr.msk.bf16.mxu0 %vm415_vm2, %v6646_v13 }
 0x197   : > { %6231 = vmatmul.mubr.msk.bf16.vlgmr.msra.gmra.mrb[12].mxu1 %vm415_vm2, %v4469_v18  ;;  %6569 = vmatprep.subr.msk.bf16.mxu0 %vm422_vm0, %v6971_v14  ;;  %v4973_v42 = vor.u32 %v4972_v21, %v4968_v8 }
 0x198   : > { %6235 = vmatpush3.bf16.msra.mxu1 %v6960_v11  ;;  %6236 = vmatprep.mubr.msk.bf16.mxu1 %vm415_vm2, %v6649_v58  ;;  %v4978_v11 = vshrl.u32 %v6650_v6, 16 }
 0x199   : > { %6578 = vmatprep.subr.msk.bf16.mxu1 %vm422_vm0, %v6971_v14  ;;  %v4977_v45 = vsel %vm394_vm1, %v4973_v42, %v4976_v43  ;;  %v4982_v14 = vshll.u32 %v6651_v44, 16 }
 0x19a   : > { %v4980_v47 = vor.u32 %v4978_v11, %v4976_v43 }
 0x19b   : > { %v4984_v50 = vrot.slane %v4982_v14, 1 }
 0x19d   : > { %v4985_v48 = vsel %vm394_vm1, %v4980_v47, %v4984_v50 }
 0x1a1   : > { %6183 = vmatmul.mubr.msk.bf16.vlgmr.msra.gmra.mrb[12].mxu0 %vm415_vm2, %v6647_v25 }
 0x1a2   : > { %6187 = vmatpush3.bf16.msra.mxu0 %v6994_v22  ;;  %6188 = vmatprep.mubr.msk.bf16.mxu0 %vm415_vm2, %v4397_v32 }
 0x1a3   : > { %6237 = vmatmul.mubr.msk.bf16.vlgmr.msra.gmra.mrb[12].mxu1 %vm415_vm2, %v6650_v6  ;;  %6570 = vmatprep.subr.msk.bf16.mxu0 %vm422_vm0, %v6999_v23 }
 0x1a4   : > { %6241 = vmatpush3.bf16.msra.mxu1 %v6994_v22  ;;  %6242 = vmatprep.mubr.msk.bf16.mxu1 %vm415_vm2, %v4977_v45  ;;  %v5048_v22 = vrot.slane %v6651_v44, 1 }
 0x1a5   : > { %6579 = vmatprep.subr.msk.bf16.mxu1 %vm422_vm0, %v6999_v23 }
 0x1a6   : > { %v5049_v23 = vsel %vm531_vm3, %v5046_v31, %v5048_v22 }
 0x1ad   : > { %6189 = vmatmul.mubr.msk.bf16.vlgmr.msra.gmra.mrb[12].mxu0 %vm415_vm2, %v4405_v9 }
 0x1ae   : > { %6193 = vmatpush3.bf16.msra.mxu0 %v7024_v34  ;;  %6194 = vmatprep.mubr.msk.bf16.mxu0 %vm415_vm2, %v4467_v2 }
 0x1af   : > { %6243 = vmatmul.mubr.msk.bf16.vlgmr.msra.gmra.mrb[12].mxu1 %vm415_vm2, %v4985_v48 }
 0x1b0   : > { %6247 = vmatpush3.bf16.msra.mxu1 %v7024_v34  ;;  %6248 = vmatprep.mubr.msk.bf16.mxu1 %vm415_vm2, %v5047_v52 }
 0x1b9   : > { %6195 = vmatmul.mubr.msk.bf16.vlgmr.msra.gmra.mrb[12].mxu0 %vm415_vm2, %v4469_v18 }
 0x1bb   : > { %6249 = vmatmul.mubr.msk.bf16.vlgmr.msra.gmra.mrb[12].mxu1 %vm415_vm2, %v5049_v23 }
 0x1bc   : > { %v5980_v35 = vpop.f32.mrb[4].mxu0 }
 0x1bd   : > { %v2211_v53 = vadd.f32 %v5980_v35, %v7409_v24  ;;  %v2190_v55 = vpop.f32.mrb[5].mxu0 }
 0x1be   : > { %v6034_v54 = vpop.f32.mrb[4].mxu1  ;;  %v2209_v60 = vadd.f32 %v7409_v24, %v2190_v55  ;;  %v5981_v34 = vpop.f32.mrb[6].mxu0 }
 0x1bf   : > { %v5582_v62 = vpack.c.bf16 %v2211_v53, %v2211_v53  ;;  %v2791_v63 = vadd.f32 %v6034_v54, %v7409_v24  ;;  %v2770_v3 = vpop.f32.mrb[5].mxu1  ;;  %v2193_v4 = vpop.f32.mrb[7].mxu0  ;;  %v2212_v33 = vadd.f32 %v5981_v34, %v7409_v24  ;;  %v2237_v40 = vsel %vm415_vm2, %v2211_v53, 0.0 }
 0x1c0   : > { %v5580_v5 = vpack.c.bf16 %v2209_v60, %v2209_v60  ;;  %v2789_v29 = vadd.f32 %v7409_v24, %v2770_v3  ;;  %v6035_v7 = vpop.f32.mrb[6].mxu1  ;;  %v2248_v13 = vmul.f32 %v2209_v60, %v2209_v60  ;;  %v2210_v16 = vadd.f32 %v7409_v24, %v2193_v4 }
 0x1c1   : > { %5423 = vst.msk [vmem:[%s7426_s19 + $0x28] sm:$0xf] %vm1069_vm4, %v5582_v62  ;;  %v5586_v37 = vpack.c.bf16 %v2791_v63, %v2791_v63  ;;  %v2773_v10 = vpop.f32.mrb[7].mxu1  ;;  %v2792_v15 = vadd.f32 %v6035_v7, %v7409_v24  ;;  %v2250_v25 = vmul.f32 %v2211_v53, %v2211_v53  ;;  %v2234_v56 = vsel %vm415_vm2, %v2209_v60, 0.0 }
 0x1c2   : > { %5421 = vst.msk [vmem:[%s7426_s19 + $0x20] sm:$0xf] %vm1069_vm4, %v5580_v5  ;;  %v5584_v12 = vpack.c.bf16 %v2789_v29, %v2789_v29  ;;  %v2828_v17 = vmul.f32 %v2789_v29, %v2789_v29  ;;  %v2790_v0 = vadd.f32 %v7409_v24, %v2773_v10  ;;  %v5583_v26 = vpack.c.bf16 %v2212_v33, %v2212_v33 }
 0x1c3   : > { %5452 = vst.msk [vmem:[%s7426_s19 + $0x38] sm:$0xf] %vm1069_vm4, %v5586_v37  ;;  %v5587_v27 = vpack.c.bf16 %v2792_v15, %v2792_v15  ;;  %v2817_v1 = vsel %vm415_vm2, %v2791_v63, 0.0  ;;  %v2830_v28 = vmul.f32 %v2791_v63, %v2791_v63  ;;  %v5581_v30 = vpack.c.bf16 %v2210_v16, %v2210_v16 }
 0x1c4   : > { %5450 = vst.msk [vmem:[%s7426_s19 + $0x30] sm:$0xf] %vm1069_vm4, %v5584_v12  ;;  %v2235_v32 = vsel %vm415_vm2, %v2210_v16, 0.0  ;;  %v2252_v46 = vsel %vm415_vm2, %v2248_v13, 0.0  ;;  %5424 = vst.msk [vmem:[%s7426_s19 + $0x2c] sm:$0xf] %vm1069_vm4, %v5583_v26  ;;  %v2249_v61 = vmul.f32 %v2210_v16, %v2210_v16  ;;  %v5585_v36 = vpack.c.bf16 %v2790_v0, %v2790_v0 }
 0x1c5   : > { %5453 = vst.msk [vmem:[%s7426_s19 + $0x3c] sm:$0xf] %vm1069_vm4, %v5587_v27  ;;  %v2236_v49 = vadd.f32 %v2235_v32, %v2234_v56  ;;  %v2814_v38 = vsel %vm415_vm2, %v2789_v29, 0.0  ;;  %v2832_v39 = vsel %vm415_vm2, %v2828_v17, 0.0  ;;  %5422 = vst.msk [vmem:[%s7426_s19 + $0x24] sm:$0xf] %vm1069_vm4, %v5581_v30  ;;  %v2829_v2 = vmul.f32 %v2790_v0, %v2790_v0 }
 0x1c6   : > { %v2815_v9 = vsel %vm415_vm2, %v2790_v0, 0.0  ;;  %v2251_v57 = vmul.f32 %v2212_v33, %v2212_v33  ;;  %v2253_v18 = vsel %vm415_vm2, %v2249_v61, 0.0  ;;  %5451 = vst.msk [vmem:[%s7426_s19 + $0x34] sm:$0xf] %vm1069_vm4, %v5585_v36  ;;  %v2239_v6 = vsel %vm415_vm2, %v2212_v33, 0.0 }
 0x1c7   : > { %v2238_v58 = vadd.f32 %v2237_v40, %v2236_v49  ;;  %v2816_v19 = vadd.f32 %v2815_v9, %v2814_v38  ;;  %v2831_v8 = vmul.f32 %v2792_v15, %v2792_v15  ;;  %v2254_v21 = vadd.f32 %v2253_v18, %v2252_v46 }
 0x1c8   : > { %v2833_v41 = vsel %vm415_vm2, %v2829_v2, 0.0  ;;  %v2255_v42 = vsel %vm415_vm2, %v2250_v25, 0.0  ;;  %v2835_v11 = vsel %vm415_vm2, %v2830_v28, 0.0  ;;  %v2819_v14 = vsel %vm415_vm2, %v2792_v15, 0.0 }
 0x1c9   : > { %v2240_v43 = vadd.f32 %v2239_v6, %v2238_v58  ;;  %v2818_v44 = vadd.f32 %v2817_v1, %v2816_v19  ;;  %v2834_v45 = vadd.f32 %v2833_v41, %v2832_v39  ;;  %v2256_v47 = vadd.f32 %v2255_v42, %v2254_v21 }
 0x1ca   : > { %v2257_v50 = vsel %vm415_vm2, %v2251_v57, 0.0  ;;  %v2837_v52 = vsel %vm415_vm2, %v2831_v8, 0.0 }
 0x1cb   : > { %v2241_v51 = vrot.slane %v2240_v43, 4  ;;  %v2820_v31 = vadd.f32 %v2819_v14, %v2818_v44  ;;  %v2836_v48 = vadd.f32 %v2835_v11, %v2834_v45  ;;  %v2258_v22 = vadd.f32 %v2257_v50, %v2256_v47 }
 0x1cd   : > { %v2242_v23 = vadd.f32 %v2241_v51, %v2240_v43  ;;  %v2821_v35 = vrot.slane %v2820_v31, 4  ;;  %v2838_v53 = vadd.f32 %v2837_v52, %v2836_v48  ;;  %v2259_v55 = vrot.slane %v2258_v22, 4 }
 0x1cf   : > { %v2243_v54 = vrot.slane %v2242_v23, 2  ;;  %v2822_v60 = vadd.f32 %v2821_v35, %v2820_v31  ;;  %v2839_v34 = vrot.slane %v2838_v53, 4  ;;  %v2260_v62 = vadd.f32 %v2259_v55, %v2258_v22 }
 0x1d1   : > { %v2244_v63 = vadd.f32 %v2243_v54, %v2242_v23  ;;  %v2823_v3 = vrot.slane %v2822_v60, 2  ;;  %v2840_v4 = vadd.f32 %v2839_v34, %v2838_v53  ;;  %v2261_v5 = vrot.slane %v2260_v62, 2 }
 0x1d3   : > { %v2245_v29 = vrot.slane %v2244_v63, 1  ;;  %v2824_v7 = vadd.f32 %v2823_v3, %v2822_v60  ;;  %v2841_v37 = vrot.slane %v2840_v4, 2  ;;  %v2262_v10 = vadd.f32 %v2261_v5, %v2260_v62 }
 0x1d5   : > { %v2246_v12 = vadd.f32 %v2245_v29, %v2244_v63  ;;  %v2825_v13 = vrot.slane %v2824_v7, 1  ;;  %v2842_v33 = vadd.f32 %v2841_v37, %v2840_v4  ;;  %v2263_v15 = vrot.slane %v2262_v10, 1 }
 0x1d7   : > { %v2247_v16 = vadd.f32 %v2246_v12, %v7501_v20  ;;  %v2826_v40 = vadd.f32 %v2825_v13, %v2824_v7  ;;  %v2843_v17 = vrot.slane %v2842_v33, 1  ;;  %v2264_v0 = vadd.f32 %v2263_v15, %v2262_v10 }
 0x1d9   : > { %v7620_v25 = vadd.f32 %v2826_v40, %v2247_v16  ;;  %v2265_v56 = vadd.f32 %v2264_v0, %v7510_v59  ;;  %v2844_v26 = vadd.f32 %v2843_v17, %v2842_v33 }
 0x1db   : > { %v7623_v27 = vadd.f32 %v2844_v26, %v2265_v56 }
 0x224   : > { %v6088_v1 = vpop.f32.mrb[8].mxu0 }
 0x225   : > { %v3371_v28 = vadd.f32 %v6088_v1, %v7409_v24  ;;  %v3350_v30 = vpop.f32.mrb[9].mxu0 }
 0x226   : > { %v6142_v32 = vpop.f32.mrb[8].mxu1  ;;  %v3369_v20 = vadd.f32 %v7409_v24, %v3350_v30  ;;  %v6089_v46 = vpop.f32.mrb[10].mxu0 }
 0x227   : > { %v5590_v49 = vpack.c.bf16 %v3371_v28, %v3371_v28  ;;  %v3951_v61 = vadd.f32 %v6142_v32, %v7409_v24  ;;  %v3930_v36 = vpop.f32.mrb[9].mxu1  ;;  %v3353_v59 = vpop.f32.mrb[11].mxu0  ;;  %v3372_v19 = vadd.f32 %v6089_v46, %v7409_v24  ;;  %v3397_v21 = vsel %vm415_vm2, %v3371_v28, 0.0 }
 0x228   : > { %v5588_v38 = vpack.c.bf16 %v3369_v20, %v3369_v20  ;;  %v3949_v39 = vadd.f32 %v7409_v24, %v3930_v36  ;;  %v6143_v9 = vpop.f32.mrb[10].mxu1  ;;  %v3408_v18 = vmul.f32 %v3369_v20, %v3369_v20  ;;  %v3370_v8 = vadd.f32 %v7409_v24, %v3353_v59 }
 0x229   : > { %5481 = vst.msk [vmem:[%s7426_s19 + $0x48] sm:$0xf] %vm1069_vm4, %v5590_v49  ;;  %v5594_v2 = vpack.c.bf16 %v3951_v61, %v3951_v61  ;;  %v3933_v57 = vpop.f32.mrb[11].mxu1  ;;  %v3952_v6 = vadd.f32 %v6143_v9, %v7409_v24  ;;  %v3410_v43 = vmul.f32 %v3371_v28, %v3371_v28  ;;  %v3394_v44 = vsel %vm415_vm2, %v3369_v20, 0.0 }
 0x22a   : > { %5479 = vst.msk [vmem:[%s7426_s19 + $0x40] sm:$0xf] %vm1069_vm4, %v5588_v38  ;;  %v5592_v58 = vpack.c.bf16 %v3949_v39, %v3949_v39  ;;  %v3988_v41 = vmul.f32 %v3949_v39, %v3949_v39  ;;  %v3950_v42 = vadd.f32 %v7409_v24, %v3933_v57  ;;  %v5591_v45 = vpack.c.bf16 %v3372_v19, %v3372_v19 }
 0x22b   : > { %5510 = vst.msk [vmem:[%s7426_s19 + $0x58] sm:$0xf] %vm1069_vm4, %v5594_v2  ;;  %v5595_v11 = vpack.c.bf16 %v3952_v6, %v3952_v6  ;;  %v3977_v14 = vsel %vm415_vm2, %v3951_v61, 0.0  ;;  %v3990_v47 = vmul.f32 %v3951_v61, %v3951_v61  ;;  %v5589_v50 = vpack.c.bf16 %v3370_v8, %v3370_v8 }
 0x22c   : > { %5508 = vst.msk [vmem:[%s7426_s19 + $0x50] sm:$0xf] %vm1069_vm4, %v5592_v58  ;;  %v3395_v51 = vsel %vm415_vm2, %v3370_v8, 0.0  ;;  %v3412_v31 = vsel %vm415_vm2, %v3408_v18, 0.0  ;;  %5482 = vst.msk [vmem:[%s7426_s19 + $0x4c] sm:$0xf] %vm1069_vm4, %v5591_v45  ;;  %v3409_v52 = vmul.f32 %v3370_v8, %v3370_v8  ;;  %v5593_v22 = vpack.c.bf16 %v3950_v42, %v3950_v42 }
 0x22d   : > { %5511 = vst.msk [vmem:[%s7426_s19 + $0x5c] sm:$0xf] %vm1069_vm4, %v5595_v11  ;;  %v3396_v48 = vadd.f32 %v3395_v51, %v3394_v44  ;;  %v3974_v23 = vsel %vm415_vm2, %v3949_v39, 0.0  ;;  %v3992_v35 = vsel %vm415_vm2, %v3988_v41, 0.0  ;;  %5480 = vst.msk [vmem:[%s7426_s19 + $0x44] sm:$0xf] %vm1069_vm4, %v5589_v50  ;;  %v3989_v55 = vmul.f32 %v3950_v42, %v3950_v42 }
 0x22e   : > { %v3975_v53 = vsel %vm415_vm2, %v3950_v42, 0.0  ;;  %v3411_v54 = vmul.f32 %v3372_v19, %v3372_v19  ;;  %v3413_v34 = vsel %vm415_vm2, %v3409_v52, 0.0  ;;  %5509 = vst.msk [vmem:[%s7426_s19 + $0x54] sm:$0xf] %vm1069_vm4, %v5593_v22  ;;  %v3399_v63 = vsel %vm415_vm2, %v3372_v19, 0.0 }
 0x22f   : > { %v3398_v60 = vadd.f32 %v3397_v21, %v3396_v48  ;;  %v3976_v62 = vadd.f32 %v3975_v53, %v3974_v23  ;;  %v3991_v3 = vmul.f32 %v3952_v6, %v3952_v6  ;;  %v3414_v4 = vadd.f32 %v3413_v34, %v3412_v31 }
 0x230   : > { %v3993_v5 = vsel %vm415_vm2, %v3989_v55, 0.0  ;;  %v3415_v29 = vsel %vm415_vm2, %v3410_v43, 0.0  ;;  %v3995_v12 = vsel %vm415_vm2, %v3990_v47, 0.0  ;;  %v3979_v13 = vsel %vm415_vm2, %v3952_v6, 0.0 }
 0x231   : > { %v3400_v7 = vadd.f32 %v3399_v63, %v3398_v60  ;;  %v3978_v37 = vadd.f32 %v3977_v14, %v3976_v62  ;;  %v3994_v10 = vadd.f32 %v3993_v5, %v3992_v35  ;;  %v3416_v33 = vadd.f32 %v3415_v29, %v3414_v4 }
 0x232   : > { %v3417_v15 = vsel %vm415_vm2, %v3411_v54, 0.0  ;;  %v3997_v0 = vsel %vm415_vm2, %v3991_v3, 0.0 }
 0x233   : > { %v3401_v16 = vrot.slane %v3400_v7, 4  ;;  %v3980_v40 = vadd.f32 %v3979_v13, %v3978_v37  ;;  %v3996_v17 = vadd.f32 %v3995_v12, %v3994_v10  ;;  %v3418_v56 = vadd.f32 %v3417_v15, %v3416_v33 }
 0x235   : > { %v3402_v26 = vadd.f32 %v3401_v16, %v3400_v7  ;;  %v3981_v1 = vrot.slane %v3980_v40, 4  ;;  %v3998_v28 = vadd.f32 %v3997_v0, %v3996_v17  ;;  %v3419_v30 = vrot.slane %v3418_v56, 4 }
 0x237   : > { %v3403_v32 = vrot.slane %v3402_v26, 2  ;;  %v3982_v20 = vadd.f32 %v3981_v1, %v3980_v40  ;;  %v3999_v46 = vrot.slane %v3998_v28, 4  ;;  %v3420_v49 = vadd.f32 %v3419_v30, %v3418_v56 }
 0x239   : > { %v3404_v61 = vadd.f32 %v3403_v32, %v3402_v26  ;;  %v3983_v36 = vrot.slane %v3982_v20, 2  ;;  %v4000_v59 = vadd.f32 %v3999_v46, %v3998_v28  ;;  %v3421_v38 = vrot.slane %v3420_v49, 2 }
 0x23b   : > { %v3405_v39 = vrot.slane %v3404_v61, 1  ;;  %v3984_v9 = vadd.f32 %v3983_v36, %v3982_v20  ;;  %v4001_v2 = vrot.slane %v4000_v59, 2  ;;  %v3422_v57 = vadd.f32 %v3421_v38, %v3420_v49 }
 0x23d   : > { %v3406_v58 = vadd.f32 %v3405_v39, %v3404_v61  ;;  %v3985_v18 = vrot.slane %v3984_v9, 1  ;;  %v4002_v19 = vadd.f32 %v4001_v2, %v4000_v59  ;;  %v3423_v6 = vrot.slane %v3422_v57, 1 }
 0x23f   : > { %v3407_v8 = vadd.f32 %v3406_v58, %v7620_v25  ;;  %v3986_v21 = vadd.f32 %v3985_v18, %v3984_v9  ;;  %v4003_v41 = vrot.slane %v4002_v19, 1  ;;  %v3424_v42 = vadd.f32 %v3423_v6, %v3422_v57 }
 0x241   : > { %v7666_v43 = vadd.f32 %v3986_v21, %v3407_v8  ;;  %v3425_v44 = vadd.f32 %v3424_v42, %v7623_v27  ;;  %v4004_v45 = vadd.f32 %v4003_v41, %v4002_v19 }
 0x243   : > { %v7669_v11 = vadd.f32 %v4004_v45, %v3425_v44 }
 0x28c   : > { %v6196_v14 = vpop.f32.mrb[12].mxu0 }
 0x28d   : > { %v4531_v47 = vadd.f32 %v6196_v14, %v7409_v24  ;;  %v4510_v50 = vpop.f32.mrb[13].mxu0 }
 0x28e   : > { %v6250_v51 = vpop.f32.mrb[12].mxu1  ;;  %v4529_v25 = vadd.f32 %v7409_v24, %v4510_v50  ;;  %v6197_v31 = vpop.f32.mrb[14].mxu0 }
 0x28f   : > { %v5598_v48 = vpack.c.bf16 %v4531_v47, %v4531_v47  ;;  %v5111_v52 = vadd.f32 %v6250_v51, %v7409_v24  ;;  %v5090_v22 = vpop.f32.mrb[13].mxu1  ;;  %v4513_v27 = vpop.f32.mrb[15].mxu0  ;;  %v4532_v62 = vadd.f32 %v6197_v31, %v7409_v24  ;;  %v4557_v4 = vsel %vm415_vm2, %v4531_v47, 0.0 }
 0x290   : > { %v5596_v23 = vpack.c.bf16 %v4529_v25, %v4529_v25  ;;  %v5109_v35 = vadd.f32 %v7409_v24, %v5090_v22  ;;  %v6251_v53 = vpop.f32.mrb[14].mxu1  ;;  %v4568_v34 = vmul.f32 %v4529_v25, %v4529_v25  ;;  %v4530_v3 = vadd.f32 %v7409_v24, %v4513_v27 }
 0x291   : > { %5539 = vst.msk [vmem:[%s7426_s19 + $0x68] sm:$0xf] %vm1069_vm4, %v5598_v48  ;;  %v5602_v55 = vpack.c.bf16 %v5111_v52, %v5111_v52  ;;  %v5093_v54 = vpop.f32.mrb[15].mxu1  ;;  %v5112_v63 = vadd.f32 %v6251_v53, %v7409_v24  ;;  %v4570_v7 = vmul.f32 %v4531_v47, %v4531_v47  ;;  %v4554_v37 = vsel %vm415_vm2, %v4529_v25, 0.0 }
 0x292   : > { %5537 = vst.msk [vmem:[%s7426_s19 + $0x60] sm:$0xf] %vm1069_vm4, %v5596_v23  ;;  %v5600_v60 = vpack.c.bf16 %v5109_v35, %v5109_v35  ;;  %v5148_v5 = vmul.f32 %v5109_v35, %v5109_v35  ;;  %v5110_v29 = vadd.f32 %v7409_v24, %v5093_v54  ;;  %v5599_v10 = vpack.c.bf16 %v4532_v62, %v4532_v62 }
 0x293   : > { %5568 = vst.msk [vmem:[%s7426_s19 + $0x78] sm:$0xf] %vm1069_vm4, %v5602_v55  ;;  %v5603_v12 = vpack.c.bf16 %v5112_v63, %v5112_v63  ;;  %v5137_v13 = vsel %vm415_vm2, %v5111_v52, 0.0  ;;  %v5150_v33 = vmul.f32 %v5111_v52, %v5111_v52  ;;  %v5597_v15 = vpack.c.bf16 %v4530_v3, %v4530_v3 }
 0x294   : > { %5566 = vst.msk [vmem:[%s7426_s19 + $0x70] sm:$0xf] %vm1069_vm4, %v5600_v60  ;;  %v4555_v16 = vsel %vm415_vm2, %v4530_v3, 0.0  ;;  %v4572_v40 = vsel %vm415_vm2, %v4568_v34, 0.0  ;;  %5540 = vst.msk [vmem:[%s7426_s19 + $0x6c] sm:$0xf] %vm1069_vm4, %v5599_v10  ;;  %v4569_v17 = vmul.f32 %v4530_v3, %v4530_v3  ;;  %v5601_v0 = vpack.c.bf16 %v5110_v29, %v5110_v29 }
 0x295   : > { %5569 = vst.msk [vmem:[%s7426_s19 + $0x7c] sm:$0xf] %vm1069_vm4, %v5603_v12  ;;  %v4556_v24 = vadd.f32 %v4555_v16, %v4554_v37  ;;  %v5134_v56 = vsel %vm415_vm2, %v5109_v35, 0.0  ;;  %v5152_v26 = vsel %vm415_vm2, %v5148_v5, 0.0  ;;  %5538 = vst.msk [vmem:[%s7426_s19 + $0x64] sm:$0xf] %vm1069_vm4, %v5597_v15  ;;  %v5149_v28 = vmul.f32 %v5110_v29, %v5110_v29 }
 0x296   : > { %v5135_v1 = vsel %vm415_vm2, %v5110_v29, 0.0  ;;  %v4571_v30 = vmul.f32 %v4532_v62, %v4532_v62  ;;  %v4573_v20 = vsel %vm415_vm2, %v4569_v17, 0.0  ;;  %5567 = vst.msk [vmem:[%s7426_s19 + $0x74] sm:$0xf] %vm1069_vm4, %v5601_v0  ;;  %v4559_v49 = vsel %vm415_vm2, %v4532_v62, 0.0 }
 0x297   : > { %v4558_v32 = vadd.f32 %v4557_v4, %v4556_v24  ;;  %v5136_v46 = vadd.f32 %v5135_v1, %v5134_v56  ;;  %v5151_v61 = vmul.f32 %v5112_v63, %v5112_v63  ;;  %v4574_v36 = vadd.f32 %v4573_v20, %v4572_v40 }
 0x298   : > { %v5153_v59 = vsel %vm415_vm2, %v5149_v28, 0.0  ;;  %v4575_v38 = vsel %vm415_vm2, %v4570_v7, 0.0  ;;  %v5155_v57 = vsel %vm415_vm2, %v5150_v33, 0.0  ;;  %v5139_v58 = vsel %vm415_vm2, %v5112_v63, 0.0 }
 0x299   : > { %v4560_v39 = vadd.f32 %v4559_v49, %v4558_v32  ;;  %v5138_v9 = vadd.f32 %v5137_v13, %v5136_v46  ;;  %v5154_v2 = vadd.f32 %v5153_v59, %v5152_v26  ;;  %v4576_v18 = vadd.f32 %v4575_v38, %v4574_v36 }
 0x29a   : > { %v4577_v19 = vsel %vm415_vm2, %v4571_v30, 0.0  ;;  %v5157_v41 = vsel %vm415_vm2, %v5151_v61, 0.0 }
 0x29b   : > { %v4561_v6 = vrot.slane %v4560_v39, 4  ;;  %v5140_v8 = vadd.f32 %v5139_v58, %v5138_v9  ;;  %v5156_v21 = vadd.f32 %v5155_v57, %v5154_v2  ;;  %v4578_v42 = vadd.f32 %v4577_v19, %v4576_v18 }
 0x29d   : > { %v4562_v44 = vadd.f32 %v4561_v6, %v4560_v39  ;;  %v5141_v45 = vrot.slane %v5140_v8, 4  ;;  %v5158_v14 = vadd.f32 %v5157_v41, %v5156_v21  ;;  %v4579_v47 = vrot.slane %v4578_v42, 4 }
 0x29f   : > { %v4563_v50 = vrot.slane %v4562_v44, 2  ;;  %v5142_v51 = vadd.f32 %v5141_v45, %v5140_v8  ;;  %v5159_v25 = vrot.slane %v5158_v14, 4  ;;  %v4580_v31 = vadd.f32 %v4579_v47, %v4578_v42 }
 0x2a1   : > { %v4564_v48 = vadd.f32 %v4563_v50, %v4562_v44  ;;  %v5143_v52 = vrot.slane %v5142_v51, 2  ;;  %v5160_v22 = vadd.f32 %v5159_v25, %v5158_v14  ;;  %v4581_v27 = vrot.slane %v4580_v31, 2 }
 0x2a3   : > { %v4565_v23 = vrot.slane %v4564_v48, 1  ;;  %v5144_v35 = vadd.f32 %v5143_v52, %v5142_v51  ;;  %v5161_v53 = vrot.slane %v5160_v22, 2  ;;  %v4582_v55 = vadd.f32 %v4581_v27, %v4580_v31 }
 0x2a5   : > { %v4566_v54 = vadd.f32 %v4565_v23, %v4564_v48  ;;  %v5145_v60 = vrot.slane %v5144_v35, 1  ;;  %v5162_v34 = vadd.f32 %v5161_v53, %v5160_v22  ;;  %v4583_v62 = vrot.slane %v4582_v55, 1 }
 0x2a7   : > { %v4567_v63 = vadd.f32 %v4566_v54, %v7666_v43  ;;  %v5146_v3 = vadd.f32 %v5145_v60, %v5144_v35  ;;  %v5163_v4 = vrot.slane %v5162_v34, 1  ;;  %v4584_v5 = vadd.f32 %v4583_v62, %v4582_v55 }
 0x2a9   : > { %v5147_v29 = vadd.f32 %v5146_v3, %v4567_v63  ;;  %v4585_v7 = vadd.f32 %v4584_v5, %v7669_v11  ;;  %v5164_v37 = vadd.f32 %v5163_v4, %v5162_v34 }
 0x2ab   : > { %5167 = vst.msk [vmem:[%s311_s28] sm:$0x1] %vm5166_vm5, %v5147_v29  ;;  %v5165_v10 = vadd.f32 %v5164_v37, %v4585_v7 }
 0x2ad   : > { %5168 = vst.msk [vmem:[%s311_s28 + $0x1] sm:$0x1] %vm5166_vm5, %v5165_v10 }
 0x2ae PF: > { %s17_s25 = sadd.s32 1, %s6690_s25   ;;  %s7740_s21 = smov %s6682_s23 }
 0x2af   : > { %p14_p8 = scmp.ge.s32.totalorder %s17_s25, 10   ;;  %s7741_s22 = smov %s6686_s24 }
 0x2b0   : > { %s7742_s23 = smov %s7745_s3  ;;  %s7743_s24 = smov %s7749_s4 }
 0x2b1   :  { %16 = sbr.rel (!%p14_p8) target bundleno = 3 (0x3), region = 97 }

// kernel: _lambda_.5
= control target key start
LH: loop header
LB: loop body
LE: loop exit
PB: predicated region body
PF: predicated region fallthrough
CT: control target
= control target key end

     0   :  { %s717_s12 = smov 0   ;;  %s719_s13 = smov 0   ;;  %s930_s0 = inlined_call_operand.vmem [shape: bf16[2,32,32,8], index: 0, kind: input, shape index: {}]   ;;  %s931_s1 = inlined_call_operand.vmem [shape: f32[1,8], index: 1, kind: input, shape index: {}]   ;;  %s932_s2 = inlined_call_operand.vmem [shape: f32[1,8], index: 2, kind: input, shape index: {}]   ;;  %s933_s3 = inlined_call_operand.vmem [shape: f32[2,32,32,8], index: 3, kind: output, shape index: {}]  }
   0x1   :  { %s721_s14 = smov 0   ;;  %s723_s15 = smov 0  }
   0x2   :  { %s725_s16 = smov 0  }
   0x3 LB: > { %s22_s17 = sadd.s32 1, %s687_s14  ;;  %s25_s18 = sadd.s32 1, %s691_s15  ;;  %s695_s16 = sphi %s725_s16, %s13_s16   ;;  %s691_s15 = sphi %s723_s15, %s937_s15   ;;  %s687_s14 = sphi %s721_s14, %s936_s14   ;;  %s683_s13 = sphi %s719_s13, %s935_s13   ;;  %s679_s12 = sphi %s717_s12, %s934_s12  }
   0x4   : > { %p23_p0 = scmp.ge.s32.totalorder %s22_s17, 4  ;;  %p525_p1 = scmp.ge.s32.totalorder %s695_s16, 1 }
   0x5   : > { %p159_p2 = scmp.lt.s32.totalorder %s695_s16, 9 }
   0x6   : > { %s939_s17 = smov (%p23_p0, %s22_s17), 0  ;;  %s941_s18 = smov (!%p23_p0, %s25_s18), %s691_s15 }
   0x7   : > { %p160_p3 = pnand %p525_p1, %p159_p2  ;;  %p27_p4 = scmp.ge.s32.totalorder %s941_s18, 2 }
   0x8   : > { %s526_s19 = sshll.u32 (!%p160_p3), %s679_s12, 3  ;;  %p194_p5 = scmp.lt.s32.totalorder (!%p160_p3), %s683_s13, 1  ;;  %v758_v0 = vld [vmem:[%s931_s1] ss:$0 sm:$0xff] (!%p160_p3)  ;;  %vm389_vm0 = vcmask (!%p160_p3), 64512  }
   0x9   : > { %s943_s18 = smov (%p27_p4, %s941_s18), 0  ;;  %163 = sbr.rel (%p160_p3) target bundleno = 58 (0x3a), region = 32 }
   0xa   : > { %p196_p6 = scmp.lt.s32.totalorder (!%p160_p3), %s526_s19, 31  ;;  %v767_v9 = vld [vmem:[%s932_s2] ss:$0 sm:$0xff] (!%p160_p3) }
  0x10   : > { %s945_s13 = smov (!%p194_p5, %s683_s13), 1  ;;  %s947_s19 = smov (!%p196_p6, %s526_s19), 31 }
  0x11   : > { %s528_s20 = sshll.u32 %s945_s13, 7  ;;  %s527_s21 = sshll.u32 %s947_s19, 2 }
  0x12   : > { %s747_s22 = sadd.s32 %s528_s20, %s527_s21 }
  0x13   : > { %s529_s23 = sshll.u32 %s747_s22, 2  ;;  %s533_s4 = sshll.u32 %s747_s22, 3 }
  0x14   : > { %s753_s26 = scalar_lea.vmem %s930_s0, %s529_s23  ;;  %s785_s7 = scalar_lea.vmem %s933_s3, %s533_s4 }
  0x15   : > { %v539_v1 = vld [vmem:[%s753_s26] sm:$0xff]   ;;  %v602_v2 = vld [vmem:[%s753_s26 + $0x8] sm:$0xff]   ;;  %v603_v3 = vld [vmem:[%s753_s26 + $0x10] sm:$0xff]  }
  0x16   : > { %v540_v4 = vunpack.c.l.bf16 %v539_v1  ;;  %v541_v5 = vunpack.c.h.bf16 %v539_v1  ;;  %v544_v6 = vunpack.c.l.bf16 %v602_v2  ;;  %v545_v7 = vunpack.c.h.bf16 %v602_v2  ;;  %v604_v8 = vld [vmem:[%s753_s26 + $0x18] sm:$0xff]   ;;  %v605_v30 = vld [vmem:[%s753_s26 + $0x20] sm:$0xff]   ;;  %v606_v31 = vld [vmem:[%s753_s26 + $0x28] sm:$0xff]  }
  0x17   : > { %v548_v10 = vunpack.c.l.bf16 %v603_v3  ;;  %v549_v11 = vunpack.c.h.bf16 %v603_v3  ;;  %v552_v12 = vunpack.c.l.bf16 %v604_v8  ;;  %v553_v13 = vunpack.c.h.bf16 %v604_v8  ;;  %v607_v36 = vld [vmem:[%s753_s26 + $0x30] sm:$0xff]   ;;  %v608_v37 = vld [vmem:[%s753_s26 + $0x38] sm:$0xff]   ;;  %v609_v3 = vld [vmem:[%s753_s26 + $0x40] sm:$0xff]  }
  0x18   : > { %v286_v14 = vmul.f32 %v540_v4, %v758_v0  ;;  %v287_v15 = vmul.f32 %v541_v5, %v758_v0  ;;  %v288_v16 = vmul.f32 %v544_v6, %v758_v0  ;;  %v289_v17 = vmul.f32 %v545_v7, %v758_v0  ;;  %v610_v4 = vld [vmem:[%s753_s26 + $0x48] sm:$0xff]  }
  0x19   : > { %v290_v18 = vmul.f32 %v548_v10, %v758_v0  ;;  %v291_v19 = vmul.f32 %v549_v11, %v758_v0  ;;  %v292_v20 = vmul.f32 %v552_v12, %v758_v0  ;;  %v293_v21 = vmul.f32 %v553_v13, %v758_v0  ;;  %v611_v10 = vld [vmem:[%s753_s26 + $0x50] sm:$0xff]   ;;  %v612_v11 = vld [vmem:[%s753_s26 + $0x58] sm:$0xff]  }
  0x1a   : > { %v325_v22 = vadd.f32 %v767_v9, %v286_v14  ;;  %v326_v23 = vadd.f32 %v767_v9, %v287_v15  ;;  %v327_v24 = vadd.f32 %v767_v9, %v288_v16  ;;  %v328_v25 = vadd.f32 %v767_v9, %v289_v17 }
  0x1b   : > { %v329_v26 = vadd.f32 %v767_v9, %v290_v18  ;;  %v330_v27 = vadd.f32 %v767_v9, %v291_v19  ;;  %v331_v28 = vadd.f32 %v767_v9, %v292_v20  ;;  %v332_v29 = vadd.f32 %v767_v9, %v293_v21 }
  0x1c   : > { %v357_v32 = vmax.f32 %v325_v22, 0.0  ;;  %v358_v33 = vmax.f32 %v326_v23, 0.0  ;;  %v359_v34 = vmax.f32 %v327_v24, 0.0  ;;  %v360_v35 = vmax.f32 %v328_v25, 0.0 }
  0x1d   : > { %v361_v38 = vmax.f32 %v329_v26, 0.0  ;;  %v362_v39 = vmax.f32 %v330_v27, 0.0  ;;  %v363_v40 = vmax.f32 %v331_v28, 0.0  ;;  %v364_v41 = vmax.f32 %v332_v29, 0.0 }
  0x1e   : > { %390 = vst.msk [vmem:[%s785_s7] sm:$0xff] %vm389_vm0, %v357_v32  ;;  %391 = vst.msk [vmem:[%s785_s7 + $0x8] sm:$0xff] %vm389_vm0, %v358_v33  ;;  %v556_v42 = vunpack.c.l.bf16 %v605_v30  ;;  %v557_v43 = vunpack.c.h.bf16 %v605_v30  ;;  %v560_v44 = vunpack.c.l.bf16 %v606_v31  ;;  %v561_v45 = vunpack.c.h.bf16 %v606_v31 }
  0x1f   : > { %392 = vst.msk [vmem:[%s785_s7 + $0x10] sm:$0xff] %vm389_vm0, %v359_v34  ;;  %393 = vst.msk [vmem:[%s785_s7 + $0x18] sm:$0xff] %vm389_vm0, %v360_v35  ;;  %v564_v46 = vunpack.c.l.bf16 %v607_v36  ;;  %v565_v47 = vunpack.c.h.bf16 %v607_v36  ;;  %v568_v48 = vunpack.c.l.bf16 %v608_v37  ;;  %v569_v49 = vunpack.c.h.bf16 %v608_v37 }
  0x20   : > { %394 = vst.msk [vmem:[%s785_s7 + $0x20] sm:$0xff] %vm389_vm0, %v361_v38  ;;  %395 = vst.msk [vmem:[%s785_s7 + $0x28] sm:$0xff] %vm389_vm0, %v362_v39  ;;  %v294_v50 = vmul.f32 %v556_v42, %v758_v0  ;;  %v295_v51 = vmul.f32 %v557_v43, %v758_v0  ;;  %v296_v52 = vmul.f32 %v560_v44, %v758_v0  ;;  %v572_v16 = vunpack.c.l.bf16 %v609_v3 }
  0x21   : > { %396 = vst.msk [vmem:[%s785_s7 + $0x30] sm:$0xff] %vm389_vm0, %v363_v40  ;;  %397 = vst.msk [vmem:[%s785_s7 + $0x38] sm:$0xff] %vm389_vm0, %v364_v41  ;;  %v297_v53 = vmul.f32 %v561_v45, %v758_v0  ;;  %v298_v54 = vmul.f32 %v564_v46, %v758_v0  ;;  %v299_v55 = vmul.f32 %v565_v47, %v758_v0  ;;  %v573_v17 = vunpack.c.h.bf16 %v609_v3  ;;  %v613_v40 = vld [vmem:[%s753_s26 + $0x60] sm:$0xff]   ;;  %v614_v41 = vld [vmem:[%s753_s26 + $0x68] sm:$0xff]  }
  0x22   : > { %v300_v56 = vmul.f32 %v568_v48, %v758_v0  ;;  %v301_v57 = vmul.f32 %v569_v49, %v758_v0  ;;  %v333_v58 = vadd.f32 %v767_v9, %v294_v50  ;;  %v334_v59 = vadd.f32 %v767_v9, %v295_v51  ;;  %v615_v46 = vld [vmem:[%s753_s26 + $0x70] sm:$0xff]   ;;  %v616_v47 = vld [vmem:[%s753_s26 + $0x78] sm:$0xff]  }
  0x23   : > { %v335_v60 = vadd.f32 %v767_v9, %v296_v52  ;;  %v336_v61 = vadd.f32 %v767_v9, %v297_v53  ;;  %v337_v62 = vadd.f32 %v767_v9, %v298_v54  ;;  %v338_v63 = vadd.f32 %v767_v9, %v299_v55 }
  0x24   : > { %v339_v1 = vadd.f32 %v767_v9, %v300_v56  ;;  %v340_v2 = vadd.f32 %v767_v9, %v301_v57  ;;  %v365_v5 = vmax.f32 %v333_v58, 0.0  ;;  %v366_v6 = vmax.f32 %v334_v59, 0.0 }
  0x25   : > { %v367_v7 = vmax.f32 %v335_v60, 0.0  ;;  %v368_v8 = vmax.f32 %v336_v61, 0.0  ;;  %v369_v12 = vmax.f32 %v337_v62, 0.0  ;;  %v370_v13 = vmax.f32 %v338_v63, 0.0 }
  0x26   : > { %v371_v14 = vmax.f32 %v339_v1, 0.0  ;;  %v372_v15 = vmax.f32 %v340_v2, 0.0  ;;  %398 = vst.msk [vmem:[%s785_s7 + $0x40] sm:$0xff] %vm389_vm0, %v365_v5  ;;  %399 = vst.msk [vmem:[%s785_s7 + $0x48] sm:$0xff] %vm389_vm0, %v366_v6  ;;  %v576_v18 = vunpack.c.l.bf16 %v610_v4  ;;  %v577_v19 = vunpack.c.h.bf16 %v610_v4 }
  0x27   : > { %400 = vst.msk [vmem:[%s785_s7 + $0x50] sm:$0xff] %vm389_vm0, %v367_v7  ;;  %401 = vst.msk [vmem:[%s785_s7 + $0x58] sm:$0xff] %vm389_vm0, %v368_v8  ;;  %v580_v20 = vunpack.c.l.bf16 %v611_v10  ;;  %v581_v21 = vunpack.c.h.bf16 %v611_v10  ;;  %v584_v22 = vunpack.c.l.bf16 %v612_v11  ;;  %v585_v23 = vunpack.c.h.bf16 %v612_v11 }
  0x28   : > { %402 = vst.msk [vmem:[%s785_s7 + $0x60] sm:$0xff] %vm389_vm0, %v369_v12  ;;  %403 = vst.msk [vmem:[%s785_s7 + $0x68] sm:$0xff] %vm389_vm0, %v370_v13  ;;  %v302_v24 = vmul.f32 %v572_v16, %v758_v0  ;;  %v303_v25 = vmul.f32 %v573_v17, %v758_v0  ;;  %v304_v26 = vmul.f32 %v576_v18, %v758_v0  ;;  %v588_v52 = vunpack.c.l.bf16 %v613_v40 }
  0x29   : > { %404 = vst.msk [vmem:[%s785_s7 + $0x70] sm:$0xff] %vm389_vm0, %v371_v14  ;;  %405 = vst.msk [vmem:[%s785_s7 + $0x78] sm:$0xff] %vm389_vm0, %v372_v15  ;;  %v305_v27 = vmul.f32 %v577_v19, %v758_v0  ;;  %v306_v28 = vmul.f32 %v580_v20, %v758_v0  ;;  %v307_v29 = vmul.f32 %v581_v21, %v758_v0  ;;  %v589_v53 = vunpack.c.h.bf16 %v613_v40 }
  0x2a   : > { %v308_v30 = vmul.f32 %v584_v22, %v758_v0  ;;  %v309_v31 = vmul.f32 %v585_v23, %v758_v0  ;;  %v341_v32 = vadd.f32 %v767_v9, %v302_v24  ;;  %v342_v33 = vadd.f32 %v767_v9, %v303_v25 }
  0x2b   : > { %v343_v34 = vadd.f32 %v767_v9, %v304_v26  ;;  %v344_v35 = vadd.f32 %v767_v9, %v305_v27  ;;  %v345_v36 = vadd.f32 %v767_v9, %v306_v28  ;;  %v346_v37 = vadd.f32 %v767_v9, %v307_v29 }
  0x2c   : > { %v347_v38 = vadd.f32 %v767_v9, %v308_v30  ;;  %v348_v39 = vadd.f32 %v767_v9, %v309_v31  ;;  %v373_v42 = vmax.f32 %v341_v32, 0.0  ;;  %v374_v43 = vmax.f32 %v342_v33, 0.0 }
  0x2d   : > { %v375_v44 = vmax.f32 %v343_v34, 0.0  ;;  %v376_v45 = vmax.f32 %v344_v35, 0.0  ;;  %v377_v48 = vmax.f32 %v345_v36, 0.0  ;;  %v378_v49 = vmax.f32 %v346_v37, 0.0 }
  0x2e   : > { %v379_v50 = vmax.f32 %v347_v38, 0.0  ;;  %v380_v51 = vmax.f32 %v348_v39, 0.0  ;;  %406 = vst.msk [vmem:[%s785_s7 + $0x80] sm:$0xff] %vm389_vm0, %v373_v42  ;;  %407 = vst.msk [vmem:[%s785_s7 + $0x88] sm:$0xff] %vm389_vm0, %v374_v43  ;;  %v592_v54 = vunpack.c.l.bf16 %v614_v41  ;;  %v593_v55 = vunpack.c.h.bf16 %v614_v41 }
  0x2f   : > { %408 = vst.msk [vmem:[%s785_s7 + $0x90] sm:$0xff] %vm389_vm0, %v375_v44  ;;  %409 = vst.msk [vmem:[%s785_s7 + $0x98] sm:$0xff] %vm389_vm0, %v376_v45  ;;  %v596_v56 = vunpack.c.l.bf16 %v615_v46  ;;  %v597_v57 = vunpack.c.h.bf16 %v615_v46  ;;  %v600_v58 = vunpack.c.l.bf16 %v616_v47  ;;  %v601_v59 = vunpack.c.h.bf16 %v616_v47 }
  0x30   : > { %410 = vst.msk [vmem:[%s785_s7 + $0xa0] sm:$0xff] %vm389_vm0, %v377_v48  ;;  %411 = vst.msk [vmem:[%s785_s7 + $0xa8] sm:$0xff] %vm389_vm0, %v378_v49  ;;  %v310_v60 = vmul.f32 %v588_v52, %v758_v0  ;;  %v311_v61 = vmul.f32 %v589_v53, %v758_v0  ;;  %v312_v62 = vmul.f32 %v592_v54, %v758_v0 }
  0x31   : > { %412 = vst.msk [vmem:[%s785_s7 + $0xb0] sm:$0xff] %vm389_vm0, %v379_v50  ;;  %413 = vst.msk [vmem:[%s785_s7 + $0xb8] sm:$0xff] %vm389_vm0, %v380_v51  ;;  %v313_v63 = vmul.f32 %v593_v55, %v758_v0  ;;  %v314_v1 = vmul.f32 %v596_v56, %v758_v0  ;;  %v315_v2 = vmul.f32 %v597_v57, %v758_v0 }
  0x32   : > { %v316_v3 = vmul.f32 %v600_v58, %v758_v0  ;;  %v317_v4 = vmul.f32 %v601_v59, %v758_v0  ;;  %v349_v5 = vadd.f32 %v767_v9, %v310_v60  ;;  %v350_v6 = vadd.f32 %v767_v9, %v311_v61 }
  0x33   : > { %v351_v7 = vadd.f32 %v767_v9, %v312_v62  ;;  %v352_v8 = vadd.f32 %v767_v9, %v313_v63  ;;  %v353_v10 = vadd.f32 %v767_v9, %v314_v1  ;;  %v354_v11 = vadd.f32 %v767_v9, %v315_v2 }
  0x34   : > { %v355_v0 = vadd.f32 %v767_v9, %v316_v3  ;;  %v356_v12 = vadd.f32 %v767_v9, %v317_v4  ;;  %v381_v13 = vmax.f32 %v349_v5, 0.0  ;;  %v382_v14 = vmax.f32 %v350_v6, 0.0 }
  0x35   : > { %v383_v15 = vmax.f32 %v351_v7, 0.0  ;;  %v384_v16 = vmax.f32 %v352_v8, 0.0  ;;  %v385_v17 = vmax.f32 %v353_v10, 0.0  ;;  %v386_v18 = vmax.f32 %v354_v11, 0.0 }
  0x36   : > { %v387_v19 = vmax.f32 %v355_v0, 0.0  ;;  %v388_v20 = vmax.f32 %v356_v12, 0.0  ;;  %414 = vst.msk [vmem:[%s785_s7 + $0xc0] sm:$0xff] %vm389_vm0, %v381_v13  ;;  %415 = vst.msk [vmem:[%s785_s7 + $0xc8] sm:$0xff] %vm389_vm0, %v382_v14 }
  0x37   : > { %416 = vst.msk [vmem:[%s785_s7 + $0xd0] sm:$0xff] %vm389_vm0, %v383_v15  ;;  %417 = vst.msk [vmem:[%s785_s7 + $0xd8] sm:$0xff] %vm389_vm0, %v384_v16 }
  0x38   : > { %418 = vst.msk [vmem:[%s785_s7 + $0xe0] sm:$0xff] %vm389_vm0, %v385_v17  ;;  %419 = vst.msk [vmem:[%s785_s7 + $0xe8] sm:$0xff] %vm389_vm0, %v386_v18 }
  0x39   : > { %420 = vst.msk [vmem:[%s785_s7 + $0xf0] sm:$0xff] %vm389_vm0, %v387_v19  ;;  %421 = vst.msk [vmem:[%s785_s7 + $0xf8] sm:$0xff] %vm389_vm0, %v388_v20 }
  0x3a PF: > { %s13_s16 = sadd.s32 1, %s695_s16   ;;  %s934_s12 = smov %s687_s14 }
  0x3b   : > { %p10_p7 = scmp.ge.s32.totalorder %s13_s16, 10   ;;  %s935_s13 = smov %s691_s15 }
  0x3c   : > { %s936_s14 = smov %s939_s17  ;;  %s937_s15 = smov %s943_s18 }
  0x3d   :  { %12 = sbr.rel (!%p10_p7) target bundleno = 3 (0x3), region = 62 }

// kernel: _lambda_.4
= control target key start
LH: loop header
LB: loop body
LE: loop exit
PB: predicated region body
PF: predicated region fallthrough
CT: control target
= control target key end

     0   :  { %s6998_s21 = smov 0   ;;  %s7000_s22 = smov 0   ;;  %s8266_s0 = inlined_call_operand.vmem [shape: bf16[2,4,10,34,4], index: 0, kind: input, shape index: {}]   ;;  %s8267_s1 = inlined_call_operand.vmem [shape: bf16[9,4,8], index: 1, kind: input, shape index: {}]   ;;  %s8268_s2 = inlined_call_operand.vmem [shape: f32[1,8], index: 2, kind: input, shape index: {}]   ;;  %s8269_s3 = inlined_call_operand.vmem [shape: f32[1,4], index: 3, kind: input, shape index: {}]   ;;  %s8270_s4 = inlined_call_operand.vmem [shape: f32[1,4], index: 4, kind: input, shape index: {}]   ;;  %s8271_s5 = inlined_call_operand.vmem [shape: bf16[2,32,32,8], index: 5, kind: output, shape index: {0}]   ;;  %s8272_s6 = inlined_call_operand.vmem [shape: f32[2,4,2,8], index: 6, kind: output, shape index: {1}]  }
   0x1   :  { %s7002_s23 = smov 0   ;;  %s7004_s24 = smov 0  }
   0x2   :  { %s7006_s25 = smov 0  }
   0x3 LB: > { %s26_s26 = sadd.s32 1, %s6953_s23  ;;  %s29_s27 = sadd.s32 1, %s6957_s24  ;;  %s6961_s25 = sphi %s7006_s25, %s17_s25   ;;  %s6957_s24 = sphi %s7004_s24, %s8280_s24   ;;  %s6953_s23 = sphi %s7002_s23, %s8279_s23   ;;  %s6949_s22 = sphi %s7000_s22, %s8278_s22   ;;  %s6945_s21 = sphi %s6998_s21, %s8277_s21  }
   0x4   : > { %p27_p0 = scmp.ge.s32.totalorder %s26_s26, 4  ;;  %p5563_p1 = scmp.ge.s32.totalorder %s6961_s25, 1 }
   0x5   : > { %p237_p2 = scmp.lt.s32.totalorder %s6961_s25, 9 }
   0x6   : > { %s8282_s26 = smov (%p27_p0, %s26_s26), 0  ;;  %s8284_s27 = smov (!%p27_p0, %s29_s27), %s6957_s24 }
   0x7   : > { %p238_p3 = pnand %p5563_p1, %p237_p2  ;;  %p31_p4 = scmp.ge.s32.totalorder %s8284_s27, 2 }
   0x8   : > { %v7033_v0 = vld [vmem:[%s8267_s1 + $0x2] sm:$0x3] (!%p238_p3)  ;;  %vm752_vm0 = vcmask (!%p238_p3), 1041408   ;;  %p284_p5 = scmp.lt.s32.totalorder (!%p238_p3), %s6949_s22, 1  ;;  %p286_p6 = scmp.lt.s32.totalorder (!%p238_p3), %s6945_s21, 3  ;;  %v577_v2 = vlaneseq (!%p238_p3)  ;;  %vm745_vm6 = vcmask (!%p238_p3), 31744  }
   0x9   : > { %s8286_s27 = smov (%p31_p4, %s8284_s27), 0  ;;  %241 = sbr.rel (%p238_p3) target bundleno = 704 (0x2c0), region = 40 }
   0xa   : > { %6798 = vmatprep.subr.msk.bf16.mxu0 (!%p238_p3), %vm752_vm0, %v7033_v0  ;;  %v7040_v1 = vsel (!%p238_p3), %vm752_vm0, %v7033_v0, 0  ;;  %6807 = vmatprep.subr.msk.bf16.mxu1 (!%p238_p3), %vm752_vm0, %v7033_v0  ;;  %p598_p7 = scmp.ne.s32.totalorder (!%p238_p3), %s6945_s21, 0  ;;  %v7052_v3 = vld [vmem:[%s8267_s1] sm:$0x3] (!%p238_p3)  ;;  %v7063_v4 = vshrl.u32 (!%p238_p3), %v577_v2, 7  ;;  %vm864_vm8 = vcmask (!%p238_p3), 1046528  }
   0xb   : > { %6111 = vmatpush3.bf16.msra.mxu0 (!%p238_p3), %v7040_v1  ;;  %6165 = vmatpush3.bf16.msra.mxu1 (!%p238_p3), %v7040_v1  ;;  %v7073_v6 = vld [vmem:[%s8269_s3] ss:$0 sm:$0xff] (!%p238_p3)  ;;  %vm724_vm5 = vsmask.f32 (!%p238_p3), 7424  ;;  %s5565_s7 = sshll.u32 (!%p238_p3), %s6945_s21, 3  ;;  %vm1382_vm9 = vcmask (!%p238_p3), 60416  }
   0xc   : > { %6799 = vmatprep.subr.msk.bf16.mxu0 (!%p238_p3), %vm752_vm0, %v7052_v3  ;;  %6808 = vmatprep.subr.msk.bf16.mxu1 (!%p238_p3), %vm752_vm0, %v7052_v3  ;;  %vm583_vm1 = vcmp.ge.s32.totalorder (!%p238_p3), %v7063_v4, 1  ;;  %v7083_v10 = vadd.s32 (!%p238_p3), 32, %v7063_v4  ;;  %v7090_v17 = vld [vmem:[%s8270_s4] ss:$0 sm:$0xff] (!%p238_p3)  ;;  %p296_p8 = scmp.lt.s32.totalorder (!%p238_p3), %s5565_s7, 31  ;;  %vm1387_vm10 = vcmask (!%p238_p3), 64512  }
   0xd   : > { %p612_p9 = scmp.ne.s32.totalorder (!%p238_p3), %s6945_s21, 3  ;;  %vm5410_vm14 = vcmask (!%p238_p3), 57344  }
   0xe   : > { %vm592_vm4 = vcmp.le.s32.totalorder (!%p238_p3), %v7083_v10, 32 }
  0x10   : > { %s8288_s22 = smov (!%p284_p5, %s6949_s22), 1  ;;  %s8290_s7 = smov (!%p296_p8, %s5565_s7), 31 }
  0x11   : > { %s7055_s8 = scalar_select %p286_p6, %s6945_s21, 3 }
  0x12   : > { %s6871_s9 = smul.u32 200, %s8288_s22  ;;  %s5569_s28 = sshll.u32 %s8288_s22, 2 }
  0x13   : > { %s6870_s10 = smul.u32 50, %s7055_s8 }
  0x14   : > { %s599_s11 = scalar_select %p598_p7, 1, 0 }
  0x15   : > { %s290_s12 = sadd.s32 %s6871_s9, %s6870_s10 }
  0x16   : > { %s5564_s13 = sshll.u32 %s290_s12, 2  ;;  %v600_v5 = vstv %s599_s11  ;;  %s5566_s11 = sshll.u32 %s8290_s7, 2 }
  0x17   : > { %s7068_s16 = scalar_lea.vmem %s8266_s0, %s5564_s13  ;;  %vm7078_vm2 = vcmp.eq.s32.totalorder %v600_v5, 1  ;;  %s5567_s12 = sshll.u32 %s8288_s22, 7 }
  0x18   : > { %v5821_v7 = vld [vmem:[%s7068_s16] sm:$0xff]   ;;  %v5880_v8 = vld [vmem:[%s7068_s16 + $0x8] sm:$0xff]   ;;  %v5881_v16 = vld [vmem:[%s7068_s16 + $0x18] sm:$0xff]   ;;  %s300_s13 = sadd.s32 %s5567_s12, %s5566_s11 }
  0x19   : > { %v5822_v11 = vunpack.c.l.bf16 %v5821_v7  ;;  %v5823_v12 = vunpack.c.h.bf16 %v5821_v7  ;;  %v5826_v13 = vunpack.c.l.bf16 %v5880_v8  ;;  %v5827_v14 = vunpack.c.h.bf16 %v5880_v8  ;;  %v318_v15 = vld [vmem:[%s7068_s16 + $0x14] ss:$12 sps:$4 sm:$0xff]   ;;  %vm602_vm3 = vmand %vm583_vm1, %vm7078_vm2  ;;  %v317_v42 = vld [vmem:[%s7068_s16 + $0x10] sm:$0x1]  ;;  %s5568_s17 = sshll.u32 %s300_s13, 2 }
  0x1a   : > { %v5830_v18 = vunpack.c.l.bf16 %v5881_v16  ;;  %v5831_v19 = vunpack.c.h.bf16 %v5881_v16  ;;  %v368_v20 = vunpack.c.l.bf16 %v318_v15  ;;  %v371_v21 = vunpack.c.h.bf16 %v318_v15  ;;  %v322_v47 = vld [vmem:[%s7068_s16 + $0x24] sm:$0x1]  ;;  %vm606_vm7 = vmand %vm592_vm4, %vm7078_vm2  ;;  %s7873_s29 = scalar_lea.vmem %s8271_s5, %s5568_s17 }
  0x1b   : > { %v420_v22 = vmul.f32 %v5822_v11, %v7073_v6  ;;  %v421_v23 = vmul.f32 %v5823_v12, %v7073_v6  ;;  %v422_v24 = vmul.f32 %v5826_v13, %v7073_v6  ;;  %v423_v25 = vmul.f32 %v5827_v14, %v7073_v6  ;;  %s613_s15 = scalar_select %p612_p9, 1, 0 }
  0x1c   : > { %v425_v26 = vmul.f32 %v7073_v6, %v368_v20  ;;  %v426_v27 = vmul.f32 %v5830_v18, %v7073_v6  ;;  %v427_v28 = vmul.f32 %v5831_v19, %v7073_v6  ;;  %v428_v29 = vmul.f32 %v7073_v6, %v371_v21 }
  0x1d   : > { %v477_v30 = vadd.f32 %v7090_v17, %v420_v22  ;;  %v478_v31 = vadd.f32 %v7090_v17, %v421_v23  ;;  %v479_v32 = vadd.f32 %v7090_v17, %v422_v24  ;;  %v480_v33 = vadd.f32 %v7090_v17, %v423_v25 }
  0x1e   : > { %v482_v34 = vadd.f32 %v7090_v17, %v425_v26  ;;  %v483_v35 = vadd.f32 %v7090_v17, %v426_v27  ;;  %v484_v36 = vadd.f32 %v7090_v17, %v427_v28  ;;  %v485_v37 = vadd.f32 %v7090_v17, %v428_v29 }
  0x1f   : > { %v527_v38 = vmax.f32 %v477_v30, 0.0  ;;  %v528_v39 = vmax.f32 %v478_v31, 0.0  ;;  %v529_v40 = vmax.f32 %v479_v32, 0.0  ;;  %v530_v41 = vmax.f32 %v480_v33, 0.0 }
  0x20   : > { %v532_v43 = vmax.f32 %v482_v34, 0.0  ;;  %v533_v44 = vmax.f32 %v483_v35, 0.0  ;;  %v534_v45 = vmax.f32 %v484_v36, 0.0  ;;  %v535_v46 = vmax.f32 %v485_v37, 0.0  ;;  %v7167_v37 = vld [vmem:[%s8267_s1 + $0x4] sm:$0x3] }
  0x21   : > { %v626_v48 = vsel %vm602_vm3, %v527_v38, 0.0  ;;  %v627_v49 = vsel %vm7078_vm2, %v528_v39, 0.0  ;;  %v628_v50 = vsel %vm7078_vm2, %v529_v40, 0.0  ;;  %v629_v51 = vsel %vm7078_vm2, %v530_v41, 0.0  ;;  %v5882_v38 = vld [vmem:[%s7068_s16 + $0x28] sm:$0xff]  }
  0x22   : > { %v7120_v52 = vpack.c.bf16 %v627_v49, %v626_v48  ;;  %v7122_v53 = vpack.c.bf16 %v629_v51, %v628_v50  ;;  %v631_v54 = vsel %vm583_vm1, %v532_v43, 0.0  ;;  %v7126_v55 = vpack.c.bf16 %v535_v46, %v534_v45 }
  0x23   : > { %v7128_v56 = vpack.c.bf16 %v533_v44, %v631_v54  ;;  %v367_v57 = vunpack.c.l.bf16 %v317_v42  ;;  %v372_v58 = vunpack.c.l.bf16 %v322_v47  ;;  %v7158_v34 = vsel %vm752_vm0, %v7052_v3, 0  ;;  %v5883_v44 = vld [vmem:[%s7068_s16 + $0x30] sm:$0xff]  }
  0x24   : > { %v726_v59 = vshrl.u32 %v7120_v52, 16  ;;  %v728_v60 = vshll.u32 %v7120_v52, 16  ;;  %v733_v61 = vshll.u32 %v7122_v53, 16  ;;  %v1000_v2 = vshll.u32 %v7126_v55, 16 }
  0x25   : > { %v994_v62 = vshrl.u32 %v7128_v56, 16  ;;  %v996_v63 = vshll.u32 %v7128_v56, 16  ;;  %v424_v8 = vmul.f32 %v7073_v6, %v367_v57  ;;  %v429_v11 = vmul.f32 %v7073_v6, %v372_v58  ;;  %v327_v57 = vld [vmem:[%s7068_s16 + $0x38] sm:$0x1] }
  0x26   : > { %v730_v5 = vrot.slane %v728_v60, 1  ;;  %v735_v7 = vrot.slane %v733_v61, 1  ;;  %v1002_v13 = vrot.slane %v1000_v2, 1  ;;  %v737_v22 = vshrl.u32 %v7122_v53, 16 }
  0x27   : > { %v998_v12 = vrot.slane %v996_v63, 1  ;;  %v481_v15 = vadd.f32 %v7090_v17, %v424_v8  ;;  %v486_v16 = vadd.f32 %v7090_v17, %v429_v11  ;;  %v1004_v24 = vshrl.u32 %v7126_v55, 16 }
  0x28   : > { %v731_v14 = vor.u32 %v730_v5, %v726_v59  ;;  %v739_v28 = vor.u32 %v737_v22, %v735_v7  ;;  %v5834_v39 = vunpack.c.l.bf16 %v5882_v38  ;;  %v5835_v40 = vunpack.c.h.bf16 %v5882_v38 }
  0x29   : > { %v999_v18 = vor.u32 %v998_v12, %v994_v62  ;;  %v531_v20 = vmax.f32 %v481_v15, 0.0  ;;  %v536_v21 = vmax.f32 %v486_v16, 0.0  ;;  %v1006_v29 = vor.u32 %v1004_v24, %v1002_v13 }
  0x2a   : > { %v736_v19 = vsel %vm724_vm5, %v731_v14, %v735_v7  ;;  %v865_v41 = vrot.slane %v7120_v52, 1  ;;  %v866_v42 = vrot.slane %v7122_v53, 1  ;;  %v430_v43 = vmul.f32 %v5834_v39, %v7073_v6 }
  0x2b   : > { %6112 = vmatprep.mubr.msk.bf16.mxu0 %vm745_vm6, %v736_v19  ;;  %v7149_v23 = vsel %vm724_vm5, %v999_v18, %v1002_v13  ;;  %v630_v9 = vsel %vm606_vm7, %v531_v20, 0.0  ;;  %v635_v25 = vsel %vm592_vm4, %v536_v21, 0.0  ;;  %v1077_v45 = vrot.slane %v7128_v56, 1  ;;  %v7240_v21 = vld [vmem:[%s8267_s1 + $0x8] sm:$0x3] }
  0x2c   : > { %6166 = vmatprep.mubr.msk.bf16.mxu1 %vm745_vm6, %v7149_v23  ;;  %v678_v26 = vpack.c.bf16 %v630_v9, %v630_v9  ;;  %v681_v27 = vpack.c.bf16 %v635_v25, %v635_v25  ;;  %v1078_v46 = vrot.slane %v7126_v55, 1  ;;  %v7191_v47 = vsel %vm752_vm0, %v7167_v37, 0 }
  0x2d   : > { %v431_v48 = vmul.f32 %v5835_v40, %v7073_v6  ;;  %v5838_v49 = vunpack.c.l.bf16 %v5883_v44  ;;  %v5839_v50 = vunpack.c.h.bf16 %v5883_v44  ;;  %v867_v51 = vsel %vm864_vm8, %v865_v41, %v866_v42 }
  0x2e   : > { %v741_v30 = vshll.u32 %v678_v26, 16  ;;  %v1008_v31 = vshll.u32 %v681_v27, 16  ;;  %v487_v54 = vadd.f32 %v7090_v17, %v430_v43  ;;  %v7207_v58 = vsel %vm864_vm8, %v1077_v45, %v1078_v46 }
  0x2f   : > { %v488_v59 = vadd.f32 %v7090_v17, %v431_v48  ;;  %v432_v60 = vmul.f32 %v5838_v49, %v7073_v6  ;;  %v377_v61 = vunpack.c.l.bf16 %v327_v57  ;;  %v868_v63 = vrot.slane %v678_v26, 1 }
  0x30   : > { %v743_v32 = vrot.slane %v741_v30, 1  ;;  %v1010_v33 = vrot.slane %v1008_v31, 1  ;;  %v537_v62 = vmax.f32 %v487_v54, 0.0  ;;  %v1080_v2 = vrot.slane %v681_v27, 1  ;;  %v7305_v54 = vld [vmem:[%s8267_s1 + $0xc] sm:$0x3] }
  0x31   : > { %v538_v5 = vmax.f32 %v488_v59, 0.0  ;;  %v489_v7 = vadd.f32 %v7090_v17, %v432_v60  ;;  %v434_v11 = vmul.f32 %v7073_v6, %v377_v61  ;;  %v869_v13 = vsel %vm864_vm8, %v866_v42, %v868_v63  ;;  %v332_v59 = vld [vmem:[%s7068_s16 + $0x4c] sm:$0x1] }
  0x32   : > { %v744_v35 = vsel %vm724_vm5, %v739_v28, %v743_v32  ;;  %v7162_v36 = vsel %vm724_vm5, %v1006_v29, %v1010_v33  ;;  %v636_v12 = vsel %vm583_vm1, %v537_v62, 0.0  ;;  %v7232_v15 = vsel %vm864_vm8, %v1078_v46, %v1080_v2  ;;  %v7269_v32 = vld [vmem:[%s8267_s1 + $0xa] sm:$0x3] }
  0x33   : > { %6113 = vmatmul.mubr.msk.bf16.vlgmr.msra.gmra.mrb[0].mxu0 %vm745_vm6, %v744_v35  ;;  %6167 = vmatmul.mubr.msk.bf16.vlgmr.msra.gmra.mrb[0].mxu1 %vm745_vm6, %v7162_v36  ;;  %v7234_v16 = vpack.c.bf16 %v538_v5, %v636_v12  ;;  %v539_v18 = vmax.f32 %v489_v7, 0.0  ;;  %v491_v20 = vadd.f32 %v7090_v17, %v434_v11  ;;  %v7264_v31 = vsel %vm752_vm0, %v7240_v21, 0  ;;  %v328_v35 = vld [vmem:[%s7068_s16 + $0x3c] ss:$12 sps:$4 sm:$0xff]  }
  0x34   : > { %6117 = vmatpush3.bf16.msra.mxu0 %v7158_v34  ;;  %6171 = vmatpush3.bf16.msra.mxu1 %v7158_v34  ;;  %v378_v40 = vunpack.c.l.bf16 %v328_v35  ;;  %v7299_v48 = vsel %vm752_vm0, %v7269_v32, 0  ;;  %v382_v62 = vunpack.c.l.bf16 %v332_v59  ;;  %v7336_v12 = vsel %vm752_vm0, %v7305_v54, 0 }
  0x35   : > { %6118 = vmatprep.mubr.msk.bf16.mxu0 %vm745_vm6, %v7120_v52  ;;  %6800 = vmatprep.subr.msk.bf16.mxu0 %vm752_vm0, %v7167_v37  ;;  %v7198_v52 = vld [vmem:[%s8267_s1 + $0x6] sm:$0x3]  ;;  %v1208_v22 = vshll.u32 %v7234_v16, 16  ;;  %v541_v9 = vmax.f32 %v491_v20, 0.0  ;;  %v1206_v25 = vshrl.u32 %v7234_v16, 16  ;;  %v1289_v45 = vrot.slane %v7234_v16, 1 }
  0x36   : > { %6172 = vmatprep.mubr.msk.bf16.mxu1 %vm745_vm6, %v7128_v56  ;;  %6809 = vmatprep.subr.msk.bf16.mxu1 %vm752_vm0, %v7167_v37  ;;  %v7229_v14 = vsel %vm752_vm0, %v7198_v52, 0  ;;  %v435_v44 = vmul.f32 %v7073_v6, %v378_v40 }
  0x37   : > { %v1210_v26 = vrot.slane %v1208_v22, 1 }
  0x38   : > { %v492_v57 = vadd.f32 %v7090_v17, %v435_v44 }
  0x39   : > { %v1211_v28 = vor.u32 %v1210_v26, %v1206_v25 }
  0x3a   : > { %v542_v63 = vmax.f32 %v492_v57, 0.0 }
  0x3c   : > { %v641_v11 = vsel %vm583_vm1, %v542_v63, 0.0 }
  0x3f   : > { %6119 = vmatmul.mubr.msk.bf16.vlgmr.msra.gmra.mrb[0].mxu0 %vm745_vm6, %v7122_v53  ;;  %6173 = vmatmul.mubr.msk.bf16.vlgmr.msra.gmra.mrb[0].mxu1 %vm745_vm6, %v7126_v55  ;;  %v433_v53 = vmul.f32 %v5839_v50, %v7073_v6 }
  0x40   : > { %6123 = vmatpush3.bf16.msra.mxu0 %v7191_v47  ;;  %6177 = vmatpush3.bf16.msra.mxu1 %v7191_v47 }
  0x41   : > { %6124 = vmatprep.mubr.msk.bf16.mxu0 %vm745_vm6, %v867_v51  ;;  %6801 = vmatprep.subr.msk.bf16.mxu0 %vm752_vm0, %v7198_v52  ;;  %v490_v8 = vadd.f32 %v7090_v17, %v433_v53  ;;  %v381_v51 = vunpack.c.h.bf16 %v328_v35 }
  0x42   : > { %6178 = vmatprep.mubr.msk.bf16.mxu1 %vm745_vm6, %v7207_v58  ;;  %6810 = vmatprep.subr.msk.bf16.mxu1 %vm752_vm0, %v7198_v52 }
  0x43   : > { %v540_v19 = vmax.f32 %v490_v8, 0.0  ;;  %v438_v61 = vmul.f32 %v7073_v6, %v381_v51  ;;  %v439_v8 = vmul.f32 %v7073_v6, %v382_v62 }
  0x45   : > { %v7252_v24 = vpack.c.bf16 %v540_v19, %v539_v18  ;;  %v495_v7 = vadd.f32 %v7090_v17, %v438_v61  ;;  %v496_v22 = vadd.f32 %v7090_v17, %v439_v8  ;;  %v5886_v61 = vld [vmem:[%s7068_s16 + $0x58] sm:$0xff]  }
  0x46   : > { %v5850_v63 = vunpack.c.l.bf16 %v5886_v61 }
  0x47   : > { %v1212_v27 = vshll.u32 %v7252_v24, 16  ;;  %v1216_v38 = vshrl.u32 %v7252_v24, 16  ;;  %v545_v20 = vmax.f32 %v495_v7, 0.0 }
  0x48   : > { %v442_v7 = vmul.f32 %v5850_v63, %v7073_v6 }
  0x49   : > { %v1214_v29 = vrot.slane %v1212_v27, 1  ;;  %v546_v27 = vmax.f32 %v496_v22, 0.0 }
  0x4b   : > { %6125 = vmatmul.mubr.msk.bf16.vlgmr.msra.gmra.mrb[0].mxu0 %vm745_vm6, %v869_v13  ;;  %6179 = vmatmul.mubr.msk.bf16.vlgmr.msra.gmra.mrb[0].mxu1 %vm745_vm6, %v7232_v15  ;;  %v7276_v33 = vsel %vm724_vm5, %v1211_v28, %v1214_v29  ;;  %v1218_v41 = vor.u32 %v1216_v38, %v1214_v29  ;;  %v645_v29 = vsel %vm592_vm4, %v546_v27, 0.0 }
  0x4c   : > { %6129 = vmatpush3.bf16.msra.mxu0 %v7229_v14  ;;  %6183 = vmatpush3.bf16.msra.mxu1 %v7229_v14  ;;  %v687_v38 = vpack.c.bf16 %v645_v29, %v645_v29 }
  0x4d   : > { %6130 = vmatprep.mubr.msk.bf16.mxu0 %vm745_vm6, %v7128_v56  ;;  %6802 = vmatprep.subr.msk.bf16.mxu0 %vm752_vm0, %v7240_v21  ;;  %v640_v56 = vsel %vm592_vm4, %v541_v9, 0.0  ;;  %v7347_v9 = vld [vmem:[%s8267_s1 + $0xe] sm:$0x3] }
  0x4e   : > { %6184 = vmatprep.mubr.msk.bf16.mxu1 %vm745_vm6, %v7234_v16  ;;  %6811 = vmatprep.subr.msk.bf16.mxu1 %vm752_vm0, %v7240_v21  ;;  %v684_v30 = vpack.c.bf16 %v640_v56, %v640_v56  ;;  %v1872_v57 = vrot.slane %v687_v38, 1 }
  0x50   : > { %v1220_v39 = vshll.u32 %v684_v30, 16  ;;  %v1292_v2 = vrot.slane %v684_v30, 1 }
  0x52   : > { %v1222_v42 = vrot.slane %v1220_v39, 1  ;;  %v7372_v39 = vsel %vm752_vm0, %v7347_v9, 0 }
  0x54   : > { %v7295_v46 = vsel %vm724_vm5, %v1218_v41, %v1222_v42  ;;  %v1803_v42 = vshll.u32 %v687_v38, 16 }
  0x56   : > { %v1805_v44 = vrot.slane %v1803_v42, 1 }
  0x57   : > { %6131 = vmatmul.mubr.msk.bf16.vlgmr.msra.gmra.mrb[0].mxu0 %vm745_vm6, %v7126_v55  ;;  %6185 = vmatmul.mubr.msk.bf16.vlgmr.msra.gmra.mrb[0].mxu1 %vm745_vm6, %v7252_v24  ;;  %v5884_v55 = vld [vmem:[%s7068_s16 + $0x40] sm:$0xff]  }
  0x58   : > { %6135 = vmatpush3.bf16.msra.mxu0 %v7264_v31  ;;  %6189 = vmatpush3.bf16.msra.mxu1 %v7264_v31  ;;  %v5842_v43 = vunpack.c.l.bf16 %v5884_v55  ;;  %v5843_v50 = vunpack.c.h.bf16 %v5884_v55  ;;  %v7377_v55 = vld [vmem:[%s8267_s1 + $0x10] sm:$0x3] }
  0x59   : > { %6136 = vmatprep.mubr.msk.bf16.mxu0 %vm745_vm6, %v7149_v23  ;;  %6803 = vmatprep.subr.msk.bf16.mxu0 %vm752_vm0, %v7269_v32  ;;  %v1290_v23 = vrot.slane %v7252_v24, 1 }
  0x5a   : > { %6190 = vmatprep.mubr.msk.bf16.mxu1 %vm745_vm6, %v7276_v33  ;;  %6812 = vmatprep.subr.msk.bf16.mxu1 %vm752_vm0, %v7269_v32  ;;  %v436_v49 = vmul.f32 %v5842_v43, %v7073_v6 }
  0x5b   : > { %v7314_v60 = vsel %vm864_vm8, %v1289_v45, %v1290_v23  ;;  %v7339_v13 = vsel %vm864_vm8, %v1290_v23, %v1292_v2  ;;  %v5851_v2 = vunpack.c.h.bf16 %v5886_v61 }
  0x5c   : > { %v493_v53 = vadd.f32 %v7090_v17, %v436_v49 }
  0x5d   : > { %v443_v8 = vmul.f32 %v5851_v2, %v7073_v6 }
  0x5e   : > { %v543_v5 = vmax.f32 %v493_v53, 0.0  ;;  %v5885_v53 = vld [vmem:[%s7068_s16 + $0x50] sm:$0xff]  }
  0x60   : > { %v7341_v18 = vpack.c.bf16 %v543_v5, %v641_v11  ;;  %v337_v5 = vld [vmem:[%s7068_s16 + $0x60] sm:$0x1] }
  0x62   : > { %v1791_v25 = vshll.u32 %v7341_v18, 16  ;;  %v1869_v45 = vrot.slane %v7341_v18, 1 }
  0x63   : > { %6137 = vmatmul.mubr.msk.bf16.vlgmr.msra.gmra.mrb[0].mxu0 %vm745_vm6, %v7162_v36  ;;  %6191 = vmatmul.mubr.msk.bf16.vlgmr.msra.gmra.mrb[0].mxu1 %vm745_vm6, %v7295_v46  ;;  %v437_v36 = vmul.f32 %v5843_v50, %v7073_v6  ;;  %v7404_v50 = vsel %vm752_vm0, %v7377_v55, 0 }
  0x64   : > { %6141 = vmatpush3.bf16.msra.mxu0 %v7299_v48  ;;  %6195 = vmatpush3.bf16.msra.mxu1 %v7299_v48  ;;  %v1793_v56 = vrot.slane %v1791_v25, 1 }
  0x65   : > { %6142 = vmatprep.mubr.msk.bf16.mxu0 %vm745_vm6, %v7207_v58  ;;  %6804 = vmatprep.subr.msk.bf16.mxu0 %vm752_vm0, %v7305_v54  ;;  %v494_v58 = vadd.f32 %v7090_v17, %v437_v36 }
  0x66   : > { %6196 = vmatprep.mubr.msk.bf16.mxu1 %vm745_vm6, %v7314_v60  ;;  %6813 = vmatprep.subr.msk.bf16.mxu1 %vm752_vm0, %v7305_v54 }
  0x67   : > { %v544_v19 = vmax.f32 %v494_v58, 0.0 }
  0x69   : > { %v7360_v26 = vpack.c.bf16 %v545_v20, %v544_v19  ;;  %v500_v20 = vadd.f32 %v7090_v17, %v443_v8  ;;  %v342_v8 = vld [vmem:[%s7068_s16 + $0x74] sm:$0x1] }
  0x6b   : > { %v1795_v28 = vshll.u32 %v7360_v26, 16  ;;  %v1799_v41 = vshrl.u32 %v7360_v26, 16  ;;  %v1870_v23 = vrot.slane %v7360_v26, 1 }
  0x6d   : > { %v1797_v35 = vrot.slane %v1795_v28, 1  ;;  %v7407_v51 = vsel %vm864_vm8, %v1869_v45, %v1870_v23  ;;  %v7424_v59 = vsel %vm864_vm8, %v1870_v23, %v1872_v57  ;;  %v338_v23 = vld [vmem:[%s7068_s16 + $0x64] ss:$12 sps:$4 sm:$0xff]  }
  0x6f   : > { %6143 = vmatmul.mubr.msk.bf16.vlgmr.msra.gmra.mrb[0].mxu0 %vm745_vm6, %v7232_v15  ;;  %6197 = vmatmul.mubr.msk.bf16.vlgmr.msra.gmra.mrb[0].mxu1 %vm745_vm6, %v7339_v13  ;;  %v1789_v15 = vshrl.u32 %v7341_v18, 16  ;;  %v1801_v43 = vor.u32 %v1799_v41, %v1797_v35 }
  0x70   : > { %6147 = vmatpush3.bf16.msra.mxu0 %v7336_v12  ;;  %6201 = vmatpush3.bf16.msra.mxu1 %v7336_v12 }
  0x71   : > { %6148 = vmatprep.mubr.msk.bf16.mxu0 %vm745_vm6, %v7234_v16  ;;  %6805 = vmatprep.subr.msk.bf16.mxu0 %vm752_vm0, %v7347_v9  ;;  %v1794_v30 = vor.u32 %v1793_v56, %v1789_v15  ;;  %v7400_v49 = vsel %vm724_vm5, %v1801_v43, %v1805_v44  ;;  %v550_v56 = vmax.f32 %v500_v20, 0.0 }
  0x72   : > { %6202 = vmatprep.mubr.msk.bf16.mxu1 %vm745_vm6, %v7341_v18  ;;  %6814 = vmatprep.subr.msk.bf16.mxu1 %vm752_vm0, %v7347_v9 }
  0x73   : > { %v7384_v40 = vsel %vm724_vm5, %v1794_v30, %v1797_v35 }
  0x7b   : > { %6149 = vmatmul.mubr.msk.bf16.vlgmr.msra.gmra.mrb[0].mxu0 %vm745_vm6, %v7252_v24  ;;  %6203 = vmatmul.mubr.msk.bf16.vlgmr.msra.gmra.mrb[0].mxu1 %vm745_vm6, %v7360_v26 }
  0x7c   : > { %6153 = vmatpush3.bf16.msra.mxu0 %v7372_v39  ;;  %6207 = vmatpush3.bf16.msra.mxu1 %v7372_v39 }
  0x7d   : > { %6154 = vmatprep.mubr.msk.bf16.mxu0 %vm745_vm6, %v7276_v33  ;;  %6806 = vmatprep.subr.msk.bf16.mxu0 %vm752_vm0, %v7377_v55 }
  0x7e   : > { %6208 = vmatprep.mubr.msk.bf16.mxu1 %vm745_vm6, %v7384_v40  ;;  %6815 = vmatprep.subr.msk.bf16.mxu1 %vm752_vm0, %v7377_v55 }
  0x87   : > { %6155 = vmatmul.mubr.msk.bf16.vlgmr.msra.gmra.mrb[0].mxu0 %vm745_vm6, %v7295_v46  ;;  %6209 = vmatmul.mubr.msk.bf16.vlgmr.msra.gmra.mrb[0].mxu1 %vm745_vm6, %v7400_v49 }
  0x88   : > { %6159 = vmatpush3.bf16.msra.mxu0 %v7404_v50  ;;  %6213 = vmatpush3.bf16.msra.mxu1 %v7404_v50 }
  0x89   : > { %6160 = vmatprep.mubr.msk.bf16.mxu0 %vm745_vm6, %v7314_v60  ;;  %6214 = vmatprep.mubr.msk.bf16.mxu1 %vm745_vm6, %v7407_v51 }
  0x8a   : > { %6816 = vmatprep.subr.msk.bf16.mxu0 %vm752_vm0, %v7033_v0  ;;  %6825 = vmatprep.subr.msk.bf16.mxu1 %vm752_vm0, %v7033_v0 }
  0x93   : > { %6161 = vmatmul.mubr.msk.bf16.vlgmr.msra.gmra.mrb[0].mxu0 %vm745_vm6, %v7339_v13  ;;  %6215 = vmatmul.mubr.msk.bf16.vlgmr.msra.gmra.mrb[0].mxu1 %vm745_vm6, %v7424_v59 }
  0x94   : > { %6219 = vmatpush3.bf16.msra.mxu0 %v7040_v1  ;;  %6273 = vmatpush3.bf16.msra.mxu1 %v7040_v1 }
  0x95   : > { %6220 = vmatprep.mubr.msk.bf16.mxu0 %vm745_vm6, %v7276_v33  ;;  %6817 = vmatprep.subr.msk.bf16.mxu0 %vm752_vm0, %v7052_v3  ;;  %v5846_v33 = vunpack.c.l.bf16 %v5885_v53 }
  0x96   : > { %6274 = vmatprep.mubr.msk.bf16.mxu1 %vm745_vm6, %v7384_v40  ;;  %6826 = vmatprep.subr.msk.bf16.mxu1 %vm752_vm0, %v7052_v3 }
  0x97   : > { %v440_v36 = vmul.f32 %v5846_v33, %v7073_v6  ;;  %v388_v33 = vunpack.c.l.bf16 %v338_v23 }
  0x9b   : > { %6221 = vmatmul.mubr.msk.bf16.vlgmr.msra.gmra.mrb[4].mxu0 %vm745_vm6, %v7295_v46  ;;  %6275 = vmatmul.mubr.msk.bf16.vlgmr.msra.gmra.mrb[4].mxu1 %vm745_vm6, %v7400_v49  ;;  %v5847_v46 = vunpack.c.h.bf16 %v5885_v53 }
  0x9c   : > { %6225 = vmatpush3.bf16.msra.mxu0 %v7158_v34  ;;  %6279 = vmatpush3.bf16.msra.mxu1 %v7158_v34 }
  0x9d   : > { %6226 = vmatprep.mubr.msk.bf16.mxu0 %vm745_vm6, %v7234_v16  ;;  %6818 = vmatprep.subr.msk.bf16.mxu0 %vm752_vm0, %v7167_v37  ;;  %v441_v62 = vmul.f32 %v5847_v46, %v7073_v6  ;;  %v497_v16 = vadd.f32 %v7090_v17, %v440_v36 }
  0x9e   : > { %6280 = vmatprep.mubr.msk.bf16.mxu1 %vm745_vm6, %v7341_v18  ;;  %6827 = vmatprep.subr.msk.bf16.mxu1 %vm752_vm0, %v7167_v37 }
  0x9f   : > { %v498_v58 = vadd.f32 %v7090_v17, %v441_v62  ;;  %v547_v11 = vmax.f32 %v497_v16, 0.0  ;;  %v445_v62 = vmul.f32 %v7073_v6, %v388_v33 }
  0xa1   : > { %v548_v19 = vmax.f32 %v498_v58, 0.0  ;;  %v646_v25 = vsel %vm583_vm1, %v547_v11, 0.0  ;;  %v391_v58 = vunpack.c.h.bf16 %v338_v23 }
  0xa3   : > { %v7482_v27 = vpack.c.bf16 %v548_v19, %v646_v25  ;;  %v448_v19 = vmul.f32 %v7073_v6, %v391_v58 }
  0xa5   : > { %v2361_v29 = vshll.u32 %v7482_v27, 16  ;;  %v2439_v63 = vrot.slane %v7482_v27, 1 }
  0xa7   : > { %6227 = vmatmul.mubr.msk.bf16.vlgmr.msra.gmra.mrb[4].mxu0 %vm745_vm6, %v7252_v24  ;;  %6281 = vmatmul.mubr.msk.bf16.vlgmr.msra.gmra.mrb[4].mxu1 %vm745_vm6, %v7360_v26  ;;  %v387_v24 = vunpack.c.l.bf16 %v337_v5  ;;  %v2363_v38 = vrot.slane %v2361_v29, 1 }
  0xa8   : > { %6231 = vmatpush3.bf16.msra.mxu0 %v7191_v47  ;;  %6285 = vmatpush3.bf16.msra.mxu1 %v7191_v47 }
  0xa9   : > { %6232 = vmatprep.mubr.msk.bf16.mxu0 %vm745_vm6, %v7314_v60  ;;  %6819 = vmatprep.subr.msk.bf16.mxu0 %vm752_vm0, %v7198_v52  ;;  %v499_v60 = vadd.f32 %v7090_v17, %v442_v7  ;;  %v444_v22 = vmul.f32 %v7073_v6, %v387_v24  ;;  %v502_v7 = vadd.f32 %v7090_v17, %v445_v62 }
  0xaa   : > { %6286 = vmatprep.mubr.msk.bf16.mxu1 %vm745_vm6, %v7407_v51  ;;  %6828 = vmatprep.subr.msk.bf16.mxu1 %vm752_vm0, %v7198_v52 }
  0xab   : > { %v549_v15 = vmax.f32 %v499_v60, 0.0  ;;  %v501_v28 = vadd.f32 %v7090_v17, %v444_v22  ;;  %v392_v60 = vunpack.c.l.bf16 %v342_v8  ;;  %v552_v20 = vmax.f32 %v502_v7, 0.0 }
  0xad   : > { %v7496_v30 = vpack.c.bf16 %v550_v56, %v549_v15  ;;  %v551_v35 = vmax.f32 %v501_v28, 0.0  ;;  %v505_v15 = vadd.f32 %v7090_v17, %v448_v19  ;;  %v449_v56 = vmul.f32 %v7073_v6, %v392_v60 }
  0xae   : > { %v651_v28 = vsel %vm583_vm1, %v552_v20, 0.0  ;;  %v347_v20 = vld [vmem:[%s7068_s16 + $0x88] sm:$0x1] }
  0xaf   : > { %v2365_v41 = vshll.u32 %v7496_v30, 16  ;;  %v2369_v57 = vshrl.u32 %v7496_v30, 16 }
  0xb1   : > { %v2367_v43 = vrot.slane %v2365_v41, 1  ;;  %v506_v41 = vadd.f32 %v7090_v17, %v449_v56 }
  0xb3   : > { %6233 = vmatmul.mubr.msk.bf16.vlgmr.msra.gmra.mrb[4].mxu0 %vm745_vm6, %v7339_v13  ;;  %6287 = vmatmul.mubr.msk.bf16.vlgmr.msra.gmra.mrb[4].mxu1 %vm745_vm6, %v7424_v59  ;;  %v2359_v13 = vshrl.u32 %v7482_v27, 16  ;;  %v2371_v46 = vor.u32 %v2369_v57, %v2367_v43 }
  0xb4   : > { %6237 = vmatpush3.bf16.msra.mxu0 %v7229_v14  ;;  %6291 = vmatpush3.bf16.msra.mxu1 %v7229_v14 }
  0xb5   : > { %6238 = vmatprep.mubr.msk.bf16.mxu0 %vm745_vm6, %v7341_v18  ;;  %6820 = vmatprep.subr.msk.bf16.mxu0 %vm752_vm0, %v7240_v21  ;;  %v650_v18 = vsel %vm592_vm4, %v551_v35, 0.0  ;;  %v2364_v42 = vor.u32 %v2363_v38, %v2359_v13  ;;  %v555_v38 = vmax.f32 %v505_v15, 0.0 }
  0xb6   : > { %6292 = vmatprep.mubr.msk.bf16.mxu1 %vm745_vm6, %v7482_v27  ;;  %6829 = vmatprep.subr.msk.bf16.mxu1 %vm752_vm0, %v7240_v21  ;;  %v690_v44 = vpack.c.bf16 %v650_v18, %v650_v18 }
  0xb7   : > { %v7511_v45 = vsel %vm724_vm5, %v2364_v42, %v2367_v43  ;;  %v556_v43 = vmax.f32 %v506_v41, 0.0 }
  0xb8   : > { %v2373_v53 = vshll.u32 %v690_v44, 16  ;;  %v2442_v22 = vrot.slane %v690_v44, 1 }
  0xb9   : > { %v655_v57 = vsel %vm592_vm4, %v556_v43, 0.0 }
  0xba   : > { %v2375_v36 = vrot.slane %v2373_v53, 1  ;;  %v693_v33 = vpack.c.bf16 %v655_v57, %v655_v57 }
  0xbc   : > { %v7530_v2 = vsel %vm724_vm5, %v2371_v46, %v2375_v36  ;;  %v3012_v7 = vrot.slane %v693_v33, 1 }
  0xbf   : > { %6239 = vmatmul.mubr.msk.bf16.vlgmr.msra.gmra.mrb[4].mxu0 %vm745_vm6, %v7360_v26  ;;  %6293 = vmatmul.mubr.msk.bf16.vlgmr.msra.gmra.mrb[4].mxu1 %vm745_vm6, %v7496_v30  ;;  %v5887_v26 = vld [vmem:[%s7068_s16 + $0x68] sm:$0xff]  }
  0xc0   : > { %6243 = vmatpush3.bf16.msra.mxu0 %v7264_v31  ;;  %6297 = vmatpush3.bf16.msra.mxu1 %v7264_v31  ;;  %v5854_v61 = vunpack.c.l.bf16 %v5887_v26  ;;  %v5855_v5 = vunpack.c.h.bf16 %v5887_v26 }
  0xc1   : > { %6244 = vmatprep.mubr.msk.bf16.mxu0 %vm745_vm6, %v7384_v40  ;;  %6821 = vmatprep.subr.msk.bf16.mxu0 %vm752_vm0, %v7269_v32  ;;  %v2440_v40 = vrot.slane %v7496_v30, 1 }
  0xc2   : > { %6298 = vmatprep.mubr.msk.bf16.mxu1 %vm745_vm6, %v7511_v45  ;;  %6830 = vmatprep.subr.msk.bf16.mxu1 %vm752_vm0, %v7269_v32  ;;  %v446_v16 = vmul.f32 %v5854_v61, %v7073_v6  ;;  %v2943_v61 = vshll.u32 %v693_v33, 16 }
  0xc3   : > { %v7540_v24 = vsel %vm864_vm8, %v2439_v63, %v2440_v40  ;;  %v7561_v29 = vsel %vm864_vm8, %v2440_v40, %v2442_v22 }
  0xc4   : > { %v503_v11 = vadd.f32 %v7090_v17, %v446_v16  ;;  %v2945_v63 = vrot.slane %v2943_v61, 1 }
  0xc6   : > { %v553_v25 = vmax.f32 %v503_v11, 0.0  ;;  %v5889_v11 = vld [vmem:[%s7068_s16 + $0x80] sm:$0xff]  }
  0xc7   : > { %v5862_v19 = vunpack.c.l.bf16 %v5889_v11  ;;  %v5863_v60 = vunpack.c.h.bf16 %v5889_v11  ;;  %v7745_v11 = vld [vmem:[%s8270_s4] ss:$0 sm:$0xff] }
  0xc8   : > { %v7563_v35 = vpack.c.bf16 %v553_v25, %v651_v28 }
  0xc9   : > { %v452_v22 = vmul.f32 %v5862_v19, %v7073_v6  ;;  %v453_v25 = vmul.f32 %v5863_v60, %v7073_v6  ;;  %v352_v19 = vld [vmem:[%s7068_s16 + $0x9c] sm:$0x1] }
  0xca   : > { %v2931_v18 = vshll.u32 %v7563_v35, 16  ;;  %v3009_v40 = vrot.slane %v7563_v35, 1 }
  0xcb   : > { %6245 = vmatmul.mubr.msk.bf16.vlgmr.msra.gmra.mrb[4].mxu0 %vm745_vm6, %v7400_v49  ;;  %6299 = vmatmul.mubr.msk.bf16.vlgmr.msra.gmra.mrb[4].mxu1 %vm745_vm6, %v7530_v2  ;;  %v447_v49 = vmul.f32 %v5855_v5, %v7073_v6  ;;  %v510_v56 = vadd.f32 %v7090_v17, %v453_v25 }
  0xcc   : > { %6249 = vmatpush3.bf16.msra.mxu0 %v7299_v48  ;;  %6303 = vmatpush3.bf16.msra.mxu1 %v7299_v48  ;;  %v2933_v44 = vrot.slane %v2931_v18, 1 }
  0xcd   : > { %6250 = vmatprep.mubr.msk.bf16.mxu0 %vm745_vm6, %v7407_v51  ;;  %6822 = vmatprep.subr.msk.bf16.mxu0 %vm752_vm0, %v7305_v54  ;;  %v504_v51 = vadd.f32 %v7090_v17, %v447_v49  ;;  %v560_v18 = vmax.f32 %v510_v56, 0.0 }
  0xce   : > { %6304 = vmatprep.mubr.msk.bf16.mxu1 %vm745_vm6, %v7540_v24  ;;  %6831 = vmatprep.subr.msk.bf16.mxu1 %vm752_vm0, %v7305_v54 }
  0xcf   : > { %v554_v13 = vmax.f32 %v504_v51, 0.0 }
  0xd1   : > { %v7577_v42 = vpack.c.bf16 %v555_v38, %v554_v13 }
  0xd3   : > { %v2935_v23 = vshll.u32 %v7577_v42, 16  ;;  %v2939_v36 = vshrl.u32 %v7577_v42, 16  ;;  %v3010_v16 = vrot.slane %v7577_v42, 1 }
  0xd5   : > { %v2937_v26 = vrot.slane %v2935_v23, 1  ;;  %v7611_v58 = vsel %vm864_vm8, %v3009_v40, %v3010_v16  ;;  %v7628_v8 = vsel %vm864_vm8, %v3010_v16, %v3012_v7  ;;  %v7733_v16 = vld [vmem:[%s8269_s3] ss:$0 sm:$0xff] }
  0xd7   : > { %6251 = vmatmul.mubr.msk.bf16.vlgmr.msra.gmra.mrb[4].mxu0 %vm745_vm6, %v7424_v59  ;;  %6305 = vmatmul.mubr.msk.bf16.vlgmr.msra.gmra.mrb[4].mxu1 %vm745_vm6, %v7561_v29  ;;  %v2929_v59 = vshrl.u32 %v7563_v35, 16  ;;  %v2941_v62 = vor.u32 %v2939_v36, %v2937_v26 }
  0xd8   : > { %6255 = vmatpush3.bf16.msra.mxu0 %v7336_v12  ;;  %6309 = vmatpush3.bf16.msra.mxu1 %v7336_v12 }
  0xd9   : > { %6256 = vmatprep.mubr.msk.bf16.mxu0 %vm745_vm6, %v7482_v27  ;;  %6823 = vmatprep.subr.msk.bf16.mxu0 %vm752_vm0, %v7347_v9  ;;  %v2934_v53 = vor.u32 %v2933_v44, %v2929_v59  ;;  %v7608_v5 = vsel %vm724_vm5, %v2941_v62, %v2945_v63 }
  0xda   : > { %6310 = vmatprep.mubr.msk.bf16.mxu1 %vm745_vm6, %v7563_v35  ;;  %6832 = vmatprep.subr.msk.bf16.mxu1 %vm752_vm0, %v7347_v9 }
  0xdb   : > { %v7592_v46 = vsel %vm724_vm5, %v2934_v53, %v2937_v26  ;;  %v348_v26 = vld [vmem:[%s7068_s16 + $0x8c] ss:$12 sps:$4 sm:$0xff]  }
  0xdc   : > { %v398_v61 = vunpack.c.l.bf16 %v348_v26 }
  0xe3   : > { %6257 = vmatmul.mubr.msk.bf16.vlgmr.msra.gmra.mrb[4].mxu0 %vm745_vm6, %v7496_v30  ;;  %6311 = vmatmul.mubr.msk.bf16.vlgmr.msra.gmra.mrb[4].mxu1 %vm745_vm6, %v7577_v42 }
  0xe4   : > { %6261 = vmatpush3.bf16.msra.mxu0 %v7372_v39  ;;  %6315 = vmatpush3.bf16.msra.mxu1 %v7372_v39 }
  0xe5   : > { %6262 = vmatprep.mubr.msk.bf16.mxu0 %vm745_vm6, %v7511_v45  ;;  %6824 = vmatprep.subr.msk.bf16.mxu0 %vm752_vm0, %v7377_v55 }
  0xe6   : > { %6316 = vmatprep.mubr.msk.bf16.mxu1 %vm745_vm6, %v7592_v46  ;;  %6833 = vmatprep.subr.msk.bf16.mxu1 %vm752_vm0, %v7377_v55 }
  0xef   : > { %6263 = vmatmul.mubr.msk.bf16.vlgmr.msra.gmra.mrb[4].mxu0 %vm745_vm6, %v7530_v2  ;;  %6317 = vmatmul.mubr.msk.bf16.vlgmr.msra.gmra.mrb[4].mxu1 %vm745_vm6, %v7608_v5 }
  0xf0   : > { %6267 = vmatpush3.bf16.msra.mxu0 %v7404_v50  ;;  %6321 = vmatpush3.bf16.msra.mxu1 %v7404_v50 }
  0xf1   : > { %6268 = vmatprep.mubr.msk.bf16.mxu0 %vm745_vm6, %v7540_v24  ;;  %6322 = vmatprep.mubr.msk.bf16.mxu1 %vm745_vm6, %v7611_v58 }
  0xf2   : > { %6834 = vmatprep.subr.msk.bf16.mxu0 %vm752_vm0, %v7033_v0  ;;  %6843 = vmatprep.subr.msk.bf16.mxu1 %vm752_vm0, %v7033_v0  ;;  %v5888_v0 = vld [vmem:[%s7068_s16 + $0x78] sm:$0xff]  }
  0xfb   : > { %6269 = vmatmul.mubr.msk.bf16.vlgmr.msra.gmra.mrb[4].mxu0 %vm745_vm6, %v7561_v29  ;;  %6323 = vmatmul.mubr.msk.bf16.vlgmr.msra.gmra.mrb[4].mxu1 %vm745_vm6, %v7628_v8 }
  0xfc   : > { %6327 = vmatpush3.bf16.msra.mxu0 %v7040_v1  ;;  %6381 = vmatpush3.bf16.msra.mxu1 %v7040_v1 }
  0xfd   : > { %6328 = vmatprep.mubr.msk.bf16.mxu0 %vm745_vm6, %v7511_v45  ;;  %6835 = vmatprep.subr.msk.bf16.mxu0 %vm752_vm0, %v7052_v3  ;;  %v5859_v45 = vunpack.c.h.bf16 %v5888_v0 }
  0xfe   : > { %6382 = vmatprep.mubr.msk.bf16.mxu1 %vm745_vm6, %v7592_v46  ;;  %6844 = vmatprep.subr.msk.bf16.mxu1 %vm752_vm0, %v7052_v3  ;;  %v5858_v3 = vunpack.c.l.bf16 %v5888_v0 }
  0xff   : > { %v451_v49 = vmul.f32 %v5859_v45, %v7073_v6 }
 0x103   : > { %6329 = vmatmul.mubr.msk.bf16.vlgmr.msra.gmra.mrb[8].mxu0 %vm745_vm6, %v7530_v2  ;;  %6383 = vmatmul.mubr.msk.bf16.vlgmr.msra.gmra.mrb[8].mxu1 %vm745_vm6, %v7608_v5  ;;  %v450_v2 = vmul.f32 %v5858_v3, %v7073_v6 }
 0x104   : > { %6333 = vmatpush3.bf16.msra.mxu0 %v7158_v34  ;;  %6387 = vmatpush3.bf16.msra.mxu1 %v7158_v34 }
 0x105   : > { %6334 = vmatprep.mubr.msk.bf16.mxu0 %vm745_vm6, %v7482_v27  ;;  %6836 = vmatprep.subr.msk.bf16.mxu0 %vm752_vm0, %v7167_v37  ;;  %v507_v27 = vadd.f32 %v7090_v17, %v450_v2  ;;  %v401_v2 = vunpack.c.h.bf16 %v348_v26 }
 0x106   : > { %6388 = vmatprep.mubr.msk.bf16.mxu1 %vm745_vm6, %v7563_v35  ;;  %6845 = vmatprep.subr.msk.bf16.mxu1 %vm752_vm0, %v7167_v37  ;;  %v508_v37 = vadd.f32 %v7090_v17, %v451_v49 }
 0x107   : > { %v557_v51 = vmax.f32 %v507_v27, 0.0 }
 0x108   : > { %v558_v15 = vmax.f32 %v508_v37, 0.0  ;;  %v402_v37 = vunpack.c.l.bf16 %v352_v19 }
 0x109   : > { %v656_v13 = vsel %vm583_vm1, %v557_v51, 0.0 }
 0x10a   : > { %v7686_v38 = vpack.c.bf16 %v558_v15, %v656_v13  ;;  %v459_v15 = vmul.f32 %v7733_v16, %v402_v37 }
 0x10c   : > { %v3579_v7 = vrot.slane %v7686_v38, 1 }
 0x10f   : > { %6335 = vmatmul.mubr.msk.bf16.vlgmr.msra.gmra.mrb[8].mxu0 %vm745_vm6, %v7496_v30  ;;  %6389 = vmatmul.mubr.msk.bf16.vlgmr.msra.gmra.mrb[8].mxu1 %vm745_vm6, %v7577_v42  ;;  %v397_v30 = vunpack.c.l.bf16 %v347_v20  ;;  %v458_v20 = vmul.f32 %v7733_v16, %v401_v2 }
 0x110   : > { %6339 = vmatpush3.bf16.msra.mxu0 %v7191_v47  ;;  %6393 = vmatpush3.bf16.msra.mxu1 %v7191_v47 }
 0x111   : > { %6340 = vmatprep.mubr.msk.bf16.mxu0 %vm745_vm6, %v7540_v24  ;;  %6837 = vmatprep.subr.msk.bf16.mxu0 %vm752_vm0, %v7198_v52  ;;  %v509_v24 = vadd.f32 %v7090_v17, %v452_v22  ;;  %v454_v28 = vmul.f32 %v7073_v6, %v397_v30  ;;  %v515_v51 = vadd.f32 %v7745_v11, %v458_v20 }
 0x112   : > { %6394 = vmatprep.mubr.msk.bf16.mxu1 %vm745_vm6, %v7611_v58  ;;  %6846 = vmatprep.subr.msk.bf16.mxu1 %vm752_vm0, %v7198_v52  ;;  %v3501_v52 = vshll.u32 %v7686_v38, 16 }
 0x113   : > { %v559_v41 = vmax.f32 %v509_v24, 0.0  ;;  %v511_v43 = vadd.f32 %v7090_v17, %v454_v28 }
 0x114   : > { %v3503_v59 = vrot.slane %v3501_v52, 1 }
 0x115   : > { %v7700_v6 = vpack.c.bf16 %v560_v18, %v559_v41  ;;  %v561_v17 = vmax.f32 %v511_v43, 0.0  ;;  %v565_v41 = vmax.f32 %v515_v51, 0.0 }
 0x117   : > { %v3505_v44 = vshll.u32 %v7700_v6, 16  ;;  %v3509_v33 = vshrl.u32 %v7700_v6, 16  ;;  %v3580_v0 = vrot.slane %v7700_v6, 1 }
 0x119   : > { %v3507_v57 = vrot.slane %v3505_v44, 1  ;;  %v7754_v60 = vsel %vm864_vm8, %v3579_v7, %v3580_v0  ;;  %v7857_v7 = vld [vmem:[%s8268_s2] ss:$0 sm:$0xff] }
 0x11b   : > { %6341 = vmatmul.mubr.msk.bf16.vlgmr.msra.gmra.mrb[8].mxu0 %vm745_vm6, %v7561_v29  ;;  %6395 = vmatmul.mubr.msk.bf16.vlgmr.msra.gmra.mrb[8].mxu1 %vm745_vm6, %v7628_v8  ;;  %v3499_v29 = vshrl.u32 %v7686_v38, 16  ;;  %v3511_v62 = vor.u32 %v3509_v33, %v3507_v57 }
 0x11c   : > { %6345 = vmatpush3.bf16.msra.mxu0 %v7229_v14  ;;  %6399 = vmatpush3.bf16.msra.mxu1 %v7229_v14 }
 0x11d   : > { %6346 = vmatprep.mubr.msk.bf16.mxu0 %vm745_vm6, %v7563_v35  ;;  %6838 = vmatprep.subr.msk.bf16.mxu0 %vm752_vm0, %v7240_v21  ;;  %v660_v35 = vsel %vm592_vm4, %v561_v17, 0.0  ;;  %v3504_v23 = vor.u32 %v3503_v59, %v3499_v29 }
 0x11e   : > { %6400 = vmatprep.mubr.msk.bf16.mxu1 %vm745_vm6, %v7686_v38  ;;  %6847 = vmatprep.subr.msk.bf16.mxu1 %vm752_vm0, %v7240_v21  ;;  %v696_v53 = vpack.c.bf16 %v660_v35, %v660_v35 }
 0x11f   : > { %v7715_v21 = vsel %vm724_vm5, %v3504_v23, %v3507_v57 }
 0x120   : > { %v3513_v36 = vshll.u32 %v696_v53, 16  ;;  %v3582_v25 = vrot.slane %v696_v53, 1 }
 0x122   : > { %v3515_v63 = vrot.slane %v3513_v36, 1  ;;  %v7775_v56 = vsel %vm864_vm8, %v3580_v0, %v3582_v25 }
 0x124   : > { %v7739_v3 = vsel %vm724_vm5, %v3511_v62, %v3515_v63 }
 0x127   : > { %6347 = vmatmul.mubr.msk.bf16.vlgmr.msra.gmra.mrb[8].mxu0 %vm745_vm6, %v7577_v42  ;;  %6401 = vmatmul.mubr.msk.bf16.vlgmr.msra.gmra.mrb[8].mxu1 %vm745_vm6, %v7700_v6  ;;  %v5890_v42 = vld [vmem:[%s7068_s16 + $0x90] sm:$0xff]  }
 0x128   : > { %6351 = vmatpush3.bf16.msra.mxu0 %v7264_v31  ;;  %6405 = vmatpush3.bf16.msra.mxu1 %v7264_v31  ;;  %v5866_v40 = vunpack.c.l.bf16 %v5890_v42  ;;  %v5867_v45 = vunpack.c.h.bf16 %v5890_v42 }
 0x129   : > { %6352 = vmatprep.mubr.msk.bf16.mxu0 %vm745_vm6, %v7592_v46  ;;  %6839 = vmatprep.subr.msk.bf16.mxu0 %vm752_vm0, %v7269_v32  ;;  %v455_v46 = vmul.f32 %v7733_v16, %v398_v61 }
 0x12a   : > { %6406 = vmatprep.mubr.msk.bf16.mxu1 %vm745_vm6, %v7715_v21  ;;  %6848 = vmatprep.subr.msk.bf16.mxu1 %vm752_vm0, %v7269_v32  ;;  %v456_v32 = vmul.f32 %v7733_v16, %v5866_v40 }
 0x12b   : > { %v512_v49 = vadd.f32 %v7745_v11, %v455_v46  ;;  %v5891_v46 = vld [vmem:[%s7068_s16 + $0xa0] sm:$0xff]  }
 0x12c   : > { %v513_v27 = vadd.f32 %v7745_v11, %v456_v32  ;;  %v5870_v0 = vunpack.c.l.bf16 %v5891_v46  ;;  %v6915_v32 = vld [vmem:[%s8267_s1] sm:$0x3] }
 0x12d   : > { %v562_v22 = vmax.f32 %v512_v49, 0.0 }
 0x12e   : > { %v563_v30 = vmax.f32 %v513_v27, 0.0  ;;  %v5871_v27 = vunpack.c.h.bf16 %v5891_v46  ;;  %v460_v25 = vmul.f32 %v7733_v16, %v5870_v0 }
 0x12f   : > { %v661_v24 = vsel %vm583_vm1, %v562_v22, 0.0 }
 0x130   : > { %v7777_v28 = vpack.c.bf16 %v563_v30, %v661_v24  ;;  %v7879_v30 = vld [vmem:[%s7068_s16 + $0xa8] sm:$0xff]  }
 0x132   : > { %v4071_v18 = vshll.u32 %v7777_v28, 16  ;;  %v4149_v36 = vrot.slane %v7777_v28, 1 }
 0x133   : > { %6353 = vmatmul.mubr.msk.bf16.vlgmr.msra.gmra.mrb[8].mxu0 %vm745_vm6, %v7608_v5  ;;  %6407 = vmatmul.mubr.msk.bf16.vlgmr.msra.gmra.mrb[8].mxu1 %vm745_vm6, %v7739_v3  ;;  %v457_v5 = vmul.f32 %v7733_v16, %v5867_v45 }
 0x134   : > { %6357 = vmatpush3.bf16.msra.mxu0 %v7299_v48  ;;  %6411 = vmatpush3.bf16.msra.mxu1 %v7299_v48  ;;  %v4073_v17 = vrot.slane %v4071_v18, 1  ;;  %v5874_v18 = vunpack.c.l.bf16 %v7879_v30 }
 0x135   : > { %6358 = vmatprep.mubr.msk.bf16.mxu0 %vm745_vm6, %v7611_v58  ;;  %6840 = vmatprep.subr.msk.bf16.mxu0 %vm752_vm0, %v7305_v54  ;;  %v514_v58 = vadd.f32 %v7745_v11, %v457_v5 }
 0x136   : > { %6412 = vmatprep.mubr.msk.bf16.mxu1 %vm745_vm6, %v7754_v60  ;;  %6849 = vmatprep.subr.msk.bf16.mxu1 %vm752_vm0, %v7305_v54  ;;  %v516_v54 = vadd.f32 %v7745_v11, %v459_v15 }
 0x137   : > { %v564_v13 = vmax.f32 %v514_v58, 0.0 }
 0x138   : > { %v566_v52 = vmax.f32 %v516_v54, 0.0  ;;  %v7890_v54 = vmul.f32 %v7733_v16, %v5871_v27 }
 0x139   : > { %v7791_v43 = vpack.c.bf16 %v565_v41, %v564_v13 }
 0x13a   : > { %v665_v59 = vsel %vm592_vm4, %v566_v52, 0.0 }
 0x13b   : > { %v4075_v29 = vshll.u32 %v7791_v43, 16  ;;  %v699_v23 = vpack.c.bf16 %v665_v59, %v665_v59  ;;  %v4079_v57 = vshrl.u32 %v7791_v43, 16  ;;  %v4150_v42 = vrot.slane %v7791_v43, 1 }
 0x13d   : > { %v4077_v35 = vrot.slane %v4075_v29, 1  ;;  %v4083_v53 = vshll.u32 %v699_v23, 16  ;;  %v7826_v62 = vsel %vm864_vm8, %v4149_v36, %v4150_v42  ;;  %v4152_v63 = vrot.slane %v699_v23, 1 }
 0x13f   : > { %6359 = vmatmul.mubr.msk.bf16.vlgmr.msra.gmra.mrb[8].mxu0 %vm745_vm6, %v7628_v8  ;;  %6413 = vmatmul.mubr.msk.bf16.vlgmr.msra.gmra.mrb[8].mxu1 %vm745_vm6, %v7775_v56  ;;  %v4069_v8 = vshrl.u32 %v7777_v28, 16  ;;  %v4081_v26 = vor.u32 %v4079_v57, %v4077_v35  ;;  %v4085_v33 = vrot.slane %v4083_v53, 1  ;;  %v7845_v40 = vsel %vm864_vm8, %v4150_v42, %v4152_v63 }
 0x140   : > { %6363 = vmatpush3.bf16.msra.mxu0 %v7336_v12  ;;  %6417 = vmatpush3.bf16.msra.mxu1 %v7336_v12 }
 0x141   : > { %6364 = vmatprep.mubr.msk.bf16.mxu0 %vm745_vm6, %v7686_v38  ;;  %6841 = vmatprep.subr.msk.bf16.mxu0 %vm752_vm0, %v7347_v9  ;;  %v4074_v44 = vor.u32 %v4073_v17, %v4069_v8  ;;  %v7822_v61 = vsel %vm724_vm5, %v4081_v26, %v4085_v33  ;;  %v5875_v17 = vunpack.c.h.bf16 %v7879_v30 }
 0x142   : > { %6418 = vmatprep.mubr.msk.bf16.mxu1 %vm745_vm6, %v7777_v28  ;;  %6850 = vmatprep.subr.msk.bf16.mxu1 %vm752_vm0, %v7347_v9 }
 0x143   : > { %v7806_v9 = vsel %vm724_vm5, %v4074_v44, %v4077_v35 }
 0x14b   : > { %6365 = vmatmul.mubr.msk.bf16.vlgmr.msra.gmra.mrb[8].mxu0 %vm745_vm6, %v7700_v6  ;;  %6419 = vmatmul.mubr.msk.bf16.vlgmr.msra.gmra.mrb[8].mxu1 %vm745_vm6, %v7791_v43 }
 0x14c   : > { %6369 = vmatpush3.bf16.msra.mxu0 %v7372_v39  ;;  %6423 = vmatpush3.bf16.msra.mxu1 %v7372_v39 }
 0x14d   : > { %6370 = vmatprep.mubr.msk.bf16.mxu0 %vm745_vm6, %v7715_v21  ;;  %6842 = vmatprep.subr.msk.bf16.mxu0 %vm752_vm0, %v7377_v55 }
 0x14e   : > { %6424 = vmatprep.mubr.msk.bf16.mxu1 %vm745_vm6, %v7806_v9  ;;  %6851 = vmatprep.subr.msk.bf16.mxu1 %vm752_vm0, %v7377_v55  ;;  %v6914_v55 = vld [vmem:[%s8267_s1 + $0x2] sm:$0x3] }
 0x157   : > { %6371 = vmatmul.mubr.msk.bf16.vlgmr.msra.gmra.mrb[8].mxu0 %vm745_vm6, %v7739_v3  ;;  %6425 = vmatmul.mubr.msk.bf16.vlgmr.msra.gmra.mrb[8].mxu1 %vm745_vm6, %v7822_v61 }
 0x158   : > { %6375 = vmatpush3.bf16.msra.mxu0 %v7404_v50  ;;  %6429 = vmatpush3.bf16.msra.mxu1 %v7404_v50 }
 0x159   : > { %6376 = vmatprep.mubr.msk.bf16.mxu0 %vm745_vm6, %v7754_v60  ;;  %6430 = vmatprep.mubr.msk.bf16.mxu1 %vm745_vm6, %v7826_v62 }
 0x15a   : > { %6852 = vmatprep.subr.msk.bf16.mxu0 %vm752_vm0, %v6914_v55  ;;  %6861 = vmatprep.subr.msk.bf16.mxu1 %vm752_vm0, %v6914_v55 }
 0x163   : > { %6377 = vmatmul.mubr.msk.bf16.vlgmr.msra.gmra.mrb[8].mxu0 %vm745_vm6, %v7775_v56  ;;  %6431 = vmatmul.mubr.msk.bf16.vlgmr.msra.gmra.mrb[8].mxu1 %vm745_vm6, %v7845_v40 }
 0x164   : > { %6435 = vmatpush3.bf16.msra.mxu0 %v7040_v1  ;;  %6489 = vmatpush3.bf16.msra.mxu1 %v7040_v1 }
 0x165   : > { %6436 = vmatprep.mubr.msk.bf16.mxu0 %vm745_vm6, %v7715_v21  ;;  %6853 = vmatprep.subr.msk.bf16.mxu0 %vm752_vm0, %v6915_v32 }
 0x166   : > { %v6162_v45 = vpop.f32.mrb[0].mxu0  ;;  %v6216_v2 = vpop.f32.mrb[0].mxu1  ;;  %6490 = vmatprep.mubr.msk.bf16.mxu1 %vm745_vm6, %v7806_v9  ;;  %6862 = vmatprep.subr.msk.bf16.mxu1 %vm752_vm0, %v6915_v32 }
 0x167   : > { %v1364_v1 = vadd.f32 %v6162_v45, %v7857_v7  ;;  %v1935_v49 = vadd.f32 %v6216_v2, %v7857_v7  ;;  %v1337_v19 = vpop.f32.mrb[1].mxu0  ;;  %v1914_v21 = vpop.f32.mrb[1].mxu1 }
 0x168   : > { %v1362_v5 = vadd.f32 %v7857_v7, %v1337_v19  ;;  %v1933_v20 = vadd.f32 %v7857_v7, %v1914_v21  ;;  %v6163_v37 = vpop.f32.mrb[2].mxu0  ;;  %v6217_v22 = vpop.f32.mrb[2].mxu1 }
 0x169   : > { %v5790_v58 = vpack.c.bf16 %v1364_v1, %v1364_v1  ;;  %v5794_v51 = vpack.c.bf16 %v1935_v49, %v1935_v49  ;;  %v1340_v15 = vpop.f32.mrb[3].mxu0  ;;  %v1917_v24 = vpop.f32.mrb[3].mxu1  ;;  %v1365_v52 = vadd.f32 %v6163_v37, %v7857_v7  ;;  %v1936_v8 = vadd.f32 %v6217_v22, %v7857_v7 }
 0x16a   : > { %v5788_v13 = vpack.c.bf16 %v1362_v5, %v1362_v5  ;;  %v5792_v41 = vpack.c.bf16 %v1933_v20, %v1933_v20  ;;  %v1391_v29 = vsel %vm1387_vm10, %v1364_v1, 0.0  ;;  %v1402_v59 = vmul.f32 %v1362_v5, %v1362_v5 }
 0x16b   : > { %1385 = vst.msk [vmem:[%s7873_s29 + $0x8] sm:$0xf] %vm1382_vm9, %v5790_v58  ;;  %5628 = vst.msk [vmem:[%s7873_s29 + $0x18] sm:$0xf] %vm1382_vm9, %v5794_v51  ;;  %6437 = vmatmul.mubr.msk.bf16.vlgmr.msra.gmra.mrb[12].mxu0 %vm745_vm6, %v7739_v3  ;;  %6491 = vmatmul.mubr.msk.bf16.vlgmr.msra.gmra.mrb[12].mxu1 %vm745_vm6, %v7822_v61  ;;  %v7900_v3 = vadd.f32 %v7745_v11, %v460_v25  ;;  %v1363_v44 = vadd.f32 %v7857_v7, %v1340_v15  ;;  %v1961_v57 = vsel %vm1387_vm10, %v1935_v49, 0.0 }
 0x16c   : > { %1383 = vst.msk [vmem:[%s7873_s29] sm:$0xf] %vm1382_vm9, %v5788_v13  ;;  %6441 = vmatpush3.bf16.msra.mxu0 %v7158_v34  ;;  %6495 = vmatpush3.bf16.msra.mxu1 %v7158_v34  ;;  %5626 = vst.msk [vmem:[%s7873_s29 + $0x10] sm:$0xf] %vm1382_vm9, %v5792_v41  ;;  %v1934_v35 = vadd.f32 %v7857_v7, %v1917_v24  ;;  %v6916_v34 = vld [vmem:[%s8267_s1 + $0x4] sm:$0x3]  ;;  %v1404_v23 = vmul.f32 %v1364_v1, %v1364_v1 }
 0x16d   : > { %6442 = vmatprep.mubr.msk.bf16.mxu0 %vm745_vm6, %v7686_v38  ;;  %6854 = vmatprep.subr.msk.bf16.mxu0 %vm752_vm0, %v6916_v34  ;;  %v1972_v53 = vmul.f32 %v1933_v20, %v1933_v20  ;;  %v5791_v26 = vpack.c.bf16 %v1365_v52, %v1365_v52  ;;  %v1974_v33 = vmul.f32 %v1935_v49, %v1935_v49  ;;  %v1388_v38 = vsel %vm1387_vm10, %v1362_v5, 0.0 }
 0x16e   : > { %6496 = vmatprep.mubr.msk.bf16.mxu1 %vm745_vm6, %v7777_v28  ;;  %6863 = vmatprep.subr.msk.bf16.mxu1 %vm752_vm0, %v6916_v34  ;;  %v5795_v36 = vpack.c.bf16 %v1936_v8, %v1936_v8  ;;  %v5789_v42 = vpack.c.bf16 %v1363_v44, %v1363_v44  ;;  %v1958_v55 = vsel %vm1387_vm10, %v1933_v20, 0.0  ;;  %v1389_v63 = vsel %vm1387_vm10, %v1363_v44, 0.0 }
 0x16f   : > { %1386 = vst.msk [vmem:[%s7873_s29 + $0xc] sm:$0xf] %vm1382_vm9, %v5791_v26  ;;  %v1403_v46 = vmul.f32 %v1363_v44, %v1363_v44  ;;  %v5793_v0 = vpack.c.bf16 %v1934_v35, %v1934_v35  ;;  %v1406_v32 = vsel %vm1387_vm10, %v1402_v59, 0.0  ;;  %v1390_v45 = vadd.f32 %v1389_v63, %v1388_v38 }
 0x170   : > { %5629 = vst.msk [vmem:[%s7873_s29 + $0x1c] sm:$0xf] %vm1382_vm9, %v5795_v36  ;;  %1384 = vst.msk [vmem:[%s7873_s29 + $0x4] sm:$0xf] %vm1382_vm9, %v5789_v42  ;;  %v1959_v2 = vsel %vm1387_vm10, %v1934_v35, 0.0  ;;  %v1973_v1 = vmul.f32 %v1934_v35, %v1934_v35  ;;  %v1976_v49 = vsel %vm1387_vm10, %v1972_v53, 0.0  ;;  %v1405_v19 = vmul.f32 %v1365_v52, %v1365_v52 }
 0x171   : > { %v1407_v21 = vsel %vm1387_vm10, %v1403_v46, 0.0  ;;  %5627 = vst.msk [vmem:[%s7873_s29 + $0x14] sm:$0xf] %vm1382_vm9, %v5793_v0  ;;  %v1960_v27 = vadd.f32 %v1959_v2, %v1958_v55  ;;  %v1975_v5 = vmul.f32 %v1936_v8, %v1936_v8  ;;  %v1392_v20 = vadd.f32 %v1391_v29, %v1390_v45  ;;  %v357_v29 = vld [vmem:[%s7068_s16 + $0xb0] sm:$0x1] }
 0x172   : > { %v1408_v37 = vadd.f32 %v1407_v21, %v1406_v32  ;;  %v1977_v22 = vsel %vm1387_vm10, %v1973_v1, 0.0  ;;  %v1409_v25 = vsel %vm1387_vm10, %v1404_v23, 0.0  ;;  %v1393_v58 = vsel %vm1387_vm10, %v1365_v52, 0.0 }
 0x173   : > { %v1962_v51 = vadd.f32 %v1961_v57, %v1960_v27  ;;  %v1978_v15 = vadd.f32 %v1977_v22, %v1976_v49  ;;  %v1979_v24 = vsel %vm1387_vm10, %v1974_v33, 0.0  ;;  %v1963_v13 = vsel %vm1387_vm10, %v1936_v8, 0.0 }
 0x174   : > { %v1394_v41 = vadd.f32 %v1393_v58, %v1392_v20  ;;  %v1410_v59 = vadd.f32 %v1409_v25, %v1408_v37  ;;  %v1411_v44 = vsel %vm1387_vm10, %v1405_v19, 0.0  ;;  %v1981_v53 = vsel %vm1387_vm10, %v1975_v5, 0.0 }
 0x175   : > { %v1964_v35 = vadd.f32 %v1963_v13, %v1962_v51  ;;  %v1980_v34 = vadd.f32 %v1979_v24, %v1978_v15  ;;  %v518_v52 = vadd.f32 %v7745_v11, %v7890_v54  ;;  %v462_v57 = vmul.f32 %v7733_v16, %v5874_v18  ;;  %v6917_v54 = vld [vmem:[%s8267_s1 + $0x6] sm:$0x3] }
 0x176   : > { %v1395_v26 = vrot.slane %v1394_v41, 4  ;;  %v1412_v38 = vadd.f32 %v1411_v44, %v1410_v59  ;;  %v463_v33 = vmul.f32 %v7733_v16, %v5875_v17  ;;  %v567_v42 = vmax.f32 %v7900_v3, 0.0 }
 0x177   : > { %6443 = vmatmul.mubr.msk.bf16.vlgmr.msra.gmra.mrb[12].mxu0 %vm745_vm6, %v7700_v6  ;;  %6497 = vmatmul.mubr.msk.bf16.vlgmr.msra.gmra.mrb[12].mxu1 %vm745_vm6, %v7791_v43  ;;  %v1965_v8 = vrot.slane %v1964_v35, 4  ;;  %v1982_v23 = vadd.f32 %v1981_v53, %v1980_v34  ;;  %v568_v63 = vmax.f32 %v518_v52, 0.0  ;;  %v519_v0 = vadd.f32 %v7745_v11, %v462_v57  ;;  %v6918_v34 = vld [vmem:[%s8267_s1 + $0x8] sm:$0x3] }
 0x178   : > { %6447 = vmatpush3.bf16.msra.mxu0 %v7191_v47  ;;  %6501 = vmatpush3.bf16.msra.mxu1 %v7191_v47  ;;  %v1396_v36 = vadd.f32 %v1395_v26, %v1394_v41  ;;  %v1413_v6 = vrot.slane %v1412_v38, 4  ;;  %v407_v47 = vunpack.c.l.bf16 %v357_v29  ;;  %v520_v32 = vadd.f32 %v7745_v11, %v463_v33  ;;  %v358_v33 = vld [vmem:[%s7068_s16 + $0xb4] ss:$12 sps:$4 sm:$0xff]  }
 0x179   : > { %6448 = vmatprep.mubr.msk.bf16.mxu0 %vm745_vm6, %v7754_v60  ;;  %6855 = vmatprep.subr.msk.bf16.mxu0 %vm752_vm0, %v6917_v54  ;;  %v1966_v55 = vadd.f32 %v1965_v8, %v1964_v35  ;;  %v1983_v30 = vrot.slane %v1982_v23, 4  ;;  %v666_v3 = vsel %vm583_vm1, %v567_v42, 0.0  ;;  %v569_v22 = vmax.f32 %v519_v0, 0.0 }
 0x17a   : > { %6502 = vmatprep.mubr.msk.bf16.mxu1 %vm745_vm6, %v7826_v62  ;;  %6864 = vmatprep.subr.msk.bf16.mxu1 %vm752_vm0, %v6917_v54  ;;  %v1397_v18 = vrot.slane %v1396_v36, 2  ;;  %v1414_v17 = vadd.f32 %v1413_v6, %v1412_v38  ;;  %v464_v1 = vmul.f32 %v7733_v16, %v407_v47  ;;  %v7968_v37 = vpack.c.bf16 %v568_v63, %v666_v3 }
 0x17b   : > { %v1967_v60 = vrot.slane %v1966_v55, 2  ;;  %v1984_v46 = vadd.f32 %v1983_v30, %v1982_v23  ;;  %v570_v51 = vmax.f32 %v520_v32, 0.0  ;;  %v614_v0 = vstv %s613_s15 }
 0x17c   : > { %v1398_v45 = vadd.f32 %v1397_v18, %v1396_v36  ;;  %v1415_v2 = vrot.slane %v1414_v17, 2  ;;  %v521_v15 = vadd.f32 %v7745_v11, %v464_v1  ;;  %v4641_v59 = vshll.u32 %v7968_v37, 16  ;;  %v5893_v36 = vld [vmem:[%s7068_s16 + $0xb8] sm:$0xff]   ;;  %v362_v1 = vld [vmem:[%s7068_s16 + $0xc4] sm:$0x1] }
 0x17d   : > { %v1968_v49 = vadd.f32 %v1967_v60, %v1966_v55  ;;  %v1985_v19 = vrot.slane %v1984_v46, 2  ;;  %v5878_v42 = vunpack.c.l.bf16 %v5893_v36  ;;  %v5879_v30 = vunpack.c.h.bf16 %v5893_v36 }
 0x17e   : > { %v1399_v21 = vrot.slane %v1398_v45, 1  ;;  %v1416_v27 = vadd.f32 %v1415_v2, %v1414_v17  ;;  %v571_v29 = vmax.f32 %v521_v15, 0.0  ;;  %v411_v17 = vunpack.c.h.bf16 %v358_v33 }
 0x17f   : > { %v1969_v5 = vrot.slane %v1968_v49, 1  ;;  %v1986_v20 = vadd.f32 %v1985_v19, %v1984_v46  ;;  %v466_v18 = vmul.f32 %v7733_v16, %v5878_v42  ;;  %v4719_v63 = vrot.slane %v7968_v37, 1 }
 0x180   : > { %v1400_v25 = vadd.f32 %v1399_v21, %v1398_v45  ;;  %v1417_v58 = vrot.slane %v1416_v27, 1  ;;  %v670_v38 = vsel %vm592_vm4, %v571_v29, 0.0  ;;  %v467_v2 = vmul.f32 %v7733_v16, %v5879_v30 }
 0x181   : > { %v1970_v24 = vadd.f32 %v1969_v5, %v1968_v49  ;;  %v1987_v13 = vrot.slane %v1986_v20, 1  ;;  %v702_v23 = vpack.c.bf16 %v670_v38, %v670_v38  ;;  %v523_v45 = vadd.f32 %v7745_v11, %v466_v18 }
 0x182   : > { %v1418_v41 = vadd.f32 %v1417_v58, %v1416_v27  ;;  %v468_v3 = vmul.f32 %v7733_v16, %v411_v17  ;;  %vm8040_vm11 = vcmp.eq.s32.totalorder %v614_v0, 1  ;;  %v412_v21 = vunpack.c.l.bf16 %v362_v1 }
 0x183   : > { %6449 = vmatmul.mubr.msk.bf16.vlgmr.msra.gmra.mrb[12].mxu0 %vm745_vm6, %v7775_v56  ;;  %6503 = vmatmul.mubr.msk.bf16.vlgmr.msra.gmra.mrb[12].mxu1 %vm745_vm6, %v7845_v40  ;;  %v7976_v44 = vadd.f32 %v1970_v24, %v1400_v25  ;;  %v1988_v35 = vadd.f32 %v1987_v13, %v1986_v20  ;;  %v7986_v56 = vpack.c.bf16 %v570_v51, %v569_v22  ;;  %v4653_v54 = vshll.u32 %v702_v23, 16  ;;  %vm621_vm12 = vmand %vm583_vm1, %vm8040_vm11 }
 0x184   : > { %6453 = vmatpush3.bf16.msra.mxu0 %v7229_v14  ;;  %6507 = vmatpush3.bf16.msra.mxu1 %v7229_v14  ;;  %v4639_v14 = vshrl.u32 %v7968_v37, 16  ;;  %v573_v27 = vmax.f32 %v523_v45, 0.0  ;;  %v524_v5 = vadd.f32 %v7745_v11, %v467_v2  ;;  %v525_v20 = vadd.f32 %v7745_v11, %v468_v3  ;;  %vm625_vm13 = vmand %vm592_vm4, %vm8040_vm11 }
 0x185   : > { %6454 = vmatprep.mubr.msk.bf16.mxu0 %vm745_vm6, %v7777_v28  ;;  %6856 = vmatprep.subr.msk.bf16.mxu0 %vm752_vm0, %v6918_v34  ;;  %v7988_v53 = vadd.f32 %v1988_v35, %v1418_v41  ;;  %v4643_v28 = vrot.slane %v4641_v59, 1  ;;  %v4645_v26 = vshll.u32 %v7986_v56, 16  ;;  %v4649_v6 = vshrl.u32 %v7986_v56, 16 }
 0x186   : > { %6508 = vmatprep.mubr.msk.bf16.mxu1 %vm745_vm6, %v7968_v37  ;;  %6865 = vmatprep.subr.msk.bf16.mxu1 %vm752_vm0, %v6918_v34  ;;  %v4655_v55 = vrot.slane %v4653_v54, 1  ;;  %v4720_v60 = vrot.slane %v7986_v56, 1  ;;  %v469_v22 = vmul.f32 %v7733_v16, %v412_v21  ;;  %v672_v58 = vsel %vm8040_vm11, %v573_v27, 0.0 }
 0x187   : > { %v4644_v52 = vor.u32 %v4643_v28, %v4639_v14  ;;  %v4647_v8 = vrot.slane %v4645_v26, 1  ;;  %v574_v51 = vmax.f32 %v524_v5, 0.0  ;;  %v575_v15 = vmax.f32 %v525_v20, 0.0 }
 0x188   : > { %v8036_v49 = vsel %vm864_vm8, %v4719_v63, %v4720_v60  ;;  %v526_v41 = vadd.f32 %v7745_v11, %v469_v22 }
 0x189   : > { %v8002_v57 = vsel %vm724_vm5, %v4644_v52, %v4647_v8  ;;  %v4651_v47 = vor.u32 %v4649_v6, %v4647_v8  ;;  %v673_v59 = vsel %vm8040_vm11, %v574_v51, 0.0  ;;  %v674_v4 = vsel %vm8040_vm11, %v575_v15, 0.0  ;;  %v6922_v8 = vld [vmem:[%s8267_s1 + $0x10] sm:$0x3] }
 0x18a   : > { %v704_v35 = vpack.c.bf16 %v674_v4, %v673_v59  ;;  %v576_v34 = vmax.f32 %v526_v41, 0.0 }
 0x18b   : > { %v8024_v46 = vsel %vm724_vm5, %v4651_v47, %v4655_v55 }
 0x18c   : > { %v675_v29 = vsel %vm625_vm13, %v576_v34, 0.0  ;;  %v5219_v10 = vshrl.u32 %v704_v35, 16  ;;  %v5290_v36 = vrot.slane %v704_v35, 1 }
 0x18d   : > { %v705_v26 = vpack.c.bf16 %v675_v29, %v675_v29 }
 0x18f   : > { %6455 = vmatmul.mubr.msk.bf16.vlgmr.msra.gmra.mrb[12].mxu0 %vm745_vm6, %v7791_v43  ;;  %6509 = vmatmul.mubr.msk.bf16.vlgmr.msra.gmra.mrb[12].mxu1 %vm745_vm6, %v7986_v56  ;;  %v6919_v43 = vld [vmem:[%s8267_s1 + $0xa] sm:$0x3]  ;;  %v5223_v52 = vshll.u32 %v705_v26, 16 }
 0x190   : > { %6459 = vmatpush3.bf16.msra.mxu0 %v7264_v31  ;;  %6513 = vmatpush3.bf16.msra.mxu1 %v7264_v31  ;;  %v408_v31 = vunpack.c.l.bf16 %v358_v33 }
 0x191   : > { %6460 = vmatprep.mubr.msk.bf16.mxu0 %vm745_vm6, %v7806_v9  ;;  %6857 = vmatprep.subr.msk.bf16.mxu0 %vm752_vm0, %v6919_v43 }
 0x192   : > { %6514 = vmatprep.mubr.msk.bf16.mxu1 %vm745_vm6, %v8002_v57  ;;  %6866 = vmatprep.subr.msk.bf16.mxu1 %vm752_vm0, %v6919_v43  ;;  %v465_v9 = vmul.f32 %v7733_v16, %v408_v31 }
 0x194   : > { %v522_v32 = vadd.f32 %v7745_v11, %v465_v9  ;;  %v6921_v11 = vld [vmem:[%s8267_s1 + $0xe] sm:$0x3] }
 0x19b   : > { %6461 = vmatmul.mubr.msk.bf16.vlgmr.msra.gmra.mrb[12].mxu0 %vm745_vm6, %v7822_v61  ;;  %6515 = vmatmul.mubr.msk.bf16.vlgmr.msra.gmra.mrb[12].mxu1 %vm745_vm6, %v8024_v46  ;;  %v6920_v61 = vld [vmem:[%s8267_s1 + $0xc] sm:$0x3] }
 0x19c   : > { %6465 = vmatpush3.bf16.msra.mxu0 %v7299_v48  ;;  %6519 = vmatpush3.bf16.msra.mxu1 %v7299_v48  ;;  %v572_v48 = vmax.f32 %v522_v32, 0.0 }
 0x19d   : > { %6466 = vmatprep.mubr.msk.bf16.mxu0 %vm745_vm6, %v7826_v62  ;;  %6858 = vmatprep.subr.msk.bf16.mxu0 %vm752_vm0, %v6920_v61  ;;  %v4722_v62 = vrot.slane %v702_v23, 1  ;;  %v5225_v23 = vrot.slane %v5223_v52, 1 }
 0x19e   : > { %6520 = vmatprep.mubr.msk.bf16.mxu1 %vm745_vm6, %v8036_v49  ;;  %6867 = vmatprep.subr.msk.bf16.mxu1 %vm752_vm0, %v6920_v61  ;;  %v671_v25 = vsel %vm621_vm12, %v572_v48, 0.0 }
 0x19f   : > { %v4723_v24 = vsel %vm864_vm8, %v4720_v60, %v4722_v62  ;;  %v703_v13 = vpack.c.bf16 %v672_v58, %v671_v25 }
 0x1a1   : > { %v5211_v16 = vshll.u32 %v703_v13, 16  ;;  %v5289_v33 = vrot.slane %v703_v13, 1 }
 0x1a3   : > { %v5291_v6 = vsel %vm864_vm8, %v5289_v33, %v5290_v36 }
 0x1a7   : > { %6467 = vmatmul.mubr.msk.bf16.vlgmr.msra.gmra.mrb[12].mxu0 %vm745_vm6, %v7845_v40  ;;  %6521 = vmatmul.mubr.msk.bf16.vlgmr.msra.gmra.mrb[12].mxu1 %vm745_vm6, %v4723_v24  ;;  %v5213_v40 = vrot.slane %v5211_v16, 1 }
 0x1a8   : > { %6471 = vmatpush3.bf16.msra.mxu0 %v7336_v12  ;;  %6525 = vmatpush3.bf16.msra.mxu1 %v7336_v12  ;;  %v5209_v12 = vshrl.u32 %v703_v13, 16 }
 0x1a9   : > { %6472 = vmatprep.mubr.msk.bf16.mxu0 %vm745_vm6, %v7968_v37  ;;  %6859 = vmatprep.subr.msk.bf16.mxu0 %vm752_vm0, %v6921_v11  ;;  %v5215_v37 = vshll.u32 %v704_v35, 16 }
 0x1aa   : > { %6526 = vmatprep.mubr.msk.bf16.mxu1 %vm745_vm6, %v703_v13  ;;  %6868 = vmatprep.subr.msk.bf16.mxu1 %vm752_vm0, %v6921_v11  ;;  %v5214_v14 = vor.u32 %v5213_v40, %v5209_v12 }
 0x1ab   : > { %v5217_v28 = vrot.slane %v5215_v37, 1 }
 0x1ad   : > { %v5218_v38 = vsel %vm724_vm5, %v5214_v14, %v5217_v28 }
 0x1b3   : > { %6473 = vmatmul.mubr.msk.bf16.vlgmr.msra.gmra.mrb[12].mxu0 %vm745_vm6, %v7986_v56  ;;  %6527 = vmatmul.mubr.msk.bf16.vlgmr.msra.gmra.mrb[12].mxu1 %vm745_vm6, %v704_v35  ;;  %v5221_v56 = vor.u32 %v5219_v10, %v5217_v28 }
 0x1b4   : > { %6477 = vmatpush3.bf16.msra.mxu0 %v7372_v39  ;;  %6531 = vmatpush3.bf16.msra.mxu1 %v7372_v39 }
 0x1b5   : > { %6478 = vmatprep.mubr.msk.bf16.mxu0 %vm745_vm6, %v8002_v57  ;;  %6860 = vmatprep.subr.msk.bf16.mxu0 %vm752_vm0, %v6922_v8  ;;  %v5226_v39 = vsel %vm724_vm5, %v5221_v56, %v5225_v23  ;;  %v5292_v57 = vrot.slane %v705_v26, 1 }
 0x1b6   : > { %6532 = vmatprep.mubr.msk.bf16.mxu1 %vm745_vm6, %v5218_v38  ;;  %6869 = vmatprep.subr.msk.bf16.mxu1 %vm752_vm0, %v6922_v8 }
 0x1b7   : > { %v5293_v54 = vsel %vm864_vm8, %v5290_v36, %v5292_v57 }
 0x1bf   : > { %6479 = vmatmul.mubr.msk.bf16.vlgmr.msra.gmra.mrb[12].mxu0 %vm745_vm6, %v8024_v46  ;;  %6533 = vmatmul.mubr.msk.bf16.vlgmr.msra.gmra.mrb[12].mxu1 %vm745_vm6, %v5226_v39 }
 0x1c0   : > { %6483 = vmatpush3.bf16.msra.mxu0 %v7404_v50  ;;  %6537 = vmatpush3.bf16.msra.mxu1 %v7404_v50 }
 0x1c1   : > { %6484 = vmatprep.mubr.msk.bf16.mxu0 %vm745_vm6, %v8036_v49  ;;  %6538 = vmatprep.mubr.msk.bf16.mxu1 %vm745_vm6, %v5291_v6 }
 0x1cb   : > { %6485 = vmatmul.mubr.msk.bf16.vlgmr.msra.gmra.mrb[12].mxu0 %vm745_vm6, %v4723_v24  ;;  %6539 = vmatmul.mubr.msk.bf16.vlgmr.msra.gmra.mrb[12].mxu1 %vm745_vm6, %v5293_v54 }
 0x1ce   : > { %v6270_v43 = vpop.f32.mrb[4].mxu0  ;;  %v6324_v42 = vpop.f32.mrb[4].mxu1 }
 0x1cf   : > { %v2505_v31 = vadd.f32 %v6270_v43, %v7857_v7  ;;  %v3075_v50 = vadd.f32 %v6324_v42, %v7857_v7  ;;  %v2484_v47 = vpop.f32.mrb[5].mxu0  ;;  %v3054_v55 = vpop.f32.mrb[5].mxu1 }
 0x1d0   : > { %v2503_v30 = vadd.f32 %v7857_v7, %v2484_v47  ;;  %v3073_v9 = vadd.f32 %v7857_v7, %v3054_v55  ;;  %v6271_v18 = vpop.f32.mrb[6].mxu0  ;;  %v6325_v17 = vpop.f32.mrb[6].mxu1 }
 0x1d1   : > { %v5798_v63 = vpack.c.bf16 %v2505_v31, %v2505_v31  ;;  %v5802_v60 = vpack.c.bf16 %v3075_v50, %v3075_v50  ;;  %v2487_v46 = vpop.f32.mrb[7].mxu0  ;;  %v3057_v0 = vpop.f32.mrb[7].mxu1  ;;  %v2506_v2 = vadd.f32 %v6271_v18, %v7857_v7  ;;  %v3076_v3 = vadd.f32 %v6325_v17, %v7857_v7 }
 0x1d2   : > { %v5796_v32 = vpack.c.bf16 %v2503_v30, %v2503_v30  ;;  %v5800_v45 = vpack.c.bf16 %v3073_v9, %v3073_v9  ;;  %v2531_v1 = vsel %vm1387_vm10, %v2505_v31, 0.0  ;;  %v2542_v49 = vmul.f32 %v2503_v30, %v2503_v30 }
 0x1d3   : > { %5654 = vst.msk [vmem:[%s7873_s29 + $0x28] sm:$0xf] %vm1382_vm9, %v5798_v63  ;;  %5680 = vst.msk [vmem:[%s7873_s29 + $0x38] sm:$0xf] %vm1382_vm9, %v5802_v60  ;;  %v2504_v19 = vadd.f32 %v7857_v7, %v2487_v46  ;;  %v3074_v61 = vadd.f32 %v7857_v7, %v3057_v0  ;;  %v2544_v21 = vmul.f32 %v2505_v31, %v2505_v31  ;;  %v3101_v48 = vsel %vm1387_vm10, %v3075_v50, 0.0 }
 0x1d4   : > { %5652 = vst.msk [vmem:[%s7873_s29 + $0x20] sm:$0xf] %vm1382_vm9, %v5796_v32  ;;  %5678 = vst.msk [vmem:[%s7873_s29 + $0x30] sm:$0xf] %vm1382_vm9, %v5800_v45  ;;  %v3112_v27 = vmul.f32 %v3073_v9, %v3073_v9  ;;  %v5799_v5 = vpack.c.bf16 %v2506_v2, %v2506_v2  ;;  %v3114_v20 = vmul.f32 %v3075_v50, %v3075_v50  ;;  %v2528_v62 = vsel %vm1387_vm10, %v2503_v30, 0.0 }
 0x1d5   : > { %v5803_v22 = vpack.c.bf16 %v3076_v3, %v3076_v3  ;;  %v5797_v25 = vpack.c.bf16 %v2504_v19, %v2504_v19  ;;  %v3098_v58 = vsel %vm1387_vm10, %v3073_v9, 0.0  ;;  %v2529_v51 = vsel %vm1387_vm10, %v2504_v19, 0.0 }
 0x1d6   : > { %5655 = vst.msk [vmem:[%s7873_s29 + $0x2c] sm:$0xf] %vm1382_vm9, %v5799_v5  ;;  %v2543_v15 = vmul.f32 %v2504_v19, %v2504_v19  ;;  %v5801_v24 = vpack.c.bf16 %v3074_v61, %v3074_v61  ;;  %v2546_v13 = vsel %vm1387_vm10, %v2542_v49, 0.0  ;;  %v2530_v41 = vadd.f32 %v2529_v51, %v2528_v62 }
 0x1d7   : > { %5681 = vst.msk [vmem:[%s7873_s29 + $0x3c] sm:$0xf] %vm1382_vm9, %v5803_v22  ;;  %5653 = vst.msk [vmem:[%s7873_s29 + $0x24] sm:$0xf] %vm1382_vm9, %v5797_v25  ;;  %v3099_v59 = vsel %vm1387_vm10, %v3074_v61, 0.0  ;;  %v3113_v4 = vmul.f32 %v3074_v61, %v3074_v61  ;;  %v3116_v16 = vsel %vm1387_vm10, %v3112_v27, 0.0  ;;  %v2545_v11 = vmul.f32 %v2506_v2, %v2506_v2 }
 0x1d8   : > { %v2547_v35 = vsel %vm1387_vm10, %v2543_v15, 0.0  ;;  %5679 = vst.msk [vmem:[%s7873_s29 + $0x34] sm:$0xf] %vm1382_vm9, %v5801_v24  ;;  %v3100_v34 = vadd.f32 %v3099_v59, %v3098_v58  ;;  %v3115_v12 = vmul.f32 %v3076_v3, %v3076_v3  ;;  %v2532_v40 = vadd.f32 %v2531_v1, %v2530_v41 }
 0x1d9   : > { %v2548_v37 = vadd.f32 %v2547_v35, %v2546_v13  ;;  %v3117_v29 = vsel %vm1387_vm10, %v3113_v4, 0.0  ;;  %v2549_v14 = vsel %vm1387_vm10, %v2544_v21, 0.0  ;;  %v2533_v28 = vsel %vm1387_vm10, %v2506_v2, 0.0 }
 0x1da   : > { %v3102_v26 = vadd.f32 %v3101_v48, %v3100_v34  ;;  %v3118_v38 = vadd.f32 %v3117_v29, %v3116_v16  ;;  %v3119_v10 = vsel %vm1387_vm10, %v3114_v20, 0.0  ;;  %v3103_v52 = vsel %vm1387_vm10, %v3076_v3, 0.0 }
 0x1db   : > { %v2534_v8 = vadd.f32 %v2533_v28, %v2532_v40  ;;  %v2550_v56 = vadd.f32 %v2549_v14, %v2548_v37  ;;  %v2551_v23 = vsel %vm1387_vm10, %v2545_v11, 0.0  ;;  %v3121_v39 = vsel %vm1387_vm10, %v3115_v12, 0.0 }
 0x1dc   : > { %v3104_v33 = vadd.f32 %v3103_v52, %v3102_v26  ;;  %v3120_v36 = vadd.f32 %v3119_v10, %v3118_v38 }
 0x1dd   : > { %v2535_v6 = vrot.slane %v2534_v8, 4  ;;  %v2552_v57 = vadd.f32 %v2551_v23, %v2550_v56 }
 0x1de   : > { %v3105_v54 = vrot.slane %v3104_v33, 4  ;;  %v3122_v43 = vadd.f32 %v3121_v39, %v3120_v36 }
 0x1df   : > { %v2536_v42 = vadd.f32 %v2535_v6, %v2534_v8  ;;  %v2553_v31 = vrot.slane %v2552_v57, 4 }
 0x1e0   : > { %v3106_v50 = vadd.f32 %v3105_v54, %v3104_v33  ;;  %v3123_v47 = vrot.slane %v3122_v43, 4 }
 0x1e1   : > { %v2537_v55 = vrot.slane %v2536_v42, 2  ;;  %v2554_v30 = vadd.f32 %v2553_v31, %v2552_v57 }
 0x1e2   : > { %v3107_v9 = vrot.slane %v3106_v50, 2  ;;  %v3124_v18 = vadd.f32 %v3123_v47, %v3122_v43 }
 0x1e3   : > { %v2538_v17 = vadd.f32 %v2537_v55, %v2536_v42  ;;  %v2555_v63 = vrot.slane %v2554_v30, 2 }
 0x1e4   : > { %v3108_v60 = vadd.f32 %v3107_v9, %v3106_v50  ;;  %v3125_v46 = vrot.slane %v3124_v18, 2 }
 0x1e5   : > { %v2539_v0 = vrot.slane %v2538_v17, 1  ;;  %v2556_v32 = vadd.f32 %v2555_v63, %v2554_v30 }
 0x1e6   : > { %v3109_v45 = vrot.slane %v3108_v60, 1  ;;  %v3126_v2 = vadd.f32 %v3125_v46, %v3124_v18 }
 0x1e7   : > { %v2540_v3 = vadd.f32 %v2539_v0, %v2538_v17  ;;  %v2557_v1 = vrot.slane %v2556_v32, 1 }
 0x1e8   : > { %v3127_v49 = vrot.slane %v3126_v2, 1  ;;  %v3110_v21 = vadd.f32 %v3109_v45, %v3108_v60 }
 0x1e9   : > { %v2541_v19 = vadd.f32 %v2540_v3, %v7976_v44  ;;  %v2558_v61 = vadd.f32 %v2557_v1, %v2556_v32 }
 0x1ea   : > { %v3128_v5 = vadd.f32 %v3127_v49, %v3126_v2 }
 0x1eb   : > { %v2559_v48 = vadd.f32 %v2558_v61, %v7988_v53  ;;  %v8154_v27 = vadd.f32 %v3110_v21, %v2541_v19 }
 0x1ed   : > { %v8156_v20 = vadd.f32 %v3128_v5, %v2559_v48 }
 0x236   : > { %v6378_v62 = vpop.f32.mrb[8].mxu0  ;;  %v6432_v22 = vpop.f32.mrb[8].mxu1 }
 0x237   : > { %v3645_v25 = vadd.f32 %v6378_v62, %v7857_v7  ;;  %v4215_v58 = vadd.f32 %v6432_v22, %v7857_v7  ;;  %v3624_v51 = vpop.f32.mrb[9].mxu0  ;;  %v4194_v44 = vpop.f32.mrb[9].mxu1 }
 0x238   : > { %v3643_v15 = vadd.f32 %v7857_v7, %v3624_v51  ;;  %v4213_v53 = vadd.f32 %v7857_v7, %v4194_v44  ;;  %v6379_v24 = vpop.f32.mrb[10].mxu0  ;;  %v6433_v13 = vpop.f32.mrb[10].mxu1 }
 0x239   : > { %v5806_v41 = vpack.c.bf16 %v3645_v25, %v3645_v25  ;;  %v5810_v59 = vpack.c.bf16 %v4215_v58, %v4215_v58  ;;  %v3627_v4 = vpop.f32.mrb[11].mxu0  ;;  %v4197_v16 = vpop.f32.mrb[11].mxu1  ;;  %v3646_v34 = vadd.f32 %v6379_v24, %v7857_v7  ;;  %v4216_v12 = vadd.f32 %v6433_v13, %v7857_v7 }
 0x23a   : > { %v5804_v11 = vpack.c.bf16 %v3643_v15, %v3643_v15  ;;  %v5808_v35 = vpack.c.bf16 %v4213_v53, %v4213_v53  ;;  %v3671_v40 = vsel %vm1387_vm10, %v3645_v25, 0.0  ;;  %v3682_v37 = vmul.f32 %v3643_v15, %v3643_v15 }
 0x23b   : > { %5706 = vst.msk [vmem:[%s7873_s29 + $0x48] sm:$0xf] %vm1382_vm9, %v5806_v41  ;;  %5732 = vst.msk [vmem:[%s7873_s29 + $0x58] sm:$0xf] %vm1382_vm9, %v5810_v59  ;;  %v3644_v29 = vadd.f32 %v7857_v7, %v3627_v4  ;;  %v4214_v14 = vadd.f32 %v7857_v7, %v4197_v16  ;;  %v3684_v28 = vmul.f32 %v3645_v25, %v3645_v25  ;;  %v4241_v26 = vsel %vm1387_vm10, %v4215_v58, 0.0 }
 0x23c   : > { %5704 = vst.msk [vmem:[%s7873_s29 + $0x40] sm:$0xf] %vm1382_vm9, %v5804_v11  ;;  %5730 = vst.msk [vmem:[%s7873_s29 + $0x50] sm:$0xf] %vm1382_vm9, %v5808_v35  ;;  %v4252_v38 = vmul.f32 %v4213_v53, %v4213_v53  ;;  %v5807_v10 = vpack.c.bf16 %v3646_v34, %v3646_v34  ;;  %v4254_v52 = vmul.f32 %v4215_v58, %v4215_v58  ;;  %v3668_v8 = vsel %vm1387_vm10, %v3643_v15, 0.0 }
 0x23d   : > { %v5811_v56 = vpack.c.bf16 %v4216_v12, %v4216_v12  ;;  %v5805_v23 = vpack.c.bf16 %v3644_v29, %v3644_v29  ;;  %v4238_v33 = vsel %vm1387_vm10, %v4213_v53, 0.0  ;;  %v3669_v36 = vsel %vm1387_vm10, %v3644_v29, 0.0 }
 0x23e   : > { %5707 = vst.msk [vmem:[%s7873_s29 + $0x4c] sm:$0xf] %vm1382_vm9, %v5807_v10  ;;  %v3683_v39 = vmul.f32 %v3644_v29, %v3644_v29  ;;  %v5809_v6 = vpack.c.bf16 %v4214_v14, %v4214_v14  ;;  %v3686_v57 = vsel %vm1387_vm10, %v3682_v37, 0.0  ;;  %v3670_v54 = vadd.f32 %v3669_v36, %v3668_v8 }
 0x23f   : > { %5733 = vst.msk [vmem:[%s7873_s29 + $0x5c] sm:$0xf] %vm1382_vm9, %v5811_v56  ;;  %5705 = vst.msk [vmem:[%s7873_s29 + $0x44] sm:$0xf] %vm1382_vm9, %v5805_v23  ;;  %v4239_v43 = vsel %vm1387_vm10, %v4214_v14, 0.0  ;;  %v4253_v42 = vmul.f32 %v4214_v14, %v4214_v14  ;;  %v4256_v31 = vsel %vm1387_vm10, %v4252_v38, 0.0  ;;  %v3685_v50 = vmul.f32 %v3646_v34, %v3646_v34 }
 0x240   : > { %v3687_v47 = vsel %vm1387_vm10, %v3683_v39, 0.0  ;;  %5731 = vst.msk [vmem:[%s7873_s29 + $0x54] sm:$0xf] %vm1382_vm9, %v5809_v6  ;;  %v4240_v55 = vadd.f32 %v4239_v43, %v4238_v33  ;;  %v4255_v30 = vmul.f32 %v4216_v12, %v4216_v12  ;;  %v3672_v9 = vadd.f32 %v3671_v40, %v3670_v54 }
 0x241   : > { %v3688_v18 = vadd.f32 %v3687_v47, %v3686_v57  ;;  %v4257_v17 = vsel %vm1387_vm10, %v4253_v42, 0.0  ;;  %v3689_v63 = vsel %vm1387_vm10, %v3684_v28, 0.0  ;;  %v3673_v60 = vsel %vm1387_vm10, %v3646_v34, 0.0 }
 0x242   : > { %v4242_v46 = vadd.f32 %v4241_v26, %v4240_v55  ;;  %v4258_v0 = vadd.f32 %v4257_v17, %v4256_v31  ;;  %v4259_v32 = vsel %vm1387_vm10, %v4254_v52, 0.0  ;;  %v4243_v45 = vsel %vm1387_vm10, %v4216_v12, 0.0 }
 0x243   : > { %v3674_v2 = vadd.f32 %v3673_v60, %v3672_v9  ;;  %v3690_v3 = vadd.f32 %v3689_v63, %v3688_v18  ;;  %v3691_v1 = vsel %vm1387_vm10, %v3685_v50, 0.0  ;;  %v4261_v61 = vsel %vm1387_vm10, %v4255_v30, 0.0 }
 0x244   : > { %v4244_v49 = vadd.f32 %v4243_v45, %v4242_v46  ;;  %v4260_v19 = vadd.f32 %v4259_v32, %v4258_v0 }
 0x245   : > { %v3675_v21 = vrot.slane %v3674_v2, 4  ;;  %v3692_v48 = vadd.f32 %v3691_v1, %v3690_v3 }
 0x246   : > { %v4245_v5 = vrot.slane %v4244_v49, 4  ;;  %v4262_v62 = vadd.f32 %v4261_v61, %v4260_v19 }
 0x247   : > { %v3676_v22 = vadd.f32 %v3675_v21, %v3674_v2  ;;  %v3693_v25 = vrot.slane %v3692_v48, 4 }
 0x248   : > { %v4246_v58 = vadd.f32 %v4245_v5, %v4244_v49  ;;  %v4263_v51 = vrot.slane %v4262_v62, 4 }
 0x249   : > { %v3677_v44 = vrot.slane %v3676_v22, 2  ;;  %v3694_v15 = vadd.f32 %v3693_v25, %v3692_v48 }
 0x24a   : > { %v4247_v53 = vrot.slane %v4246_v58, 2  ;;  %v4264_v24 = vadd.f32 %v4263_v51, %v4262_v62 }
 0x24b   : > { %v3678_v13 = vadd.f32 %v3677_v44, %v3676_v22  ;;  %v3695_v41 = vrot.slane %v3694_v15, 2 }
 0x24c   : > { %v4248_v59 = vadd.f32 %v4247_v53, %v4246_v58  ;;  %v4265_v4 = vrot.slane %v4264_v24, 2 }
 0x24d   : > { %v3679_v16 = vrot.slane %v3678_v13, 1  ;;  %v3696_v11 = vadd.f32 %v3695_v41, %v3694_v15 }
 0x24e   : > { %v4249_v35 = vrot.slane %v4248_v59, 1  ;;  %v4266_v34 = vadd.f32 %v4265_v4, %v4264_v24 }
 0x24f   : > { %v3680_v12 = vadd.f32 %v3679_v16, %v3678_v13  ;;  %v3697_v40 = vrot.slane %v3696_v11, 1 }
 0x250   : > { %v4267_v37 = vrot.slane %v4266_v34, 1  ;;  %v4250_v28 = vadd.f32 %v4249_v35, %v4248_v59 }
 0x251   : > { %v3681_v29 = vadd.f32 %v3680_v12, %v8154_v27  ;;  %v3698_v14 = vadd.f32 %v3697_v40, %v3696_v11 }
 0x252   : > { %v4268_v10 = vadd.f32 %v4267_v37, %v4266_v34 }
 0x253   : > { %v3699_v26 = vadd.f32 %v3698_v14, %v8156_v20  ;;  %v8200_v38 = vadd.f32 %v4250_v28, %v3681_v29 }
 0x255   : > { %v8202_v52 = vadd.f32 %v4268_v10, %v3699_v26 }
 0x29e   : > { %v6486_v8 = vpop.f32.mrb[12].mxu0  ;;  %v6540_v56 = vpop.f32.mrb[12].mxu1 }
 0x29f   : > { %v4785_v23 = vadd.f32 %v6486_v8, %v7857_v7  ;;  %v5355_v33 = vadd.f32 %v6540_v56, %v7857_v7  ;;  %v4764_v36 = vpop.f32.mrb[13].mxu0  ;;  %v5334_v27 = vpop.f32.mrb[13].mxu1 }
 0x2a0   : > { %v4783_v39 = vadd.f32 %v7857_v7, %v4764_v36  ;;  %v5353_v20 = vadd.f32 %v7857_v7, %v5334_v27  ;;  %v6487_v6 = vpop.f32.mrb[14].mxu0  ;;  %v6541_v57 = vpop.f32.mrb[14].mxu1 }
 0x2a1   : > { %v5814_v54 = vpack.c.bf16 %v4785_v23, %v4785_v23  ;;  %v5818_v43 = vpack.c.bf16 %v5355_v33, %v5355_v33  ;;  %v4767_v42 = vpop.f32.mrb[15].mxu0  ;;  %v5337_v31 = vpop.f32.mrb[15].mxu1  ;;  %v4786_v55 = vadd.f32 %v6487_v6, %v7857_v7  ;;  %v5356_v30 = vadd.f32 %v6541_v57, %v7857_v7 }
 0x2a2   : > { %v5812_v50 = vpack.c.bf16 %v4783_v39, %v4783_v39  ;;  %v5816_v47 = vpack.c.bf16 %v5353_v20, %v5353_v20  ;;  %v4811_v9 = vsel %vm1387_vm10, %v4785_v23, 0.0  ;;  %v4822_v18 = vmul.f32 %v4783_v39, %v4783_v39 }
 0x2a3   : > { %5758 = vst.msk [vmem:[%s7873_s29 + $0x68] sm:$0xf] %vm1382_vm9, %v5814_v54  ;;  %5784 = vst.msk [vmem:[%s7873_s29 + $0x78] sm:$0xf] %vm1382_vm9, %v5818_v43  ;;  %v4784_v17 = vadd.f32 %v7857_v7, %v4767_v42  ;;  %v5354_v63 = vadd.f32 %v7857_v7, %v5337_v31  ;;  %v4824_v60 = vmul.f32 %v4785_v23, %v4785_v23  ;;  %v5381_v46 = vsel %vm1387_vm10, %v5355_v33, 0.0 }
 0x2a4   : > { %5756 = vst.msk [vmem:[%s7873_s29 + $0x60] sm:$0xf] %vm1382_vm9, %v5812_v50  ;;  %5782 = vst.msk [vmem:[%s7873_s29 + $0x70] sm:$0xf] %vm1382_vm9, %v5816_v47  ;;  %v5392_v0 = vmul.f32 %v5353_v20, %v5353_v20  ;;  %v5815_v32 = vpack.c.bf16 %v4786_v55, %v4786_v55  ;;  %v5394_v45 = vmul.f32 %v5355_v33, %v5355_v33  ;;  %v4808_v2 = vsel %vm1387_vm10, %v4783_v39, 0.0 }
 0x2a5   : > { %v5819_v3 = vpack.c.bf16 %v5356_v30, %v5356_v30  ;;  %v5813_v1 = vpack.c.bf16 %v4784_v17, %v4784_v17  ;;  %v5378_v49 = vsel %vm1387_vm10, %v5353_v20, 0.0  ;;  %v4809_v19 = vsel %vm1387_vm10, %v4784_v17, 0.0 }
 0x2a6   : > { %5759 = vst.msk [vmem:[%s7873_s29 + $0x6c] sm:$0xf] %vm1382_vm9, %v5815_v32  ;;  %v4823_v61 = vmul.f32 %v4784_v17, %v4784_v17  ;;  %v5817_v7 = vpack.c.bf16 %v5354_v63, %v5354_v63  ;;  %v4826_v21 = vsel %vm1387_vm10, %v4822_v18, 0.0  ;;  %v4810_v48 = vadd.f32 %v4809_v19, %v4808_v2 }
 0x2a7   : > { %5785 = vst.msk [vmem:[%s7873_s29 + $0x7c] sm:$0xf] %vm1382_vm9, %v5819_v3  ;;  %5757 = vst.msk [vmem:[%s7873_s29 + $0x64] sm:$0xf] %vm1382_vm9, %v5813_v1  ;;  %v5379_v5 = vsel %vm1387_vm10, %v5354_v63, 0.0  ;;  %v5393_v62 = vmul.f32 %v5354_v63, %v5354_v63  ;;  %v5396_v22 = vsel %vm1387_vm10, %v5392_v0, 0.0  ;;  %v4825_v25 = vmul.f32 %v4786_v55, %v4786_v55 }
 0x2a8   : > { %v4827_v58 = vsel %vm1387_vm10, %v4823_v61, 0.0  ;;  %5783 = vst.msk [vmem:[%s7873_s29 + $0x74] sm:$0xf] %vm1382_vm9, %v5817_v7  ;;  %v5380_v51 = vadd.f32 %v5379_v5, %v5378_v49  ;;  %v5395_v44 = vmul.f32 %v5356_v30, %v5356_v30  ;;  %v4812_v15 = vadd.f32 %v4811_v9, %v4810_v48  ;;  %s309_s29 = sadd.s32 %s5569_s28, %s7055_s8 }
 0x2a9   : > { %v4828_v53 = vadd.f32 %v4827_v58, %v4826_v21  ;;  %v5397_v24 = vsel %vm1387_vm10, %v5393_v62, 0.0  ;;  %v4829_v13 = vsel %vm1387_vm10, %v4824_v60, 0.0  ;;  %v4813_v41 = vsel %vm1387_vm10, %v4786_v55, 0.0  ;;  %s5570_s30 = sshll.u32 %s309_s29, 1 }
 0x2aa   : > { %v5382_v59 = vadd.f32 %v5381_v46, %v5380_v51  ;;  %v5398_v4 = vadd.f32 %v5397_v24, %v5396_v22  ;;  %v5399_v16 = vsel %vm1387_vm10, %v5394_v45, 0.0  ;;  %v5383_v11 = vsel %vm1387_vm10, %v5356_v30, 0.0  ;;  %s311_s9 = scalar_lea.vmem %s8272_s6, %s5570_s30 }
 0x2ab   : > { %v4814_v35 = vadd.f32 %v4813_v41, %v4812_v15  ;;  %v4830_v34 = vadd.f32 %v4829_v13, %v4828_v53  ;;  %v4831_v12 = vsel %vm1387_vm10, %v4825_v25, 0.0  ;;  %v5401_v29 = vsel %vm1387_vm10, %v5395_v44, 0.0 }
 0x2ac   : > { %v5384_v40 = vadd.f32 %v5383_v11, %v5382_v59  ;;  %v5400_v37 = vadd.f32 %v5399_v16, %v5398_v4 }
 0x2ad   : > { %v4815_v14 = vrot.slane %v4814_v35, 4  ;;  %v4832_v28 = vadd.f32 %v4831_v12, %v4830_v34 }
 0x2ae   : > { %v5385_v26 = vrot.slane %v5384_v40, 4  ;;  %v5402_v10 = vadd.f32 %v5401_v29, %v5400_v37 }
 0x2af   : > { %v4816_v8 = vadd.f32 %v4815_v14, %v4814_v35  ;;  %v4833_v56 = vrot.slane %v4832_v28, 4 }
 0x2b0   : > { %v5386_v23 = vadd.f32 %v5385_v26, %v5384_v40  ;;  %v5403_v33 = vrot.slane %v5402_v10, 4 }
 0x2b1   : > { %v4817_v36 = vrot.slane %v4816_v8, 2  ;;  %v4834_v27 = vadd.f32 %v4833_v56, %v4832_v28 }
 0x2b2   : > { %v5387_v39 = vrot.slane %v5386_v23, 2  ;;  %v5404_v20 = vadd.f32 %v5403_v33, %v5402_v10 }
 0x2b3   : > { %v4818_v6 = vadd.f32 %v4817_v36, %v4816_v8  ;;  %v4835_v57 = vrot.slane %v4834_v27, 2 }
 0x2b4   : > { %v5388_v54 = vadd.f32 %v5387_v39, %v5386_v23  ;;  %v5405_v43 = vrot.slane %v5404_v20, 2 }
 0x2b5   : > { %v4819_v42 = vrot.slane %v4818_v6, 1  ;;  %v4836_v31 = vadd.f32 %v4835_v57, %v4834_v27 }
 0x2b6   : > { %v5389_v50 = vrot.slane %v5388_v54, 1  ;;  %v5406_v47 = vadd.f32 %v5405_v43, %v5404_v20 }
 0x2b7   : > { %v4820_v55 = vadd.f32 %v4819_v42, %v4818_v6  ;;  %v4837_v30 = vrot.slane %v4836_v31, 1 }
 0x2b8   : > { %v5407_v9 = vrot.slane %v5406_v47, 1  ;;  %v5390_v63 = vadd.f32 %v5389_v50, %v5388_v54 }
 0x2b9   : > { %v4821_v18 = vadd.f32 %v4820_v55, %v8200_v38  ;;  %v4838_v17 = vadd.f32 %v4837_v30, %v4836_v31 }
 0x2ba   : > { %v5408_v0 = vadd.f32 %v5407_v9, %v5406_v47 }
 0x2bb   : > { %v4839_v60 = vadd.f32 %v4838_v17, %v8202_v52  ;;  %v5391_v46 = vadd.f32 %v5390_v63, %v4821_v18 }
 0x2bd   : > { %v5409_v32 = vadd.f32 %v5408_v0, %v4839_v60  ;;  %5411 = vst.msk [vmem:[%s311_s9] sm:$0x1] %vm5410_vm14, %v5391_v46 }
 0x2bf   : > { %5412 = vst.msk [vmem:[%s311_s9 + $0x1] sm:$0x1] %vm5410_vm14, %v5409_v32 }
 0x2c0 PF: > { %s17_s25 = sadd.s32 1, %s6961_s25   ;;  %s8277_s21 = smov %s6953_s23 }
 0x2c1   : > { %p14_p10 = scmp.ge.s32.totalorder %s17_s25, 10   ;;  %s8278_s22 = smov %s6957_s24 }
 0x2c2   : > { %s8279_s23 = smov %s8282_s26  ;;  %s8280_s24 = smov %s8286_s27 }
 0x2c3   :  { %16 = sbr.rel (!%p14_p10) target bundleno = 3 (0x3), region = 97 }

</bundles_post_ra>
